<compile_context>
chip_gen: v5e
topology: v5e:2x2
jax: 0.10.0
libtpu: 0.0.40
codegen_flags: <defaults>
</compile_context>

<pallas_src>
import functools

import numpy as np
import jax
import jax.numpy as jnp
from jax.experimental import pallas as pl
from jax.experimental.pallas import tpu as pltpu

ACTION_SIZE = 7


# ---------------- fused Pallas kernel ----------------

def _dqn_fused_kernel(*refs, dims):
    """Whole DQN forward for one image (grid step = one batch element).

    refs = (x, B1..B5, beo1..beo5, sel1..sel5, w1, b1, w2, b2, out, xp1..xp4)
      x    : (H1+2, W1*C1) f32, row-padded input, cols = x*Cin + ci
      B_l  : (3*Ws_in, 2*halfp) bf16 banded conv weights (K = 3 row shifts,
             N = [even-x block | odd-x block], each padded to a 128 multiple)
      beo_l: (1, 2*halfp) f32 bias per output column (0 in pad / missing-x cols)
      sel_l: (2*Ho, H) bf16 y-pool selector (top half = even rows, bottom = odd)
      w1   : (128, Ho_last*20) bf16 yo-blocked fc1, b1 (1,20) f32
      w2   : (20, 7) bf16, b2 (1,7) f32
      out  : (8, 128) f32 lane-dense padded output block (row 0, cols 0:7 used)
      xp_l : (Ho+2, halfp) f32 padded activation scratch for layers 2..5
    """
    nl = len(dims)
    x_ref = refs[0]
    B_refs = refs[1:1 + nl]
    beo_refs = refs[1 + nl:1 + 2 * nl]
    sel_refs = refs[1 + 2 * nl:1 + 3 * nl]
    w1_ref, b1_ref, w2_ref, b2_ref, out_ref = refs[1 + 3 * nl:6 + 3 * nl]
    xpads = refs[6 + 3 * nl:]

    src = x_ref          # padded (H+2, Ws) f32 ref for the current layer
    pooled = None
    for l in range(nl):
        H, Ho, halfp = dims[l]

        # conv3x3 = ONE MXU dot: 3 row-shifted views concatenated along K (bf16).
        src3 = jnp.concatenate(
            [src[0:H, :].astype(jnp.bfloat16),
             src[1:H + 1, :].astype(jnp.bfloat16),
             src[2:H + 2, :].astype(jnp.bfloat16)], axis=1)
        acc = jnp.dot(src3, B_refs[l][...], preferred_element_type=jnp.float32)

        # bias + ReLU, then x-direction 2-max = max of the two aligned lane halves
        # (ceil-mode: the missing odd column is 0, activations are >= 0).
        v = jnp.maximum(acc + beo_refs[l][...], 0.0)
        m = jnp.maximum(v[:, :halfp], v[:, halfp:]).astype(jnp.bfloat16)

        # y-direction 2-max via ONE selector dot: rows [0:Ho) gather even source
        # rows, rows [Ho:2Ho) gather odd ones (missing ceil-mode row selects 0).
        y = jnp.dot(sel_refs[l][...], m, preferred_element_type=jnp.float32)
        pooled = jnp.maximum(y[0:Ho, :], y[Ho:2 * Ho, :])       # (Ho, halfp) f32

        if l + 1 < nl:
            nxt = xpads[l]                                      # (Ho+2, halfp) f32
            zrow = jnp.zeros((1, nxt.shape[1]), nxt.dtype)
            nxt[0:1, :] = zrow                                  # top pad row only
            nxt[Ho + 1:Ho + 2, :] = zrow                        # bottom pad row only
            nxt[1:Ho + 1, :] = pooled
            src = nxt

    # FC head: single dot against the yo-blocked fc1 matrix, then gather the
    # diagonal (yo, yo*20:(yo+1)*20) blocks.  Matches PyTorch's NCHW flatten.
    z = jnp.dot(pooled.astype(jnp.bfloat16), w1_ref[...],
                preferred_element_type=jnp.float32)             # (Ho, Ho*20)
    h = b1_ref[...]
    nh = b1_ref.shape[1]
    for yo in range(dims[-1][1]):
        h = h + z[yo:yo + 1, yo * nh:(yo + 1) * nh]
    h = jnp.maximum(h, 0.0).astype(jnp.bfloat16)
    q = jnp.dot(h, w2_ref[...], preferred_element_type=jnp.float32) + b2_ref[...]

    out_ref[...] = jnp.zeros(out_ref.shape, out_ref.dtype)
    out_ref[0:1, 0:q.shape[1]] = q


# ---------------- one-time parameter preprocessing (host side) ----------------

def prepare_params(params, channels, H0, W0):
    """Banded conv matrices (K-concat + parity-concat, lane padded), tiled biases,
    fused pool selectors, and the yo-blocked / transposed FC weights."""
    conv_cin = [channels, 4, 8, 16, 16]
    conv_cout = [4, 8, 16, 16, 16]
    prep = {}
    dims = []
    H, W = H0, W0
    Ws = W * channels                       # stored lane width of the layer input
    for l in range(5):
        Cin, Cout = conv_cin[l], conv_cout[l]
        Ho, Wo = -(-H // 2), -(-W // 2)
        half = Wo * Cout
        halfp = -(-half // 128) * 128       # pad each parity block to a lane tile
        w = np.asarray(params[f"conv{l + 1}_w"], np.float32)    # (Cout, Cin, 3, 3)
        b = np.asarray(params[f"conv{l + 1}_b"], np.float32)

        B = np.zeros((3 * Ws, 2 * halfp), np.float32)           # rows: ky*Ws + xin*Cin + ci
        beo = np.zeros((1, 2 * halfp), np.float32)
        for parity in range(2):
            for xo in range(Wo):
                x = 2 * xo + parity
                if x >= W:
                    continue                                    # ceil-mode: stays 0
                c0 = parity * halfp + xo * Cout
                beo[0, c0:c0 + Cout] = b
                for ky in range(3):
                    for kx in range(3):
                        xin = x + kx - 1
                        if 0 <= xin < W:
                            r0 = ky * Ws + xin * Cin
                            B[r0:r0 + Cin, c0:c0 + Cout] = w[:, :, ky, kx].T

        sel = np.zeros((2 * Ho, H), np.float32)
        for yo in range(Ho):
            sel[yo, 2 * yo] = 1.0
            if 2 * yo + 1 < H:
                sel[Ho + yo, 2 * yo + 1] = 1.0

        prep[f"B{l + 1}"] = jnp.asarray(B, jnp.bfloat16)
        prep[f"beo{l + 1}"] = jnp.asarray(beo)                  # f32 (added post-dot)
        prep[f"sel{l + 1}"] = jnp.asarray(sel, jnp.bfloat16)
        dims.append((H, Ho, halfp))
        H, W, Ws = Ho, Wo, halfp

    # fc1: yo-blocked (halfp_last, Ho*20) so pooled(Ho,halfp) @ w1 gives, per row yo,
    # the fc1 contribution of that row in columns [yo*20, (yo+1)*20).
    Cl = conv_cout[-1]
    fc1_w = np.asarray(params["fc1_w"], np.float32).reshape(20, Cl, H, W)  # (j,c,yo,xo)
    w1cat = np.zeros((dims[-1][2], 20 * H), np.float32)
    for yo in range(H):
        blk = fc1_w[:, :, yo, :].transpose(2, 1, 0).reshape(W * Cl, 20)   # (xo*Cl+c, j)
        w1cat[:W * Cl, yo * 20:(yo + 1) * 20] = blk
    prep["w1"] = jnp.asarray(w1cat, jnp.bfloat16)
    prep["b1"] = jnp.asarray(np.asarray(params["fc1_b"], np.float32).reshape(1, -1))
    prep["w2"] = jnp.asarray(np.asarray(params["fc2_w"], np.float32).T.copy(), jnp.bfloat16)
    prep["b2"] = jnp.asarray(np.asarray(params["fc2_b"], np.float32).reshape(1, -1))
    return prep, tuple(dims)


# ---------------- forward wrapper ----------------

def _const_spec(arr):
    zeros = (0,) * arr.ndim
    return pl.BlockSpec(arr.shape, lambda i, _z=zeros: _z)


def dqn_forward(prep, x_nchw, *, dims):
    N, C, H, W = x_nchw.shape
    # NCHW -> (N, H, W*C) with cols = x*C + c, plus one zero pad row top/bottom.
    x = jnp.transpose(x_nchw, (0, 2, 3, 1)).reshape(N, H, W * C)
    x = jnp.pad(x, ((0, 0), (1, 1), (0, 0)))

    inputs = [x]
    in_specs = [pl.BlockSpec((None, H + 2, W * C), lambda i: (i, 0, 0))]
    for name_fmt in ("B{}", "beo{}", "sel{}"):
        for l in range(1, 6):
            arr = prep[name_fmt.format(l)]
            inputs.append(arr)
            in_specs.append(_const_spec(arr))
    for name in ("w1", "b1", "w2", "b2"):
        arr = prep[name]
        inputs.append(arr)
        in_specs.append(_const_spec(arr))

    # padded activation scratch for layers 2..5: (Ho+2, halfp), f32
    scratch = [pltpu.VMEM((d[1] + 2, d[2]), jnp.float32) for d in dims[:-1]]

    out = pl.pallas_call(
        functools.partial(_dqn_fused_kernel, dims=dims),
        out_shape=jax.ShapeDtypeStruct((N, 8, 128), jnp.float32),
        grid=(N,),
        in_specs=in_specs,
        out_specs=pl.BlockSpec((None, 8, 128), lambda i: (i, 0, 0)),
        scratch_shapes=scratch,
        compiler_params=pltpu.CompilerParams(
            dimension_semantics=("parallel",),
            vmem_limit_bytes=32 * 1024 * 1024),
    )(*inputs)
    return out[:, 0, :ACTION_SIZE]


# ---------------- parameters (deterministic synthetic init) ----------------

def init_params(key, channels, action_size):
    # TODO(synk): torch.manual_seed(42) RNG stream itself is not reproducible in JAX;
    # this uses PyTorch-default-style uniform bounds with a JAX PRNG instead.
    keys = jax.random.split(key, 14)

    def u(k, shape, fan_in):
        bound = 1.0 / (fan_in ** 0.5)
        return jax.random.uniform(k, shape, jnp.float32, -bound, bound)

    p = {}
    conv_dims = [(channels, 4), (4, 8), (8, 16), (16, 16), (16, 16)]
    for li, (cin, cout) in enumerate(conv_dims, start=1):
        p[f"conv{li}_w"] = u(keys[2 * (li - 1)], (cout, cin, 3, 3), cin * 9)
        p[f"conv{li}_b"] = u(keys[2 * (li - 1) + 1], (cout,), cin * 9)
    flat_len = 16 * 3 * 4
    p["fc1_w"] = u(keys[10], (20, flat_len), flat_len)
    p["fc1_b"] = u(keys[11], (20,), flat_len)
    p["fc2_w"] = u(keys[12], (action_size, 20), 20)
    p["fc2_b"] = u(keys[13], (action_size,), 20)
    return p


# ---------------- pure-JAX reference (correctness check) ----------------

def dqn_forward_ref(params, x_nchw):
    x = jnp.transpose(x_nchw, (0, 2, 3, 1))
    for li in range(1, 6):
        w = jnp.transpose(params[f"conv{li}_w"], (2, 3, 1, 0))
        x = jax.lax.conv_general_dilated(
            x, w, (1, 1), "SAME", dimension_numbers=("NHWC", "HWIO", "NHWC"))
        x = jax.nn.relu(x + params[f"conv{li}_b"])
        n, h, wd, c = x.shape
        ho, wo = -(-h // 2), -(-wd // 2)
        xp = jnp.pad(x, ((0, 0), (0, 2 * ho - h), (0, 2 * wo - wd), (0, 0)))
        x = jax.lax.reduce_window(xp, -jnp.inf, jax.lax.max,
                                  (1, 2, 2, 1), (1, 2, 2, 1), "VALID")
    n = x.shape[0]
    flat = jnp.transpose(x, (0, 3, 1, 2)).reshape(n, -1)
    h = jax.nn.relu(flat @ params["fc1_w"].T + params["fc1_b"])
    return h @ params["fc2_w"].T + params["fc2_b"]


if __name__ == "__main__":
    channels = 4
    # 5 ceil-mode halvings must yield 3x4 spatial so that flat_len = 16*3*4 = 192.
    N, H, W = 2, 72, 112
    key = jax.random.PRNGKey(0)
    pkey, xkey = jax.random.split(key)
    params = init_params(pkey, channels, ACTION_SIZE)
    x = jax.random.normal(xkey, (N, channels, H, W), jnp.float32)

    prep, dims = prepare_params(params, channels, H, W)
    fwd = jax.jit(functools.partial(dqn_forward, dims=dims))

    q = jax.block_until_ready(fwd(prep, x))
    q_ref = jax.block_until_ready(dqn_forward_ref(params, x))

    assert q.shape == (N, ACTION_SIZE), q.shape
    # bf16 weights / MXU inputs (f32 accumulation) -> looser tolerance than pure f32.
    assert jnp.allclose(q, q_ref, atol=5e-2, rtol=5e-2), (q, q_ref)
    print("KERNEL_OK")
</pallas_src>

<mosaic_0001>
module attributes {stable_mosaic.version = 11 : i64} {
  func.func @_dqn_fused_kernel(%arg0: i32, %arg1: memref<1x74x448xf32, #tpu.memory_space<vmem>>, %arg2: memref<1344x512xbf16, #tpu.memory_space<vmem>>, %arg3: memref<768x512xbf16, #tpu.memory_space<vmem>>, %arg4: memref<768x512xbf16, #tpu.memory_space<vmem>>, %arg5: memref<768x256xbf16, #tpu.memory_space<vmem>>, %arg6: memref<384x256xbf16, #tpu.memory_space<vmem>>, %arg7: memref<1x512xf32, #tpu.memory_space<vmem>>, %arg8: memref<1x512xf32, #tpu.memory_space<vmem>>, %arg9: memref<1x512xf32, #tpu.memory_space<vmem>>, %arg10: memref<1x256xf32, #tpu.memory_space<vmem>>, %arg11: memref<1x256xf32, #tpu.memory_space<vmem>>, %arg12: memref<72x72xbf16, #tpu.memory_space<vmem>>, %arg13: memref<36x36xbf16, #tpu.memory_space<vmem>>, %arg14: memref<18x18xbf16, #tpu.memory_space<vmem>>, %arg15: memref<10x9xbf16, #tpu.memory_space<vmem>>, %arg16: memref<6x5xbf16, #tpu.memory_space<vmem>>, %arg17: memref<128x60xbf16, #tpu.memory_space<vmem>>, %arg18: memref<1x20xf32, #tpu.memory_space<vmem>>, %arg19: memref<20x7xbf16, #tpu.memory_space<vmem>>, %arg20: memref<1x7xf32, #tpu.memory_space<vmem>>, %arg21: memref<1x8x128xf32, #tpu.memory_space<vmem>>, %arg22: memref<38x256xf32, #tpu.memory_space<vmem>>, %arg23: memref<20x256xf32, #tpu.memory_space<vmem>>, %arg24: memref<11x256xf32, #tpu.memory_space<vmem>>, %arg25: memref<7x128xf32, #tpu.memory_space<vmem>>) attributes {dimension_semantics = [#tpu.dimension_semantics<parallel>], iteration_bounds = array<i64: 2>, scalar_prefetch = 0 : i64, scratch_operands = 4 : i64, tpu.core_type = #tpu.core_type<tc>, window_params = [{transform_indices = @transform_0, window_bounds = array<i64: 1, 74, 448>}, {pipeline_mode = #tpu.pipeline_mode<synchronous>, transform_indices = @transform_1, window_bounds = array<i64: 1344, 512>}, {pipeline_mode = #tpu.pipeline_mode<synchronous>, transform_indices = @transform_2, window_bounds = array<i64: 768, 512>}, {pipeline_mode = #tpu.pipeline_mode<synchronous>, transform_indices = @transform_3, window_bounds = array<i64: 768, 512>}, {pipeline_mode = #tpu.pipeline_mode<synchronous>, transform_indices = @transform_4, window_bounds = array<i64: 768, 256>}, {pipeline_mode = #tpu.pipeline_mode<synchronous>, transform_indices = @transform_5, window_bounds = array<i64: 384, 256>}, {pipeline_mode = #tpu.pipeline_mode<synchronous>, transform_indices = @transform_6, window_bounds = array<i64: 1, 512>}, {pipeline_mode = #tpu.pipeline_mode<synchronous>, transform_indices = @transform_7, window_bounds = array<i64: 1, 512>}, {pipeline_mode = #tpu.pipeline_mode<synchronous>, transform_indices = @transform_8, window_bounds = array<i64: 1, 512>}, {pipeline_mode = #tpu.pipeline_mode<synchronous>, transform_indices = @transform_9, window_bounds = array<i64: 1, 256>}, {pipeline_mode = #tpu.pipeline_mode<synchronous>, transform_indices = @transform_10, window_bounds = array<i64: 1, 256>}, {pipeline_mode = #tpu.pipeline_mode<synchronous>, transform_indices = @transform_11, window_bounds = array<i64: 72, 72>}, {pipeline_mode = #tpu.pipeline_mode<synchronous>, transform_indices = @transform_12, window_bounds = array<i64: 36, 36>}, {pipeline_mode = #tpu.pipeline_mode<synchronous>, transform_indices = @transform_13, window_bounds = array<i64: 18, 18>}, {pipeline_mode = #tpu.pipeline_mode<synchronous>, transform_indices = @transform_14, window_bounds = array<i64: 10, 9>}, {pipeline_mode = #tpu.pipeline_mode<synchronous>, transform_indices = @transform_15, window_bounds = array<i64: 6, 5>}, {pipeline_mode = #tpu.pipeline_mode<synchronous>, transform_indices = @transform_16, window_bounds = array<i64: 128, 60>}, {pipeline_mode = #tpu.pipeline_mode<synchronous>, transform_indices = @transform_17, window_bounds = array<i64: 1, 20>}, {pipeline_mode = #tpu.pipeline_mode<synchronous>, transform_indices = @transform_18, window_bounds = array<i64: 20, 7>}, {pipeline_mode = #tpu.pipeline_mode<synchronous>, transform_indices = @transform_19, window_bounds = array<i64: 1, 7>}, {transform_indices = @transform_20, window_bounds = array<i64: 1, 8, 128>}]} {
    %c0 = arith.constant 0 : index
    %c0_0 = arith.constant 0 : index
    %c0_1 = arith.constant 0 : index
    %0 = vector.load %arg1[%c0, %c0_0, %c0_1] : memref<1x74x448xf32, #tpu.memory_space<vmem>>, vector<1x72x448xf32>
    %1 = vector.shape_cast %0 : vector<1x72x448xf32> to vector<72x448xf32>
    %2 = arith.truncf %1 : vector<72x448xf32> to vector<72x448xbf16>
    %c0_2 = arith.constant 0 : index
    %c1 = arith.constant 1 : index
    %c0_3 = arith.constant 0 : index
    %3 = vector.load %arg1[%c0_2, %c1, %c0_3] : memref<1x74x448xf32, #tpu.memory_space<vmem>>, vector<1x72x448xf32>
    %4 = vector.shape_cast %3 : vector<1x72x448xf32> to vector<72x448xf32>
    %5 = arith.truncf %4 : vector<72x448xf32> to vector<72x448xbf16>
    %c0_4 = arith.constant 0 : index
    %c2 = arith.constant 2 : index
    %c0_5 = arith.constant 0 : index
    %6 = vector.load %arg1[%c0_4, %c2, %c0_5] : memref<1x74x448xf32, #tpu.memory_space<vmem>>, vector<1x72x448xf32>
    %7 = vector.shape_cast %6 : vector<1x72x448xf32> to vector<72x448xf32>
    %8 = arith.truncf %7 : vector<72x448xf32> to vector<72x448xbf16>
    %9 = tpu.concatenate %2, %5, %8 in 1 : vector<72x448xbf16>, vector<72x448xbf16>, vector<72x448xbf16> -> vector<72x1344xbf16>
    %c0_6 = arith.constant 0 : index
    %c0_7 = arith.constant 0 : index
    %10 = vector.load %arg2[%c0_6, %c0_7] : memref<1344x512xbf16, #tpu.memory_space<vmem>>, vector<1344x512xbf16>
    %cst = arith.constant dense<0.000000e+00> : vector<72x512xf32>
    %11 = tpu.matmul %9, %10, %cst {dimension_numbers = #tpu.dot_dimension_numbers<[1], [0], [0], [1], [0, 0, 1, 1], [], []>} : vector<72x1344xbf16>, vector<1344x512xbf16>, vector<72x512xf32> -> vector<72x512xf32>
    %c0_8 = arith.constant 0 : index
    %c0_9 = arith.constant 0 : index
    %12 = vector.load %arg7[%c0_8, %c0_9] : memref<1x512xf32, #tpu.memory_space<vmem>>, vector<1x512xf32>
    %13 = vector.broadcast %12 : vector<1x512xf32> to vector<72x512xf32>
    %14 = arith.addf %11, %13 : vector<72x512xf32>
    %cst_10 = arith.constant 0.000000e+00 : f32
    %15 = vector.broadcast %cst_10 : f32 to vector<72x512xf32>
    %16 = arith.maximumf %14, %15 : vector<72x512xf32>
    %17 = vector.extract_strided_slice %16 {offsets = [0, 0], sizes = [72, 256], strides = [1, 1]} : vector<72x512xf32> to vector<72x256xf32>
    %18 = vector.extract_strided_slice %16 {offsets = [0, 256], sizes = [72, 256], strides = [1, 1]} : vector<72x512xf32> to vector<72x256xf32>
    %19 = arith.maximumf %17, %18 : vector<72x256xf32>
    %20 = arith.truncf %19 : vector<72x256xf32> to vector<72x256xbf16>
    %c0_11 = arith.constant 0 : index
    %c0_12 = arith.constant 0 : index
    %21 = vector.load %arg12[%c0_11, %c0_12] : memref<72x72xbf16, #tpu.memory_space<vmem>>, vector<72x72xbf16>
    %cst_13 = arith.constant dense<0.000000e+00> : vector<72x256xf32>
    %22 = tpu.matmul %21, %20, %cst_13 {dimension_numbers = #tpu.dot_dimension_numbers<[1], [0], [0], [1], [0, 0, 1, 1], [], []>} : vector<72x72xbf16>, vector<72x256xbf16>, vector<72x256xf32> -> vector<72x256xf32>
    %23 = vector.extract_strided_slice %22 {offsets = [0, 0], sizes = [36, 256], strides = [1, 1]} : vector<72x256xf32> to vector<36x256xf32>
    %24 = vector.extract_strided_slice %22 {offsets = [36, 0], sizes = [36, 256], strides = [1, 1]} : vector<72x256xf32> to vector<36x256xf32>
    %25 = arith.maximumf %23, %24 : vector<36x256xf32>
    %cst_14 = arith.constant 0.000000e+00 : f32
    %26 = vector.broadcast %cst_14 : f32 to vector<1x256xf32>
    %c0_15 = arith.constant 0 : index
    %c0_16 = arith.constant 0 : index
    %27 = vector.load %arg22[%c0_15, %c0_16] : memref<38x256xf32, #tpu.memory_space<vmem>>, vector<1x256xf32>
    tpu.vector_store %arg22[%c0_15, %c0_16], %26 {strides = array<i32>} : memref<38x256xf32, #tpu.memory_space<vmem>>, vector<1x256xf32>,
    %c37 = arith.constant 37 : index
    %c0_17 = arith.constant 0 : index
    %28 = vector.load %arg22[%c37, %c0_17] : memref<38x256xf32, #tpu.memory_space<vmem>>, vector<1x256xf32>
    tpu.vector_store %arg22[%c37, %c0_17], %26 {strides = array<i32>} : memref<38x256xf32, #tpu.memory_space<vmem>>, vector<1x256xf32>,
    %c1_18 = arith.constant 1 : index
    %c0_19 = arith.constant 0 : index
    %29 = vector.load %arg22[%c1_18, %c0_19] : memref<38x256xf32, #tpu.memory_space<vmem>>, vector<36x256xf32>
    tpu.vector_store %arg22[%c1_18, %c0_19], %25 {strides = array<i32>} : memref<38x256xf32, #tpu.memory_space<vmem>>, vector<36x256xf32>,
    %c0_20 = arith.constant 0 : index
    %c0_21 = arith.constant 0 : index
    %30 = vector.load %arg22[%c0_20, %c0_21] : memref<38x256xf32, #tpu.memory_space<vmem>>, vector<36x256xf32>
    %31 = arith.truncf %30 : vector<36x256xf32> to vector<36x256xbf16>
    %c1_22 = arith.constant 1 : index
    %c0_23 = arith.constant 0 : index
    %32 = vector.load %arg22[%c1_22, %c0_23] : memref<38x256xf32, #tpu.memory_space<vmem>>, vector<36x256xf32>
    %33 = arith.truncf %32 : vector<36x256xf32> to vector<36x256xbf16>
    %c2_24 = arith.constant 2 : index
    %c0_25 = arith.constant 0 : index
    %34 = vector.load %arg22[%c2_24, %c0_25] : memref<38x256xf32, #tpu.memory_space<vmem>>, vector<36x256xf32>
    %35 = arith.truncf %34 : vector<36x256xf32> to vector<36x256xbf16>
    %36 = tpu.concatenate %31, %33, %35 in 1 : vector<36x256xbf16>, vector<36x256xbf16>, vector<36x256xbf16> -> vector<36x768xbf16>
    %c0_26 = arith.constant 0 : index
    %c0_27 = arith.constant 0 : index
    %37 = vector.load %arg3[%c0_26, %c0_27] : memref<768x512xbf16, #tpu.memory_space<vmem>>, vector<768x512xbf16>
    %cst_28 = arith.constant dense<0.000000e+00> : vector<36x512xf32>
    %38 = tpu.matmul %36, %37, %cst_28 {dimension_numbers = #tpu.dot_dimension_numbers<[1], [0], [0], [1], [0, 0, 1, 1], [], []>} : vector<36x768xbf16>, vector<768x512xbf16>, vector<36x512xf32> -> vector<36x512xf32>
    %c0_29 = arith.constant 0 : index
    %c0_30 = arith.constant 0 : index
    %39 = vector.load %arg8[%c0_29, %c0_30] : memref<1x512xf32, #tpu.memory_space<vmem>>, vector<1x512xf32>
    %40 = vector.broadcast %39 : vector<1x512xf32> to vector<36x512xf32>
    %41 = arith.addf %38, %40 : vector<36x512xf32>
    %cst_31 = arith.constant 0.000000e+00 : f32
    %42 = vector.broadcast %cst_31 : f32 to vector<36x512xf32>
    %43 = arith.maximumf %41, %42 : vector<36x512xf32>
    %44 = vector.extract_strided_slice %43 {offsets = [0, 0], sizes = [36, 256], strides = [1, 1]} : vector<36x512xf32> to vector<36x256xf32>
    %45 = vector.extract_strided_slice %43 {offsets = [0, 256], sizes = [36, 256], strides = [1, 1]} : vector<36x512xf32> to vector<36x256xf32>
    %46 = arith.maximumf %44, %45 : vector<36x256xf32>
    %47 = arith.truncf %46 : vector<36x256xf32> to vector<36x256xbf16>
    %c0_32 = arith.constant 0 : index
    %c0_33 = arith.constant 0 : index
    %48 = vector.load %arg13[%c0_32, %c0_33] : memref<36x36xbf16, #tpu.memory_space<vmem>>, vector<36x36xbf16>
    %cst_34 = arith.constant dense<0.000000e+00> : vector<36x256xf32>
    %49 = tpu.matmul %48, %47, %cst_34 {dimension_numbers = #tpu.dot_dimension_numbers<[1], [0], [0], [1], [0, 0, 1, 1], [], []>} : vector<36x36xbf16>, vector<36x256xbf16>, vector<36x256xf32> -> vector<36x256xf32>
    %50 = vector.extract_strided_slice %49 {offsets = [0, 0], sizes = [18, 256], strides = [1, 1]} : vector<36x256xf32> to vector<18x256xf32>
    %51 = vector.extract_strided_slice %49 {offsets = [18, 0], sizes = [18, 256], strides = [1, 1]} : vector<36x256xf32> to vector<18x256xf32>
    %52 = arith.maximumf %50, %51 : vector<18x256xf32>
    %cst_35 = arith.constant 0.000000e+00 : f32
    %53 = vector.broadcast %cst_35 : f32 to vector<1x256xf32>
    %c0_36 = arith.constant 0 : index
    %c0_37 = arith.constant 0 : index
    %54 = vector.load %arg23[%c0_36, %c0_37] : memref<20x256xf32, #tpu.memory_space<vmem>>, vector<1x256xf32>
    tpu.vector_store %arg23[%c0_36, %c0_37], %53 {strides = array<i32>} : memref<20x256xf32, #tpu.memory_space<vmem>>, vector<1x256xf32>,
    %c19 = arith.constant 19 : index
    %c0_38 = arith.constant 0 : index
    %55 = vector.load %arg23[%c19, %c0_38] : memref<20x256xf32, #tpu.memory_space<vmem>>, vector<1x256xf32>
    tpu.vector_store %arg23[%c19, %c0_38], %53 {strides = array<i32>} : memref<20x256xf32, #tpu.memory_space<vmem>>, vector<1x256xf32>,
    %c1_39 = arith.constant 1 : index
    %c0_40 = arith.constant 0 : index
    %56 = vector.load %arg23[%c1_39, %c0_40] : memref<20x256xf32, #tpu.memory_space<vmem>>, vector<18x256xf32>
    tpu.vector_store %arg23[%c1_39, %c0_40], %52 {strides = array<i32>} : memref<20x256xf32, #tpu.memory_space<vmem>>, vector<18x256xf32>,
    %c0_41 = arith.constant 0 : index
    %c0_42 = arith.constant 0 : index
    %57 = vector.load %arg23[%c0_41, %c0_42] : memref<20x256xf32, #tpu.memory_space<vmem>>, vector<18x256xf32>
    %58 = arith.truncf %57 : vector<18x256xf32> to vector<18x256xbf16>
    %c1_43 = arith.constant 1 : index
    %c0_44 = arith.constant 0 : index
    %59 = vector.load %arg23[%c1_43, %c0_44] : memref<20x256xf32, #tpu.memory_space<vmem>>, vector<18x256xf32>
    %60 = arith.truncf %59 : vector<18x256xf32> to vector<18x256xbf16>
    %c2_45 = arith.constant 2 : index
    %c0_46 = arith.constant 0 : index
    %61 = vector.load %arg23[%c2_45, %c0_46] : memref<20x256xf32, #tpu.memory_space<vmem>>, vector<18x256xf32>
    %62 = arith.truncf %61 : vector<18x256xf32> to vector<18x256xbf16>
    %63 = tpu.concatenate %58, %60, %62 in 1 : vector<18x256xbf16>, vector<18x256xbf16>, vector<18x256xbf16> -> vector<18x768xbf16>
    %c0_47 = arith.constant 0 : index
    %c0_48 = arith.constant 0 : index
    %64 = vector.load %arg4[%c0_47, %c0_48] : memref<768x512xbf16, #tpu.memory_space<vmem>>, vector<768x512xbf16>
    %cst_49 = arith.constant dense<0.000000e+00> : vector<18x512xf32>
    %65 = tpu.matmul %63, %64, %cst_49 {dimension_numbers = #tpu.dot_dimension_numbers<[1], [0], [0], [1], [0, 0, 1, 1], [], []>} : vector<18x768xbf16>, vector<768x512xbf16>, vector<18x512xf32> -> vector<18x512xf32>
    %c0_50 = arith.constant 0 : index
    %c0_51 = arith.constant 0 : index
    %66 = vector.load %arg9[%c0_50, %c0_51] : memref<1x512xf32, #tpu.memory_space<vmem>>, vector<1x512xf32>
    %67 = vector.broadcast %66 : vector<1x512xf32> to vector<18x512xf32>
    %68 = arith.addf %65, %67 : vector<18x512xf32>
    %cst_52 = arith.constant 0.000000e+00 : f32
    %69 = vector.broadcast %cst_52 : f32 to vector<18x512xf32>
    %70 = arith.maximumf %68, %69 : vector<18x512xf32>
    %71 = vector.extract_strided_slice %70 {offsets = [0, 0], sizes = [18, 256], strides = [1, 1]} : vector<18x512xf32> to vector<18x256xf32>
    %72 = vector.extract_strided_slice %70 {offsets = [0, 256], sizes = [18, 256], strides = [1, 1]} : vector<18x512xf32> to vector<18x256xf32>
    %73 = arith.maximumf %71, %72 : vector<18x256xf32>
    %74 = arith.truncf %73 : vector<18x256xf32> to vector<18x256xbf16>
    %c0_53 = arith.constant 0 : index
    %c0_54 = arith.constant 0 : index
    %75 = vector.load %arg14[%c0_53, %c0_54] : memref<18x18xbf16, #tpu.memory_space<vmem>>, vector<18x18xbf16>
    %cst_55 = arith.constant dense<0.000000e+00> : vector<18x256xf32>
    %76 = tpu.matmul %75, %74, %cst_55 {dimension_numbers = #tpu.dot_dimension_numbers<[1], [0], [0], [1], [0, 0, 1, 1], [], []>} : vector<18x18xbf16>, vector<18x256xbf16>, vector<18x256xf32> -> vector<18x256xf32>
    %77 = vector.extract_strided_slice %76 {offsets = [0, 0], sizes = [9, 256], strides = [1, 1]} : vector<18x256xf32> to vector<9x256xf32>
    %78 = vector.extract_strided_slice %76 {offsets = [9, 0], sizes = [9, 256], strides = [1, 1]} : vector<18x256xf32> to vector<9x256xf32>
    %79 = arith.maximumf %77, %78 : vector<9x256xf32>
    %cst_56 = arith.constant 0.000000e+00 : f32
    %80 = vector.broadcast %cst_56 : f32 to vector<1x256xf32>
    %c0_57 = arith.constant 0 : index
    %c0_58 = arith.constant 0 : index
    %81 = vector.load %arg24[%c0_57, %c0_58] : memref<11x256xf32, #tpu.memory_space<vmem>>, vector<1x256xf32>
    tpu.vector_store %arg24[%c0_57, %c0_58], %80 {strides = array<i32>} : memref<11x256xf32, #tpu.memory_space<vmem>>, vector<1x256xf32>,
    %c10 = arith.constant 10 : index
    %c0_59 = arith.constant 0 : index
    %82 = vector.load %arg24[%c10, %c0_59] : memref<11x256xf32, #tpu.memory_space<vmem>>, vector<1x256xf32>
    tpu.vector_store %arg24[%c10, %c0_59], %80 {strides = array<i32>} : memref<11x256xf32, #tpu.memory_space<vmem>>, vector<1x256xf32>,
    %c1_60 = arith.constant 1 : index
    %c0_61 = arith.constant 0 : index
    %83 = vector.load %arg24[%c1_60, %c0_61] : memref<11x256xf32, #tpu.memory_space<vmem>>, vector<9x256xf32>
    tpu.vector_store %arg24[%c1_60, %c0_61], %79 {strides = array<i32>} : memref<11x256xf32, #tpu.memory_space<vmem>>, vector<9x256xf32>,
    %c0_62 = arith.constant 0 : index
    %c0_63 = arith.constant 0 : index
    %84 = vector.load %arg24[%c0_62, %c0_63] : memref<11x256xf32, #tpu.memory_space<vmem>>, vector<9x256xf32>
    %85 = arith.truncf %84 : vector<9x256xf32> to vector<9x256xbf16>
    %c1_64 = arith.constant 1 : index
    %c0_65 = arith.constant 0 : index
    %86 = vector.load %arg24[%c1_64, %c0_65] : memref<11x256xf32, #tpu.memory_space<vmem>>, vector<9x256xf32>
    %87 = arith.truncf %86 : vector<9x256xf32> to vector<9x256xbf16>
    %c2_66 = arith.constant 2 : index
    %c0_67 = arith.constant 0 : index
    %88 = vector.load %arg24[%c2_66, %c0_67] : memref<11x256xf32, #tpu.memory_space<vmem>>, vector<9x256xf32>
    %89 = arith.truncf %88 : vector<9x256xf32> to vector<9x256xbf16>
    %90 = tpu.concatenate %85, %87, %89 in 1 : vector<9x256xbf16>, vector<9x256xbf16>, vector<9x256xbf16> -> vector<9x768xbf16>
    %c0_68 = arith.constant 0 : index
    %c0_69 = arith.constant 0 : index
    %91 = vector.load %arg5[%c0_68, %c0_69] : memref<768x256xbf16, #tpu.memory_space<vmem>>, vector<768x256xbf16>
    %cst_70 = arith.constant dense<0.000000e+00> : vector<9x256xf32>
    %92 = tpu.matmul %90, %91, %cst_70 {dimension_numbers = #tpu.dot_dimension_numbers<[1], [0], [0], [1], [0, 0, 1, 1], [], []>} : vector<9x768xbf16>, vector<768x256xbf16>, vector<9x256xf32> -> vector<9x256xf32>
    %c0_71 = arith.constant 0 : index
    %c0_72 = arith.constant 0 : index
    %93 = vector.load %arg10[%c0_71, %c0_72] : memref<1x256xf32, #tpu.memory_space<vmem>>, vector<1x256xf32>
    %94 = vector.broadcast %93 : vector<1x256xf32> to vector<9x256xf32>
    %95 = arith.addf %92, %94 : vector<9x256xf32>
    %cst_73 = arith.constant 0.000000e+00 : f32
    %96 = vector.broadcast %cst_73 : f32 to vector<9x256xf32>
    %97 = arith.maximumf %95, %96 : vector<9x256xf32>
    %98 = vector.extract_strided_slice %97 {offsets = [0, 0], sizes = [9, 128], strides = [1, 1]} : vector<9x256xf32> to vector<9x128xf32>
    %99 = vector.extract_strided_slice %97 {offsets = [0, 128], sizes = [9, 128], strides = [1, 1]} : vector<9x256xf32> to vector<9x128xf32>
    %100 = arith.maximumf %98, %99 : vector<9x128xf32>
    %101 = arith.truncf %100 : vector<9x128xf32> to vector<9x128xbf16>
    %c0_74 = arith.constant 0 : index
    %c0_75 = arith.constant 0 : index
    %102 = vector.load %arg15[%c0_74, %c0_75] : memref<10x9xbf16, #tpu.memory_space<vmem>>, vector<10x9xbf16>
    %cst_76 = arith.constant dense<0.000000e+00> : vector<10x128xf32>
    %103 = tpu.matmul %102, %101, %cst_76 {dimension_numbers = #tpu.dot_dimension_numbers<[1], [0], [0], [1], [0, 0, 1, 1], [], []>} : vector<10x9xbf16>, vector<9x128xbf16>, vector<10x128xf32> -> vector<10x128xf32>
    %104 = vector.extract_strided_slice %103 {offsets = [0, 0], sizes = [5, 128], strides = [1, 1]} : vector<10x128xf32> to vector<5x128xf32>
    %105 = vector.extract_strided_slice %103 {offsets = [5, 0], sizes = [5, 128], strides = [1, 1]} : vector<10x128xf32> to vector<5x128xf32>
    %106 = arith.maximumf %104, %105 : vector<5x128xf32>
    %cst_77 = arith.constant 0.000000e+00 : f32
    %107 = vector.broadcast %cst_77 : f32 to vector<1x128xf32>
    %c0_78 = arith.constant 0 : index
    %c0_79 = arith.constant 0 : index
    %108 = vector.load %arg25[%c0_78, %c0_79] : memref<7x128xf32, #tpu.memory_space<vmem>>, vector<1x128xf32>
    tpu.vector_store %arg25[%c0_78, %c0_79], %107 {strides = array<i32>} : memref<7x128xf32, #tpu.memory_space<vmem>>, vector<1x128xf32>,
    %c6 = arith.constant 6 : index
    %c0_80 = arith.constant 0 : index
    %109 = vector.load %arg25[%c6, %c0_80] : memref<7x128xf32, #tpu.memory_space<vmem>>, vector<1x128xf32>
    tpu.vector_store %arg25[%c6, %c0_80], %107 {strides = array<i32>} : memref<7x128xf32, #tpu.memory_space<vmem>>, vector<1x128xf32>,
    %c1_81 = arith.constant 1 : index
    %c0_82 = arith.constant 0 : index
    %110 = vector.load %arg25[%c1_81, %c0_82] : memref<7x128xf32, #tpu.memory_space<vmem>>, vector<5x128xf32>
    tpu.vector_store %arg25[%c1_81, %c0_82], %106 {strides = array<i32>} : memref<7x128xf32, #tpu.memory_space<vmem>>, vector<5x128xf32>,
    %c0_83 = arith.constant 0 : index
    %c0_84 = arith.constant 0 : index
    %111 = vector.load %arg25[%c0_83, %c0_84] : memref<7x128xf32, #tpu.memory_space<vmem>>, vector<5x128xf32>
    %112 = arith.truncf %111 : vector<5x128xf32> to vector<5x128xbf16>
    %c1_85 = arith.constant 1 : index
    %c0_86 = arith.constant 0 : index
    %113 = vector.load %arg25[%c1_85, %c0_86] : memref<7x128xf32, #tpu.memory_space<vmem>>, vector<5x128xf32>
    %114 = arith.truncf %113 : vector<5x128xf32> to vector<5x128xbf16>
    %c2_87 = arith.constant 2 : index
    %c0_88 = arith.constant 0 : index
    %115 = vector.load %arg25[%c2_87, %c0_88] : memref<7x128xf32, #tpu.memory_space<vmem>>, vector<5x128xf32>
    %116 = arith.truncf %115 : vector<5x128xf32> to vector<5x128xbf16>
    %117 = tpu.concatenate %112, %114, %116 in 1 : vector<5x128xbf16>, vector<5x128xbf16>, vector<5x128xbf16> -> vector<5x384xbf16>
    %c0_89 = arith.constant 0 : index
    %c0_90 = arith.constant 0 : index
    %118 = vector.load %arg6[%c0_89, %c0_90] : memref<384x256xbf16, #tpu.memory_space<vmem>>, vector<384x256xbf16>
    %cst_91 = arith.constant dense<0.000000e+00> : vector<5x256xf32>
    %119 = tpu.matmul %117, %118, %cst_91 {dimension_numbers = #tpu.dot_dimension_numbers<[1], [0], [0], [1], [0, 0, 1, 1], [], []>} : vector<5x384xbf16>, vector<384x256xbf16>, vector<5x256xf32> -> vector<5x256xf32>
    %c0_92 = arith.constant 0 : index
    %c0_93 = arith.constant 0 : index
    %120 = vector.load %arg11[%c0_92, %c0_93] : memref<1x256xf32, #tpu.memory_space<vmem>>, vector<1x256xf32>
    %121 = vector.broadcast %120 : vector<1x256xf32> to vector<5x256xf32>
    %122 = arith.addf %119, %121 : vector<5x256xf32>
    %cst_94 = arith.constant 0.000000e+00 : f32
    %123 = vector.broadcast %cst_94 : f32 to vector<5x256xf32>
    %124 = arith.maximumf %122, %123 : vector<5x256xf32>
    %125 = vector.extract_strided_slice %124 {offsets = [0, 0], sizes = [5, 128], strides = [1, 1]} : vector<5x256xf32> to vector<5x128xf32>
    %126 = vector.extract_strided_slice %124 {offsets = [0, 128], sizes = [5, 128], strides = [1, 1]} : vector<5x256xf32> to vector<5x128xf32>
    %127 = arith.maximumf %125, %126 : vector<5x128xf32>
    %128 = arith.truncf %127 : vector<5x128xf32> to vector<5x128xbf16>
    %c0_95 = arith.constant 0 : index
    %c0_96 = arith.constant 0 : index
    %129 = vector.load %arg16[%c0_95, %c0_96] : memref<6x5xbf16, #tpu.memory_space<vmem>>, vector<6x5xbf16>
    %cst_97 = arith.constant dense<0.000000e+00> : vector<6x128xf32>
    %130 = tpu.matmul %129, %128, %cst_97 {dimension_numbers = #tpu.dot_dimension_numbers<[1], [0], [0], [1], [0, 0, 1, 1], [], []>} : vector<6x5xbf16>, vector<5x128xbf16>, vector<6x128xf32> -> vector<6x128xf32>
    %131 = vector.extract_strided_slice %130 {offsets = [0, 0], sizes = [3, 128], strides = [1, 1]} : vector<6x128xf32> to vector<3x128xf32>
    %132 = vector.extract_strided_slice %130 {offsets = [3, 0], sizes = [3, 128], strides = [1, 1]} : vector<6x128xf32> to vector<3x128xf32>
    %133 = arith.maximumf %131, %132 : vector<3x128xf32>
    %134 = arith.truncf %133 : vector<3x128xf32> to vector<3x128xbf16>
    %c0_98 = arith.constant 0 : index
    %c0_99 = arith.constant 0 : index
    %135 = vector.load %arg17[%c0_98, %c0_99] : memref<128x60xbf16, #tpu.memory_space<vmem>>, vector<128x60xbf16>
    %cst_100 = arith.constant dense<0.000000e+00> : vector<3x60xf32>
    %136 = tpu.matmul %134, %135, %cst_100 {dimension_numbers = #tpu.dot_dimension_numbers<[1], [0], [0], [1], [0, 0, 1, 1], [], []>} : vector<3x128xbf16>, vector<128x60xbf16>, vector<3x60xf32> -> vector<3x60xf32>
    %c0_101 = arith.constant 0 : index
    %c0_102 = arith.constant 0 : index
    %137 = vector.load %arg18[%c0_101, %c0_102] : memref<1x20xf32, #tpu.memory_space<vmem>>, vector<1x20xf32>
    %138 = vector.extract_strided_slice %136 {offsets = [0, 0], sizes = [1, 20], strides = [1, 1]} : vector<3x60xf32> to vector<1x20xf32>
    %139 = arith.addf %137, %138 : vector<1x20xf32>
    %140 = vector.extract_strided_slice %136 {offsets = [1, 20], sizes = [1, 20], strides = [1, 1]} : vector<3x60xf32> to vector<1x20xf32>
    %141 = arith.addf %139, %140 : vector<1x20xf32>
    %142 = vector.extract_strided_slice %136 {offsets = [2, 40], sizes = [1, 20], strides = [1, 1]} : vector<3x60xf32> to vector<1x20xf32>
    %143 = arith.addf %141, %142 : vector<1x20xf32>
    %cst_103 = arith.constant 0.000000e+00 : f32
    %144 = vector.broadcast %cst_103 : f32 to vector<1x20xf32>
    %145 = arith.maximumf %143, %144 : vector<1x20xf32>
    %146 = arith.truncf %145 : vector<1x20xf32> to vector<1x20xbf16>
    %c0_104 = arith.constant 0 : index
    %c0_105 = arith.constant 0 : index
    %147 = vector.load %arg19[%c0_104, %c0_105] : memref<20x7xbf16, #tpu.memory_space<vmem>>, vector<20x7xbf16>
    %cst_106 = arith.constant dense<0.000000e+00> : vector<1x7xf32>
    %148 = tpu.matmul %146, %147, %cst_106 {dimension_numbers = #tpu.dot_dimension_numbers<[1], [0], [0], [1], [0, 0, 1, 1], [], []>} : vector<1x20xbf16>, vector<20x7xbf16>, vector<1x7xf32> -> vector<1x7xf32>
    %c0_107 = arith.constant 0 : index
    %c0_108 = arith.constant 0 : index
    %149 = vector.load %arg20[%c0_107, %c0_108] : memref<1x7xf32, #tpu.memory_space<vmem>>, vector<1x7xf32>
    %150 = arith.addf %148, %149 : vector<1x7xf32>
    %cst_109 = arith.constant 0.000000e+00 : f32
    %151 = vector.broadcast %cst_109 : f32 to vector<8x128xf32>
    %c0_110 = arith.constant 0 : index
    %c0_111 = arith.constant 0 : index
    %c0_112 = arith.constant 0 : index
    %152 = vector.load %arg21[%c0_110, %c0_111, %c0_112] : memref<1x8x128xf32, #tpu.memory_space<vmem>>, vector<1x8x128xf32>
    %153 = vector.shape_cast %152 : vector<1x8x128xf32> to vector<8x128xf32>
    %154 = vector.shape_cast %151 : vector<8x128xf32> to vector<1x8x128xf32>
    tpu.vector_store %arg21[%c0_110, %c0_111, %c0_112], %154 {strides = array<i32>} : memref<1x8x128xf32, #tpu.memory_space<vmem>>, vector<1x8x128xf32>,
    %c0_113 = arith.constant 0 : index
    %c0_114 = arith.constant 0 : index
    %c0_115 = arith.constant 0 : index
    %155 = vector.load %arg21[%c0_113, %c0_114, %c0_115] : memref<1x8x128xf32, #tpu.memory_space<vmem>>, vector<1x1x7xf32>
    %156 = vector.shape_cast %155 : vector<1x1x7xf32> to vector<1x7xf32>
    %157 = vector.shape_cast %150 : vector<1x7xf32> to vector<1x1x7xf32>
    tpu.vector_store %arg21[%c0_113, %c0_114, %c0_115], %157 {strides = array<i32>} : memref<1x8x128xf32, #tpu.memory_space<vmem>>, vector<1x1x7xf32>,
    return
  }
  func.func @transform_0(%arg0: i32) -> (i32, i32, i32) {
    %c0_i32 = arith.constant 0 : i32
    %c0_i32_0 = arith.constant 0 : i32
    %c0_i32_1 = arith.constant 0 : i32
    return %arg0, %c0_i32, %c0_i32_0 : i32, i32, i32
  }
  func.func @transform_1(%arg0: i32) -> (i32, i32) {
    %c0_i32 = arith.constant 0 : i32
    %c0_i32_0 = arith.constant 0 : i32
    %c0_i32_1 = arith.constant 0 : i32
    return %c0_i32, %c0_i32_0 : i32, i32
  }
  func.func @transform_2(%arg0: i32) -> (i32, i32) {
    %c0_i32 = arith.constant 0 : i32
    %c0_i32_0 = arith.constant 0 : i32
    %c0_i32_1 = arith.constant 0 : i32
    return %c0_i32, %c0_i32_0 : i32, i32
  }
  func.func @transform_3(%arg0: i32) -> (i32, i32) {
    %c0_i32 = arith.constant 0 : i32
    %c0_i32_0 = arith.constant 0 : i32
    %c0_i32_1 = arith.constant 0 : i32
    return %c0_i32, %c0_i32_0 : i32, i32
  }
  func.func @transform_4(%arg0: i32) -> (i32, i32) {
    %c0_i32 = arith.constant 0 : i32
    %c0_i32_0 = arith.constant 0 : i32
    %c0_i32_1 = arith.constant 0 : i32
    return %c0_i32, %c0_i32_0 : i32, i32
  }
  func.func @transform_5(%arg0: i32) -> (i32, i32) {
    %c0_i32 = arith.constant 0 : i32
    %c0_i32_0 = arith.constant 0 : i32
    %c0_i32_1 = arith.constant 0 : i32
    return %c0_i32, %c0_i32_0 : i32, i32
  }
  func.func @transform_6(%arg0: i32) -> (i32, i32) {
    %c0_i32 = arith.constant 0 : i32
    %c0_i32_0 = arith.constant 0 : i32
    %c0_i32_1 = arith.constant 0 : i32
    return %c0_i32, %c0_i32_0 : i32, i32
  }
  func.func @transform_7(%arg0: i32) -> (i32, i32) {
    %c0_i32 = arith.constant 0 : i32
    %c0_i32_0 = arith.constant 0 : i32
    %c0_i32_1 = arith.constant 0 : i32
    return %c0_i32, %c0_i32_0 : i32, i32
  }
  func.func @transform_8(%arg0: i32) -> (i32, i32) {
    %c0_i32 = arith.constant 0 : i32
    %c0_i32_0 = arith.constant 0 : i32
    %c0_i32_1 = arith.constant 0 : i32
    return %c0_i32, %c0_i32_0 : i32, i32
  }
  func.func @transform_9(%arg0: i32) -> (i32, i32) {
    %c0_i32 = arith.constant 0 : i32
    %c0_i32_0 = arith.constant 0 : i32
    %c0_i32_1 = arith.constant 0 : i32
    return %c0_i32, %c0_i32_0 : i32, i32
  }
  func.func @transform_10(%arg0: i32) -> (i32, i32) {
    %c0_i32 = arith.constant 0 : i32
    %c0_i32_0 = arith.constant 0 : i32
    %c0_i32_1 = arith.constant 0 : i32
    return %c0_i32, %c0_i32_0 : i32, i32
  }
  func.func @transform_11(%arg0: i32) -> (i32, i32) {
    %c0_i32 = arith.constant 0 : i32
    %c0_i32_0 = arith.constant 0 : i32
    %c0_i32_1 = arith.constant 0 : i32
    return %c0_i32, %c0_i32_0 : i32, i32
  }
  func.func @transform_12(%arg0: i32) -> (i32, i32) {
    %c0_i32 = arith.constant 0 : i32
    %c0_i32_0 = arith.constant 0 : i32
    %c0_i32_1 = arith.constant 0 : i32
    return %c0_i32, %c0_i32_0 : i32, i32
  }
  func.func @transform_13(%arg0: i32) -> (i32, i32) {
    %c0_i32 = arith.constant 0 : i32
    %c0_i32_0 = arith.constant 0 : i32
    %c0_i32_1 = arith.constant 0 : i32
    return %c0_i32, %c0_i32_0 : i32, i32
  }
  func.func @transform_14(%arg0: i32) -> (i32, i32) {
    %c0_i32 = arith.constant 0 : i32
    %c0_i32_0 = arith.constant 0 : i32
    %c0_i32_1 = arith.constant 0 : i32
    return %c0_i32, %c0_i32_0 : i32, i32
  }
  func.func @transform_15(%arg0: i32) -> (i32, i32) {
    %c0_i32 = arith.constant 0 : i32
    %c0_i32_0 = arith.constant 0 : i32
    %c0_i32_1 = arith.constant 0 : i32
    return %c0_i32, %c0_i32_0 : i32, i32
  }
  func.func @transform_16(%arg0: i32) -> (i32, i32) {
    %c0_i32 = arith.constant 0 : i32
    %c0_i32_0 = arith.constant 0 : i32
    %c0_i32_1 = arith.constant 0 : i32
    return %c0_i32, %c0_i32_0 : i32, i32
  }
  func.func @transform_17(%arg0: i32) -> (i32, i32) {
    %c0_i32 = arith.constant 0 : i32
    %c0_i32_0 = arith.constant 0 : i32
    %c0_i32_1 = arith.constant 0 : i32
    return %c0_i32, %c0_i32_0 : i32, i32
  }
  func.func @transform_18(%arg0: i32) -> (i32, i32) {
    %c0_i32 = arith.constant 0 : i32
    %c0_i32_0 = arith.constant 0 : i32
    %c0_i32_1 = arith.constant 0 : i32
    return %c0_i32, %c0_i32_0 : i32, i32
  }
  func.func @transform_19(%arg0: i32) -> (i32, i32) {
    %c0_i32 = arith.constant 0 : i32
    %c0_i32_0 = arith.constant 0 : i32
    %c0_i32_1 = arith.constant 0 : i32
    return %c0_i32, %c0_i32_0 : i32, i32
  }
  func.func @transform_20(%arg0: i32) -> (i32, i32, i32) {
    %c0_i32 = arith.constant 0 : i32
    %c0_i32_0 = arith.constant 0 : i32
    %c0_i32_1 = arith.constant 0 : i32
    return %arg0, %c0_i32, %c0_i32_0 : i32, i32, i32
  }
}

</mosaic_0001>

<bundles_post_ra>
// kernel: dqn_forward.1
= control target key start
LH: loop header
LB: loop body
LE: loop exit
PB: predicated region body
PF: predicated region fallthrough
CT: control target
= control target key end

     0   :  { %s20993_s0 = inlined_call_operand.vmem [shape: f32[2,74,448], index: 0, kind: input, shape index: {}]   ;;  %s20994_s1 = inlined_call_operand.vmem [shape: bf16[1344,512], index: 1, kind: input, shape index: {}]   ;;  %s20995_s2 = inlined_call_operand.vmem [shape: bf16[768,512], index: 2, kind: input, shape index: {}]   ;;  %s20996_s3 = inlined_call_operand.hbm [shape: bf16[768,512], index: 3, kind: input, shape index: {}]   ;;  %s20997_s4 = inlined_call_operand.hbm [shape: bf16[768,256], index: 4, kind: input, shape index: {}]   ;;  %s20998_s5 = inlined_call_operand.hbm [shape: bf16[384,256], index: 5, kind: input, shape index: {}]   ;;  %s20999_s6 = inlined_call_operand.hbm [shape: f32[1,512], index: 6, kind: input, shape index: {}]   ;;  %s21000_s7 = inlined_call_operand.hbm [shape: f32[1,512], index: 7, kind: input, shape index: {}]   ;;  %s21001_s8 = inlined_call_operand.hbm [shape: f32[1,512], index: 8, kind: input, shape index: {}]   ;;  %s21002_s9 = inlined_call_operand.hbm [shape: f32[1,256], index: 9, kind: input, shape index: {}]   ;;  %s21003_s10 = inlined_call_operand.hbm [shape: f32[1,256], index: 10, kind: input, shape index: {}]   ;;  %s21004_s11 = inlined_call_operand.hbm [shape: bf16[72,72], index: 11, kind: input, shape index: {}]   ;;  %s21005_s12 = inlined_call_operand.vmem [shape: bf16[36,36], index: 12, kind: input, shape index: {}]   ;;  %s21006_s13 = inlined_call_operand.vmem [shape: bf16[18,18], index: 13, kind: input, shape index: {}]   ;;  %s21007_s14 = inlined_call_operand.hbm [shape: bf16[10,9], index: 14, kind: input, shape index: {}]   ;;  %s21008_s15 = inlined_call_operand.hbm [shape: bf16[6,5], index: 15, kind: input, shape index: {}]   ;;  %s21009_s16 = inlined_call_operand.vmem [shape: bf16[128,60], index: 16, kind: input, shape index: {}]   ;;  %s21010_s17 = inlined_call_operand.hbm [shape: f32[1,20], index: 17, kind: input, shape index: {}]   ;;  %s21011_s18 = inlined_call_operand.vmem [shape: bf16[20,7], index: 18, kind: input, shape index: {}]   ;;  %s21012_s19 = inlined_call_operand.hbm [shape: f32[1,7], index: 19, kind: input, shape index: {}]   ;;  %s21013_s20 = inlined_call_operand.vmem [shape: f32[2,8,128], index: 20, kind: output, shape index: {}]  }
   0x1   :  { %21087 = sst [smem:[#allocation74_spill]] %s20993_s0 }
   0x2   :  { %21088 = sst [smem:[#allocation75_spill]] %s20994_s1 }
   0x3   :  { %21089 = sst [smem:[#allocation76_spill]] %s20995_s2 }
   0x4   :  { %21090 = sst [smem:[#allocation77_spill]] %s20996_s3 }
   0x5   :  { %21091 = sst [smem:[#allocation78_spill]] %s20997_s4 }
   0x6   :  { %21092 = sst [smem:[#allocation79_spill]] %s20999_s6 }
   0x7   :  { %21093 = sst [smem:[#allocation80_spill]] %s21001_s8 }
   0x8   :  { %21094 = sst [smem:[#allocation81_spill]] %s21011_s18 }
   0x9   :  { %21095 = sst [smem:[#allocation82_spill]] %s21013_s20 }
   0xa   :  { %25 = vsyncpa [#allocation7], 0 }
   0xb   :  { %26 = vsyncpa [#allocation9], 0 }
   0xc   :  { %27 = vsyncpa [#allocation12], 0 }
   0xd   :  { %28 = vsyncpa [#allocation15], 0 }
   0xe   :  { %29 = vsyncpa [#allocation18], 0 }
   0xf   :  { %30 = vsyncpa [#allocation21], 0 }
  0x10   :  { %31 = vsyncpa [#allocation24], 0  ;;  %s15749_s1 = smov 0  }
  0x11 LB: > { %21096 = sst [smem:[#allocation33_spill]] %s15618_s1  ;;  %s15758_s25 = sadd.s32 4294967295, %s15618_s1   ;;  %s15618_s1 = sphi %s15749_s1, %s37_s1  }
  0x12   : > { %s21097_s24 = sld [smem:[#allocation78_spill]]  ;;  %p10558_p0 = scmp.ge.s32.totalorder %s15618_s1, 1 }
  0x13   : > { %p493_p1 = scmp.lt.s32.totalorder %s15618_s1, 3  ;;  %p15132_p2 = scmp.eq.s32.totalorder %s15758_s25, 0 }
  0x14   : > { %s15620_s26 = smov [#allocation8]   ;;  %s21099_s6 = sld [smem:[#allocation79_spill]] }
  0x15   : > { %p15763_p3 = pnand %p10558_p0, %p493_p1  ;;  %s526_s27 = sshll.u32 %s15620_s26, 4  ;;  %s527_s27 = int_to_ptr.vmem [resolvable:$true] %s526_s27 }
  0x16   : > { %s15621_s0 = smov [#allocation11]   ;;  %s21101_s8 = sld [smem:[#allocation80_spill]] }
  0x17   : > { %p15092_p4 = pneg %p15763_p3  ;;  %s555_s21 = sshll.u32 %s15621_s0, 4  ;;  %s556_s21 = int_to_ptr.vmem [resolvable:$true] %s555_s21 }
  0x18   : > { %s524_s2 = sshll.u32 %s21097_s24, 4  ;;  %s21018_s26 = smov 128   ;;  %s525_s2 = int_to_ptr.hbm [resolvable:$true] %s524_s2 }
  0x19   : > { %p15774_p5 = pnand %p15132_p2, %p15092_p4  ;;  %s15623_s28 = smov 8  }
  0x1a   : > { %s553_s29 = sshll.u32 %s21099_s6, 4  ;;  %s15624_s4 = smov [#allocation14]   ;;  %s554_s29 = int_to_ptr.hbm [resolvable:$true] %s553_s29 }
  0x1b   : > { %15098 = dma.hbm_to_vmem [thread:$0]  (!%p15774_p5), %s525_s2, 12288, %s527_s27, [#allocation9], %s21018_s26, %s21018_s26, %s15623_s28  }
  0x1c   : > { %s577_s24 = sshll.u32 %s21101_s8, 4  ;;  %s579_s6 = sshll.u32 %s15624_s4, 4  ;;  %s578_s24 = int_to_ptr.hbm [resolvable:$true] %s577_s24  ;;  %s580_s6 = int_to_ptr.vmem [resolvable:$true] %s579_s6 }
  0x1d   : > { %15104 = dma.hbm_to_vmem [thread:$0]  (!%p15774_p5), %s554_s29, 64, %s556_s21, [#allocation12]  }
  0x1e   : > { %s601_s18 = sshll.u32 %s21003_s10, 4  ;;  %s15625_s22 = smov [#allocation17]   ;;  %s602_s18 = int_to_ptr.hbm [resolvable:$true] %s601_s18 }
  0x1f   : > { %15110 = dma.hbm_to_vmem [thread:$0]  (!%p15774_p5), %s578_s24, 64, %s580_s6, [#allocation15]  }
  0x20   : > { %s603_s23 = sshll.u32 %s15625_s22, 4  ;;  %s632_s2 = sshll.u32 %s21007_s14, 4  ;;  %s604_s23 = int_to_ptr.vmem [resolvable:$true] %s603_s23  ;;  %s633_s2 = int_to_ptr.hbm [resolvable:$true] %s632_s2 }
  0x21   : > { %15116 = dma.hbm_to_vmem [thread:$0]  (!%p15774_p5), %s602_s18, 32, %s604_s23, [#allocation18]  }
  0x22   : > { %s15626_s27 = smov [#allocation20]   ;;  %s662_s4 = sshll.u32 %s21010_s17, 4  ;;  %s663_s4 = int_to_ptr.hbm [resolvable:$true] %s662_s4 }
  0x23   : > { %s634_s29 = sshll.u32 %s15626_s27, 4  ;;  %s21019_s6 = smov 64   ;;  %s635_s29 = int_to_ptr.vmem [resolvable:$true] %s634_s29 }
  0x24   : > { %s15628_s24 = smov 4   ;;  %s21102_s18 = sld [smem:[#allocation77_spill]] }
  0x25   : > { %15122 = dma.hbm_to_vmem [thread:$0]  (!%p15774_p5), %s633_s2, 128, %s635_s29, [#allocation21], %s21019_s6, %s21019_s6, %s15628_s24  }
  0x26   : > { %s15629_s22 = smov [#allocation23]   ;;  %s15630_s27 = smov [#allocation6]  }
  0x27   : > { %s664_s23 = sshll.u32 %s15629_s22, 4  ;;  %s512_s1 = sshll.u32 %s15630_s27, 4  ;;  %s665_s23 = int_to_ptr.vmem [resolvable:$true] %s664_s23  ;;  %s513_s1 = int_to_ptr.vmem [resolvable:$true] %s512_s1 }
  0x28   : > { %15128 = dma.hbm_to_vmem [thread:$0]  (!%p15774_p5), %s663_s4, 16, %s665_s23, [#allocation24]  }
  0x29   : > { %s15631_s21 = smov 256   ;;  %s15632_s26 = smov 16  }
  0x2a   : > { %s510_s0 = sshll.u32 %s21102_s18, 4  ;;  %s538_s8 = sshll.u32 %s20998_s5, 4  ;;  %s511_s0 = int_to_ptr.hbm [resolvable:$true] %s510_s0  ;;  %s539_s8 = int_to_ptr.hbm [resolvable:$true] %s538_s8 }
  0x2b   : > { %15095 = dma.hbm_to_vmem [thread:$0]  (!%p15774_p5), %s511_s0, 24576, %s513_s1, [#allocation7], %s15631_s21, %s15631_s21, %s15632_s26  }
  0x2c   : > { %s15633_s20 = smov [#allocation10]   ;;  %s565_s4 = sshll.u32 %s21000_s7, 4  ;;  %s566_s4 = int_to_ptr.hbm [resolvable:$true] %s565_s4 }
  0x2d   : > { %s540_s18 = sshll.u32 %s15633_s20, 4  ;;  %s21103_s23 = smov 128   ;;  %s541_s18 = int_to_ptr.vmem [resolvable:$true] %s540_s18 }
  0x2e   : > { %15101 = dma.hbm_to_vmem [thread:$0]  (!%p15774_p5), %s539_s8, 6144, %s541_s18, [#allocation9], %s21103_s23, %s21103_s23, %s15623_s28  }
  0x2f   : > { %s15634_s26 = smov [#allocation13]   ;;  %s589_s21 = sshll.u32 %s21002_s9, 4  ;;  %s590_s21 = int_to_ptr.hbm [resolvable:$true] %s589_s21 }
  0x30   : > { %s567_s0 = sshll.u32 %s15634_s26, 4  ;;  %s612_s29 = sshll.u32 %s21004_s11, 4  ;;  %s568_s0 = int_to_ptr.vmem [resolvable:$true] %s567_s0  ;;  %s613_s29 = int_to_ptr.hbm [resolvable:$true] %s612_s29 }
  0x31   : > { %15107 = dma.hbm_to_vmem [thread:$0]  (!%p15774_p5), %s566_s4, 64, %s568_s0, [#allocation12]  }
  0x32   : > { %s15635_s20 = smov [#allocation16]   ;;  %s15636_s28 = smov [#allocation19]  }
  0x33   : > { %s591_s22 = sshll.u32 %s15635_s20, 4  ;;  %s614_s8 = sshll.u32 %s15636_s28, 4  ;;  %s592_s22 = int_to_ptr.vmem [resolvable:$true] %s591_s22  ;;  %s615_s8 = int_to_ptr.vmem [resolvable:$true] %s614_s8 }
  0x34   : > { %15113 = dma.hbm_to_vmem [thread:$0]  (!%p15774_p5), %s590_s21, 32, %s592_s22, [#allocation15]  }
  0x35   : > { %s647_s26 = sshll.u32 %s21008_s15, 4  ;;  %s21104_s4 = smov 64   ;;  %s648_s26 = int_to_ptr.hbm [resolvable:$true] %s647_s26 }
  0x36   : > { %15119 = dma.hbm_to_vmem [thread:$0]  (!%p15774_p5), %s613_s29, 576, %s615_s8, [#allocation18], %s21104_s4, %s21104_s4, %s15628_s24  }
  0x37   : > { %s677_s1 = sshll.u32 %s21012_s19, 4  ;;  %s15637_s2 = smov [#allocation22]   ;;  %s678_s1 = int_to_ptr.hbm [resolvable:$true] %s677_s1 }
  0x38   : > { %s649_s21 = sshll.u32 %s15637_s2, 4  ;;  %s15638_s6 = smov [#allocation25]   ;;  %s650_s21 = int_to_ptr.vmem [resolvable:$true] %s649_s21 }
  0x39   : > { %15125 = dma.hbm_to_vmem [thread:$0]  (!%p15774_p5), %s648_s26, 64, %s650_s21, [#allocation21]  }
  0x3a   : > { %s679_s20 = sshll.u32 %s15638_s6, 4  ;;  %700 = sbr.rel (%p15763_p3) target bundleno = 3626 (0xe2a), region = 100  ;;  %s680_s20 = int_to_ptr.vmem [resolvable:$true] %s679_s20 }
  0x3b   : > { %15131 = dma.hbm_to_vmem [thread:$0]  (!%p15774_p5), %s678_s1, 16, %s680_s20, [#allocation24]  }
  0x3f   : > { %15589 = dma.done.wait (%p15132_p2), [#allocation7], 24576  }
  0x40   : > { %15591 = vsyncadd (%p15132_p2), [#allocation7], 4294942720 }
  0x41   : > { %15593 = dma.done.wait (%p15132_p2), [#allocation9], 18432  }
  0x42   : > { %15595 = vsyncadd (%p15132_p2), [#allocation9], 4294948864 }
  0x43   : > { %15597 = dma.done.wait (%p15132_p2), [#allocation12], 128  }
  0x44   : > { %15599 = vsyncadd (%p15132_p2), [#allocation12], 4294967168 }
  0x45   : > { %15601 = dma.done.wait (%p15132_p2), [#allocation15], 96  }
  0x46   : > { %15603 = vsyncadd (%p15132_p2), [#allocation15], 4294967200 }
  0x47   : > { %15605 = dma.done.wait (%p15132_p2), [#allocation18], 608  }
  0x48   : > { %15607 = vsyncadd (%p15132_p2), [#allocation18], 4294966688 }
  0x49   : > { %15609 = dma.done.wait (%p15132_p2), [#allocation21], 192  }
  0x4a   : > { %15611 = vsyncadd (%p15132_p2), [#allocation21], 4294967104 }
  0x4b   : > { %15613 = dma.done.wait (%p15132_p2), [#allocation24], 32  }
  0x4c   : > { %15615 = vsyncadd (%p15132_p2), [#allocation24], 4294967264  ;;  %p818_p6 = scmp.lt.s32.totalorder %s15758_s25, 1  ;;  %s21105_s29 = sld [smem:[#allocation74_spill]]  ;;  %vm1015_vm0 = vsmask.f32 7424 }
  0x4d   : > { %s15639_s28 = smov 64   ;;  %s21108_s23 = sld [smem:[#allocation75_spill]]  ;;  %vm1212_vm1 = vcmask 523264   ;;  %vm1263_vm2 = vcmask 1046528   ;;  %vm4938_vm3 = vcmask 1043456   ;;  %vm4922_vm4 = vcmask 588800  }
  0x4e   : > { %s21243_s25 = smov (!%p818_p6, %s15758_s25), 1  ;;  %vm5078_vm5 = vcmask 1040384   ;;  %s21238_s26 = sld [smem:[#allocation76_spill]]  ;;  %vm7037_vm7 = vcmask 1041408   ;;  %vm7027_vm8 = vcmask 293888   ;;  %vm7096_vm9 = vcmask 1045504  }
  0x4f   : > { %s15039_s3 = smul.u32 320, %s21243_s25  ;;  %vm8881_vm10 = vcmask 146432   ;;  %vm9804_vm11 = vcmask 1044480   ;;  %vm9800_vm12 = vcmask 72704   ;;  %vm9826_vm13 = vcmask 1042432   ;;  %s15642_s20 = smov 108  }
  0x50   : > { %vm10218_vm14 = vcmask 39936   ;;  %s15643_s8 = smov 88   ;;  %s21240_s0 = sld [smem:[#allocation81_spill]]  ;;  %vm10354_vm15 = vcmask 162816  }
  0x52   : > { %s15887_s22 = scalar_lea.vmem %s21105_s29, %s15039_s3  ;;  %s10588_s3 = sshll.u32 %s21243_s25, 3 }
  0x53   : > { %v844_v0 = vld [vmem:[%s15887_s22 + $0x80] sm:$0xff]  ;;  %v845_v1 = vld [vmem:[%s15887_s22 + $0x88] sm:$0xff]  ;;  %v834_v55 = vld [vmem:[%s15887_s22 + $0x30] sm:$0xff]  ;;  %s21239_s29 = sld [smem:[#allocation82_spill]] }
  0x54   : > { %v848_v2 = vld [vmem:[%s15887_s22 + $0xa0] sm:$0xff]  ;;  %v849_v3 = vld [vmem:[%s15887_s22 + $0xa8] sm:$0xff]  ;;  %v15895_v6 = vpack.c.bf16 %v845_v1, %v844_v0  ;;  %v835_v56 = vld [vmem:[%s15887_s22 + $0x38] sm:$0xff] }
  0x55   : > { %v852_v4 = vld [vmem:[%s15887_s22 + $0xc0] sm:$0xff]  ;;  %v853_v5 = vld [vmem:[%s15887_s22 + $0xc8] sm:$0xff]  ;;  %v15899_v9 = vpack.c.bf16 %v849_v3, %v848_v2  ;;  %v838_v57 = vld [vmem:[%s15887_s22 + $0x50] sm:$0xff] }
  0x56   : > { %v856_v7 = vld [vmem:[%s15887_s22 + $0xe0] sm:$0xff]  ;;  %v857_v8 = vld [vmem:[%s15887_s22 + $0xe8] sm:$0xff]  ;;  %v15901_v10 = vpack.c.bf16 %v853_v5, %v852_v4  ;;  %v940_v13 = vunpack.c.l.b16 %v15895_v6  ;;  %v839_v62 = vld [vmem:[%s15887_s22 + $0x58] sm:$0xff] }
  0x57   : > { %v832_v11 = vld [vmem:[%s15887_s22 + $0x20] sm:$0xff]  ;;  %v15904_v12 = vpack.c.bf16 %v857_v8, %v856_v7  ;;  %v833_v14 = vld [vmem:[%s15887_s22 + $0x28] sm:$0xff]  ;;  %v944_v17 = vunpack.c.l.b16 %v15899_v9  ;;  %v842_v63 = vld [vmem:[%s15887_s22 + $0x70] sm:$0xff] }
  0x58   : > { %v836_v15 = vld [vmem:[%s15887_s22 + $0x40] sm:$0xff]  ;;  %v837_v16 = vld [vmem:[%s15887_s22 + $0x48] sm:$0xff]  ;;  %v948_v18 = vunpack.c.l.b16 %v15901_v10  ;;  %v866_v21 = vpack.c.bf16 %v833_v14, %v832_v11  ;;  %v843_v0 = vld [vmem:[%s15887_s22 + $0x78] sm:$0xff]  ;;  %v15961_v14 = vpack.c.bf16 %v835_v56, %v834_v55 }
  0x59   : > { %v840_v19 = vld [vmem:[%s15887_s22 + $0x60] sm:$0xff]  ;;  %v841_v20 = vld [vmem:[%s15887_s22 + $0x68] sm:$0xff]  ;;  %v868_v22 = vpack.c.bf16 %v837_v16, %v836_v15  ;;  %v952_v24 = vunpack.c.l.b16 %v15904_v12  ;;  %v15919_v29 = vpack.c.b16 %v944_v17, %v940_v13  ;;  %v884_v5 = vld [vmem:[%s15887_s22 + $0x10] sm:$0xfe] }
  0x5a   : > { %v882_v23 = vld [vmem:[%s15887_s22] sm:$0xfe]  ;;  %v870_v25 = vpack.c.bf16 %v841_v20, %v840_v19  ;;  %v883_v26 = vld [vmem:[%s15887_s22 + $0x8] sm:$0xfe]  ;;  %v15921_v31 = vunpack.c.l.b16 %v866_v21  ;;  %v886_v33 = vld [vmem:[%s15887_s22 + $0x120] sm:$0x1]  ;;  %v15933_v42 = vunpack.c.h.b16 %v866_v21 }
  0x5b   : > { %v860_v27 = vld [vmem:[%s15887_s22 + $0x100] sm:$0xff]  ;;  %v861_v28 = vld [vmem:[%s15887_s22 + $0x108] sm:$0xff]  ;;  %21106 = vst [vmem:[#allocation34_spill] sm:$0xff] %v15919_v29  ;;  %v890_v30 = vpack.c.bf16 %v883_v26, %v882_v23  ;;  %v932_v32 = vunpack.c.l.b16 %v868_v22  ;;  %v15925_v35 = vpack.c.b16 %v952_v24, %v948_v18  ;;  %v1068_v39 = vshll.u32 %v15919_v29, 16  ;;  %v885_v7 = vld [vmem:[%s15887_s22 + $0x18] sm:$0xfe] }
  0x5c   : > { %v887_v34 = vld [vmem:[%s15887_s22 + $0x128] sm:$0x1]  ;;  %v936_v36 = vunpack.c.l.b16 %v870_v25  ;;  %v15927_v37 = vpack.c.bf16 %v861_v28, %v860_v27  ;;  %v1096_v40 = vshrl.u32 %v15919_v29, 16  ;;  %v933_v50 = vunpack.c.h.b16 %v868_v22  ;;  %v10703_v19 = vld [vmem:[%s21108_s23 + $0xe0] sm:$0xf] }
  0x5d   : > { %v15929_v38 = vpack.c.bf16 %v887_v34, %v886_v33  ;;  %v999_v41 = vunpack.c.l.b16 %v890_v30  ;;  %v1100_v43 = vshll.u32 %v15925_v35, 16  ;;  %v1070_v47 = vrot.slane %v1068_v39, 1  ;;  %v14188_v20 = vld [vmem:[%s21108_s23 + $0xec] sm:$0xf0]  ;;  %v10831_v24 = vld [vmem:[%s21108_s23 + $0x1e0] sm:$0xf] }
  0x5e   : > { %v15936_v44 = vpack.c.b16 %v936_v36, %v932_v32  ;;  %v15939_v45 = vunpack.c.l.b16 %v15927_v37  ;;  %v1128_v49 = vshrl.u32 %v15925_v35, 16  ;;  %v937_v61 = vunpack.c.h.b16 %v870_v25  ;;  %v14220_v25 = vld [vmem:[%s21108_s23 + $0x1ec] sm:$0xf0]  ;;  %v10959_v26 = vld [vmem:[%s21108_s23 + $0x2e0] sm:$0xf] }
  0x5f   : > { %v1003_v46 = vunpack.c.l.b16 %v15929_v38  ;;  %v1007_v48 = vpack.c.b16 %v15921_v31, %v999_v41  ;;  %v1102_v51 = vrot.slane %v1100_v43, 1  ;;  %v1098_v58 = vor.u32 %v1096_v40, %v1070_v47  ;;  %v14252_v33 = vld [vmem:[%s21108_s23 + $0x2ec] sm:$0xf0] }
  0x60   : > { %21107 = vst [vmem:[#allocation35_spill] sm:$0xff] %v15936_v44  ;;  %v1024_v52 = vshll.u32 %v15936_v44, 16  ;;  %v1064_v54 = vshrl.u32 %v15936_v44, 16  ;;  %v1000_v4 = vunpack.c.h.b16 %v890_v30  ;;  %v15959_v13 = vpack.c.b16 %v937_v61, %v933_v50  ;;  %v14184_v41 = vld [vmem:[%s21108_s23 + $0xcc] sm:$0xf0] }
  0x61   : > { %v15946_v53 = vpack.c.b16 %v1003_v46, %v15939_v45  ;;  %v1017_v59 = vshrl.u32 %v1007_v48, 16  ;;  %v1019_v60 = vshll.u32 %v1007_v48, 16  ;;  %v1130_v2 = vor.u32 %v1128_v49, %v1102_v51  ;;  %v10815_v49 = vld [vmem:[%s21108_s23 + $0x1c0] sm:$0xf]  ;;  %v14216_v50 = vld [vmem:[%s21108_s23 + $0x1cc] sm:$0xf0] }
  0x62   : > { %v1026_v1 = vrot.slane %v1024_v52, 1  ;;  %v1103_v8 = vsel %vm1015_vm0, %v1098_v58, %v1102_v51  ;;  %v1008_v17 = vpack.c.b16 %v15933_v42, %v1000_v4  ;;  %v15967_v18 = vpack.c.bf16 %v839_v62, %v838_v57  ;;  %v14248_v56 = vld [vmem:[%s21108_s23 + $0x2cc] sm:$0xf0]  ;;  %v10671_v61 = vld [vmem:[%s21108_s23 + $0xa0] sm:$0xf] }
  0x63   : > { %v1132_v3 = vshll.u32 %v15946_v53, 16  ;;  %v1021_v11 = vrot.slane %v1019_v60, 1  ;;  %1188 = vrot.lane.b32.xlu1 %v1103_v8, %s15639_s28  ;;  %v15975_v22 = vpack.c.bf16 %v843_v0, %v842_v63  ;;  %v15977_v23 = vpack.c.bf16 %v885_v7, %v884_v5  ;;  %v846_v4 = vld [vmem:[%s15887_s22 + $0x90] sm:$0xff]  ;;  %v847_v5 = vld [vmem:[%s15887_s22 + $0x98] sm:$0xff] }
  0x64   : > { %v1066_v16 = vor.u32 %v1064_v54, %v1026_v1  ;;  %v941_v27 = vunpack.c.h.b16 %v15895_v6  ;;  %v1029_v28 = vshrl.u32 %v1008_v17, 16  ;;  %v1031_v30 = vshll.u32 %v1008_v17, 16  ;;  %v10687_v6 = vld [vmem:[%s21108_s23 + $0xc0] sm:$0xf] }
  0x65   : > { %v15964_v15 = vrot.slane %v1132_v3, 1  ;;  %v1022_v21 = vor.u32 %v1021_v11, %v1017_v59  ;;  %v1036_v32 = vshll.u32 %v15959_v13, 16  ;;  %v945_v34 = vunpack.c.h.b16 %v15899_v9  ;;  %v14212_v3 = vld [vmem:[%s21108_s23 + $0x1ac] sm:$0xf0]  ;;  %v10927_v17 = vld [vmem:[%s21108_s23 + $0x2a0] sm:$0xf] }
  0x66   : > { %v15998_v40 = vunpack.c.h.b16 %v15961_v14  ;;  %v1071_v9 = vsel %vm1015_vm0, %v1066_v16, %v1070_v47  ;;  %v1033_v43 = vrot.slane %v1031_v30, 1  ;;  %v935_v46 = vunpack.c.h.b16 %v15967_v18  ;;  %v10943_v47 = vld [vmem:[%s21108_s23 + $0x2c0] sm:$0xf] }
  0x67   : > { %v1027_v36 = vsel %vm1015_vm0, %v1022_v21, %v1026_v1  ;;  %v1135_v39 = vsel %vm1015_vm0, %v1130_v2, %v15964_v15  ;;  %v939_v48 = vunpack.c.h.b16 %v15975_v22  ;;  %v1002_v51 = vunpack.c.h.b16 %v15977_v23  ;;  %v14180_v1 = vld [vmem:[%s21108_s23 + $0xac] sm:$0xf0]  ;;  %v10799_v2 = vld [vmem:[%s21108_s23 + $0x1a0] sm:$0xf] }
  0x68   : > { %1172 = vrot.lane.b32.xlu0 %v1027_v36, %s15639_s28  ;;  %v10704_v52 = vor.u32 %v14188_v20, %v10703_v19  ;;  %v10832_v54 = vor.u32 %v14220_v25, %v10831_v24  ;;  %v10960_v55 = vor.u32 %v14252_v33, %v10959_v26  ;;  %v1034_v57 = vor.u32 %v1033_v43, %v1029_v28  ;;  %v850_v19 = vld [vmem:[%s15887_s22 + $0xb0] sm:$0xff]  ;;  %v851_v20 = vld [vmem:[%s15887_s22 + $0xb8] sm:$0xff] }
  0x69   : > { %v1038_v58 = vrot.slane %v1036_v32, 1  ;;  %v16023_v59 = vpack.c.b16 %v939_v48, %v935_v46  ;;  %v16025_v60 = vpack.c.b16 %v945_v34, %v941_v27  ;;  %v1010_v62 = vpack.c.b16 %v15998_v40, %v1002_v51 }
  0x6a   : > { %3374 = vmatpush.bf16.msra.mxu0 %v10704_v52  ;;  %3407 = vmatpush.bf16.msra.mxu1 %v10832_v54  ;;  %v10688_v63 = vor.u32 %v14184_v41, %v10687_v6  ;;  %v10816_v0 = vor.u32 %v14216_v50, %v10815_v49  ;;  %v934_v7 = vunpack.c.l.b16 %v15967_v18  ;;  %v938_v8 = vunpack.c.l.b16 %v15975_v22  ;;  %v14244_v18 = vld [vmem:[%s21108_s23 + $0x2ac] sm:$0xf0] }
  0x6b   : > { %1196 = vrot.lane.b32.xlu1 %v1135_v39, %s15639_s28  ;;  %v1060_v11 = vshll.u32 %v16023_v59, 16  ;;  %3440 = vmatpush.bf16.msra.mxu2 %v10960_v55  ;;  %v10944_v16 = vor.u32 %v14248_v56, %v10943_v47  ;;  %v1053_v21 = vshrl.u32 %v1010_v62, 16  ;;  %v1055_v24 = vshll.u32 %v1010_v62, 16  ;;  %v10655_v39 = vld [vmem:[%s21108_s23 + $0x80] sm:$0xf] }
  0x6c   : > { %v1072_v25 = vshrl.u32 %v15959_v13, 16  ;;  %v1076_v26 = vshll.u32 %v16025_v60, 16  ;;  %v1039_v22 = vsel %vm1015_vm0, %v1034_v57, %v1038_v58  ;;  %v10672_v28 = vor.u32 %v14180_v1, %v10671_v61  ;;  %v14176_v6 = vld [vmem:[%s21108_s23 + $0x8c] sm:$0xf0] }
  0x6d   : > { %v1062_v27 = vrot.slane %v1060_v11, 1  ;;  %v10800_v30 = vor.u32 %v14212_v3, %v10799_v2  ;;  %v1057_v32 = vrot.slane %v1055_v24, 1  ;;  %v1160_v33 = vshrl.u32 %v15946_v53, 16  ;;  %v14240_v52 = vld [vmem:[%s21108_s23 + $0x28c] sm:$0xf0] }
  0x6e   : > { %3375 = vmatpush.bf16.msra.mxu0 %v10688_v63  ;;  %3408 = vmatpush.bf16.msra.mxu1 %v10816_v0  ;;  %v949_v34 = vunpack.c.h.b16 %v15901_v10  ;;  %v953_v36 = vunpack.c.h.b16 %v15904_v12  ;;  %v10928_v41 = vor.u32 %v14244_v18, %v10927_v17  ;;  %v1104_v43 = vshrl.u32 %v16025_v60, 16  ;;  %v10783_v10 = vld [vmem:[%s21108_s23 + $0x180] sm:$0xf]  ;;  %v14208_v12 = vld [vmem:[%s21108_s23 + $0x18c] sm:$0xf0] }
  0x6f   : > { %3441 = vmatpush.bf16.msra.mxu2 %v10944_v16  ;;  %v873_v46 = vpack.c.bf16 %v847_v5, %v846_v4  ;;  %v875_v53 = vpack.c.bf16 %v851_v20, %v850_v19  ;;  %v1058_v48 = vor.u32 %v1057_v32, %v1053_v21  ;;  %v1078_v49 = vrot.slane %v1076_v26, 1  ;;  %v14172_v57 = vld [vmem:[%s21108_s23 + $0x6c] sm:$0xf0]  ;;  %v10895_v5 = vld [vmem:[%s21108_s23 + $0x260] sm:$0xf] }
  0x70   : > { %1180 = vrot.lane.b32.xlu0 %v1071_v9, %s15639_s28  ;;  %v1162_v50 = vor.u32 %v1160_v33, %v15964_v15  ;;  %v16075_v51 = vpack.c.b16 %v953_v36, %v949_v34  ;;  %v10911_v9 = vld [vmem:[%s21108_s23 + $0x280] sm:$0xf]  ;;  %v16083_v54 = vpack.c.b16 %v938_v8, %v934_v7  ;;  %v1074_v55 = vor.u32 %v1072_v25, %v1038_v58  ;;  %v14204_v1 = vld [vmem:[%s21108_s23 + $0x16c] sm:$0xf0] }
  0x71   : > { %v943_v47 = vunpack.c.h.b16 %v873_v46  ;;  %v1088_v56 = vshrl.u32 %v16023_v59, 16  ;;  %v10639_v15 = vld [vmem:[%s21108_s23 + $0x60] sm:$0xf]  ;;  %v1106_v61 = vor.u32 %v1104_v43, %v1078_v49  ;;  %v942_v63 = vunpack.c.l.b16 %v873_v46  ;;  %v14236_v7 = vld [vmem:[%s21108_s23 + $0x26c] sm:$0xf0]  ;;  %v855_v43 = vld [vmem:[%s15887_s22 + $0xd8] sm:$0xff] }
  0x72   : > { %3376 = vmatpush.bf16.msra.mxu0 %v10672_v28  ;;  %3409 = vmatpush.bf16.msra.mxu1 %v10800_v30  ;;  %v1108_v62 = vshll.u32 %v16075_v51, 16  ;;  %v947_v0 = vunpack.c.h.b16 %v875_v53  ;;  %v10767_v58 = vld [vmem:[%s21108_s23 + $0x160] sm:$0xf]  ;;  %v946_v2 = vunpack.c.l.b16 %v875_v53  ;;  %v10656_v3 = vor.u32 %v14176_v6, %v10655_v39  ;;  %v16123_v21 = vld [vmem:[%s21108_s23 + $0x4c] sm:$0xf0]  ;;  %v859_v53 = vld [vmem:[%s15887_s22 + $0xf8] sm:$0xff] }
  0x73   : > { %1174 = vrot.lane.b32.xlu1 %v1039_v22, %s15639_s28  ;;  %3442 = vmatpush.bf16.msra.mxu2 %v10928_v41  ;;  %v10784_v4 = vor.u32 %v14208_v12, %v10783_v10  ;;  %v16107_v8 = vunpack.c.l.b16 %v15961_v14  ;;  %v16112_v11 = vld [vmem:[%s21108_s23 + $0x40] sm:$0xf]  ;;  %v1063_v16 = vsel %vm1015_vm0, %v1058_v48, %v1062_v27  ;;  %v10912_v20 = vor.u32 %v14240_v52, %v10911_v9  ;;  %v14200_v18 = vld [vmem:[%s21108_s23 + $0x14c] sm:$0xf0] }
  0x74   : > { %1204 = vrot.lane.b32.xlu2 %v1162_v50, %s15639_s28  ;;  %v16116_v17 = vrot.slane %v1108_v62, 1  ;;  %v16118_v19 = vpack.c.b16 %v947_v0, %v943_v47  ;;  %v16128_v14 = vld [vmem:[%s21108_s23 + $0x140] sm:$0xf]  ;;  %v1079_v24 = vsel %vm1015_vm0, %v1074_v55, %v1078_v49  ;;  %v1090_v25 = vor.u32 %v1088_v56, %v1062_v27  ;;  %v16143_v28 = vld [vmem:[%s21108_s23 + $0x24c] sm:$0xf0] }
  0x75   : > { %v1001_v26 = vunpack.c.l.b16 %v15977_v23  ;;  %v16138_v22 = vld [vmem:[%s21108_s23 + $0x240] sm:$0xf]  ;;  %v10640_v23 = vor.u32 %v14172_v57, %v10639_v15  ;;  %v10768_v30 = vor.u32 %v14204_v1, %v10767_v58  ;;  %v1048_v32 = vshll.u32 %v16083_v54, 16  ;;  %v16155_v34 = vld [vmem:[%s21108_s23 + $0x2c] sm:$0xf0] }
  0x76   : > { %v1092_v27 = vshll.u32 %v16118_v19, 16  ;;  %3377 = vmatpush.bf16.msra.mxu0 %v10656_v3  ;;  %3410 = vmatpush.bf16.msra.mxu1 %v10784_v4  ;;  %v16150_v33 = vld [vmem:[%s21108_s23 + $0x20] sm:$0xf]  ;;  %v854_v36 = vld [vmem:[%s15887_s22 + $0xd0] sm:$0xff]  ;;  %v16159_v39 = vpack.c.b16 %v946_v2, %v942_v63  ;;  %v10896_v6 = vor.u32 %v14236_v7, %v10895_v5  ;;  %v16167_v10 = vsel %vm1015_vm0, %v1106_v61, %v16116_v17 }
  0x77   : > { %3443 = vmatpush.bf16.msra.mxu2 %v10912_v20  ;;  %v1009_v41 = vpack.c.b16 %v16107_v8, %v1001_v26  ;;  %v858_v46 = vld [vmem:[%s15887_s22 + $0xf0] sm:$0xff]  ;;  %v10624_v48 = vor.u32 %v16123_v21, %v16112_v11  ;;  %v16174_v49 = vld [vmem:[%s21108_s23 + $0x120] sm:$0xf]  ;;  %v16182_v9 = vunpack.c.h.b16 %v15927_v37  ;;  %v10752_v47 = vor.u32 %v14200_v18, %v16128_v14  ;;  %v829_v20 = vld [vmem:[%s15887_s22 + $0x8] sm:$0xff] }
  0x78   : > { %1178 = vrot.lane.b32.xlu0 %v1063_v16, %s15639_s28  ;;  %v1094_v12 = vrot.slane %v1092_v27, 1  ;;  %v16179_v50 = vld [vmem:[%s21108_s23 + $0x12c] sm:$0xf0]  ;;  %v1004_v56 = vunpack.c.h.b16 %v15929_v38  ;;  %v1050_v15 = vrot.slane %v1048_v32, 1  ;;  %v10880_v57 = vor.u32 %v16143_v28, %v16138_v22  ;;  %v10863_v61 = vld [vmem:[%s21108_s23 + $0x220] sm:$0xf] }
  0x79   : > { %v1041_v52 = vshrl.u32 %v1009_v41, 16  ;;  %v1043_v55 = vshll.u32 %v1009_v41, 16  ;;  %v14228_v37 = vld [vmem:[%s21108_s23 + $0x22c] sm:$0xf0]  ;;  %v877_v62 = vpack.c.bf16 %v855_v43, %v854_v36  ;;  %v879_v63 = vpack.c.bf16 %v859_v53, %v858_v46  ;;  %v10591_v2 = vld [vmem:[%s21108_s23] sm:$0xf] }
  0x7a   : > { %3378 = vmatpush.bf16.msra.mxu0 %v10640_v23  ;;  %3411 = vmatpush.bf16.msra.mxu1 %v10768_v30  ;;  %v10608_v0 = vor.u32 %v16155_v34, %v16150_v33  ;;  %v10736_v58 = vor.u32 %v16179_v50, %v16174_v49  ;;  %v16200_v1 = vpack.c.b16 %v1004_v56, %v16182_v9  ;;  %v14160_v3 = vld [vmem:[%s21108_s23 + $0xc] sm:$0xf0]  ;;  %v828_v4 = vld [vmem:[%s15887_s22] sm:$0xff]  ;;  %v1120_v16 = vshrl.u32 %v16118_v19, 16  ;;  %v831_v14 = vld [vmem:[%s15887_s22 + $0x18] sm:$0xff] }
  0x7b   : > { %1182 = vrot.lane.b32.xlu1 %v1079_v24, %s15639_s28  ;;  %3444 = vmatpush.bf16.msra.mxu2 %v10896_v6  ;;  %v1045_v38 = vrot.slane %v1043_v55, 1  ;;  %v1095_v5 = vsel %vm1015_vm0, %v1090_v25, %v1094_v12  ;;  %v951_v7 = vunpack.c.h.b16 %v877_v62  ;;  %v955_v11 = vunpack.c.h.b16 %v879_v63  ;;  %v830_v21 = vld [vmem:[%s15887_s22 + $0x10] sm:$0xff]  ;;  %v10719_v28 = vld [vmem:[%s21108_s23 + $0x100] sm:$0xf]  ;;  %v863_v43 = vld [vmem:[%s15887_s22 + $0x118] sm:$0xff] }
  0x7c   : > { %v10864_v26 = vor.u32 %v14228_v37, %v10863_v61  ;;  %v950_v18 = vunpack.c.l.b16 %v877_v62  ;;  %v954_v22 = vunpack.c.l.b16 %v879_v63  ;;  %v14192_v25 = vld [vmem:[%s21108_s23 + $0x10c] sm:$0xf0]  ;;  %v1136_v27 = vshrl.u32 %v16075_v51, 16  ;;  %v10847_v49 = vld [vmem:[%s21108_s23 + $0x200] sm:$0xf] }
  0x7d   : > { %v1046_v24 = vor.u32 %v1045_v38, %v1041_v52  ;;  %v16221_v23 = vpack.c.b16 %v955_v11, %v951_v7  ;;  %v10592_v30 = vor.u32 %v14160_v3, %v10591_v2  ;;  %v1080_v32 = vshrl.u32 %v16083_v54, 16  ;;  %v862_v41 = vld [vmem:[%s15887_s22 + $0x110] sm:$0xff] }
  0x7e   : > { %3379 = vmatpush.bf16.msra.mxu0 %v10624_v48  ;;  %3412 = vmatpush.bf16.msra.mxu1 %v10752_v47  ;;  %v1140_v34 = vshll.u32 %v16200_v1, 16  ;;  %v864_v36 = vpack.c.bf16 %v829_v20, %v828_v4  ;;  %v16227_v6 = vpack.c.bf16 %v831_v14, %v830_v21  ;;  %v1122_v46 = vor.u32 %v1120_v16, %v1094_v12  ;;  %v14224_v50 = vld [vmem:[%s21108_s23 + $0x20c] sm:$0xf0]  ;;  %v889_v12 = vld [vmem:[%s15887_s22 + $0x138] sm:$0x1] }
  0x7f   : > { %v1051_v33 = vsel %vm1015_vm0, %v1046_v24, %v1050_v15  ;;  %3445 = vmatpush.bf16.msra.mxu2 %v10880_v57  ;;  %v1124_v53 = vshll.u32 %v16221_v23, 16  ;;  %v10720_v48 = vor.u32 %v14192_v25, %v10719_v28  ;;  %v1084_v52 = vshll.u32 %v16159_v39, 16  ;;  %v888_v61 = vld [vmem:[%s15887_s22 + $0x130] sm:$0x1]  ;;  %v11087_v25 = vld [vmem:[%s21108_s23 + $0x3e0] sm:$0xf] }
  0x80   : > { %1186 = vrot.lane.b32.xlu0 %v1095_v5, %s15639_s28  ;;  %1176 = vrot.lane.b32.xlu2 %v1051_v33, %s15639_s28  ;;  %v16240_v55 = vpack.c.b16 %v954_v22, %v950_v18  ;;  %v924_v47 = vunpack.c.l.b16 %v864_v36  ;;  %v925_v56 = vunpack.c.h.b16 %v864_v36  ;;  %v1082_v57 = vor.u32 %v1080_v32, %v1050_v15  ;;  %v11071_v36 = vld [vmem:[%s21108_s23 + $0x3c0] sm:$0xf] }
  0x81   : > { %v1126_v37 = vrot.slane %v1124_v53, 1  ;;  %v926_v62 = vunpack.c.l.b16 %v16227_v6  ;;  %v1086_v63 = vrot.slane %v1084_v52, 1  ;;  %v881_v38 = vpack.c.bf16 %v863_v43, %v862_v41  ;;  %v14280_v41 = vld [vmem:[%s21108_s23 + $0x3cc] sm:$0xf0]  ;;  %v11055_v52 = vld [vmem:[%s21108_s23 + $0x3a0] sm:$0xf] }
  0x82   : > { %3380 = vmatpush.bf16.msra.mxu0 %v10608_v0  ;;  %3413 = vmatpush.bf16.msra.mxu1 %v10736_v58  ;;  %v1138_v2 = vor.u32 %v1136_v27, %v16116_v17  ;;  %v1142_v3 = vrot.slane %v1140_v34, 1  ;;  %v10848_v4 = vor.u32 %v14224_v50, %v10847_v49  ;;  %v16250_v15 = vpack.c.b16 %v15921_v31, %v924_v47  ;;  %v14284_v27 = vld [vmem:[%s21108_s23 + $0x3ec] sm:$0xf0] }
  0x83   : > { %1190 = vrot.lane.b32.xlu1 %v16167_v10, %s15639_s28  ;;  %3446 = vmatpush.bf16.msra.mxu2 %v10864_v26  ;;  %v1127_v5 = vsel %vm1015_vm0, %v1122_v46, %v1126_v37  ;;  %v893_v0 = vpack.c.bf16 %v889_v12, %v888_v61  ;;  %v16252_v58 = vunpack.c.h.b16 %v881_v38  ;;  %v16255_v7 = vpack.c.b16 %v15933_v42, %v925_v56  ;;  %v14276_v47 = vld [vmem:[%s21108_s23 + $0x3ac] sm:$0xf0] }
  0x84   : > { %21109 = vst [vmem:[#allocation36_spill] sm:$0xff] %v16250_v15  ;;  %v1087_v11 = vsel %vm1015_vm0, %v1082_v57, %v1086_v63  ;;  %v1112_v10 = vshrl.u32 %v16159_v39, 16  ;;  %v1116_v16 = vshll.u32 %v16240_v55, 16  ;;  %v16261_v17 = vpack.c.b16 %v16107_v8, %v926_v62 }
  0x85   : > { %v1006_v20 = vunpack.c.h.b16 %v893_v0  ;;  %v1152_v21 = vshrl.u32 %v16221_v23, 16  ;;  %v1143_v14 = vsel %vm1015_vm0, %v1138_v2, %v1142_v3  ;;  %v1005_v32 = vunpack.c.l.b16 %v893_v0  ;;  %v11215_v0 = vld [vmem:[%s21108_s23 + $0x4e0] sm:$0xf] }
  0x86   : > { %3381 = vmatpush.bf16.msra.mxu0 %v10592_v30  ;;  %3414 = vmatpush.bf16.msra.mxu1 %v10720_v48  ;;  %v1114_v26 = vor.u32 %v1112_v10, %v1086_v63  ;;  %v1118_v18 = vrot.slane %v1116_v16, 1  ;;  %v16277_v30 = vunpack.c.l.b16 %v881_v38  ;;  %v1163_v33 = vshrl.u32 %v16200_v1, 16  ;;  %v11039_v63 = vld [vmem:[%s21108_s23 + $0x380] sm:$0xf]  ;;  %v14272_v38 = vld [vmem:[%s21108_s23 + $0x38c] sm:$0xf0] }
  0x87   : > { %3447 = vmatpush.bf16.msra.mxu2 %v10848_v4  ;;  %v1014_v24 = vpack.c.b16 %v1006_v20, %v16252_v58  ;;  %v1154_v22 = vor.u32 %v1152_v21, %v1126_v37  ;;  %v11088_v34 = vor.u32 %v14284_v27, %v11087_v25  ;;  %v1144_v48 = vshrl.u32 %v16240_v55, 16  ;;  %v11023_v4 = vld [vmem:[%s21108_s23 + $0x360] sm:$0xf]  ;;  %v14316_v10 = vld [vmem:[%s21108_s23 + $0x4ec] sm:$0xf0] }
  0x88   : > { %1194 = vrot.lane.b32.xlu0 %v1127_v5, %s15639_s28  ;;  %1184 = vrot.lane.b32.xlu2 %v1087_v11, %s15639_s28  ;;  %v1013_v46 = vpack.c.b16 %v1005_v32, %v16277_v30  ;;  %v1119_v53 = vsel %vm1015_vm0, %v1114_v26, %v1118_v18  ;;  %v11072_v49 = vor.u32 %v14280_v41, %v11071_v36  ;;  %v14268_v5 = vld [vmem:[%s21108_s23 + $0x36c] sm:$0xf0]  ;;  %v11343_v16 = vld [vmem:[%s21108_s23 + $0x5e0] sm:$0xf] }
  0x89   : > { %3382 = vmatmul.bf16.vlgmr.msra.gmra.mxu0 %v16250_v15  ;;  %3415 = vmatmul.bf16.vlgmr.msra.gmra.mxu1 %v16255_v7  ;;  %v1156_v28 = vshll.u32 %v1014_v24, 16  ;;  %v1165_v56 = vor.u32 %v1163_v33, %v1142_v3  ;;  %v1169_v57 = vshrl.u32 %v1014_v24, 16  ;;  %v1146_v61 = vor.u32 %v1144_v48, %v1118_v18  ;;  %v14348_v20 = vld [vmem:[%s21108_s23 + $0x5ec] sm:$0xf0]  ;;  %v11471_v24 = vld [vmem:[%s21108_s23 + $0x6e0] sm:$0xf] }
  0x8a   : > { %3448 = vmatmul.bf16.vlgmr.msra.gmra.mxu2 %v16261_v17  ;;  %3473 = vmatpush.bf16.msra.mxu3 %v11088_v34  ;;  %v1148_v50 = vshll.u32 %v1013_v46, 16  ;;  %v11056_v37 = vor.u32 %v14276_v47, %v11055_v52  ;;  %v11040_v3 = vor.u32 %v14272_v38, %v11039_v63  ;;  %v11024_v11 = vor.u32 %v14268_v5, %v11023_v4  ;;  %v14380_v26 = vld [vmem:[%s21108_s23 + $0x6ec] sm:$0xf0]  ;;  %v11199_v27 = vld [vmem:[%s21108_s23 + $0x4c0] sm:$0xf] }
  0x8b   : > { %1198 = vrot.lane.b32.xlu1 %v1143_v14, %s15639_s28  ;;  %v1158_v43 = vrot.slane %v1156_v28, 1  ;;  %v11216_v21 = vor.u32 %v14316_v10, %v11215_v0  ;;  %v11344_v14 = vor.u32 %v14348_v20, %v11343_v16  ;;  %v1166_v18 = vshrl.u32 %v1013_v46, 16  ;;  %v11007_v28 = vld [vmem:[%s21108_s23 + $0x340] sm:$0xf]  ;;  %v14264_v25 = vld [vmem:[%s21108_s23 + $0x34c] sm:$0xf0] }
  0x8c   : > { %v1150_v12 = vrot.slane %v1148_v50, 1  ;;  %v11008_v33 = vor.u32 %v14264_v25, %v11007_v28  ;;  %v14312_v34 = vld [vmem:[%s21108_s23 + $0x4cc] sm:$0xf0]  ;;  %v11327_v36 = vld [vmem:[%s21108_s23 + $0x5c0] sm:$0xf] }
  0x8d   : > { %v1159_v1 = vsel %vm1015_vm0, %v1154_v22, %v1158_v43  ;;  %v1171_v62 = vor.u32 %v1169_v57, %v1158_v43  ;;  %v11472_v22 = vor.u32 %v14380_v26, %v11471_v24  ;;  %3506 = vmatpush.bf16.msrb.mxu0 %v11216_v21  ;;  %v14344_v41 = vld [vmem:[%s21108_s23 + $0x5cc] sm:$0xf0]  ;;  %3539 = vmatpush.bf16.msrb.mxu1 %v11344_v14  ;;  %v11183_v52 = vld [vmem:[%s21108_s23 + $0x4a0] sm:$0xf] }
  0x8e   : > { %3474 = vmatpush.bf16.msra.mxu3 %v11072_v49  ;;  %v1151_v2 = vsel %vm1015_vm0, %v1146_v61, %v1150_v12  ;;  %v1168_v32 = vor.u32 %v1166_v18, %v1150_v12  ;;  %v11200_v43 = vor.u32 %v14312_v34, %v11199_v27  ;;  %v11328_v46 = vor.u32 %v14344_v41, %v11327_v36  ;;  %v14376_v48 = vld [vmem:[%s21108_s23 + $0x6cc] sm:$0xf0]  ;;  %v10991_v49 = vld [vmem:[%s21108_s23 + $0x320] sm:$0xf] }
  0x8f   : > { %3572 = vmatpush.bf16.msrb.mxu2 %v11472_v22  ;;  %v14260_v50 = vld [vmem:[%s21108_s23 + $0x32c] sm:$0xf0]  ;;  %v11439_v61 = vld [vmem:[%s21108_s23 + $0x6a0] sm:$0xf] }
  0x90   : > { %1202 = vrot.lane.b32.xlu0 %v1159_v1, %s15639_s28  ;;  %1192 = vrot.lane.b32.xlu2 %v1119_v53, %s15639_s28  ;;  %v11455_v53 = vld [vmem:[%s21108_s23 + $0x6c0] sm:$0xf]  ;;  %v14308_v47 = vld [vmem:[%s21108_s23 + $0x4ac] sm:$0xf0]  ;;  %v10992_v12 = vor.u32 %v14260_v50, %v10991_v49 }
  0x91   : > { %v11456_v1 = vor.u32 %v14376_v48, %v11455_v53  ;;  %v14340_v57 = vld [vmem:[%s21108_s23 + $0x5ac] sm:$0xf0]  ;;  %3507 = vmatpush.bf16.msrb.mxu0 %v11200_v43  ;;  %3540 = vmatpush.bf16.msrb.mxu1 %v11328_v46  ;;  %v11167_v4 = vld [vmem:[%s21108_s23 + $0x480] sm:$0xf] }
  0x92   : > { %3475 = vmatpush.bf16.msra.mxu3 %v11056_v37  ;;  %v11184_v37 = vor.u32 %v14308_v47, %v11183_v52  ;;  %v14304_v5 = vld [vmem:[%s21108_s23 + $0x48c] sm:$0xf0]  ;;  %v11295_v0 = vld [vmem:[%s21108_s23 + $0x580] sm:$0xf] }
  0x93   : > { %1206 = vrot.lane.b32.xlu1 %v1165_v56, %s15639_s28  ;;  %v11311_v56 = vld [vmem:[%s21108_s23 + $0x5a0] sm:$0xf]  ;;  %3573 = vmatpush.bf16.msrb.mxu2 %v11456_v1  ;;  %v14368_v16 = vld [vmem:[%s21108_s23 + $0x68c] sm:$0xf0]  ;;  %v11168_v21 = vor.u32 %v14304_v5, %v11167_v4 }
  0x94   : > { %v11312_v63 = vor.u32 %v14340_v57, %v11311_v56  ;;  %v11423_v10 = vld [vmem:[%s21108_s23 + $0x680] sm:$0xf]  ;;  %v14300_v18 = vld [vmem:[%s21108_s23 + $0x46c] sm:$0xf0] }
  0x95   : > { %3508 = vmatpush.bf16.msrb.mxu0 %v11184_v37  ;;  %v11424_v24 = vor.u32 %v14368_v16, %v11423_v10  ;;  %v11151_v26 = vld [vmem:[%s21108_s23 + $0x460] sm:$0xf]  ;;  %v14332_v25 = vld [vmem:[%s21108_s23 + $0x56c] sm:$0xf0]  ;;  %v16489_v10 = vpack.c.b16 %v15939_v45, %v15939_v45  ;;  %v16493_v16 = vpack.c.b16 %v16182_v9, %v16182_v9 }
  0x96   : > { %3476 = vmatpush.bf16.msra.mxu3 %v11040_v3  ;;  %v14256_v3 = vld [vmem:[%s21108_s23 + $0x30c] sm:$0xf0]  ;;  %3541 = vmatpush.bf16.msrb.mxu1 %v11312_v63  ;;  %v11279_v22 = vld [vmem:[%s21108_s23 + $0x560] sm:$0xf]  ;;  %v11152_v28 = vor.u32 %v14300_v18, %v11151_v26 }
  0x97   : > { %v11407_v27 = vld [vmem:[%s21108_s23 + $0x660] sm:$0xf]  ;;  %v14296_v41 = vld [vmem:[%s21108_s23 + $0x44c] sm:$0xf0] }
  0x98   : > { %1210 = vrot.lane.b32.xlu0 %v1171_v62, %s15639_s28  ;;  %1200 = vrot.lane.b32.xlu2 %v1151_v2, %s15639_s28  ;;  %v14372_v62 = vld [vmem:[%s21108_s23 + $0x6ac] sm:$0xf0]  ;;  %v10975_v2 = vld [vmem:[%s21108_s23 + $0x300] sm:$0xf] }
  0x99   : > { %3387 = vmatmul.bf16.gmra.mxu0 %v15936_v44  ;;  %3420 = vmatmul.bf16.gmra.mxu1 %v15959_v13  ;;  %v11440_v38 = vor.u32 %v14372_v62, %v11439_v61  ;;  %v10976_v20 = vor.u32 %v14256_v3, %v10975_v2  ;;  %v11135_v36 = vld [vmem:[%s21108_s23 + $0x440] sm:$0xf]  ;;  %v14328_v53 = vld [vmem:[%s21108_s23 + $0x54c] sm:$0xf0] }
  0x9a   : > { %3453 = vmatmul.bf16.gmra.mxu2 %v16083_v54  ;;  %3477 = vmatpush.bf16.msra.mxu3 %v11024_v11  ;;  %v14336_v11 = vld [vmem:[%s21108_s23 + $0x58c] sm:$0xf0]  ;;  %v11263_v43 = vld [vmem:[%s21108_s23 + $0x540] sm:$0xf]  ;;  %v11136_v46 = vor.u32 %v14296_v41, %v11135_v36 }
  0x9b   : > { %3574 = vmatpush.bf16.msrb.mxu2 %v11440_v38  ;;  %v11296_v14 = vor.u32 %v14336_v11, %v11295_v0  ;;  %3509 = vmatpush.bf16.msrb.mxu0 %v11168_v21  ;;  %v11391_v48 = vld [vmem:[%s21108_s23 + $0x640] sm:$0xf]  ;;  %v14360_v49 = vld [vmem:[%s21108_s23 + $0x64c] sm:$0xf0]  ;;  %v11264_v1 = vor.u32 %v14328_v53, %v11263_v43 }
  0x9c   : > { %v11392_v50 = vor.u32 %v14360_v49, %v11391_v48  ;;  %v11119_v52 = vld [vmem:[%s21108_s23 + $0x420] sm:$0xf]  ;;  %v14292_v47 = vld [vmem:[%s21108_s23 + $0x42c] sm:$0xf0] }
  0x9d   : > { %3542 = vmatpush.bf16.msrb.mxu1 %v11296_v14  ;;  %v11247_v56 = vld [vmem:[%s21108_s23 + $0x520] sm:$0xf]  ;;  %v11120_v57 = vor.u32 %v14292_v47, %v11119_v52  ;;  %v14324_v61 = vld [vmem:[%s21108_s23 + $0x52c] sm:$0xf0] }
  0x9e   : > { %3478 = vmatpush.bf16.msra.mxu3 %v11008_v33  ;;  %v11280_v33 = vor.u32 %v14332_v25, %v11279_v22  ;;  %v14356_v37 = vld [vmem:[%s21108_s23 + $0x62c] sm:$0xf0]  ;;  %v11248_v62 = vor.u32 %v14324_v61, %v11247_v56  ;;  %v11103_v38 = vld [vmem:[%s21108_s23 + $0x400] sm:$0xf] }
  0x9f   : > { %3575 = vmatpush.bf16.msrb.mxu2 %v11424_v24  ;;  %3510 = vmatpush.bf16.msrb.mxu0 %v11152_v28  ;;  %v14288_v2 = vld [vmem:[%s21108_s23 + $0x40c] sm:$0xf0]  ;;  %v11231_v3 = vld [vmem:[%s21108_s23 + $0x500] sm:$0xf]  ;;  %v927_v24 = vunpack.c.h.b16 %v16227_v6 }
  0xa0   : > { %1208 = vrot.lane.b32.xlu2 %v1168_v32, %s15639_s28  ;;  %v14364_v32 = vld [vmem:[%s21108_s23 + $0x66c] sm:$0xf0]  ;;  %v11104_v4 = vor.u32 %v14288_v2, %v11103_v38  ;;  %v11359_v0 = vld [vmem:[%s21108_s23 + $0x600] sm:$0xf] }
  0xa1   : > { %v11408_v34 = vor.u32 %v14364_v32, %v11407_v27  ;;  %3543 = vmatpush.bf16.msrb.mxu1 %v11280_v33  ;;  %v14320_v5 = vld [vmem:[%s21108_s23 + $0x50c] sm:$0xf0]  ;;  %v963_v18 = vpack.c.b16 %v15998_v40, %v927_v24  ;;  %v11567_v47 = vld [vmem:[%s21108_s23 + $0x7a0] sm:$0xf] }
  0xa2   : > { %3479 = vmatpush.bf16.msra.mxu3 %v10992_v12  ;;  %v11375_v12 = vld [vmem:[%s21108_s23 + $0x620] sm:$0xf]  ;;  %v14352_v11 = vld [vmem:[%s21108_s23 + $0x60c] sm:$0xf0]  ;;  %v11232_v21 = vor.u32 %v14320_v5, %v11231_v3 }
  0xa3   : > { %3576 = vmatpush.bf16.msrb.mxu2 %v11408_v34  ;;  %3511 = vmatpush.bf16.msrb.mxu0 %v11136_v46  ;;  %v11376_v63 = vor.u32 %v14356_v37, %v11375_v12  ;;  %v11360_v14 = vor.u32 %v14352_v11, %v11359_v0  ;;  %v11599_v46 = vld [vmem:[%s21108_s23 + $0x7e0] sm:$0xf]  ;;  %v14412_v53 = vld [vmem:[%s21108_s23 + $0x7ec] sm:$0xf0] }
  0xa4   : > { %v11600_v49 = vor.u32 %v14412_v53, %v11599_v46  ;;  %v14404_v56 = vld [vmem:[%s21108_s23 + $0x7ac] sm:$0xf0]  ;;  %v11551_v12 = vld [vmem:[%s21108_s23 + $0x780] sm:$0xf] }
  0xa5   : > { %3544 = vmatpush.bf16.msrb.mxu1 %v11264_v1  ;;  %v11583_v1 = vld [vmem:[%s21108_s23 + $0x7c0] sm:$0xf]  ;;  %v14400_v37 = vld [vmem:[%s21108_s23 + $0x78c] sm:$0xf0] }
  0xa6   : > { %3480 = vmatpush.bf16.msra.mxu3 %v10976_v20  ;;  %v16497_v20 = vpack.c.b16 %v16277_v30, %v16277_v30  ;;  %v11552_v38 = vor.u32 %v14400_v37, %v11551_v12  ;;  %v11535_v0 = vld [vmem:[%s21108_s23 + $0x760] sm:$0xf]  ;;  %v14396_v11 = vld [vmem:[%s21108_s23 + $0x76c] sm:$0xf0] }
  0xa7   : > { %3577 = vmatpush.bf16.msrb.mxu2 %v11392_v50  ;;  %3512 = vmatpush.bf16.msrb.mxu0 %v11120_v57  ;;  %v14408_v50 = vld [vmem:[%s21108_s23 + $0x7cc] sm:$0xf0]  ;;  %v11568_v57 = vor.u32 %v14404_v56, %v11567_v47  ;;  %v11711_v46 = vld [vmem:[%s21108_s23 + $0x8c0] sm:$0xf] }
  0xa8   : > { %v11584_v52 = vor.u32 %v14408_v50, %v11583_v1  ;;  %v14444_v24 = vld [vmem:[%s21108_s23 + $0x8ec] sm:$0xf0]  ;;  %v11839_v1 = vld [vmem:[%s21108_s23 + $0x9c0] sm:$0xf] }
  0xa9   : > { %3392 = vmatmul.bf16.gmra.mxu0 %v15919_v29  ;;  %3425 = vmatmul.bf16.gmra.mxu1 %v16025_v60  ;;  %v14472_v50 = vld [vmem:[%s21108_s23 + $0x9cc] sm:$0xf0]  ;;  %v11503_v56 = vld [vmem:[%s21108_s23 + $0x720] sm:$0xf] }
  0xaa   : > { %3458 = vmatmul.bf16.gmra.mxu2 %v16159_v39  ;;  %3545 = vmatpush.bf16.msrb.mxu1 %v11248_v62  ;;  %v11840_v47 = vor.u32 %v14472_v50, %v11839_v1  ;;  %v14436_v12 = vld [vmem:[%s21108_s23 + $0x8ac] sm:$0xf0]  ;;  %v11823_v37 = vld [vmem:[%s21108_s23 + $0x9a0] sm:$0xf] }
  0xab   : > { %3578 = vmatpush.bf16.msrb.mxu2 %v11376_v63  ;;  %3513 = vmatpush.bf16.msrb.mxu0 %v11104_v4 }
  0xac   : > { %3605 = vmatpush.bf16.msrb.mxu3 %v11600_v49  ;;  %v14440_v49 = vld [vmem:[%s21108_s23 + $0x8cc] sm:$0xf0] }
  0xae   : > { %3546 = vmatpush.bf16.msrb.mxu1 %v11232_v21  ;;  %v11727_v21 = vld [vmem:[%s21108_s23 + $0x8e0] sm:$0xf] }
  0xaf   : > { %3579 = vmatpush.bf16.msrb.mxu2 %v11360_v14  ;;  %v11536_v14 = vor.u32 %v14396_v11, %v11535_v0 }
  0xb0   : > { %3606 = vmatpush.bf16.msrb.mxu3 %v11584_v52  ;;  %v11712_v52 = vor.u32 %v14440_v49, %v11711_v46 }
  0xb4   : > { %3607 = vmatpush.bf16.msrb.mxu3 %v11568_v57  ;;  %v14388_v57 = vld [vmem:[%s21108_s23 + $0x72c] sm:$0xf0] }
  0xb8   : > { %3608 = vmatpush.bf16.msrb.mxu3 %v11552_v38  ;;  %v1669_v38 = vld [vmem:[#allocation11] sm:$0xf] }
  0xb9   : > { %3397 = vmatmul.bf16.gmra.mxu0 %v15925_v35  ;;  %3430 = vmatmul.bf16.gmra.mxu1 %v16075_v51 }
  0xba   : > { %3463 = vmatmul.bf16.gmra.mxu2 %v16240_v55 }
  0xbc   : > { %3609 = vmatpush.bf16.msrb.mxu3 %v11536_v14  ;;  %v11487_v14 = vld [vmem:[%s21108_s23 + $0x700] sm:$0xf] }
  0xc9   : > { %3402 = vmatmul.bf16.gmra.mxu0 %v16489_v10  ;;  %3435 = vmatmul.bf16.gmra.mxu1 %v16493_v16 }
  0xca   : > { %3468 = vmatmul.bf16.gmra.mxu2 %v16497_v20 }
  0xce   : > { %v16506_v28 = vpop.permute.xlu2 %1204 }
  0xd5   : > { %v16503_v26 = vpop.permute.xlu1 %1188 }
  0xd6   : > { %v16566_v4 = vsel %vm1212_vm1, %v16118_v19, %v16503_v26 }
  0xda   : > { %v1173_v22 = vpop.permute.xlu0 %1172  ;;  %v1177_v33 = vpop.permute.xlu2 %1176 }
  0xdb   : > { %v16509_v25 = vsel %vm1212_vm1, %v963_v18, %v1173_v22  ;;  %v11855_v18 = vld [vmem:[%s21108_s23 + $0x9e0] sm:$0xf] }
  0xdc   : > { %3481 = vmatmul.bf16.vlgmr.msra.gmra.mxu3 %v16509_v25 }
  0xdd   : > { %v16512_v27 = vpop.permute.xlu1 %1196 }
  0xe2   : > { %v1181_v32 = vpop.permute.xlu0 %1180  ;;  %v1185_v61 = vpop.permute.xlu2 %1184 }
  0xe3   : > { %v16524_v41 = vsel %vm1212_vm1, %v16023_v59, %v1181_v32 }
  0xe5   : > { %v1175_v34 = vpop.permute.xlu1 %1174 }
  0xe6   : > { %v16515_v6 = vsel %vm1212_vm1, %v1173_v22, %v1175_v34  ;;  %v16518_v36 = vsel %vm1212_vm1, %v1175_v34, %v1177_v33  ;;  %v14476_v22 = vld [vmem:[%s21108_s23 + $0x9ec] sm:$0xf0]  ;;  %v11519_v34 = vld [vmem:[%s21108_s23 + $0x740] sm:$0xf] }
  0xe7   : > { %3514 = vmatmul.bf16.vlgmr.msrb.gmra.mxu0 %v16515_v6  ;;  %3547 = vmatmul.bf16.vlgmr.msrb.gmra.mxu1 %v16518_v36 }
  0xea   : > { %v1179_v43 = vpop.permute.xlu0 %1178  ;;  %v1193_v0 = vpop.permute.xlu2 %1192 }
  0xeb   : > { %v16533_v48 = vsel %vm1212_vm1, %v1177_v33, %v1179_v43  ;;  %v11856_v33 = vor.u32 %v14476_v22, %v11855_v18  ;;  %v14392_v43 = vld [vmem:[%s21108_s23 + $0x74c] sm:$0xf0]  ;;  %v11679_v18 = vld [vmem:[%s21108_s23 + $0x880] sm:$0xf] }
  0xec   : > { %21110 = vst [vmem:[#allocation37_spill] sm:$0xff] %v16533_v48  ;;  %3486 = vmatmul.bf16.gmra.mxu3 %v16524_v41  ;;  %3580 = vmatmul.bf16.vlgmr.msrb.gmra.mxu2 %v16533_v48  ;;  %v11520_v53 = vor.u32 %v14392_v43, %v11519_v34  ;;  %v14432_v22 = vld [vmem:[%s21108_s23 + $0x88c] sm:$0xf0]  ;;  %v16645_v43 = vperm.slane %v1669_v38, 0 }
  0xed   : > { %v1183_v62 = vpop.permute.xlu1 %1182  ;;  %3671 = vmatpush.bf16.msra.mxu1 %v11856_v33  ;;  %v14464_v33 = vld [vmem:[%s21108_s23 + $0x98c] sm:$0xf0]  ;;  %v11680_v1 = vor.u32 %v14432_v22, %v11679_v18 }
  0xee   : > { %v16556_v63 = vsel %vm1212_vm1, %v1183_v62, %v1185_v61  ;;  %v16559_v3 = vsel %vm1212_vm1, %v1181_v32, %v1183_v62  ;;  %v11728_v32 = vor.u32 %v14444_v24, %v11727_v21  ;;  %v14468_v62 = vld [vmem:[%s21108_s23 + $0x9ac] sm:$0xf0]  ;;  %3610 = vmatpush.bf16.msrb.mxu3 %v11520_v53 }
  0xef   : > { %21111 = vst [vmem:[#allocation38_spill] sm:$0xff] %v16556_v63  ;;  %v11824_v21 = vor.u32 %v14468_v62, %v11823_v37  ;;  %v14384_v24 = vld [vmem:[%s21108_s23 + $0x70c] sm:$0xf0] }
  0xf0   : > { %21112 = vst [vmem:[#allocation39_spill] sm:$0xff] %v16559_v3  ;;  %3638 = vmatpush.bf16.msra.mxu0 %v11728_v32  ;;  %v11807_v32 = vld [vmem:[%s21108_s23 + $0x980] sm:$0xf]  ;;  %v11488_v53 = vor.u32 %v14384_v24, %v11487_v14  ;;  %v14428_v62 = vld [vmem:[%s21108_s23 + $0x86c] sm:$0xf0] }
  0xf1   : > { %3672 = vmatpush.bf16.msra.mxu1 %v11840_v47  ;;  %v11808_v50 = vor.u32 %v14464_v33, %v11807_v32  ;;  %v14492_v14 = vld [vmem:[%s21108_s23 + $0xa6c] sm:$0xf0]  ;;  %v11647_v24 = vld [vmem:[%s21108_s23 + $0x840] sm:$0xf] }
  0xf2   : > { %v1187_v2 = vpop.permute.xlu0 %1186  ;;  %v14424_v18 = vld [vmem:[%s21108_s23 + $0x84c] sm:$0xf0]  ;;  %v11775_v32 = vld [vmem:[%s21108_s23 + $0x940] sm:$0xf] }
  0xf3   : > { %v16569_v5 = vsel %vm1212_vm1, %v1185_v61, %v1187_v2  ;;  %v11695_v61 = vld [vmem:[%s21108_s23 + $0x8a0] sm:$0xf]  ;;  %v11504_v2 = vor.u32 %v14388_v57, %v11503_v56  ;;  %v14456_v33 = vld [vmem:[%s21108_s23 + $0x94c] sm:$0xf0] }
  0xf4   : > { %21113 = vst [vmem:[#allocation40_spill] sm:$0xff] %v16569_v5  ;;  %3639 = vmatpush.bf16.msra.mxu0 %v11712_v52  ;;  %v11696_v11 = vor.u32 %v14436_v12, %v11695_v61  ;;  %v16660_v61 = vsel %vm1212_vm1, %v16221_v23, %v16512_v27 }
  0xf5   : > { %v1191_v34 = vpop.permute.xlu1 %1190  ;;  %3611 = vmatpush.bf16.msrb.mxu3 %v11504_v2  ;;  %3673 = vmatpush.bf16.msra.mxu1 %v11824_v21  ;;  %v11791_v2 = vld [vmem:[%s21108_s23 + $0x960] sm:$0xf] }
  0xf6   : > { %v16648_v46 = vsel %vm1212_vm1, %v1191_v34, %v1193_v0  ;;  %v16652_v52 = vsel %vm1212_vm1, %v16503_v26, %v1191_v34  ;;  %v11663_v26 = vld [vmem:[%s21108_s23 + $0x860] sm:$0xf] }
  0xf7   : > { %3519 = vmatmul.bf16.gmra.mxu0 %v16559_v3  ;;  %3552 = vmatmul.bf16.gmra.mxu1 %v16556_v63  ;;  %21114 = vst [vmem:[#allocation41_spill] sm:$0xff] %v16648_v46  ;;  %v11664_v38 = vor.u32 %v14428_v62, %v11663_v26  ;;  %v11903_v34 = vld [vmem:[%s21108_s23 + $0xa40] sm:$0xf]  ;;  %v10625_v3 = vld [vmem:[%s21108_s23 + $0x50] sm:$0xf0] }
  0xf8   : > { %3640 = vmatpush.bf16.msra.mxu0 %v11696_v11  ;;  %21115 = vst [vmem:[#allocation42_spill] sm:$0xff] %v16652_v52  ;;  %v11919_v11 = vld [vmem:[%s21108_s23 + $0xa60] sm:$0xf] }
  0xf9   : > { %3612 = vmatpush.bf16.msrb.mxu3 %v11488_v53  ;;  %3674 = vmatpush.bf16.msra.mxu1 %v11808_v50  ;;  %v11920_v22 = vor.u32 %v14492_v14, %v11919_v11  ;;  %v14488_v50 = vld [vmem:[%s21108_s23 + $0xa4c] sm:$0xf0] }
  0xfa   : > { %v1195_v49 = vpop.permute.xlu0 %1194  ;;  %v11904_v62 = vor.u32 %v14488_v50, %v11903_v34  ;;  %v14484_v11 = vld [vmem:[%s21108_s23 + $0xa2c] sm:$0xf0]  ;;  %v979_v50 = vpack.c.b16 %v16252_v58, %v16252_v58 }
  0xfb   : > { %v16663_v12 = vsel %vm1212_vm1, %v1193_v0, %v1195_v49  ;;  %v14460_v0 = vld [vmem:[%s21108_s23 + $0x96c] sm:$0xf0]  ;;  %v11648_v49 = vor.u32 %v14424_v18, %v11647_v24  ;;  %3708 = vmatpush.bf16.msra.mxu2 %v11920_v22  ;;  %v11615_v18 = vld [vmem:[%s21108_s23 + $0x800] sm:$0xf] }
  0xfc   : > { %3491 = vmatmul.bf16.gmra.mxu3 %v16566_v4  ;;  %3585 = vmatmul.bf16.gmra.mxu2 %v16569_v5  ;;  %21116 = vst [vmem:[#allocation43_spill] sm:$0xff] %v16663_v12  ;;  %v11792_v21 = vor.u32 %v14460_v0, %v11791_v2  ;;  %v11759_v2 = vld [vmem:[%s21108_s23 + $0x920] sm:$0xf]  ;;  %v14452_v0 = vld [vmem:[%s21108_s23 + $0x92c] sm:$0xf0] }
  0xfd   : > { %3641 = vmatpush.bf16.msra.mxu0 %v11680_v1  ;;  %v11776_v1 = vor.u32 %v14456_v33, %v11775_v32  ;;  %v11760_v24 = vor.u32 %v14452_v0, %v11759_v2  ;;  %v14416_v32 = vld [vmem:[%s21108_s23 + $0x80c] sm:$0xf0]  ;;  %v11743_v33 = vld [vmem:[%s21108_s23 + $0x900] sm:$0xf]  ;;  %v895_v0 = vld [vmem:[%s15887_s22 + $0x8] sm:$0xfc] }
  0xfe   : > { %3675 = vmatpush.bf16.msra.mxu1 %v11792_v21  ;;  %v1201_v21 = vpop.permute.xlu2 %1200  ;;  %v14448_v34 = vld [vmem:[%s21108_s23 + $0x90c] sm:$0xf0]  ;;  %v894_v2 = vld [vmem:[%s15887_s22] sm:$0xfc] }
  0xff   : > { %3709 = vmatpush.bf16.msra.mxu2 %v11904_v62 }
 0x101   : > { %3642 = vmatpush.bf16.msra.mxu0 %v11664_v38  ;;  %v14420_v38 = vld [vmem:[%s21108_s23 + $0x82c] sm:$0xf0] }
 0x102   : > { %3676 = vmatpush.bf16.msra.mxu1 %v11776_v1  ;;  %v14480_v1 = vld [vmem:[%s21108_s23 + $0xa0c] sm:$0xf0]  ;;  %v1203_v62 = vpop.permute.xlu0 %1202 }
 0x105   : > { %3643 = vmatpush.bf16.msra.mxu0 %v11648_v49  ;;  %v11871_v49 = vld [vmem:[%s21108_s23 + $0xa00] sm:$0xf] }
 0x106   : > { %v3383_v47 = vpop.f32.mrf.mxu0  ;;  %v3416_v56 = vpop.f32.mrf.mxu1  ;;  %3677 = vmatpush.bf16.msra.mxu1 %v11760_v24  ;;  %v11872_v5 = vor.u32 %v14480_v1, %v11871_v49  ;;  %v16766_v24 = vsel %vm1212_vm1, %v1201_v21, %v1203_v62  ;;  %v896_v49 = vld [vmem:[%s15887_s22 + $0x10] sm:$0xfc] }
 0x107   : > { %3524 = vmatmul.bf16.gmra.mxu0 %v16652_v52  ;;  %3557 = vmatmul.bf16.gmra.mxu1 %v16648_v46  ;;  %v3384_v57 = vadd.f32 %v3383_v47, %v16645_v43  ;;  %v11631_v47 = vld [vmem:[%s21108_s23 + $0x820] sm:$0xf]  ;;  %21119 = vst [vmem:[#allocation46_spill] sm:$0xff] %v16766_v24 }
 0x108   : > { %v11632_v14 = vor.u32 %v14420_v38, %v11631_v47 }
 0x109   : > { %v3417_v37 = vadd.f32 %v3416_v56, %v3384_v57 }
 0x10a   : > { %3644 = vmatpush.bf16.msra.mxu0 %v11632_v14  ;;  %v16763_v14 = vsel %vm1212_vm1, %v979_v50, %v16506_v28  ;;  %v1265_v50 = vrot.slane %v15936_v44, 1 }
 0x10c   : > { %3496 = vmatmul.bf16.gmra.mxu3 %v16660_v61  ;;  %3590 = vmatmul.bf16.gmra.mxu2 %v16663_v12 }
 0x10d   : > { %v3449_v53 = vpop.f32.mrf.mxu2 }
 0x10e   : > { %v16706_v56 = vadd.f32 %v3449_v53, %v3417_v37  ;;  %v16708_v57 = vpop.f32.mrf.mxu0  ;;  %v16710_v26 = vpop.f32.mrf.mxu1  ;;  %v11887_v37 = vld [vmem:[%s21108_s23 + $0xa20] sm:$0xf] }
 0x10f   : > { %v11888_v22 = vor.u32 %v14484_v11, %v11887_v37  ;;  %v1199_v53 = vpop.permute.xlu1 %1198  ;;  %v11616_v37 = vor.u32 %v14416_v32, %v11615_v18  ;;  %v11744_v11 = vor.u32 %v14448_v34, %v11743_v33 }
 0x110   : > { %v16748_v47 = vsel %vm1212_vm1, %v1199_v53, %v1201_v21  ;;  %v16756_v12 = vsel %vm1212_vm1, %v16512_v27, %v1199_v53  ;;  %v902_v27 = vpack.c.bf16 %v895_v0, %v894_v2  ;;  %v1209_v53 = vpop.permute.xlu2 %1208  ;;  %v1211_v2 = vpop.permute.xlu0 %1210 }
 0x111   : > { %21117 = vst [vmem:[#allocation44_spill] sm:$0xff] %v16748_v47  ;;  %3710 = vmatpush.bf16.msra.mxu2 %v11888_v22  ;;  %3645 = vmatpush.bf16.msra.mxu0 %v11616_v37 }
 0x112   : > { %21118 = vst [vmem:[#allocation45_spill] sm:$0xff] %v16756_v12  ;;  %3678 = vmatpush.bf16.msra.mxu1 %v11744_v11  ;;  %v1247_v22 = vunpack.c.l.b16 %v902_v27 }
 0x114   : > { %v1255_v21 = vpack.c.b16 %v15921_v31, %v1247_v22  ;;  %v16793_v22 = vsel %vm1212_vm1, %v1209_v53, %v1211_v2 }
 0x115   : > { %v16750_v38 = vpop.f32.mrf.mxu2  ;;  %3711 = vmatpush.bf16.msra.mxu2 %v11872_v5  ;;  %21122 = vst [vmem:[#allocation49_spill] sm:$0xff] %v16793_v22 }
 0x116   : > { %v3388_v46 = vpop.f32.mrf.mxu0  ;;  %v3421_v52 = vpop.f32.mrf.mxu1  ;;  %v1264_v1 = vrot.slane %v1255_v21, 1  ;;  %v1248_v21 = vunpack.c.h.b16 %v902_v27 }
 0x117   : > { %3529 = vmatmul.bf16.gmra.mxu0 %v16756_v12  ;;  %3562 = vmatmul.bf16.gmra.mxu1 %v16748_v47  ;;  %v3389_v63 = vadd.f32 %v3388_v46, %v16645_v43  ;;  %v898_v47 = vld [vmem:[%s15887_s22 + $0x120] sm:$0x3]  ;;  %v899_v12 = vld [vmem:[%s15887_s22 + $0x128] sm:$0x3] }
 0x119   : > { %v3422_v18 = vadd.f32 %v3421_v52, %v3389_v63  ;;  %v897_v63 = vld [vmem:[%s15887_s22 + $0x18] sm:$0xfc]  ;;  %v1207_v52 = vpop.permute.xlu1 %1206 }
 0x11a   : > { %v16780_v5 = vsel %vm1212_vm1, %v1207_v52, %v1209_v53  ;;  %v903_v62 = vpack.c.bf16 %v897_v63, %v896_v49  ;;  %v16787_v37 = vsel %vm1212_vm1, %v16506_v28, %v1207_v52  ;;  %v1256_v52 = vpack.c.b16 %v15933_v42, %v1248_v21 }
 0x11b   : > { %21120 = vst [vmem:[#allocation47_spill] sm:$0xff] %v16780_v5  ;;  %v1274_v21 = vrot.slane %v16023_v59, 1  ;;  %v14186_v59 = vld [vmem:[%s21108_s23 + $0xe4] sm:$0xf] }
 0x11c   : > { %3501 = vmatmul.bf16.gmra.mxu3 %v16763_v14  ;;  %3595 = vmatmul.bf16.gmra.mxu2 %v16766_v24  ;;  %21121 = vst [vmem:[#allocation48_spill] sm:$0xff] %v16787_v37  ;;  %v1249_v49 = vunpack.c.l.b16 %v903_v62  ;;  %v1250_v28 = vunpack.c.h.b16 %v903_v62  ;;  %v1276_v62 = vrot.slane %v15919_v29, 1  ;;  %v21054_v24 = vrot.slane %v16118_v19, 1 }
 0x11d   : > { %v3454_v46 = vpop.f32.mrf.mxu2 }
 0x11e   : > { %v16770_v32 = vadd.f32 %v3454_v46, %v3422_v18  ;;  %v16772_v33 = vpop.f32.mrf.mxu0  ;;  %v16774_v34 = vpop.f32.mrf.mxu1  ;;  %v16796_v46 = vsel %vm1263_vm2, %v1264_v1, %v1265_v50  ;;  %v1258_v27 = vpack.c.b16 %v15998_v40, %v1250_v28  ;;  %v1267_v1 = vrot.slane %v1256_v52, 1 }
 0x11f   : > { %21123 = vst [vmem:[#allocation50_spill] sm:$0xff] %v16796_v46  ;;  %v16825_v28 = vsel %vm1263_vm2, %v1265_v50, %v1276_v62 }
 0x120   : > { %21126 = vst [vmem:[#allocation53_spill] sm:$0xff] %v16825_v28 }
 0x125   : > { %v16783_v0 = vpop.f32.mrf.mxu2 }
 0x126   : > { %v3393_v31 = vpop.f32.mrf.mxu0  ;;  %v3426_v11 = vpop.f32.mrf.mxu1 }
 0x127   : > { %3534 = vmatmul.bf16.gmra.mxu0 %v16787_v37  ;;  %3567 = vmatmul.bf16.gmra.mxu1 %v16780_v5  ;;  %v3394_v18 = vadd.f32 %v3393_v31, %v16645_v43  ;;  %v1257_v5 = vpack.c.b16 %v16107_v8, %v1249_v49 }
 0x129   : > { %v3427_v63 = vadd.f32 %v3426_v11, %v3394_v18  ;;  %v1268_v11 = vrot.slane %v15959_v13, 1  ;;  %v1270_v18 = vrot.slane %v1257_v5, 1 }
 0x12b   : > { %v16813_v42 = vsel %vm1263_vm2, %v1267_v1, %v1268_v11 }
 0x12c   : > { %3600 = vmatmul.bf16.gmra.mxu2 %v16793_v22  ;;  %3613 = vmatmul.bf16.vlgmr.msrb.gmra.mxu3 %v16796_v46  ;;  %v1271_v22 = vrot.slane %v16083_v54, 1  ;;  %21124 = vst [vmem:[#allocation51_spill] sm:$0xff] %v16813_v42  ;;  %v16894_v46 = vsel %vm1263_vm2, %v1274_v21, %v21054_v24  ;;  %v14214_v24 = vld [vmem:[%s21108_s23 + $0x1c4] sm:$0xf] }
 0x12d   : > { %v3459_v37 = vpop.f32.mrf.mxu2  ;;  %21131 = vst [vmem:[#allocation58_spill] sm:$0xff] %v16894_v46 }
 0x12e   : > { %v16802_v31 = vadd.f32 %v3459_v37, %v3427_v63  ;;  %v16804_v53 = vpop.f32.mrf.mxu0  ;;  %v16806_v2 = vpop.f32.mrf.mxu1  ;;  %v16816_v8 = vsel %vm1263_vm2, %v1270_v18, %v1271_v22  ;;  %v1273_v37 = vrot.slane %v1258_v27, 1  ;;  %v10705_v27 = vld [vmem:[%s21108_s23 + $0xf0] sm:$0xf0] }
 0x12f   : > { %21125 = vst [vmem:[#allocation52_spill] sm:$0xff] %v16816_v8  ;;  %v10708_v18 = vor.u32 %v14186_v59, %v10705_v27 }
 0x130   : > { %v16828_v52 = vsel %vm1263_vm2, %v1273_v37, %v1274_v21  ;;  %v14182_v37 = vld [vmem:[%s21108_s23 + $0xc4] sm:$0xf] }
 0x131   : > { %21127 = vst [vmem:[#allocation54_spill] sm:$0xff] %v16828_v52  ;;  %3737 = vmatpush.bf16.msra.mxu3 %v10708_v18  ;;  %v14178_v18 = vld [vmem:[%s21108_s23 + $0xa4] sm:$0xf] }
 0x132   : > { %v14250_v21 = vld [vmem:[%s21108_s23 + $0x2e4] sm:$0xf] }
 0x135   : > { %v16819_v49 = vpop.f32.mrf.mxu2 }
 0x136   : > { %v3398_v40 = vpop.f32.mrf.mxu0  ;;  %v3431_v63 = vpop.f32.mrf.mxu1 }
 0x137   : > { %3646 = vmatmul.bf16.vlgmr.msra.gmra.mxu0 %v16813_v42  ;;  %3679 = vmatmul.bf16.vlgmr.msra.gmra.mxu1 %v16816_v8  ;;  %v3399_v5 = vadd.f32 %v3398_v40, %v16645_v43  ;;  %v10689_v40 = vld [vmem:[%s21108_s23 + $0xd0] sm:$0xf0]  ;;  %v21050_v8 = vrot.slane %v16025_v60, 1  ;;  %v21051_v42 = vrot.slane %v16159_v39, 1 }
 0x138   : > { %v10692_v27 = vor.u32 %v14182_v37, %v10689_v40 }
 0x139   : > { %v3432_v1 = vadd.f32 %v3431_v63, %v3399_v5  ;;  %v16863_v37 = vsel %vm1263_vm2, %v1268_v11, %v21050_v8  ;;  %v16868_v40 = vsel %vm1263_vm2, %v1271_v22, %v21051_v42  ;;  %v10657_v11 = vld [vmem:[%s21108_s23 + $0x90] sm:$0xf0] }
 0x13a   : > { %3738 = vmatpush.bf16.msra.mxu3 %v10692_v27  ;;  %21128 = vst [vmem:[#allocation55_spill] sm:$0xff] %v16863_v37 }
 0x13b   : > { %21129 = vst [vmem:[#allocation56_spill] sm:$0xff] %v16868_v40 }
 0x13c   : > { %3618 = vmatmul.bf16.gmra.mxu3 %v16825_v28  ;;  %11933 = vmatmul.msk.bf16.vlgmr.msra.gmra.mxu2 %vm1212_vm1, %v16828_v52  ;;  %v10673_v52 = vld [vmem:[%s21108_s23 + $0xb0] sm:$0xf0] }
 0x13d   : > { %v3464_v50 = vpop.f32.mrf.mxu2 }
 0x13e   : > { %v16845_v63 = vadd.f32 %v3464_v50, %v3432_v1  ;;  %v16847_v5 = vpop.f32.mrf.mxu0  ;;  %v16849_v59 = vpop.f32.mrf.mxu1  ;;  %v10676_v1 = vor.u32 %v14178_v18, %v10673_v52  ;;  %v21055_v50 = vrot.slane %v15925_v35, 1  ;;  %v14174_v52 = vld [vmem:[%s21108_s23 + $0x84] sm:$0xf] }
 0x13f   : > { %v10660_v8 = vor.u32 %v14174_v52, %v10657_v11  ;;  %v14170_v11 = vld [vmem:[%s21108_s23 + $0x64] sm:$0xf] }
 0x140   : > { %3739 = vmatpush.bf16.msra.mxu3 %v10676_v1  ;;  %v16884_v1 = vpack.c.bf16 %v899_v12, %v898_v47  ;;  %v16889_v42 = vsel %vm1263_vm2, %v1276_v62, %v21055_v50  ;;  %v10641_v12 = vld [vmem:[%s21108_s23 + $0x70] sm:$0xf0]  ;;  %v14218_v62 = vld [vmem:[%s21108_s23 + $0x1e4] sm:$0xf] }
 0x141   : > { %21130 = vst [vmem:[#allocation57_spill] sm:$0xff] %v16889_v42  ;;  %v10644_v47 = vor.u32 %v14170_v11, %v10641_v12  ;;  %v14282_v11 = vld [vmem:[%s21108_s23 + $0x3e4] sm:$0xf]  ;;  %v11089_v12 = vld [vmem:[%s21108_s23 + $0x3f0] sm:$0xf0] }
 0x144   : > { %3740 = vmatpush.bf16.msra.mxu3 %v10660_v8  ;;  %v10833_v8 = vld [vmem:[%s21108_s23 + $0x1f0] sm:$0xf0] }
 0x145   : > { %v16873_v28 = vpop.f32.mrf.mxu2 }
 0x146   : > { %v3403_v27 = vpop.f32.mrf.mxu0  ;;  %v3436_v18 = vpop.f32.mrf.mxu1 }
 0x147   : > { %3651 = vmatmul.bf16.gmra.mxu0 %v16863_v37  ;;  %3684 = vmatmul.bf16.gmra.mxu1 %v16868_v40  ;;  %v3404_v22 = vadd.f32 %v3403_v27, %v16645_v43  ;;  %v1251_v27 = vunpack.c.l.b16 %v16884_v1  ;;  %v901_v40 = vld [vmem:[%s15887_s22 + $0x138] sm:$0x3] }
 0x148   : > { %3741 = vmatpush.bf16.msra.mxu3 %v10644_v47 }
 0x149   : > { %v3437_v52 = vadd.f32 %v3436_v18, %v3404_v22  ;;  %v10836_v18 = vor.u32 %v14218_v62, %v10833_v8  ;;  %v10961_v22 = vld [vmem:[%s21108_s23 + $0x2f0] sm:$0xf0]  ;;  %v11092_v8 = vor.u32 %v14282_v11, %v11089_v12  ;;  %v14162_v12 = vld [vmem:[%s21108_s23 + $0x24] sm:$0xf] }
 0x14a   : > { %v10964_v62 = vor.u32 %v14250_v21, %v10961_v22  ;;  %v14246_v22 = vld [vmem:[%s21108_s23 + $0x2c4] sm:$0xf]  ;;  %v10945_v11 = vld [vmem:[%s21108_s23 + $0x2d0] sm:$0xf0] }
 0x14b   : > { %3770 = vmatpush.bf16.msrb.mxu0 %v10836_v18  ;;  %3836 = vmatpush.bf16.msrb.mxu2 %v11092_v8  ;;  %v10817_v18 = vld [vmem:[%s21108_s23 + $0x1d0] sm:$0xf0] }
 0x14c   : > { %3623 = vmatmul.bf16.gmra.mxu3 %v16889_v42  ;;  %11934 = vmatmul.msk.bf16.gmra.mxu2 %vm1212_vm1, %v16894_v46  ;;  %v900_v46 = vld [vmem:[%s15887_s22 + $0x130] sm:$0x3]  ;;  %v14166_v42 = vld [vmem:[%s21108_s23 + $0x44] sm:$0xf]  ;;  %s826_s22 = scalar_lea.vmem %s21239_s29, %s10588_s3 }
 0x14d   : > { %v3469_v37 = vpop.f32.mrf.mxu2  ;;  %3803 = vmatpush.bf16.msrb.mxu1 %v10964_v62  ;;  %v10628_v21 = vor.u32 %v14166_v42, %v10625_v3  ;;  %v14278_v3 = vld [vmem:[%s21108_s23 + $0x3c4] sm:$0xf]  ;;  %v11073_v42 = vld [vmem:[%s21108_s23 + $0x3d0] sm:$0xf0]  ;;  %v16958_v62 = vpack.c.bf16 %v901_v40, %v900_v46 }
 0x14e   : > { %v16937_v50 = vadd.f32 %v3469_v37, %v3437_v52  ;;  %v3405_v48 = vpop.f32.mrf.mxu0  ;;  %v3438_v47 = vpop.f32.mrf.mxu1  ;;  %v1259_v37 = vpack.c.b16 %v1251_v27, %v15939_v45  ;;  %v10820_v52 = vor.u32 %v14214_v24, %v10817_v18  ;;  %v11076_v8 = vor.u32 %v14278_v3, %v11073_v42  ;;  %v10609_v45 = vld [vmem:[%s21108_s23 + $0x30] sm:$0xf0]  ;;  %v14210_v24 = vld [vmem:[%s21108_s23 + $0x1a4] sm:$0xf] }
 0x14f   : > { %v10948_v48 = vor.u32 %v14246_v22, %v10945_v11  ;;  %3742 = vmatpush.bf16.msra.mxu3 %v10628_v21  ;;  %v10801_v27 = vld [vmem:[%s21108_s23 + $0x1b0] sm:$0xf0]  ;;  %v10612_v47 = vor.u32 %v14162_v12, %v10609_v45  ;;  %v14242_v46 = vld [vmem:[%s21108_s23 + $0x2a4] sm:$0xf]  ;;  %v21070_v3 = vrot.slane %v16221_v23, 1  ;;  %v21133_v12 = vrot.slane %v16075_v51, 1 }
 0x150   : > { %3771 = vmatpush.bf16.msrb.mxu0 %v10820_v52  ;;  %v10804_v18 = vor.u32 %v14210_v24, %v10801_v27  ;;  %v10929_v40 = vld [vmem:[%s21108_s23 + $0x2b0] sm:$0xf0]  ;;  %v14274_v21 = vld [vmem:[%s21108_s23 + $0x3a4] sm:$0xf]  ;;  %3837 = vmatpush.bf16.msrb.mxu2 %v11076_v8  ;;  %v16981_v52 = vrot.slane %v1259_v37, 1  ;;  %v21134_v45 = vrot.slane %v16025_v60, 1  ;;  %v1252_v37 = vunpack.c.h.b16 %v16884_v1 }
 0x151   : > { %3804 = vmatpush.bf16.msrb.mxu1 %v10948_v48  ;;  %v10932_v22 = vor.u32 %v14242_v46, %v10929_v40  ;;  %v11057_v11 = vld [vmem:[%s21108_s23 + $0x3b0] sm:$0xf0]  ;;  %v21136_v48 = vrot.slane %v16240_v55, 1  ;;  %v21137_v8 = vrot.slane %v16159_v39, 1  ;;  %v1253_v46 = vunpack.c.l.b16 %v16958_v62 }
 0x152   : > { %21132 = vst [vmem:[#allocation59_spill] sm:$0xff] %v16981_v52  ;;  %v11060_v42 = vor.u32 %v14274_v21, %v11057_v11  ;;  %v16989_v24 = vsel %vm1263_vm2, %v21134_v45, %v21133_v12  ;;  %v14158_v21 = vld [vmem:[%s21108_s23 + $0x4] sm:$0xf]  ;;  %v10593_v11 = vld [vmem:[%s21108_s23 + $0x10] sm:$0xf0] }
 0x153   : > { %21135 = vst [vmem:[#allocation60_spill] sm:$0xff] %v16989_v24  ;;  %v16996_v27 = vsel %vm1263_vm2, %v21137_v8, %v21136_v48  ;;  %3743 = vmatpush.bf16.msra.mxu3 %v10612_v47  ;;  %v14206_v12 = vld [vmem:[%s21108_s23 + $0x184] sm:$0xf]  ;;  %v10596_v1 = vor.u32 %v14158_v21, %v10593_v11  ;;  %v10785_v47 = vld [vmem:[%s21108_s23 + $0x190] sm:$0xf0]  ;;  %v21139_v48 = vrot.slane %v15925_v35, 1 }
 0x154   : > { %21138 = vst [vmem:[#allocation61_spill] sm:$0xff] %v16996_v27  ;;  %3772 = vmatpush.bf16.msrb.mxu0 %v10804_v18  ;;  %3838 = vmatpush.bf16.msrb.mxu2 %v11060_v42  ;;  %v14238_v18 = vld [vmem:[%s21108_s23 + $0x284] sm:$0xf]  ;;  %v10913_v45 = vld [vmem:[%s21108_s23 + $0x290] sm:$0xf0]  ;;  %v21141_v11 = vrot.slane %v16118_v19, 1 }
 0x155   : > { %v3471_v40 = vpop.f32.mrf.mxu2  ;;  %3805 = vmatpush.bf16.msrb.mxu1 %v10932_v22  ;;  %v17022_v8 = vsel %vm1263_vm2, %v21139_v48, %v16981_v52  ;;  %v10788_v22 = vor.u32 %v14206_v12, %v10785_v47  ;;  %v10916_v42 = vor.u32 %v14238_v18, %v10913_v45  ;;  %v11041_v21 = vld [vmem:[%s21108_s23 + $0x390] sm:$0xf0]  ;;  %v1261_v12 = vpack.c.b16 %v1253_v46, %v16277_v30  ;;  %v14202_v18 = vld [vmem:[%s21108_s23 + $0x164] sm:$0xf] }
 0x156   : > { %21140 = vst [vmem:[#allocation62_spill] sm:$0xff] %v17022_v8  ;;  %v14270_v40 = vld [vmem:[%s21108_s23 + $0x384] sm:$0xf]  ;;  %v17037_v48 = vsel %vm1263_vm2, %v21141_v11, %v21070_v3  ;;  %v10769_v45 = vld [vmem:[%s21108_s23 + $0x170] sm:$0xf0]  ;;  %v21144_v3 = vrot.slane %v16075_v51, 1 }
 0x157   : > { %3656 = vmatmul.bf16.gmra.mxu0 %v16989_v24  ;;  %3689 = vmatmul.bf16.gmra.mxu1 %v16996_v27  ;;  %21142 = vst [vmem:[#allocation63_spill] sm:$0xff] %v17037_v48  ;;  %v1260_v24 = vpack.c.b16 %v1252_v37, %v16182_v9  ;;  %v11044_v47 = vor.u32 %v14270_v40, %v11041_v21  ;;  %v14234_v19 = vld [vmem:[%s21108_s23 + $0x264] sm:$0xf]  ;;  %v10897_v30 = vld [vmem:[%s21108_s23 + $0x270] sm:$0xf0]  ;;  %v17064_v40 = vrot.slane %v1261_v12, 1  ;;  %v1254_v21 = vunpack.c.h.b16 %v16958_v62 }
 0x158   : > { %3744 = vmatpush.bf16.msra.mxu3 %v10596_v1  ;;  %3773 = vmatpush.bf16.msrb.mxu0 %v10788_v22  ;;  %v10772_v9 = vor.u32 %v14202_v18, %v10769_v45  ;;  %v14266_v37 = vld [vmem:[%s21108_s23 + $0x364] sm:$0xf]  ;;  %v11025_v46 = vld [vmem:[%s21108_s23 + $0x370] sm:$0xf0]  ;;  %v10900_v1 = vor.u32 %v14234_v19, %v10897_v30  ;;  %v21146_v27 = vrot.slane %v16240_v55, 1 }
 0x159   : > { %3806 = vmatpush.bf16.msrb.mxu1 %v10916_v42  ;;  %3839 = vmatpush.bf16.msrb.mxu2 %v11044_v47  ;;  %v11028_v22 = vor.u32 %v14266_v37, %v11025_v46  ;;  %v17062_v42 = vrot.slane %v1260_v24, 1  ;;  %v14198_v11 = vld [vmem:[%s21108_s23 + $0x144] sm:$0xf]  ;;  %v10753_v47 = vld [vmem:[%s21108_s23 + $0x150] sm:$0xf0] }
 0x15a   : > { %v14230_v18 = vld [vmem:[%s21108_s23 + $0x244] sm:$0xf]  ;;  %v10756_v24 = vor.u32 %v14198_v11, %v10753_v47  ;;  %v10881_v62 = vld [vmem:[%s21108_s23 + $0x250] sm:$0xf0]  ;;  %v1262_v11 = vpack.c.b16 %v1254_v21, %v16252_v58 }
 0x15b   : > { %21143 = vst [vmem:[#allocation64_spill] sm:$0xff] %v17062_v42  ;;  %v14262_v12 = vld [vmem:[%s21108_s23 + $0x344] sm:$0xf]  ;;  %v11009_v19 = vld [vmem:[%s21108_s23 + $0x350] sm:$0xf0]  ;;  %v10884_v30 = vor.u32 %v14230_v18, %v10881_v62 }
 0x15c   : > { %3628 = vmatmul.bf16.gmra.mxu3 %v17022_v8  ;;  %11935 = vmatmul.msk.bf16.gmra.mxu2 %vm1212_vm1, %v17037_v48  ;;  %v11012_v37 = vor.u32 %v14262_v12, %v11009_v19  ;;  %v14194_v46 = vld [vmem:[%s21108_s23 + $0x124] sm:$0xf]  ;;  %v10993_v18 = vld [vmem:[%s21108_s23 + $0x330] sm:$0xf0]  ;;  %v17111_v48 = vsel %vm1263_vm2, %v21144_v3, %v17062_v42  ;;  %v17117_v8 = vsel %vm1263_vm2, %v21146_v27, %v17064_v40 }
 0x15d   : > { %3774 = vmatpush.bf16.msrb.mxu0 %v10772_v9  ;;  %3807 = vmatpush.bf16.msrb.mxu1 %v10900_v1  ;;  %v10737_v1 = vld [vmem:[%s21108_s23 + $0x130] sm:$0xf0]  ;;  %v14258_v47 = vld [vmem:[%s21108_s23 + $0x324] sm:$0xf]  ;;  %21145 = vst [vmem:[#allocation65_spill] sm:$0xff] %v17111_v48 }
 0x15e   : > { %3840 = vmatpush.bf16.msrb.mxu2 %v11028_v22  ;;  %v14226_v22 = vld [vmem:[%s21108_s23 + $0x224] sm:$0xf]  ;;  %v10740_v62 = vor.u32 %v14194_v46, %v10737_v1  ;;  %v10996_v21 = vor.u32 %v14258_v47, %v10993_v18  ;;  %v10721_v3 = vld [vmem:[%s21108_s23 + $0x110] sm:$0xf0]  ;;  %v21147_v47 = vrot.slane %v16221_v23, 1 }
 0x15f   : > { %v3482_v45 = vpop.f32.mrf.mxu3  ;;  %v14222_v46 = vld [vmem:[%s21108_s23 + $0x204] sm:$0xf] }
 0x160   : > { %v3483_v9 = vadd.f32 %v3482_v45, %v16706_v56  ;;  %v10865_v56 = vld [vmem:[%s21108_s23 + $0x230] sm:$0xf0]  ;;  %v3386_v45 = vadd.f32 %v16708_v57, %v16645_v43  ;;  %v17119_v57 = vrot.slane %v1262_v11, 1 }
 0x161   : > { %3775 = vmatpush.bf16.msrb.mxu0 %v10756_v24  ;;  %3808 = vmatpush.bf16.msrb.mxu1 %v10884_v30  ;;  %v10868_v58 = vor.u32 %v14226_v22, %v10865_v56  ;;  %v10977_v22 = vld [vmem:[%s21108_s23 + $0x310] sm:$0xf0] }
 0x162   : > { %3841 = vmatpush.bf16.msrb.mxu2 %v11012_v37  ;;  %v3419_v24 = vadd.f32 %v16710_v26, %v3386_v45  ;;  %v14190_v37 = vld [vmem:[%s21108_s23 + $0x104] sm:$0xf]  ;;  %v10849_v26 = vld [vmem:[%s21108_s23 + $0x210] sm:$0xf0]  ;;  %v17146_v18 = vsel %vm1263_vm2, %v21147_v47, %v17119_v57 }
 0x163   : > { %v10724_v1 = vor.u32 %v14190_v37, %v10721_v3  ;;  %v10852_v56 = vor.u32 %v14222_v46, %v10849_v26 }
 0x164   : > { %v3515_v12 = vpop.f32.mrf.mxu0  ;;  %v3548_v19 = vpop.f32.mrf.mxu1 }
 0x165   : > { %v3516_v30 = vadd.f32 %v3515_v12, %v3483_v9  ;;  %3776 = vmatpush.bf16.msrb.mxu0 %v10740_v62  ;;  %3809 = vmatpush.bf16.msrb.mxu1 %v10868_v58  ;;  %v14254_v9 = vld [vmem:[%s21108_s23 + $0x304] sm:$0xf]  ;;  %v3452_v62 = vadd.f32 %v16750_v38, %v3419_v24  ;;  %v3391_v38 = vadd.f32 %v16772_v33, %v16645_v43 }
 0x166   : > { %3842 = vmatpush.bf16.msrb.mxu2 %v10996_v21  ;;  %v10980_v45 = vor.u32 %v14254_v9, %v10977_v22 }
 0x167   : > { %v3484_v27 = vpop.f32.mrf.mxu3  ;;  %v3549_v11 = vadd.f32 %v3548_v19, %v3516_v30  ;;  %3661 = vmatmul.bf16.gmra.mxu0 %v17111_v48  ;;  %3694 = vmatmul.bf16.gmra.mxu1 %v17117_v8 }
 0x168   : > { %v3485_v58 = vadd.f32 %v3484_v27, %v3452_v62 }
 0x169   : > { %3777 = vmatpush.bf16.msrb.mxu0 %v10724_v1  ;;  %3810 = vmatpush.bf16.msrb.mxu1 %v10852_v56  ;;  %v3424_v1 = vadd.f32 %v16774_v34, %v3391_v38 }
 0x16a   : > { %3843 = vmatpush.bf16.msrb.mxu2 %v10980_v45 }
 0x16c   : > { %3633 = vmatmul.bf16.gmra.mxu3 %v16981_v52  ;;  %11936 = vmatmul.msk.bf16.gmra.mxu2 %vm1212_vm1, %v17146_v18  ;;  %v3517_v21 = vpop.f32.mrf.mxu0  ;;  %v3550_v12 = vpop.f32.mrf.mxu1 }
 0x16d   : > { %v3518_v19 = vadd.f32 %v3517_v21, %v3485_v58 }
 0x16f   : > { %v3487_v30 = vpop.f32.mrf.mxu3  ;;  %v3581_v23 = vpop.f32.mrf.mxu2  ;;  %v3551_v46 = vadd.f32 %v3550_v12, %v3518_v19 }
 0x170   : > { %v3488_v37 = vadd.f32 %v3487_v30, %v16770_v32  ;;  %v17153_v3 = vadd.f32 %v3581_v23, %v3549_v11  ;;  %v3457_v32 = vadd.f32 %v16783_v0, %v3424_v1  ;;  %v3396_v30 = vadd.f32 %v16804_v53, %v16645_v43  ;;  %v14314_v53 = vld [vmem:[%s21108_s23 + $0x4e4] sm:$0xf] }
 0x174   : > { %v3520_v24 = vpop.f32.mrf.mxu0  ;;  %v3553_v27 = vpop.f32.mrf.mxu1 }
 0x175   : > { %v3521_v26 = vadd.f32 %v3520_v24, %v3488_v37  ;;  %v3429_v37 = vadd.f32 %v16806_v2, %v3396_v30  ;;  %v11217_v2 = vld [vmem:[%s21108_s23 + $0x4f0] sm:$0xf0] }
 0x176   : > { %v11185_v30 = vld [vmem:[%s21108_s23 + $0x4b0] sm:$0xf0] }
 0x177   : > { %v3489_v9 = vpop.f32.mrf.mxu3  ;;  %v3583_v22 = vpop.f32.mrf.mxu2  ;;  %v3554_v47 = vadd.f32 %v3553_v27, %v3521_v26  ;;  %3666 = vmatmul.bf16.gmra.mxu0 %v17062_v42  ;;  %3699 = vmatmul.bf16.gmra.mxu1 %v17064_v40  ;;  %v11220_v26 = vor.u32 %v14314_v53, %v11217_v2 }
 0x178   : > { %v17158_v56 = vadd.f32 %v3583_v22, %v3551_v46  ;;  %v3490_v11 = vadd.f32 %v3489_v9, %v3457_v32 }
 0x179   : > { %3869 = vmatpush.bf16.msrb.mxu3 %v11220_v26 }
 0x17c   : > { %11937 = vmatmul.msk.bf16.gmra.mxu2 %vm1212_vm1, %v17119_v57  ;;  %3745 = vmatmul.bf16.vlgmr.msra.gmra.mxu3 %v16250_v15  ;;  %v3522_v33 = vpop.f32.mrf.mxu0  ;;  %v3555_v34 = vpop.f32.mrf.mxu1 }
 0x17d   : > { %v3523_v45 = vadd.f32 %v3522_v33, %v3490_v11  ;;  %v11201_v11 = vld [vmem:[%s21108_s23 + $0x4d0] sm:$0xf0] }
 0x17f   : > { %v3492_v62 = vpop.f32.mrf.mxu3  ;;  %v3586_v58 = vpop.f32.mrf.mxu2  ;;  %v3556_v19 = vadd.f32 %v3555_v34, %v3523_v45 }
 0x180   : > { %v3493_v21 = vadd.f32 %v3492_v62, %v16802_v31  ;;  %v17167_v12 = vadd.f32 %v3586_v58, %v3554_v47  ;;  %v3462_v31 = vadd.f32 %v16819_v49, %v3429_v37  ;;  %v14310_v49 = vld [vmem:[%s21108_s23 + $0x4c4] sm:$0xf] }
 0x181   : > { %v11204_v45 = vor.u32 %v14310_v49, %v11201_v11  ;;  %v11473_v49 = vld [vmem:[%s21108_s23 + $0x6f0] sm:$0xf0] }
 0x183   : > { %3870 = vmatpush.bf16.msrb.mxu3 %v11204_v45  ;;  %v14410_v45 = vld [vmem:[%s21108_s23 + $0x7e4] sm:$0xf] }
 0x184   : > { %v3525_v0 = vpop.f32.mrf.mxu0  ;;  %v3558_v23 = vpop.f32.mrf.mxu1 }
 0x185   : > { %v3526_v46 = vadd.f32 %v3525_v0, %v3493_v21 }
 0x187   : > { %v3494_v38 = vpop.f32.mrf.mxu3  ;;  %v3588_v24 = vpop.f32.mrf.mxu2  ;;  %v3559_v1 = vadd.f32 %v3558_v23, %v3526_v46  ;;  %3778 = vmatmul.bf16.vlgmr.msrb.gmra.mxu0 %v16255_v7  ;;  %3811 = vmatmul.bf16.vlgmr.msrb.gmra.mxu1 %v16261_v17  ;;  %v3401_v23 = vadd.f32 %v16847_v5, %v16645_v43 }
 0x188   : > { %v17172_v27 = vadd.f32 %v3588_v24, %v3556_v19  ;;  %v3495_v9 = vadd.f32 %v3494_v38, %v3462_v31  ;;  %v14306_v19 = vld [vmem:[%s21108_s23 + $0x4a4] sm:$0xf] }
 0x189   : > { %v11188_v0 = vor.u32 %v14306_v19, %v11185_v30  ;;  %v14302_v24 = vld [vmem:[%s21108_s23 + $0x484] sm:$0xf] }
 0x18b   : > { %3871 = vmatpush.bf16.msrb.mxu3 %v11188_v0 }
 0x18c   : > { %3750 = vmatmul.bf16.gmra.mxu3 %v15936_v44  ;;  %3844 = vmatmul.bf16.vlgmr.msrb.gmra.mxu2 %v16509_v25  ;;  %v3527_v22 = vpop.f32.mrf.mxu0  ;;  %v3560_v47 = vpop.f32.mrf.mxu1 }
 0x18d   : > { %v3528_v32 = vadd.f32 %v3527_v22, %v3495_v9  ;;  %v11153_v9 = vld [vmem:[%s21108_s23 + $0x470] sm:$0xf0]  ;;  %v14346_v22 = vld [vmem:[%s21108_s23 + $0x5e4] sm:$0xf] }
 0x18f   : > { %v3497_v33 = vpop.f32.mrf.mxu3  ;;  %v3591_v34 = vpop.f32.mrf.mxu2  ;;  %v3561_v21 = vadd.f32 %v3560_v47, %v3528_v32  ;;  %v11345_v32 = vld [vmem:[%s21108_s23 + $0x5f0] sm:$0xf0] }
 0x190   : > { %v3498_v62 = vadd.f32 %v3497_v33, %v16845_v63  ;;  %v17192_v58 = vadd.f32 %v3591_v34, %v3559_v1  ;;  %v3434_v63 = vadd.f32 %v16849_v59, %v3401_v23  ;;  %v11169_v1 = vld [vmem:[%s21108_s23 + $0x490] sm:$0xf0]  ;;  %v14298_v59 = vld [vmem:[%s21108_s23 + $0x464] sm:$0xf]  ;;  %v11348_v33 = vor.u32 %v14346_v22, %v11345_v32 }
 0x191   : > { %v11172_v2 = vor.u32 %v14302_v24, %v11169_v1  ;;  %v11156_v47 = vor.u32 %v14298_v59, %v11153_v9  ;;  %v14294_v23 = vld [vmem:[%s21108_s23 + $0x444] sm:$0xf]  ;;  %v11329_v1 = vld [vmem:[%s21108_s23 + $0x5d0] sm:$0xf0] }
 0x192   : > { %v3467_v5 = vadd.f32 %v16873_v28, %v3434_v63  ;;  %v14378_v28 = vld [vmem:[%s21108_s23 + $0x6e4] sm:$0xf]  ;;  %3902 = vmatpush.bf16.msra.mxu0 %v11348_v33  ;;  %v11313_v33 = vld [vmem:[%s21108_s23 + $0x5b0] sm:$0xf0] }
 0x193   : > { %3872 = vmatpush.bf16.msrb.mxu3 %v11172_v2  ;;  %v11476_v34 = vor.u32 %v14378_v28, %v11473_v49  ;;  %v14406_v22 = vld [vmem:[%s21108_s23 + $0x7c4] sm:$0xf] }
 0x194   : > { %v3530_v37 = vpop.f32.mrf.mxu0  ;;  %v3563_v46 = vpop.f32.mrf.mxu1  ;;  %v14338_v49 = vld [vmem:[%s21108_s23 + $0x5a4] sm:$0xf] }
 0x195   : > { %v3531_v38 = vadd.f32 %v3530_v37, %v3498_v62  ;;  %v11601_v62 = vld [vmem:[%s21108_s23 + $0x7f0] sm:$0xf0]  ;;  %3935 = vmatpush.bf16.msra.mxu1 %v11476_v34  ;;  %v14370_v34 = vld [vmem:[%s21108_s23 + $0x6a4] sm:$0xf] }
 0x196   : > { %v11604_v30 = vor.u32 %v14410_v45, %v11601_v62  ;;  %v11137_v37 = vld [vmem:[%s21108_s23 + $0x450] sm:$0xf0]  ;;  %v11316_v62 = vor.u32 %v14338_v49, %v11313_v33 }
 0x197   : > { %v3499_v31 = vpop.f32.mrf.mxu3  ;;  %v3593_v53 = vpop.f32.mrf.mxu2  ;;  %v3564_v43 = vadd.f32 %v3563_v46, %v3531_v38  ;;  %3783 = vmatmul.bf16.gmra.mxu0 %v15959_v13  ;;  %3816 = vmatmul.bf16.gmra.mxu1 %v16083_v54  ;;  %v14342_v46 = vld [vmem:[%s21108_s23 + $0x5c4] sm:$0xf]  ;;  %v11140_v24 = vor.u32 %v14294_v23, %v11137_v37  ;;  %v11441_v45 = vld [vmem:[%s21108_s23 + $0x6b0] sm:$0xf0] }
 0x198   : > { %v17209_v26 = vadd.f32 %v3593_v53, %v3561_v21  ;;  %v3500_v11 = vadd.f32 %v3499_v31, %v3467_v5  ;;  %3873 = vmatpush.bf16.msrb.mxu3 %v11156_v47  ;;  %3968 = vmatpush.bf16.msra.mxu2 %v11604_v30  ;;  %v14374_v31 = vld [vmem:[%s21108_s23 + $0x6c4] sm:$0xf]  ;;  %v11457_v53 = vld [vmem:[%s21108_s23 + $0x6d0] sm:$0xf0]  ;;  %v11332_v9 = vor.u32 %v14342_v46, %v11329_v1 }
 0x199   : > { %v11585_v47 = vld [vmem:[%s21108_s23 + $0x7d0] sm:$0xf0]  ;;  %v11460_v32 = vor.u32 %v14374_v31, %v11457_v53 }
 0x19a   : > { %v11588_v28 = vor.u32 %v14406_v22, %v11585_v47  ;;  %3903 = vmatpush.bf16.msra.mxu0 %v11332_v9  ;;  %v11569_v30 = vld [vmem:[%s21108_s23 + $0x7b0] sm:$0xf0]  ;;  %v14366_v9 = vld [vmem:[%s21108_s23 + $0x684] sm:$0xf] }
 0x19b   : > { %3936 = vmatpush.bf16.msra.mxu1 %v11460_v32  ;;  %v11425_v22 = vld [vmem:[%s21108_s23 + $0x690] sm:$0xf0] }
 0x19c   : > { %3755 = vmatmul.bf16.gmra.mxu3 %v15919_v29  ;;  %3849 = vmatmul.bf16.gmra.mxu2 %v16524_v41  ;;  %v3532_v21 = vpop.f32.mrf.mxu0  ;;  %v3565_v19 = vpop.f32.mrf.mxu1  ;;  %v11428_v49 = vor.u32 %v14366_v9, %v11425_v22  ;;  %v11281_v33 = vld [vmem:[%s21108_s23 + $0x570] sm:$0xf0] }
 0x19d   : > { %v3533_v0 = vadd.f32 %v3532_v21, %v3500_v11  ;;  %3874 = vmatpush.bf16.msrb.mxu3 %v11140_v24  ;;  %3969 = vmatpush.bf16.msra.mxu2 %v11588_v28  ;;  %v11444_v21 = vor.u32 %v14370_v34, %v11441_v45  ;;  %v14334_v24 = vld [vmem:[%s21108_s23 + $0x584] sm:$0xf]  ;;  %v11521_v9 = vld [vmem:[%s21108_s23 + $0x750] sm:$0xf0] }
 0x19e   : > { %3904 = vmatpush.bf16.msra.mxu0 %v11316_v62  ;;  %v14362_v34 = vld [vmem:[%s21108_s23 + $0x664] sm:$0xf]  ;;  %v11409_v62 = vld [vmem:[%s21108_s23 + $0x670] sm:$0xf0] }
 0x19f   : > { %v3502_v63 = vpop.f32.mrf.mxu3  ;;  %v3596_v38 = vpop.f32.mrf.mxu2  ;;  %v3566_v59 = vadd.f32 %v3565_v19, %v3533_v0  ;;  %v14402_v19 = vld [vmem:[%s21108_s23 + $0x7a4] sm:$0xf]  ;;  %3937 = vmatpush.bf16.msra.mxu1 %v11444_v21 }
 0x1a0   : > { %v3503_v2 = vadd.f32 %v3502_v63, %v16937_v50  ;;  %v17259_v5 = vadd.f32 %v3596_v38, %v3564_v43  ;;  %v14290_v50 = vld [vmem:[%s21108_s23 + $0x424] sm:$0xf]  ;;  %v11121_v43 = vld [vmem:[%s21108_s23 + $0x430] sm:$0xf0]  ;;  %v11572_v37 = vor.u32 %v14402_v19, %v11569_v30  ;;  %v11412_v30 = vor.u32 %v14362_v34, %v11409_v62 }
 0x1a1   : > { %v11124_v11 = vor.u32 %v14290_v50, %v11121_v43  ;;  %v14286_v63 = vld [vmem:[%s21108_s23 + $0x404] sm:$0xf]  ;;  %v11105_v38 = vld [vmem:[%s21108_s23 + $0x410] sm:$0xf0] }
 0x1a2   : > { %3970 = vmatpush.bf16.msra.mxu2 %v11572_v37  ;;  %v11108_v53 = vor.u32 %v14286_v63, %v11105_v38  ;;  %v14398_v50 = vld [vmem:[%s21108_s23 + $0x784] sm:$0xf]  ;;  %v11553_v43 = vld [vmem:[%s21108_s23 + $0x790] sm:$0xf0] }
 0x1a3   : > { %3875 = vmatpush.bf16.msrb.mxu3 %v11124_v11  ;;  %v11556_v11 = vor.u32 %v14398_v50, %v11553_v43  ;;  %3938 = vmatpush.bf16.msra.mxu1 %v11428_v49  ;;  %v14394_v21 = vld [vmem:[%s21108_s23 + $0x764] sm:$0xf]  ;;  %v11537_v19 = vld [vmem:[%s21108_s23 + $0x770] sm:$0xf0] }
 0x1a4   : > { %v3535_v0 = vpop.f32.mrf.mxu0  ;;  %v3568_v23 = vpop.f32.mrf.mxu1  ;;  %v11265_v63 = vld [vmem:[%s21108_s23 + $0x550] sm:$0xf0]  ;;  %v14358_v38 = vld [vmem:[%s21108_s23 + $0x644] sm:$0xf] }
 0x1a5   : > { %v3536_v46 = vadd.f32 %v3535_v0, %v3503_v2  ;;  %v11297_v2 = vld [vmem:[%s21108_s23 + $0x590] sm:$0xf0]  ;;  %v11540_v0 = vor.u32 %v14394_v21, %v11537_v19  ;;  %v14322_v49 = vld [vmem:[%s21108_s23 + $0x524] sm:$0xf] }
 0x1a6   : > { %v11300_v28 = vor.u32 %v14334_v24, %v11297_v2  ;;  %3971 = vmatpush.bf16.msra.mxu2 %v11556_v11  ;;  %v14390_v2 = vld [vmem:[%s21108_s23 + $0x744] sm:$0xf]  ;;  %v11249_v11 = vld [vmem:[%s21108_s23 + $0x530] sm:$0xf0] }
 0x1a7   : > { %v3504_v1 = vpop.f32.mrf.mxu3  ;;  %v3598_v31 = vpop.f32.mrf.mxu2  ;;  %v3569_v32 = vadd.f32 %v3568_v23, %v3536_v46  ;;  %3788 = vmatmul.bf16.gmra.mxu0 %v16025_v60  ;;  %3821 = vmatmul.bf16.gmra.mxu1 %v16159_v39  ;;  %v14326_v46 = vld [vmem:[%s21108_s23 + $0x544] sm:$0xf]  ;;  %v11524_v43 = vor.u32 %v14390_v2, %v11521_v9  ;;  %v11505_v34 = vld [vmem:[%s21108_s23 + $0x730] sm:$0xf0] }
 0x1a8   : > { %v17309_v47 = vadd.f32 %v3598_v31, %v3566_v59  ;;  %3876 = vmatpush.bf16.msrb.mxu3 %v11108_v53  ;;  %3905 = vmatpush.bf16.msra.mxu0 %v11300_v28  ;;  %v14330_v59 = vld [vmem:[%s21108_s23 + $0x564] sm:$0xf]  ;;  %v11268_v31 = vor.u32 %v14326_v46, %v11265_v63  ;;  %v11393_v53 = vld [vmem:[%s21108_s23 + $0x650] sm:$0xf0] }
 0x1a9   : > { %v11284_v45 = vor.u32 %v14330_v59, %v11281_v33  ;;  %3939 = vmatpush.bf16.msra.mxu1 %v11412_v30  ;;  %v11396_v50 = vor.u32 %v14358_v38, %v11393_v53  ;;  %v14354_v59 = vld [vmem:[%s21108_s23 + $0x624] sm:$0xf] }
 0x1aa   : > { %3972 = vmatpush.bf16.msra.mxu2 %v11540_v0  ;;  %v14386_v33 = vld [vmem:[%s21108_s23 + $0x724] sm:$0xf] }
 0x1ab   : > { %v11508_v62 = vor.u32 %v14386_v33, %v11505_v34  ;;  %v14318_v0 = vld [vmem:[%s21108_s23 + $0x504] sm:$0xf] }
 0x1ac   : > { %3760 = vmatmul.bf16.gmra.mxu3 %v15925_v35  ;;  %3854 = vmatmul.bf16.gmra.mxu2 %v16566_v4  ;;  %v3537_v23 = vpop.f32.mrf.mxu0  ;;  %v3570_v37 = vpop.f32.mrf.mxu1 }
 0x1ad   : > { %3906 = vmatpush.bf16.msra.mxu0 %v11284_v45  ;;  %3940 = vmatpush.bf16.msra.mxu1 %v11396_v50  ;;  %v11233_v23 = vld [vmem:[%s21108_s23 + $0x510] sm:$0xf0]  ;;  %v14350_v37 = vld [vmem:[%s21108_s23 + $0x604] sm:$0xf] }
 0x1ae   : > { %3973 = vmatpush.bf16.msra.mxu2 %v11524_v43  ;;  %v11236_v38 = vor.u32 %v14318_v0, %v11233_v23 }
 0x1af   : > { %v3601_v24 = vpop.f32.mrf.mxu2  ;;  %v3614_v1 = vpop.f32.mrf.mxu3 }
 0x1b0   : > { %v17357_v22 = vadd.f32 %v3601_v24, %v3569_v32  ;;  %v3615_v28 = vadd.f32 %v3614_v1, %v17153_v3  ;;  %v11252_v32 = vor.u32 %v14322_v49, %v11249_v11  ;;  %v11377_v3 = vld [vmem:[%s21108_s23 + $0x630] sm:$0xf0]  ;;  %v14382_v1 = vld [vmem:[%s21108_s23 + $0x704] sm:$0xf] }
 0x1b1   : > { %3907 = vmatpush.bf16.msra.mxu0 %v11268_v31  ;;  %v11380_v45 = vor.u32 %v14354_v59, %v11377_v3  ;;  %v11361_v24 = vld [vmem:[%s21108_s23 + $0x610] sm:$0xf0] }
 0x1b2   : > { %3974 = vmatpush.bf16.msra.mxu2 %v11508_v62  ;;  %v11489_v31 = vld [vmem:[%s21108_s23 + $0x710] sm:$0xf0]  ;;  %v11364_v9 = vor.u32 %v14350_v37, %v11361_v24 }
 0x1b3   : > { %3941 = vmatpush.bf16.msra.mxu1 %v11380_v45 }
 0x1b4   : > { %v3647_v21 = vpop.f32.mrf.mxu0  ;;  %v3680_v19 = vpop.f32.mrf.mxu1 }
 0x1b5   : > { %v3648_v30 = vadd.f32 %v3647_v21, %v3615_v28  ;;  %3908 = vmatpush.bf16.msra.mxu0 %v11252_v32  ;;  %v11492_v28 = vor.u32 %v14382_v1, %v11489_v31 }
 0x1b7   : > { %v3603_v46 = vpop.f32.mrf.mxu2  ;;  %v3616_v63 = vpop.f32.mrf.mxu3  ;;  %v3681_v2 = vadd.f32 %v3680_v19, %v3648_v30  ;;  %3793 = vmatmul.bf16.gmra.mxu0 %v16075_v51  ;;  %3826 = vmatmul.bf16.gmra.mxu1 %v16240_v55 }
 0x1b8   : > { %v3617_v53 = vadd.f32 %v3616_v63, %v17158_v56  ;;  %3942 = vmatpush.bf16.msra.mxu1 %v11364_v9  ;;  %3975 = vmatpush.bf16.msra.mxu2 %v11492_v28 }
 0x1b9   : > { %3909 = vmatpush.bf16.msra.mxu0 %v11236_v38 }
 0x1bc   : > { %3765 = vmatmul.bf16.gmra.mxu3 %v16489_v10  ;;  %3859 = vmatmul.bf16.gmra.mxu2 %v16660_v61  ;;  %v3649_v50 = vpop.f32.mrf.mxu0  ;;  %v3682_v43 = vpop.f32.mrf.mxu1 }
 0x1bd   : > { %v3650_v49 = vadd.f32 %v3649_v50, %v3617_v53 }
 0x1bf   : > { %v3619_v11 = vpop.f32.mrf.mxu3  ;;  %v3713_v59 = vpop.f32.mrf.mxu2  ;;  %v3683_v3 = vadd.f32 %v3682_v43, %v3650_v49  ;;  %v21152_v49 = vld [vmem:[#allocation37_spill] sm:$0xff] }
 0x1c0   : > { %v3620_v56 = vadd.f32 %v3619_v11, %v17167_v12  ;;  %v17402_v32 = vadd.f32 %v3713_v59, %v3681_v2  ;;  %v11729_v11 = vld [vmem:[%s21108_s23 + $0x8f0] sm:$0xf0] }
 0x1c2   : > { %21148 = vst [vmem:[#allocation66_spill] sm:$0xff] %v17402_v32  ;;  %v21173_v32 = vld [vmem:[#allocation49_spill] sm:$0xff] }
 0x1c4   : > { %v3652_v33 = vpop.f32.mrf.mxu0  ;;  %v3685_v34 = vpop.f32.mrf.mxu1 }
 0x1c5   : > { %v3653_v45 = vadd.f32 %v3652_v33, %v3620_v56  ;;  %v21153_v56 = vld [vmem:[#allocation39_spill] sm:$0xff] }
 0x1c7   : > { %v3621_v62 = vpop.f32.mrf.mxu3  ;;  %v3715_v21 = vpop.f32.mrf.mxu2  ;;  %v3686_v0 = vadd.f32 %v3685_v34, %v3653_v45  ;;  %3798 = vmatmul.bf16.gmra.mxu0 %v16493_v16  ;;  %3831 = vmatmul.bf16.gmra.mxu1 %v16497_v20  ;;  %v14438_v45 = vld [vmem:[%s21108_s23 + $0x8c4] sm:$0xf] }
 0x1c8   : > { %v3622_v19 = vadd.f32 %v3621_v62, %v17172_v27  ;;  %v17405_v30 = vadd.f32 %v3715_v21, %v3683_v3  ;;  %v21154_v3 = vld [vmem:[#allocation50_spill] sm:$0xff] }
 0x1c9   : > { %v11713_v62 = vld [vmem:[%s21108_s23 + $0x8d0] sm:$0xf0] }
 0x1ca   : > { %21149 = vst [vmem:[#allocation67_spill] sm:$0xff] %v17405_v30  ;;  %v21172_v30 = vld [vmem:[#allocation47_spill] sm:$0xff] }
 0x1cc   : > { %3864 = vmatmul.bf16.gmra.mxu2 %v16763_v14  ;;  %3877 = vmatmul.bf16.vlgmr.msrb.gmra.mxu3 %v16515_v6  ;;  %v3654_v12 = vpop.f32.mrf.mxu0  ;;  %v3687_v23 = vpop.f32.mrf.mxu1 }
 0x1cd   : > { %v3655_v37 = vadd.f32 %v3654_v12, %v3622_v19 }
 0x1cf   : > { %v3624_v46 = vpop.f32.mrf.mxu3  ;;  %v3718_v63 = vpop.f32.mrf.mxu2  ;;  %v3688_v27 = vadd.f32 %v3687_v23, %v3655_v37 }
 0x1d0   : > { %v3625_v38 = vadd.f32 %v3624_v46, %v17192_v58  ;;  %v17412_v24 = vadd.f32 %v3718_v63, %v3686_v0  ;;  %v14442_v58 = vld [vmem:[%s21108_s23 + $0x8e4] sm:$0xf]  ;;  %v11716_v0 = vor.u32 %v14438_v45, %v11713_v62  ;;  %v11697_v63 = vld [vmem:[%s21108_s23 + $0x8b0] sm:$0xf0] }
 0x1d1   : > { %v11732_v59 = vor.u32 %v14442_v58, %v11729_v11  ;;  %v14434_v46 = vld [vmem:[%s21108_s23 + $0x8a4] sm:$0xf]  ;;  %v11857_v62 = vld [vmem:[%s21108_s23 + $0x9f0] sm:$0xf0] }
 0x1d2   : > { %21150 = vst [vmem:[#allocation68_spill] sm:$0xff] %v17412_v24 }
 0x1d3   : > { %4001 = vmatpush.bf16.msra.mxu3 %v11732_v59  ;;  %v21157_v59 = vld [vmem:[#allocation38_spill] sm:$0xff] }
 0x1d4   : > { %v3657_v1 = vpop.f32.mrf.mxu0  ;;  %v3690_v31 = vpop.f32.mrf.mxu1 }
 0x1d5   : > { %v3658_v53 = vadd.f32 %v3657_v1, %v3625_v38  ;;  %v11700_v38 = vor.u32 %v14434_v46, %v11697_v63 }
 0x1d7   : > { %v3626_v2 = vpop.f32.mrf.mxu3  ;;  %v3720_v9 = vpop.f32.mrf.mxu2  ;;  %v3691_v43 = vadd.f32 %v3690_v31, %v3658_v53  ;;  %3910 = vmatmul.bf16.vlgmr.msra.gmra.mxu0 %v16518_v36  ;;  %3943 = vmatmul.bf16.vlgmr.msra.gmra.mxu1 %v21152_v49  ;;  %v11681_v53 = vld [vmem:[%s21108_s23 + $0x890] sm:$0xf0] }
 0x1d8   : > { %v3627_v28 = vadd.f32 %v3626_v2, %v17209_v26  ;;  %v17415_v50 = vadd.f32 %v3720_v9, %v3688_v27  ;;  %4002 = vmatpush.bf16.msra.mxu3 %v11716_v0  ;;  %v21160_v0 = vld [vmem:[#allocation53_spill] sm:$0xff] }
 0x1da   : > { %21151 = vst [vmem:[#allocation69_spill] sm:$0xff] %v17415_v50 }
 0x1dc   : > { %3882 = vmatmul.bf16.gmra.mxu3 %v21153_v56  ;;  %3976 = vmatmul.bf16.vlgmr.msra.gmra.mxu2 %v21154_v3  ;;  %v3659_v26 = vpop.f32.mrf.mxu0  ;;  %v3692_v33 = vpop.f32.mrf.mxu1 }
 0x1dd   : > { %v3660_v34 = vadd.f32 %v3659_v26, %v3627_v28  ;;  %4003 = vmatpush.bf16.msra.mxu3 %v11700_v38  ;;  %v21158_v26 = vld [vmem:[#allocation40_spill] sm:$0xff] }
 0x1df   : > { %v3629_v21 = vpop.f32.mrf.mxu3  ;;  %v3723_v19 = vpop.f32.mrf.mxu2  ;;  %v3693_v37 = vadd.f32 %v3692_v33, %v3660_v34  ;;  %v14426_v33 = vld [vmem:[%s21108_s23 + $0x864] sm:$0xf]  ;;  %v11665_v34 = vld [vmem:[%s21108_s23 + $0x870] sm:$0xf0] }
 0x1e0   : > { %v3630_v12 = vadd.f32 %v3629_v21, %v17259_v5  ;;  %v17434_v23 = vadd.f32 %v3723_v19, %v3691_v43  ;;  %v14430_v5 = vld [vmem:[%s21108_s23 + $0x884] sm:$0xf]  ;;  %v11668_v45 = vor.u32 %v14426_v33, %v11665_v34  ;;  %v10711_v21 = vld [vmem:[%s21108_s23 + $0xe8] sm:$0xf]  ;;  %v21159_v19 = vld [vmem:[#allocation42_spill] sm:$0xff] }
 0x1e1   : > { %v11684_v28 = vor.u32 %v14430_v5, %v11681_v53  ;;  %v14470_v5 = vld [vmem:[%s21108_s23 + $0x9c4] sm:$0xf]  ;;  %v14185_v33 = vld [vmem:[%s21108_s23 + $0xd4] sm:$0xf0] }
 0x1e2   : > { %21155 = vst [vmem:[#allocation37_spill] sm:$0xff] %v17434_v23 }
 0x1e3   : > { %4004 = vmatpush.bf16.msra.mxu3 %v11684_v28  ;;  %v11841_v28 = vld [vmem:[%s21108_s23 + $0x9d0] sm:$0xf0] }
 0x1e4   : > { %v3662_v27 = vpop.f32.mrf.mxu0  ;;  %v3695_v1 = vpop.f32.mrf.mxu1 }
 0x1e5   : > { %v3663_v31 = vadd.f32 %v3662_v27, %v3630_v12 }
 0x1e7   : > { %v3631_v2 = vpop.f32.mrf.mxu3  ;;  %v3725_v9 = vpop.f32.mrf.mxu2  ;;  %v3696_v11 = vadd.f32 %v3695_v1, %v3663_v31  ;;  %3915 = vmatmul.bf16.gmra.mxu0 %v21157_v59  ;;  %3948 = vmatmul.bf16.gmra.mxu1 %v21158_v26  ;;  %v14422_v1 = vld [vmem:[%s21108_s23 + $0x844] sm:$0xf]  ;;  %v11649_v31 = vld [vmem:[%s21108_s23 + $0x850] sm:$0xf0] }
 0x1e8   : > { %v3632_v43 = vadd.f32 %v3631_v2, %v17309_v47  ;;  %v17449_v58 = vadd.f32 %v3725_v9, %v3693_v37  ;;  %v14474_v47 = vld [vmem:[%s21108_s23 + $0x9e4] sm:$0xf]  ;;  %v14189_v37 = vld [vmem:[%s21108_s23 + $0xf4] sm:$0xf0]  ;;  %4005 = vmatpush.bf16.msra.mxu3 %v11668_v45  ;;  %v11652_v9 = vor.u32 %v14422_v1, %v11649_v31 }
 0x1e9   : > { %v11860_v12 = vor.u32 %v14474_v47, %v11857_v62  ;;  %v10712_v38 = vor.u32 %v14189_v37, %v10711_v21  ;;  %v11844_v62 = vor.u32 %v14470_v5, %v11841_v28  ;;  %v14418_v21 = vld [vmem:[%s21108_s23 + $0x824] sm:$0xf] }
 0x1ea   : > { %21156 = vst [vmem:[#allocation39_spill] sm:$0xff] %v17449_v58  ;;  %v14466_v37 = vld [vmem:[%s21108_s23 + $0x9a4] sm:$0xf] }
 0x1eb   : > { %4034 = vmatpush.bf16.msrb.mxu0 %v11860_v12  ;;  %4100 = vmatpush.bf16.msrb.mxu2 %v10712_v38  ;;  %v11633_v12 = vld [vmem:[%s21108_s23 + $0x830] sm:$0xf0]  ;;  %v14462_v28 = vld [vmem:[%s21108_s23 + $0x984] sm:$0xf] }
 0x1ec   : > { %3887 = vmatmul.bf16.gmra.mxu3 %v21159_v19  ;;  %3981 = vmatmul.bf16.gmra.mxu2 %v21160_v0  ;;  %v3664_v46 = vpop.f32.mrf.mxu0  ;;  %v3697_v63 = vpop.f32.mrf.mxu1  ;;  %v11636_v38 = vor.u32 %v14418_v21, %v11633_v12  ;;  %v10663_v21 = vld [vmem:[%s21108_s23 + $0x88] sm:$0xf]  ;;  %v14177_v12 = vld [vmem:[%s21108_s23 + $0x94] sm:$0xf0]  ;;  %v14446_v58 = vld [vmem:[%s21108_s23 + $0x904] sm:$0xf] }
 0x1ed   : > { %v3665_v27 = vadd.f32 %v3664_v46, %v3632_v43  ;;  %v10695_v43 = vld [vmem:[%s21108_s23 + $0xc8] sm:$0xf]  ;;  %4006 = vmatpush.bf16.msra.mxu3 %v11652_v9  ;;  %v11617_v9 = vld [vmem:[%s21108_s23 + $0x810] sm:$0xf0] }
 0x1ee   : > { %v10696_v46 = vor.u32 %v14185_v33, %v10695_v43 }
 0x1ef   : > { %v3634_v53 = vpop.f32.mrf.mxu3  ;;  %v3728_v2 = vpop.f32.mrf.mxu2  ;;  %v3698_v47 = vadd.f32 %v3697_v63, %v3665_v27  ;;  %v14181_v63 = vld [vmem:[%s21108_s23 + $0xb4] sm:$0xf0]  ;;  %4035 = vmatpush.bf16.msrb.mxu0 %v11844_v62 }
 0x1f0   : > { %v3635_v34 = vadd.f32 %v3634_v53, %v17357_v22  ;;  %v17492_v45 = vadd.f32 %v3728_v2, %v3696_v11  ;;  %v11825_v22 = vld [vmem:[%s21108_s23 + $0x9b0] sm:$0xf0]  ;;  %v10679_v11 = vld [vmem:[%s21108_s23 + $0xa8] sm:$0xf]  ;;  %4101 = vmatpush.bf16.msrb.mxu2 %v10696_v46  ;;  %v14414_v2 = vld [vmem:[%s21108_s23 + $0x804] sm:$0xf] }
 0x1f1   : > { %v11828_v27 = vor.u32 %v14466_v37, %v11825_v22  ;;  %v10680_v1 = vor.u32 %v14181_v63, %v10679_v11  ;;  %4007 = vmatpush.bf16.msra.mxu3 %v11636_v38  ;;  %v11620_v62 = vor.u32 %v14414_v2, %v11617_v9  ;;  %v21163_v38 = vld [vmem:[#allocation41_spill] sm:$0xff]  ;;  %v21164_v22 = vld [vmem:[#allocation43_spill] sm:$0xff]  ;;  %v10664_v63 = vor.u32 %v14177_v12, %v10663_v21 }
 0x1f2   : > { %21161 = vst [vmem:[#allocation50_spill] sm:$0xff] %v17492_v45  ;;  %v21165_v2 = vld [vmem:[#allocation45_spill] sm:$0xff] }
 0x1f3   : > { %4036 = vmatpush.bf16.msrb.mxu0 %v11828_v27  ;;  %v14458_v27 = vld [vmem:[%s21108_s23 + $0x964] sm:$0xf]  ;;  %v21166_v9 = vld [vmem:[#allocation57_spill] sm:$0xff] }
 0x1f4   : > { %v3667_v31 = vpop.f32.mrf.mxu0  ;;  %v3700_v5 = vpop.f32.mrf.mxu1  ;;  %4102 = vmatpush.bf16.msrb.mxu2 %v10680_v1  ;;  %v11793_v1 = vld [vmem:[%s21108_s23 + $0x970] sm:$0xf0] }
 0x1f5   : > { %v3668_v53 = vadd.f32 %v3667_v31, %v3635_v34  ;;  %v11809_v34 = vld [vmem:[%s21108_s23 + $0x990] sm:$0xf0]  ;;  %4008 = vmatpush.bf16.msra.mxu3 %v11620_v62  ;;  %v14490_v31 = vld [vmem:[%s21108_s23 + $0xa64] sm:$0xf] }
 0x1f6   : > { %v11812_v11 = vor.u32 %v14462_v28, %v11809_v34 }
 0x1f7   : > { %v3636_v43 = vpop.f32.mrf.mxu3  ;;  %v3730_v33 = vpop.f32.mrf.mxu2  ;;  %v3701_v46 = vadd.f32 %v3700_v5, %v3668_v53  ;;  %3920 = vmatmul.bf16.gmra.mxu0 %v21163_v38  ;;  %3953 = vmatmul.bf16.gmra.mxu1 %v21164_v22  ;;  %v11921_v5 = vld [vmem:[%s21108_s23 + $0xa70] sm:$0xf0]  ;;  %v10647_v53 = vld [vmem:[%s21108_s23 + $0x68] sm:$0xf] }
 0x1f8   : > { %v17530_v37 = vadd.f32 %v3730_v33, %v3698_v47  ;;  %4037 = vmatpush.bf16.msrb.mxu0 %v11812_v11  ;;  %4103 = vmatpush.bf16.msrb.mxu2 %v10664_v63  ;;  %v11796_v47 = vor.u32 %v14458_v27, %v11793_v1  ;;  %v11924_v28 = vor.u32 %v14490_v31, %v11921_v5  ;;  %v14173_v43 = vld [vmem:[%s21108_s23 + $0x74] sm:$0xf0]  ;;  %v15190_v33 = vld [vmem:[#allocation11] sm:$0xf]  ;;  %v14454_v11 = vld [vmem:[%s21108_s23 + $0x944] sm:$0xf] }
 0x1f9   : > { %v17554_v62 = vperm.slane %v15190_v33, 1  ;;  %v10648_v12 = vor.u32 %v14173_v43, %v10647_v53  ;;  %v11777_v63 = vld [vmem:[%s21108_s23 + $0x950] sm:$0xf0]  ;;  %v14486_v27 = vld [vmem:[%s21108_s23 + $0xa44] sm:$0xf] }
 0x1fa   : > { %21162 = vst [vmem:[#allocation38_spill] sm:$0xff] %v17530_v37  ;;  %4071 = vmatpush.bf16.msrb.mxu1 %v11924_v28  ;;  %v11780_v5 = vor.u32 %v14454_v11, %v11777_v63  ;;  %v10631_v53 = vld [vmem:[%s21108_s23 + $0x48] sm:$0xf]  ;;  %v14169_v28 = vld [vmem:[%s21108_s23 + $0x54] sm:$0xf0] }
 0x1fb   : > { %v14482_v11 = vld [vmem:[%s21108_s23 + $0xa24] sm:$0xf]  ;;  %v11889_v63 = vld [vmem:[%s21108_s23 + $0xa30] sm:$0xf0] }
 0x1fc   : > { %3892 = vmatmul.bf16.gmra.mxu3 %v21165_v2  ;;  %3986 = vmatmul.bf16.gmra.mxu2 %v21166_v9  ;;  %v3669_v34 = vpop.f32.mrf.mxu0  ;;  %v3702_v21 = vpop.f32.mrf.mxu1 }
 0x1fd   : > { %4038 = vmatpush.bf16.msrb.mxu0 %v11796_v47  ;;  %4104 = vmatpush.bf16.msrb.mxu2 %v10648_v12  ;;  %v11905_v47 = vld [vmem:[%s21108_s23 + $0xa50] sm:$0xf0]  ;;  %v10632_v34 = vor.u32 %v14169_v28, %v10631_v53  ;;  %v14450_v21 = vld [vmem:[%s21108_s23 + $0x924] sm:$0xf] }
 0x1fe   : > { %v11908_v33 = vor.u32 %v14486_v27, %v11905_v47  ;;  %v11761_v12 = vld [vmem:[%s21108_s23 + $0x930] sm:$0xf0]  ;;  %v14165_v27 = vld [vmem:[%s21108_s23 + $0x34] sm:$0xf0]  ;;  %v11892_v47 = vor.u32 %v14482_v11, %v11889_v63 }
 0x1ff   : > { %v3733_v1 = vpop.f32.mrf.mxu2  ;;  %v3746_v31 = vpop.f32.mrf.mxu3  ;;  %v14161_v11 = vld [vmem:[%s21108_s23 + $0x14] sm:$0xf0] }
 0x200   : > { %v17574_v43 = vadd.f32 %v3733_v1, %v3701_v46  ;;  %v10615_v46 = vld [vmem:[%s21108_s23 + $0x28] sm:$0xf]  ;;  %4072 = vmatpush.bf16.msrb.mxu1 %v11908_v33  ;;  %v11764_v1 = vor.u32 %v14450_v21, %v11761_v12  ;;  %v3747_v28 = vadd.f32 %v3746_v31, %v17554_v62  ;;  %v14478_v33 = vld [vmem:[%s21108_s23 + $0xa04] sm:$0xf] }
 0x201   : > { %4039 = vmatpush.bf16.msrb.mxu0 %v11780_v5  ;;  %4105 = vmatpush.bf16.msrb.mxu2 %v10632_v34  ;;  %v10616_v53 = vor.u32 %v14165_v27, %v10615_v46  ;;  %v11745_v5 = vld [vmem:[%s21108_s23 + $0x910] sm:$0xf0]  ;;  %v10599_v12 = vld [vmem:[%s21108_s23 + $0x8] sm:$0xf] }
 0x202   : > { %21167 = vst [vmem:[#allocation40_spill] sm:$0xff] %v17574_v43  ;;  %v11748_v31 = vor.u32 %v14446_v58, %v11745_v5  ;;  %v21168_v46 = vld [vmem:[#allocation44_spill] sm:$0xff]  ;;  %v21169_v27 = vld [vmem:[#allocation46_spill] sm:$0xff] }
 0x204   : > { %v3779_v43 = vpop.f32.mrf.mxu0  ;;  %v3812_v37 = vpop.f32.mrf.mxu1  ;;  %4073 = vmatpush.bf16.msrb.mxu1 %v11892_v47  ;;  %v10600_v47 = vor.u32 %v14161_v11, %v10599_v12 }
 0x205   : > { %v3780_v45 = vadd.f32 %v3779_v43, %v3747_v28  ;;  %4040 = vmatpush.bf16.msrb.mxu0 %v11764_v1  ;;  %4106 = vmatpush.bf16.msrb.mxu2 %v10616_v53  ;;  %v11873_v43 = vld [vmem:[%s21108_s23 + $0xa10] sm:$0xf0]  ;;  %v21170_v53 = vld [vmem:[#allocation48_spill] sm:$0xff] }
 0x206   : > { %v11876_v1 = vor.u32 %v14478_v33, %v11873_v43  ;;  %v21171_v28 = vld [vmem:[#allocation62_spill] sm:$0xff] }
 0x207   : > { %v3735_v34 = vpop.f32.mrf.mxu2  ;;  %v3748_v21 = vpop.f32.mrf.mxu3  ;;  %v3813_v63 = vadd.f32 %v3812_v37, %v3780_v45  ;;  %3925 = vmatmul.bf16.gmra.mxu0 %v21168_v46  ;;  %3958 = vmatmul.bf16.gmra.mxu1 %v21169_v27  ;;  %v21176_v27 = vld [vmem:[#allocation54_spill] sm:$0xff] }
 0x208   : > { %4074 = vmatpush.bf16.msrb.mxu1 %v11876_v1  ;;  %v3749_v58 = vadd.f32 %v3748_v21, %v17554_v62 }
 0x209   : > { %4041 = vmatpush.bf16.msrb.mxu0 %v11748_v31  ;;  %4107 = vmatpush.bf16.msrb.mxu2 %v10600_v47 }
 0x20c   : > { %3897 = vmatmul.bf16.gmra.mxu3 %v21170_v53  ;;  %3991 = vmatmul.bf16.gmra.mxu2 %v21171_v28  ;;  %v3781_v5 = vpop.f32.mrf.mxu0  ;;  %v3814_v34 = vpop.f32.mrf.mxu1  ;;  %v21175_v28 = vld [vmem:[#allocation52_spill] sm:$0xff] }
 0x20d   : > { %v3782_v23 = vadd.f32 %v3781_v5, %v3749_v58 }
 0x20f   : > { %v3751_v50 = vpop.f32.mrf.mxu3  ;;  %v3845_v45 = vpop.f32.mrf.mxu2  ;;  %v3815_v24 = vadd.f32 %v3814_v34, %v3782_v23 }
 0x210   : > { %v17618_v37 = vadd.f32 %v3845_v45, %v3813_v63  ;;  %v3752_v33 = vadd.f32 %v3751_v50, %v17554_v62  ;;  %v21174_v63 = vld [vmem:[#allocation51_spill] sm:$0xff] }
 0x214   : > { %v3784_v43 = vpop.f32.mrf.mxu0  ;;  %v3817_v31 = vpop.f32.mrf.mxu1 }
 0x215   : > { %v3785_v12 = vadd.f32 %v3784_v43, %v3752_v33 }
 0x217   : > { %v3753_v11 = vpop.f32.mrf.mxu3  ;;  %v3847_v1 = vpop.f32.mrf.mxu2  ;;  %v3818_v47 = vadd.f32 %v3817_v31, %v3785_v12  ;;  %3930 = vmatmul.bf16.gmra.mxu0 %v21172_v30  ;;  %3963 = vmatmul.bf16.gmra.mxu1 %v21173_v32 }
 0x218   : > { %v17621_v21 = vadd.f32 %v3847_v1, %v3815_v24  ;;  %v3754_v58 = vadd.f32 %v3753_v11, %v17554_v62 }
 0x21c   : > { %3996 = vmatmul.bf16.gmra.mxu2 %v16981_v52  ;;  %4009 = vmatmul.bf16.vlgmr.msra.gmra.mxu3 %v21174_v63  ;;  %v3786_v23 = vpop.f32.mrf.mxu0  ;;  %v3819_v50 = vpop.f32.mrf.mxu1 }
 0x21d   : > { %v3787_v5 = vadd.f32 %v3786_v23, %v3754_v58  ;;  %v14221_v58 = vld [vmem:[%s21108_s23 + $0x1f4] sm:$0xf0] }
 0x21f   : > { %v3756_v34 = vpop.f32.mrf.mxu3  ;;  %v3850_v45 = vpop.f32.mrf.mxu2  ;;  %v3820_v24 = vadd.f32 %v3819_v50, %v3787_v5  ;;  %v21177_v5 = vld [vmem:[#allocation55_spill] sm:$0xff] }
 0x220   : > { %v17628_v33 = vadd.f32 %v3850_v45, %v3818_v47  ;;  %v3757_v43 = vadd.f32 %v3756_v34, %v17554_v62  ;;  %v10839_v47 = vld [vmem:[%s21108_s23 + $0x1e8] sm:$0xf] }
 0x221   : > { %v10840_v23 = vor.u32 %v14221_v58, %v10839_v47  ;;  %v10807_v58 = vld [vmem:[%s21108_s23 + $0x1a8] sm:$0xf] }
 0x223   : > { %4133 = vmatpush.bf16.msrb.mxu3 %v10840_v23  ;;  %v14213_v23 = vld [vmem:[%s21108_s23 + $0x1b4] sm:$0xf0] }
 0x224   : > { %v3789_v31 = vpop.f32.mrf.mxu0  ;;  %v3822_v12 = vpop.f32.mrf.mxu1 }
 0x225   : > { %v3790_v1 = vadd.f32 %v3789_v31, %v3757_v43  ;;  %v14217_v43 = vld [vmem:[%s21108_s23 + $0x1d4] sm:$0xf0] }
 0x227   : > { %v3758_v32 = vpop.f32.mrf.mxu3  ;;  %v3852_v30 = vpop.f32.mrf.mxu2  ;;  %v3823_v52 = vadd.f32 %v3822_v12, %v3790_v1  ;;  %4042 = vmatmul.bf16.vlgmr.msrb.gmra.mxu0 %v21175_v28  ;;  %11938 = vmatmul.msk.bf16.vlgmr.msrb.gmra.mxu1 %vm1212_vm1, %v21176_v27 }
 0x228   : > { %v17631_v11 = vadd.f32 %v3852_v30, %v3820_v24  ;;  %v3759_v50 = vadd.f32 %v3758_v32, %v17554_v62  ;;  %v10823_v24 = vld [vmem:[%s21108_s23 + $0x1c8] sm:$0xf] }
 0x229   : > { %v10824_v1 = vor.u32 %v14217_v43, %v10823_v24 }
 0x22b   : > { %4134 = vmatpush.bf16.msrb.mxu3 %v10824_v1 }
 0x22c   : > { %4014 = vmatmul.bf16.gmra.mxu3 %v21177_v5  ;;  %4108 = vmatmul.bf16.vlgmr.msrb.gmra.mxu2 %v16250_v15  ;;  %v3791_v30 = vpop.f32.mrf.mxu0  ;;  %v3824_v34 = vpop.f32.mrf.mxu1 }
 0x22d   : > { %v3792_v45 = vadd.f32 %v3791_v30, %v3759_v50  ;;  %v10808_v50 = vor.u32 %v14213_v23, %v10807_v58  ;;  %v21178_v58 = vld [vmem:[#allocation56_spill] sm:$0xff]  ;;  %v14205_v23 = vld [vmem:[%s21108_s23 + $0x174] sm:$0xf0] }
 0x22f   : > { %v3761_v31 = vpop.f32.mrf.mxu3  ;;  %v3855_v12 = vpop.f32.mrf.mxu2  ;;  %v3825_v47 = vadd.f32 %v3824_v34, %v3792_v45  ;;  %4135 = vmatpush.bf16.msrb.mxu3 %v10808_v50  ;;  %v14209_v34 = vld [vmem:[%s21108_s23 + $0x194] sm:$0xf0] }
 0x230   : > { %v17651_v32 = vadd.f32 %v3855_v12, %v3823_v52  ;;  %v3762_v30 = vadd.f32 %v3761_v31, %v17554_v62  ;;  %v10791_v52 = vld [vmem:[%s21108_s23 + $0x188] sm:$0xf]  ;;  %v21179_v31 = vld [vmem:[#allocation58_spill] sm:$0xff] }
 0x231   : > { %v10792_v43 = vor.u32 %v14209_v34, %v10791_v52  ;;  %v21180_v34 = vld [vmem:[#allocation60_spill] sm:$0xff] }
 0x233   : > { %4136 = vmatpush.bf16.msrb.mxu3 %v10792_v43 }
 0x234   : > { %v3794_v15 = vpop.f32.mrf.mxu0  ;;  %v3827_v27 = vpop.f32.mrf.mxu1 }
 0x235   : > { %v3795_v28 = vadd.f32 %v3794_v15, %v3762_v30  ;;  %v10775_v15 = vld [vmem:[%s21108_s23 + $0x168] sm:$0xf]  ;;  %v14285_v30 = vld [vmem:[%s21108_s23 + $0x3f4] sm:$0xf0] }
 0x236   : > { %v10776_v50 = vor.u32 %v14205_v23, %v10775_v15  ;;  %v11223_v15 = vld [vmem:[%s21108_s23 + $0x4e8] sm:$0xf]  ;;  %v14317_v23 = vld [vmem:[%s21108_s23 + $0x4f4] sm:$0xf0] }
 0x237   : > { %v3763_v45 = vpop.f32.mrf.mxu3  ;;  %v3857_v24 = vpop.f32.mrf.mxu2  ;;  %v3828_v1 = vadd.f32 %v3827_v27, %v3795_v28  ;;  %4047 = vmatmul.bf16.gmra.mxu0 %v21178_v58  ;;  %11939 = vmatmul.msk.bf16.gmra.mxu1 %vm1212_vm1, %v21179_v31  ;;  %v14253_v27 = vld [vmem:[%s21108_s23 + $0x2f4] sm:$0xf0]  ;;  %v11095_v28 = vld [vmem:[%s21108_s23 + $0x3e8] sm:$0xf]  ;;  %v11224_v46 = vor.u32 %v14317_v23, %v11223_v15 }
 0x238   : > { %v17666_v12 = vadd.f32 %v3857_v24, %v3825_v47  ;;  %v10967_v47 = vld [vmem:[%s21108_s23 + $0x2e8] sm:$0xf]  ;;  %v3764_v52 = vadd.f32 %v3763_v45, %v17554_v62  ;;  %v11096_v43 = vor.u32 %v14285_v30, %v11095_v28  ;;  %4137 = vmatpush.bf16.msrb.mxu3 %v10776_v50 }
 0x239   : > { %v10968_v24 = vor.u32 %v14253_v27, %v10967_v47  ;;  %v10759_v45 = vld [vmem:[%s21108_s23 + $0x148] sm:$0xf]  ;;  %v14201_v47 = vld [vmem:[%s21108_s23 + $0x154] sm:$0xf0]  ;;  %4232 = vmatpush.bf16.msra.mxu2 %v11224_v46 }
 0x23a   : > { %4199 = vmatpush.bf16.msra.mxu1 %v11096_v43  ;;  %v10951_v27 = vld [vmem:[%s21108_s23 + $0x2c8] sm:$0xf]  ;;  %v10760_v50 = vor.u32 %v14201_v47, %v10759_v45  ;;  %v14313_v45 = vld [vmem:[%s21108_s23 + $0x4d4] sm:$0xf0] }
 0x23b   : > { %4166 = vmatpush.bf16.msra.mxu0 %v10968_v24  ;;  %v14281_v24 = vld [vmem:[%s21108_s23 + $0x3d4] sm:$0xf0]  ;;  %v11207_v46 = vld [vmem:[%s21108_s23 + $0x4c8] sm:$0xf] }
 0x23c   : > { %4019 = vmatmul.bf16.gmra.mxu3 %v21180_v34  ;;  %4113 = vmatmul.bf16.gmra.mxu2 %v15936_v44  ;;  %v3796_v31 = vpop.f32.mrf.mxu0  ;;  %v3829_v58 = vpop.f32.mrf.mxu1  ;;  %v10743_v47 = vld [vmem:[%s21108_s23 + $0x128] sm:$0xf]  ;;  %v11208_v34 = vor.u32 %v14313_v45, %v11207_v46 }
 0x23d   : > { %v3797_v9 = vadd.f32 %v3796_v31, %v3764_v52  ;;  %v14249_v31 = vld [vmem:[%s21108_s23 + $0x2d4] sm:$0xf0]  ;;  %v11079_v52 = vld [vmem:[%s21108_s23 + $0x3c8] sm:$0xf]  ;;  %4138 = vmatpush.bf16.msrb.mxu3 %v10760_v50 }
 0x23e   : > { %v10952_v23 = vor.u32 %v14249_v31, %v10951_v27  ;;  %v11080_v44 = vor.u32 %v14281_v24, %v11079_v52  ;;  %v11063_v50 = vld [vmem:[%s21108_s23 + $0x3a8] sm:$0xf]  ;;  %v14277_v31 = vld [vmem:[%s21108_s23 + $0x3b4] sm:$0xf0]  ;;  %4233 = vmatpush.bf16.msra.mxu2 %v11208_v34 }
 0x23f   : > { %v3766_v28 = vpop.f32.mrf.mxu3  ;;  %v3860_v30 = vpop.f32.mrf.mxu2  ;;  %v3830_v15 = vadd.f32 %v3829_v58, %v3797_v9  ;;  %v14197_v9 = vld [vmem:[%s21108_s23 + $0x134] sm:$0xf0]  ;;  %v11191_v52 = vld [vmem:[%s21108_s23 + $0x4a8] sm:$0xf]  ;;  %v11064_v24 = vor.u32 %v14277_v31, %v11063_v50 }
 0x240   : > { %v17716_v43 = vadd.f32 %v3860_v30, %v3828_v1  ;;  %v10935_v1 = vld [vmem:[%s21108_s23 + $0x2a8] sm:$0xf]  ;;  %v14245_v58 = vld [vmem:[%s21108_s23 + $0x2b4] sm:$0xf0]  ;;  %4167 = vmatpush.bf16.msra.mxu0 %v10952_v23  ;;  %v10744_v27 = vor.u32 %v14197_v9, %v10743_v47  ;;  %4200 = vmatpush.bf16.msra.mxu1 %v11080_v44  ;;  %v3767_v46 = vadd.f32 %v3766_v28, %v17554_v62 }
 0x241   : > { %v10936_v30 = vor.u32 %v14245_v58, %v10935_v1  ;;  %v14309_v23 = vld [vmem:[%s21108_s23 + $0x4b4] sm:$0xf0]  ;;  %v10727_v58 = vld [vmem:[%s21108_s23 + $0x108] sm:$0xf] }
 0x242   : > { %v11192_v45 = vor.u32 %v14309_v23, %v11191_v52  ;;  %4139 = vmatpush.bf16.msrb.mxu3 %v10744_v27  ;;  %v14193_v44 = vld [vmem:[%s21108_s23 + $0x114] sm:$0xf0]  ;;  %v10919_v34 = vld [vmem:[%s21108_s23 + $0x288] sm:$0xf] }
 0x243   : > { %v10728_v28 = vor.u32 %v14193_v44, %v10727_v58  ;;  %v14241_v27 = vld [vmem:[%s21108_s23 + $0x294] sm:$0xf0] }
 0x244   : > { %v3799_v47 = vpop.f32.mrf.mxu0  ;;  %v3832_v9 = vpop.f32.mrf.mxu1  ;;  %4168 = vmatpush.bf16.msra.mxu0 %v10936_v30  ;;  %4201 = vmatpush.bf16.msra.mxu1 %v11064_v24  ;;  %v11047_v30 = vld [vmem:[%s21108_s23 + $0x388] sm:$0xf]  ;;  %v14273_v31 = vld [vmem:[%s21108_s23 + $0x394] sm:$0xf0]  ;;  %v21182_v24 = vld [vmem:[#allocation63_spill] sm:$0xff] }
 0x245   : > { %v3800_v1 = vadd.f32 %v3799_v47, %v3767_v46  ;;  %4234 = vmatpush.bf16.msra.mxu2 %v11192_v45  ;;  %v21181_v46 = vld [vmem:[#allocation61_spill] sm:$0xff]  ;;  %v10920_v45 = vor.u32 %v14241_v27, %v10919_v34  ;;  %v11175_v47 = vld [vmem:[%s21108_s23 + $0x488] sm:$0xf]  ;;  %v14305_v58 = vld [vmem:[%s21108_s23 + $0x494] sm:$0xf0]  ;;  %v11048_v44 = vor.u32 %v14273_v31, %v11047_v30 }
 0x246   : > { %4140 = vmatpush.bf16.msrb.mxu3 %v10728_v28  ;;  %v11159_v28 = vld [vmem:[%s21108_s23 + $0x468] sm:$0xf]  ;;  %v14301_v27 = vld [vmem:[%s21108_s23 + $0x474] sm:$0xf0] }
 0x247   : > { %v3768_v50 = vpop.f32.mrf.mxu3  ;;  %v3862_v62 = vpop.f32.mrf.mxu2  ;;  %v3833_v23 = vadd.f32 %v3832_v9, %v3800_v1  ;;  %4052 = vmatmul.bf16.gmra.mxu0 %v21181_v46  ;;  %11940 = vmatmul.msk.bf16.gmra.mxu1 %vm1212_vm1, %v21182_v24  ;;  %v14237_v9 = vld [vmem:[%s21108_s23 + $0x274] sm:$0xf0]  ;;  %v11031_v1 = vld [vmem:[%s21108_s23 + $0x368] sm:$0xf]  ;;  %v11160_v31 = vor.u32 %v14301_v27, %v11159_v28 }
 0x248   : > { %v17767_v52 = vadd.f32 %v3862_v62, %v3830_v15  ;;  %v11176_v50 = vor.u32 %v14305_v58, %v11175_v47  ;;  %4169 = vmatpush.bf16.msra.mxu0 %v10920_v45  ;;  %v10903_v15 = vld [vmem:[%s21108_s23 + $0x268] sm:$0xf]  ;;  %4202 = vmatpush.bf16.msra.mxu1 %v11048_v44  ;;  %v14269_v62 = vld [vmem:[%s21108_s23 + $0x374] sm:$0xf0] }
 0x249   : > { %v10904_v34 = vor.u32 %v14237_v9, %v10903_v15  ;;  %v11032_v30 = vor.u32 %v14269_v62, %v11031_v1  ;;  %v10887_v58 = vld [vmem:[%s21108_s23 + $0x248] sm:$0xf]  ;;  %v14233_v44 = vld [vmem:[%s21108_s23 + $0x254] sm:$0xf0] }
 0x24a   : > { %4235 = vmatpush.bf16.msra.mxu2 %v11176_v50  ;;  %v11015_v50 = vld [vmem:[%s21108_s23 + $0x348] sm:$0xf]  ;;  %v10888_v1 = vor.u32 %v14233_v44, %v10887_v58  ;;  %v14297_v28 = vld [vmem:[%s21108_s23 + $0x454] sm:$0xf0] }
 0x24b   : > { %v11143_v62 = vld [vmem:[%s21108_s23 + $0x448] sm:$0xf]  ;;  %v14229_v58 = vld [vmem:[%s21108_s23 + $0x234] sm:$0xf0] }
 0x24c   : > { %4024 = vmatmul.bf16.gmra.mxu3 %v17111_v48  ;;  %4118 = vmatmul.bf16.gmra.mxu2 %v15919_v29  ;;  %v3801_v45 = vpop.f32.mrf.mxu0  ;;  %v3834_v47 = vpop.f32.mrf.mxu1  ;;  %v10999_v44 = vld [vmem:[%s21108_s23 + $0x328] sm:$0xf]  ;;  %v14225_v46 = vld [vmem:[%s21108_s23 + $0x214] sm:$0xf0] }
 0x24d   : > { %4170 = vmatpush.bf16.msra.mxu0 %v10904_v34  ;;  %4203 = vmatpush.bf16.msra.mxu1 %v11032_v30  ;;  %v14265_v34 = vld [vmem:[%s21108_s23 + $0x354] sm:$0xf0]  ;;  %v11144_v30 = vor.u32 %v14297_v28, %v11143_v62  ;;  %v10855_v24 = vld [vmem:[%s21108_s23 + $0x208] sm:$0xf] }
 0x24e   : > { %4236 = vmatpush.bf16.msra.mxu2 %v11160_v31  ;;  %v11016_v47 = vor.u32 %v14265_v34, %v11015_v50  ;;  %v10871_v31 = vld [vmem:[%s21108_s23 + $0x228] sm:$0xf]  ;;  %v14293_v50 = vld [vmem:[%s21108_s23 + $0x434] sm:$0xf0] }
 0x24f   : > { %v3865_v15 = vpop.f32.mrf.mxu2  ;;  %v3878_v9 = vpop.f32.mrf.mxu3 }
 0x250   : > { %v17816_v27 = vadd.f32 %v3865_v15, %v3833_v23  ;;  %v3879_v45 = vadd.f32 %v3878_v9, %v17618_v37  ;;  %v14261_v23 = vld [vmem:[%s21108_s23 + $0x334] sm:$0xf0]  ;;  %v11127_v37 = vld [vmem:[%s21108_s23 + $0x428] sm:$0xf]  ;;  %v10872_v15 = vor.u32 %v14229_v58, %v10871_v31  ;;  %v10856_v31 = vor.u32 %v14225_v46, %v10855_v24 }
 0x251   : > { %4171 = vmatpush.bf16.msra.mxu0 %v10888_v1  ;;  %4204 = vmatpush.bf16.msra.mxu1 %v11016_v47  ;;  %v11000_v9 = vor.u32 %v14261_v23, %v10999_v44  ;;  %v11128_v34 = vor.u32 %v14293_v50, %v11127_v37  ;;  %v10983_v1 = vld [vmem:[%s21108_s23 + $0x308] sm:$0xf]  ;;  %v14289_v44 = vld [vmem:[%s21108_s23 + $0x414] sm:$0xf0] }
 0x252   : > { %4237 = vmatpush.bf16.msra.mxu2 %v11144_v30  ;;  %v11111_v58 = vld [vmem:[%s21108_s23 + $0x408] sm:$0xf] }
 0x253   : > { %v11112_v24 = vor.u32 %v14289_v44, %v11111_v58 }
 0x254   : > { %v3911_v62 = vpop.f32.mrf.mxu0  ;;  %v3944_v28 = vpop.f32.mrf.mxu1 }
 0x255   : > { %v3912_v29 = vadd.f32 %v3911_v62, %v3879_v45  ;;  %4172 = vmatpush.bf16.msra.mxu0 %v10872_v15  ;;  %4205 = vmatpush.bf16.msra.mxu1 %v11000_v9  ;;  %v14257_v45 = vld [vmem:[%s21108_s23 + $0x314] sm:$0xf0] }
 0x256   : > { %4238 = vmatpush.bf16.msra.mxu2 %v11128_v34  ;;  %v10984_v46 = vor.u32 %v14257_v45, %v10983_v1 }
 0x257   : > { %v3867_v47 = vpop.f32.mrf.mxu2  ;;  %v3880_v30 = vpop.f32.mrf.mxu3  ;;  %v3945_v37 = vadd.f32 %v3944_v28, %v3912_v29  ;;  %4057 = vmatmul.bf16.gmra.mxu0 %v17117_v8  ;;  %11941 = vmatmul.msk.bf16.gmra.mxu1 %vm1212_vm1, %v17146_v18 }
 0x258   : > { %v3881_v23 = vadd.f32 %v3880_v30, %v17621_v21 }
 0x259   : > { %4173 = vmatpush.bf16.msra.mxu0 %v10856_v31  ;;  %4206 = vmatpush.bf16.msra.mxu1 %v10984_v46 }
 0x25a   : > { %4239 = vmatpush.bf16.msra.mxu2 %v11112_v24 }
 0x25c   : > { %4029 = vmatmul.bf16.gmra.mxu3 %v17062_v42  ;;  %4123 = vmatmul.bf16.gmra.mxu2 %v15925_v35  ;;  %v3913_v50 = vpop.f32.mrf.mxu0  ;;  %v3946_v15 = vpop.f32.mrf.mxu1 }
 0x25d   : > { %v3914_v9 = vadd.f32 %v3913_v50, %v3881_v23 }
 0x25f   : > { %v3883_v34 = vpop.f32.mrf.mxu3  ;;  %v3977_v21 = vpop.f32.mrf.mxu2  ;;  %v3947_v28 = vadd.f32 %v3946_v15, %v3914_v9 }
 0x260   : > { %v3884_v29 = vadd.f32 %v3883_v34, %v17628_v33  ;;  %v17862_v62 = vadd.f32 %v3977_v21, %v3945_v37 }
 0x264   : > { %v3916_v47 = vpop.f32.mrf.mxu0  ;;  %v3949_v1 = vpop.f32.mrf.mxu1 }
 0x265   : > { %v3917_v30 = vadd.f32 %v3916_v47, %v3884_v29 }
 0x267   : > { %v3885_v31 = vpop.f32.mrf.mxu3  ;;  %v3979_v45 = vpop.f32.mrf.mxu2  ;;  %v3950_v46 = vadd.f32 %v3949_v1, %v3917_v30  ;;  %4062 = vmatmul.bf16.gmra.mxu0 %v17064_v40  ;;  %11942 = vmatmul.msk.bf16.gmra.mxu1 %vm1212_vm1, %v17119_v57 }
 0x268   : > { %v3886_v58 = vadd.f32 %v3885_v31, %v17631_v11  ;;  %v17865_v44 = vadd.f32 %v3979_v45, %v3947_v28  ;;  %v14349_v45 = vld [vmem:[%s21108_s23 + $0x5f4] sm:$0xf0] }
 0x26c   : > { %4128 = vmatmul.bf16.gmra.mxu2 %v16489_v10  ;;  %4141 = vmatmul.bf16.vlgmr.msrb.gmra.mxu3 %v16255_v7  ;;  %v3918_v33 = vpop.f32.mrf.mxu0  ;;  %v3951_v23 = vpop.f32.mrf.mxu1 }
 0x26d   : > { %v3919_v37 = vadd.f32 %v3918_v33, %v3886_v58 }
 0x26f   : > { %v3888_v24 = vpop.f32.mrf.mxu3  ;;  %v3982_v50 = vpop.f32.mrf.mxu2  ;;  %v3952_v9 = vadd.f32 %v3951_v23, %v3919_v37  ;;  %v11335_v23 = vld [vmem:[%s21108_s23 + $0x5c8] sm:$0xf]  ;;  %v14345_v37 = vld [vmem:[%s21108_s23 + $0x5d4] sm:$0xf0] }
 0x270   : > { %v3889_v15 = vadd.f32 %v3888_v24, %v17651_v32  ;;  %v17873_v11 = vadd.f32 %v3982_v50, %v3950_v46  ;;  %v11351_v32 = vld [vmem:[%s21108_s23 + $0x5e8] sm:$0xf] }
 0x271   : > { %v11352_v58 = vor.u32 %v14349_v45, %v11351_v32 }
 0x273   : > { %4265 = vmatpush.bf16.msra.mxu3 %v11352_v58 }
 0x274   : > { %v3921_v34 = vpop.f32.mrf.mxu0  ;;  %v3954_v21 = vpop.f32.mrf.mxu1 }
 0x275   : > { %v3922_v29 = vadd.f32 %v3921_v34, %v3889_v15  ;;  %v11336_v15 = vor.u32 %v14345_v37, %v11335_v23 }
 0x277   : > { %v3890_v28 = vpop.f32.mrf.mxu3  ;;  %v3984_v47 = vpop.f32.mrf.mxu2  ;;  %v3955_v31 = vadd.f32 %v3954_v21, %v3922_v29  ;;  %4174 = vmatmul.bf16.vlgmr.msra.gmra.mxu0 %v16261_v17  ;;  %4207 = vmatmul.bf16.vlgmr.msra.gmra.mxu1 %v16509_v25  ;;  %v11319_v29 = vld [vmem:[%s21108_s23 + $0x5a8] sm:$0xf] }
 0x278   : > { %v3891_v1 = vadd.f32 %v3890_v28, %v17666_v12  ;;  %v17876_v30 = vadd.f32 %v3984_v47, %v3952_v9  ;;  %v14341_v28 = vld [vmem:[%s21108_s23 + $0x5b4] sm:$0xf0]  ;;  %4266 = vmatpush.bf16.msra.mxu3 %v11336_v15 }
 0x279   : > { %v11320_v47 = vor.u32 %v14341_v28, %v11319_v29  ;;  %v14413_v29 = vld [vmem:[%s21108_s23 + $0x7f4] sm:$0xf0] }
 0x27c   : > { %4146 = vmatmul.bf16.gmra.mxu3 %v15959_v13  ;;  %4240 = vmatmul.bf16.vlgmr.msra.gmra.mxu2 %v16515_v6  ;;  %v3923_v12 = vpop.f32.mrf.mxu0  ;;  %v3956_v46 = vpop.f32.mrf.mxu1 }
 0x27d   : > { %v3924_v33 = vadd.f32 %v3923_v12, %v3891_v1  ;;  %4267 = vmatpush.bf16.msra.mxu3 %v11320_v47 }
 0x27f   : > { %v3893_v24 = vpop.f32.mrf.mxu3  ;;  %v3987_v50 = vpop.f32.mrf.mxu2  ;;  %v3957_v21 = vadd.f32 %v3956_v46, %v3924_v33 }
 0x280   : > { %v3894_v9 = vadd.f32 %v3893_v24, %v17716_v43  ;;  %v17895_v34 = vadd.f32 %v3987_v50, %v3955_v31  ;;  %v11303_v43 = vld [vmem:[%s21108_s23 + $0x588] sm:$0xf]  ;;  %v14337_v31 = vld [vmem:[%s21108_s23 + $0x594] sm:$0xf0] }
 0x281   : > { %v11304_v46 = vor.u32 %v14337_v31, %v11303_v43  ;;  %v11287_v24 = vld [vmem:[%s21108_s23 + $0x568] sm:$0xf]  ;;  %v14333_v50 = vld [vmem:[%s21108_s23 + $0x574] sm:$0xf0] }
 0x282   : > { %v11288_v15 = vor.u32 %v14333_v50, %v11287_v24  ;;  %v11463_v24 = vld [vmem:[%s21108_s23 + $0x6c8] sm:$0xf] }
 0x283   : > { %4268 = vmatpush.bf16.msra.mxu3 %v11304_v46  ;;  %v14329_v46 = vld [vmem:[%s21108_s23 + $0x554] sm:$0xf0] }
 0x284   : > { %v3926_v1 = vpop.f32.mrf.mxu0  ;;  %v3959_v32 = vpop.f32.mrf.mxu1 }
 0x285   : > { %v3927_v45 = vadd.f32 %v3926_v1, %v3894_v9  ;;  %v14381_v9 = vld [vmem:[%s21108_s23 + $0x6f4] sm:$0xf0]  ;;  %v11735_v1 = vld [vmem:[%s21108_s23 + $0x8e8] sm:$0xf] }
 0x287   : > { %v3895_v58 = vpop.f32.mrf.mxu3  ;;  %v3989_v12 = vpop.f32.mrf.mxu2  ;;  %v3960_v37 = vadd.f32 %v3959_v32, %v3927_v45  ;;  %4179 = vmatmul.bf16.gmra.mxu0 %v16083_v54  ;;  %4212 = vmatmul.bf16.gmra.mxu1 %v16524_v41  ;;  %v14445_v32 = vld [vmem:[%s21108_s23 + $0x8f4] sm:$0xf0] }
 0x288   : > { %v3896_v33 = vadd.f32 %v3895_v58, %v17767_v52  ;;  %v17910_v23 = vadd.f32 %v3989_v12, %v3957_v21  ;;  %v11479_v52 = vld [vmem:[%s21108_s23 + $0x6e8] sm:$0xf]  ;;  %4269 = vmatpush.bf16.msra.mxu3 %v11288_v15  ;;  %v11736_v31 = vor.u32 %v14445_v32, %v11735_v1  ;;  %v14441_v32 = vld [vmem:[%s21108_s23 + $0x8d4] sm:$0xf0] }
 0x289   : > { %v11607_v21 = vld [vmem:[%s21108_s23 + $0x7e8] sm:$0xf]  ;;  %v11480_v28 = vor.u32 %v14381_v9, %v11479_v52 }
 0x28a   : > { %v11608_v47 = vor.u32 %v14413_v29, %v11607_v21  ;;  %v11271_v12 = vld [vmem:[%s21108_s23 + $0x548] sm:$0xf]  ;;  %4364 = vmatpush.bf16.msrb.mxu2 %v11736_v31  ;;  %v14409_v21 = vld [vmem:[%s21108_s23 + $0x7d4] sm:$0xf0] }
 0x28b   : > { %4298 = vmatpush.bf16.msrb.mxu0 %v11480_v28  ;;  %v11272_v15 = vor.u32 %v14329_v46, %v11271_v12  ;;  %v11591_v9 = vld [vmem:[%s21108_s23 + $0x7c8] sm:$0xf] }
 0x28c   : > { %4151 = vmatmul.bf16.gmra.mxu3 %v16025_v60  ;;  %4245 = vmatmul.bf16.gmra.mxu2 %v21153_v56  ;;  %v3928_v45 = vpop.f32.mrf.mxu0  ;;  %v3961_v43 = vpop.f32.mrf.mxu1  ;;  %v11719_v1 = vld [vmem:[%s21108_s23 + $0x8c8] sm:$0xf]  ;;  %v11592_v31 = vor.u32 %v14409_v21, %v11591_v9  ;;  %v14437_v9 = vld [vmem:[%s21108_s23 + $0x8b4] sm:$0xf0] }
 0x28d   : > { %v3929_v58 = vadd.f32 %v3928_v45, %v3896_v33  ;;  %4331 = vmatpush.bf16.msrb.mxu1 %v11608_v47  ;;  %v14377_v33 = vld [vmem:[%s21108_s23 + $0x6d4] sm:$0xf0]  ;;  %4270 = vmatpush.bf16.msra.mxu3 %v11272_v15  ;;  %v11720_v12 = vor.u32 %v14441_v32, %v11719_v1  ;;  %v11255_v46 = vld [vmem:[%s21108_s23 + $0x528] sm:$0xf] }
 0x28e   : > { %v11464_v45 = vor.u32 %v14377_v33, %v11463_v24  ;;  %v11575_v24 = vld [vmem:[%s21108_s23 + $0x7a8] sm:$0xf] }
 0x28f   : > { %v3898_v50 = vpop.f32.mrf.mxu3  ;;  %v3992_v52 = vpop.f32.mrf.mxu2  ;;  %v3962_v47 = vadd.f32 %v3961_v43, %v3929_v58  ;;  %v14373_v58 = vld [vmem:[%s21108_s23 + $0x6b4] sm:$0xf0]  ;;  %4365 = vmatpush.bf16.msrb.mxu2 %v11720_v12  ;;  %v11703_v33 = vld [vmem:[%s21108_s23 + $0x8a8] sm:$0xf] }
 0x290   : > { %v3899_v29 = vadd.f32 %v3898_v50, %v17816_v27  ;;  %v17959_v28 = vadd.f32 %v3992_v52, %v3960_v37  ;;  %v14325_v27 = vld [vmem:[%s21108_s23 + $0x534] sm:$0xf0]  ;;  %v11447_v37 = vld [vmem:[%s21108_s23 + $0x6a8] sm:$0xf]  ;;  %4299 = vmatpush.bf16.msrb.mxu0 %v11464_v45  ;;  %v11704_v32 = vor.u32 %v14437_v9, %v11703_v33 }
 0x291   : > { %4332 = vmatpush.bf16.msrb.mxu1 %v11592_v31  ;;  %v11256_v43 = vor.u32 %v14325_v27, %v11255_v46  ;;  %v14405_v50 = vld [vmem:[%s21108_s23 + $0x7b4] sm:$0xf0]  ;;  %v11448_v52 = vor.u32 %v14373_v58, %v11447_v37  ;;  %v11239_v31 = vld [vmem:[%s21108_s23 + $0x508] sm:$0xf] }
 0x292   : > { %v11576_v15 = vor.u32 %v14405_v50, %v11575_v24  ;;  %v14321_v12 = vld [vmem:[%s21108_s23 + $0x514] sm:$0xf0]  ;;  %v11431_v46 = vld [vmem:[%s21108_s23 + $0x688] sm:$0xf] }
 0x293   : > { %4271 = vmatpush.bf16.msra.mxu3 %v11256_v43  ;;  %v11240_v58 = vor.u32 %v14321_v12, %v11239_v31  ;;  %v11559_v43 = vld [vmem:[%s21108_s23 + $0x788] sm:$0xf]  ;;  %v14401_v24 = vld [vmem:[%s21108_s23 + $0x794] sm:$0xf0]  ;;  %4366 = vmatpush.bf16.msrb.mxu2 %v11704_v32 }
 0x294   : > { %v3931_v21 = vpop.f32.mrf.mxu0  ;;  %v3964_v1 = vpop.f32.mrf.mxu1  ;;  %4300 = vmatpush.bf16.msrb.mxu0 %v11448_v52  ;;  %v14433_v9 = vld [vmem:[%s21108_s23 + $0x894] sm:$0xf0] }
 0x295   : > { %v3932_v45 = vadd.f32 %v3931_v21, %v3899_v29  ;;  %4333 = vmatpush.bf16.msrb.mxu1 %v11576_v15  ;;  %v14369_v29 = vld [vmem:[%s21108_s23 + $0x694] sm:$0xf0]  ;;  %v11687_v15 = vld [vmem:[%s21108_s23 + $0x888] sm:$0xf]  ;;  %v11560_v21 = vor.u32 %v14401_v24, %v11559_v43 }
 0x296   : > { %v11432_v52 = vor.u32 %v14369_v29, %v11431_v46  ;;  %v11688_v31 = vor.u32 %v14433_v9, %v11687_v15  ;;  %v14397_v32 = vld [vmem:[%s21108_s23 + $0x774] sm:$0xf0]  ;;  %v11671_v46 = vld [vmem:[%s21108_s23 + $0x868] sm:$0xf] }
 0x297   : > { %v3900_v27 = vpop.f32.mrf.mxu3  ;;  %v3994_v37 = vpop.f32.mrf.mxu2  ;;  %v3965_v33 = vadd.f32 %v3964_v1, %v3932_v45  ;;  %4184 = vmatmul.bf16.gmra.mxu0 %v16159_v39  ;;  %4217 = vmatmul.bf16.gmra.mxu1 %v16566_v4  ;;  %v14365_v1 = vld [vmem:[%s21108_s23 + $0x674] sm:$0xf0]  ;;  %v11543_v45 = vld [vmem:[%s21108_s23 + $0x768] sm:$0xf] }
 0x298   : > { %v18009_v50 = vadd.f32 %v3994_v37, %v3962_v47  ;;  %4272 = vmatpush.bf16.msra.mxu3 %v11240_v58  ;;  %v11415_v47 = vld [vmem:[%s21108_s23 + $0x668] sm:$0xf]  ;;  %4301 = vmatpush.bf16.msrb.mxu0 %v11432_v52  ;;  %v14429_v27 = vld [vmem:[%s21108_s23 + $0x874] sm:$0xf0]  ;;  %v11544_v37 = vor.u32 %v14397_v32, %v11543_v45 }
 0x299   : > { %4334 = vmatpush.bf16.msrb.mxu1 %v11560_v21  ;;  %v11416_v12 = vor.u32 %v14365_v1, %v11415_v47  ;;  %4367 = vmatpush.bf16.msrb.mxu2 %v11688_v31  ;;  %v11672_v43 = vor.u32 %v14429_v27, %v11671_v46  ;;  %v11399_v24 = vld [vmem:[%s21108_s23 + $0x648] sm:$0xf]  ;;  %v14361_v52 = vld [vmem:[%s21108_s23 + $0x654] sm:$0xf0] }
 0x29a   : > { %v11527_v15 = vld [vmem:[%s21108_s23 + $0x748] sm:$0xf]  ;;  %v11400_v47 = vor.u32 %v14361_v52, %v11399_v24  ;;  %v14393_v31 = vld [vmem:[%s21108_s23 + $0x754] sm:$0xf0] }
 0x29b   : > { %v11655_v1 = vld [vmem:[%s21108_s23 + $0x848] sm:$0xf]  ;;  %v14425_v45 = vld [vmem:[%s21108_s23 + $0x854] sm:$0xf0]  ;;  %v11528_v27 = vor.u32 %v14393_v31, %v11527_v15 }
 0x29c   : > { %4156 = vmatmul.bf16.gmra.mxu3 %v16075_v51  ;;  %4250 = vmatmul.bf16.gmra.mxu2 %v21159_v19  ;;  %v3933_v58 = vpop.f32.mrf.mxu0  ;;  %v3966_v29 = vpop.f32.mrf.mxu1  ;;  %v14421_v24 = vld [vmem:[%s21108_s23 + $0x834] sm:$0xf0]  ;;  %v11367_v31 = vld [vmem:[%s21108_s23 + $0x608] sm:$0xf] }
 0x29d   : > { %4302 = vmatpush.bf16.msrb.mxu0 %v11416_v12  ;;  %4335 = vmatpush.bf16.msrb.mxu1 %v11544_v37  ;;  %v11656_v12 = vor.u32 %v14425_v45, %v11655_v1  ;;  %v11383_v37 = vld [vmem:[%s21108_s23 + $0x628] sm:$0xf]  ;;  %v14357_v58 = vld [vmem:[%s21108_s23 + $0x634] sm:$0xf0] }
 0x29e   : > { %4368 = vmatpush.bf16.msrb.mxu2 %v11672_v43  ;;  %v11511_v29 = vld [vmem:[%s21108_s23 + $0x728] sm:$0xf]  ;;  %v14353_v1 = vld [vmem:[%s21108_s23 + $0x614] sm:$0xf0] }
 0x29f   : > { %v3997_v9 = vpop.f32.mrf.mxu2  ;;  %v4010_v21 = vpop.f32.mrf.mxu3  ;;  %v11639_v43 = vld [vmem:[%s21108_s23 + $0x828] sm:$0xf] }
 0x2a0   : > { %v18057_v32 = vadd.f32 %v3997_v9, %v3965_v33  ;;  %v4011_v46 = vadd.f32 %v4010_v21, %v17862_v62  ;;  %v11384_v33 = vor.u32 %v14357_v58, %v11383_v37  ;;  %v14389_v62 = vld [vmem:[%s21108_s23 + $0x734] sm:$0xf0]  ;;  %v11640_v21 = vor.u32 %v14421_v24, %v11639_v43  ;;  %v11495_v45 = vld [vmem:[%s21108_s23 + $0x708] sm:$0xf] }
 0x2a1   : > { %4303 = vmatpush.bf16.msrb.mxu0 %v11400_v47  ;;  %4336 = vmatpush.bf16.msrb.mxu1 %v11528_v27  ;;  %v11512_v52 = vor.u32 %v14389_v62, %v11511_v29  ;;  %v11368_v58 = vor.u32 %v14353_v1, %v11367_v31  ;;  %v14417_v29 = vld [vmem:[%s21108_s23 + $0x814] sm:$0xf0] }
 0x2a2   : > { %4369 = vmatpush.bf16.msrb.mxu2 %v11656_v12  ;;  %v11623_v12 = vld [vmem:[%s21108_s23 + $0x808] sm:$0xf] }
 0x2a3   : > { %v11624_v24 = vor.u32 %v14417_v29, %v11623_v12 }
 0x2a4   : > { %v4043_v15 = vpop.f32.mrf.mxu0  ;;  %v4076_v9 = vpop.f32.mrf.mxu1 }
 0x2a5   : > { %v4044_v47 = vadd.f32 %v4043_v15, %v4011_v46  ;;  %4304 = vmatpush.bf16.msrb.mxu0 %v11384_v33  ;;  %4337 = vmatpush.bf16.msrb.mxu1 %v11512_v52  ;;  %v14385_v46 = vld [vmem:[%s21108_s23 + $0x714] sm:$0xf0] }
 0x2a6   : > { %v11496_v33 = vor.u32 %v14385_v46, %v11495_v45  ;;  %4370 = vmatpush.bf16.msrb.mxu2 %v11640_v21 }
 0x2a7   : > { %v3999_v27 = vpop.f32.mrf.mxu2  ;;  %v4012_v37 = vpop.f32.mrf.mxu3  ;;  %v18097_v43 = vadd.f32 %v4076_v9, %v4044_v47  ;;  %4189 = vmatmul.bf16.gmra.mxu0 %v16240_v55  ;;  %4222 = vmatmul.bf16.gmra.mxu1 %v16660_v61 }
 0x2a8   : > { %v4013_v62 = vadd.f32 %v4012_v37, %v17865_v44 }
 0x2a9   : > { %21183 = vst [vmem:[#allocation42_spill] sm:$0xff] %v18097_v43  ;;  %4305 = vmatpush.bf16.msrb.mxu0 %v11368_v58  ;;  %4338 = vmatpush.bf16.msrb.mxu1 %v11496_v33 }
 0x2aa   : > { %4371 = vmatpush.bf16.msrb.mxu2 %v11624_v24 }
 0x2ac   : > { %4161 = vmatmul.bf16.gmra.mxu3 %v16493_v16  ;;  %4255 = vmatmul.bf16.gmra.mxu2 %v21165_v2  ;;  %v4045_v52 = vpop.f32.mrf.mxu0  ;;  %v4078_v15 = vpop.f32.mrf.mxu1 }
 0x2ad   : > { %v4046_v31 = vadd.f32 %v4045_v52, %v4013_v62 }
 0x2af   : > { %v4015_v44 = vpop.f32.mrf.mxu3  ;;  %v18103_v9 = vpop.f32.mrf.mxu2  ;;  %v18106_v1 = vadd.f32 %v4078_v15, %v4046_v31 }
 0x2b0   : > { %v4016_v47 = vadd.f32 %v4015_v44, %v17873_v11 }
 0x2b1   : > { %21184 = vst [vmem:[#allocation41_spill] sm:$0xff] %v18106_v1 }
 0x2b4   : > { %v4048_v45 = vpop.f32.mrf.mxu0  ;;  %v4081_v21 = vpop.f32.mrf.mxu1 }
 0x2b5   : > { %v4049_v27 = vadd.f32 %v4048_v45, %v4016_v47 }
 0x2b7   : > { %v4017_v37 = vpop.f32.mrf.mxu3  ;;  %v18108_v58 = vpop.f32.mrf.mxu2  ;;  %v18111_v12 = vadd.f32 %v4081_v21, %v4049_v27  ;;  %4194 = vmatmul.bf16.gmra.mxu0 %v16497_v20  ;;  %4227 = vmatmul.bf16.gmra.mxu1 %v16763_v14 }
 0x2b8   : > { %v4018_v46 = vadd.f32 %v4017_v37, %v17876_v30  ;;  %v14477_v37 = vld [vmem:[%s21108_s23 + $0x9f4] sm:$0xf0] }
 0x2b9   : > { %21185 = vst [vmem:[#allocation45_spill] sm:$0xff] %v18111_v12 }
 0x2bc   : > { %4260 = vmatmul.bf16.gmra.mxu2 %v21170_v53  ;;  %4273 = vmatmul.bf16.vlgmr.msra.gmra.mxu3 %v16518_v36  ;;  %v4050_v11 = vpop.f32.mrf.mxu0  ;;  %v4083_v29 = vpop.f32.mrf.mxu1 }
 0x2bd   : > { %v4051_v62 = vadd.f32 %v4050_v11, %v4018_v46 }
 0x2bf   : > { %v4020_v33 = vpop.f32.mrf.mxu3  ;;  %v18117_v24 = vpop.f32.mrf.mxu2  ;;  %v18120_v15 = vadd.f32 %v4083_v29, %v4051_v62  ;;  %v11847_v62 = vld [vmem:[%s21108_s23 + $0x9c8] sm:$0xf] }
 0x2c0   : > { %v4021_v52 = vadd.f32 %v4020_v33, %v17895_v34  ;;  %v11863_v34 = vld [vmem:[%s21108_s23 + $0x9e8] sm:$0xf]  ;;  %v14473_v33 = vld [vmem:[%s21108_s23 + $0x9d4] sm:$0xf0] }
 0x2c1   : > { %21186 = vst [vmem:[#allocation48_spill] sm:$0xff] %v18120_v15  ;;  %v11864_v46 = vor.u32 %v14477_v37, %v11863_v34  ;;  %v14469_v34 = vld [vmem:[%s21108_s23 + $0x9b4] sm:$0xf0] }
 0x2c3   : > { %4397 = vmatpush.bf16.msrb.mxu3 %v11864_v46 }
 0x2c4   : > { %v4053_v30 = vpop.f32.mrf.mxu0  ;;  %v4086_v31 = vpop.f32.mrf.mxu1 }
 0x2c5   : > { %v4054_v44 = vadd.f32 %v4053_v30, %v4021_v52 }
 0x2c7   : > { %v4022_v47 = vpop.f32.mrf.mxu3  ;;  %v18122_v45 = vpop.f32.mrf.mxu2  ;;  %v18125_v27 = vadd.f32 %v4086_v31, %v4054_v44  ;;  %4306 = vmatmul.bf16.vlgmr.msrb.gmra.mxu0 %v21152_v49  ;;  %4339 = vmatmul.bf16.vlgmr.msrb.gmra.mxu1 %v21154_v3  ;;  %v11848_v31 = vor.u32 %v14473_v33, %v11847_v62 }
 0x2c8   : > { %v4023_v21 = vadd.f32 %v4022_v47, %v17910_v23 }
 0x2c9   : > { %21187 = vst [vmem:[#allocation51_spill] sm:$0xff] %v18125_v27  ;;  %4398 = vmatpush.bf16.msrb.mxu3 %v11848_v31 }
 0x2cc   : > { %4278 = vmatmul.bf16.gmra.mxu3 %v21157_v59  ;;  %4372 = vmatmul.bf16.vlgmr.msrb.gmra.mxu2 %v21174_v63  ;;  %v4055_v23 = vpop.f32.mrf.mxu0  ;;  %v4088_v11 = vpop.f32.mrf.mxu1 }
 0x2cd   : > { %v4056_v29 = vadd.f32 %v4055_v23, %v4023_v21  ;;  %v11831_v21 = vld [vmem:[%s21108_s23 + $0x9a8] sm:$0xf] }
 0x2ce   : > { %v11832_v37 = vor.u32 %v14469_v34, %v11831_v21  ;;  %v14461_v21 = vld [vmem:[%s21108_s23 + $0x974] sm:$0xf0] }
 0x2cf   : > { %v4025_v52 = vpop.f32.mrf.mxu3  ;;  %v18143_v30 = vpop.f32.mrf.mxu2  ;;  %v18146_v47 = vadd.f32 %v4088_v11, %v4056_v29  ;;  %v14465_v11 = vld [vmem:[%s21108_s23 + $0x994] sm:$0xf0] }
 0x2d0   : > { %v4026_v44 = vadd.f32 %v4025_v52, %v17959_v28  ;;  %4399 = vmatpush.bf16.msrb.mxu3 %v11832_v37  ;;  %v11815_v28 = vld [vmem:[%s21108_s23 + $0x988] sm:$0xf]  ;;  %v14219_v37 = vld [vmem:[%s21108_s23 + $0x1ec] sm:$0xf] }
 0x2d1   : > { %21188 = vst [vmem:[#allocation70_spill] sm:$0xff] %v18146_v47  ;;  %v11816_v33 = vor.u32 %v14465_v11, %v11815_v28 }
 0x2d4   : > { %v4058_v46 = vpop.f32.mrf.mxu0  ;;  %v4091_v23 = vpop.f32.mrf.mxu1  ;;  %4400 = vmatpush.bf16.msrb.mxu3 %v11816_v33 }
 0x2d5   : > { %v4059_v27 = vadd.f32 %v4058_v46, %v4026_v44  ;;  %v11799_v44 = vld [vmem:[%s21108_s23 + $0x968] sm:$0xf] }
 0x2d6   : > { %v11800_v34 = vor.u32 %v14461_v21, %v11799_v44  ;;  %v11783_v44 = vld [vmem:[%s21108_s23 + $0x948] sm:$0xf]  ;;  %v14457_v21 = vld [vmem:[%s21108_s23 + $0x954] sm:$0xf0] }
 0x2d7   : > { %v4027_v29 = vpop.f32.mrf.mxu3  ;;  %v18160_v62 = vpop.f32.mrf.mxu2  ;;  %v18163_v31 = vadd.f32 %v4091_v23, %v4059_v27  ;;  %4311 = vmatmul.bf16.gmra.mxu0 %v21158_v26  ;;  %4344 = vmatmul.bf16.gmra.mxu1 %v21160_v0  ;;  %v10713_v27 = vld [vmem:[%s21108_s23 + $0xf8] sm:$0xf0]  ;;  %v21198_v0 = vld [vmem:[#allocation49_spill] sm:$0xff] }
 0x2d8   : > { %v4028_v52 = vadd.f32 %v4027_v29, %v18009_v50  ;;  %v14187_v50 = vld [vmem:[%s21108_s23 + $0xec] sm:$0xf]  ;;  %v10841_v23 = vld [vmem:[%s21108_s23 + $0x1f8] sm:$0xf0]  ;;  %4401 = vmatpush.bf16.msrb.mxu3 %v11800_v34  ;;  %v11784_v34 = vor.u32 %v14457_v21, %v11783_v44  ;;  %v14453_v44 = vld [vmem:[%s21108_s23 + $0x934] sm:$0xf0] }
 0x2d9   : > { %21189 = vst [vmem:[#allocation71_spill] sm:$0xff] %v18163_v31  ;;  %v10716_v46 = vor.u32 %v14187_v50, %v10713_v27  ;;  %v10844_v29 = vor.u32 %v14219_v37, %v10841_v23  ;;  %v14183_v50 = vld [vmem:[%s21108_s23 + $0xcc] sm:$0xf] }
 0x2da   : > { %v14215_v37 = vld [vmem:[%s21108_s23 + $0x1cc] sm:$0xf] }
 0x2db   : > { %4463 = vmatpush.bf16.msra.mxu1 %v10716_v46  ;;  %4496 = vmatpush.bf16.msra.mxu2 %v10844_v29  ;;  %v10825_v46 = vld [vmem:[%s21108_s23 + $0x1d8] sm:$0xf0]  ;;  %v11767_v29 = vld [vmem:[%s21108_s23 + $0x928] sm:$0xf]  ;;  %v14179_v21 = vld [vmem:[%s21108_s23 + $0xac] sm:$0xf] }
 0x2dc   : > { %4283 = vmatmul.bf16.gmra.mxu3 %v21163_v38  ;;  %4377 = vmatmul.bf16.gmra.mxu2 %v21177_v5  ;;  %v4060_v28 = vpop.f32.mrf.mxu0  ;;  %v4093_v11 = vpop.f32.mrf.mxu1  ;;  %v10828_v15 = vor.u32 %v14215_v37, %v10825_v46  ;;  %v11768_v12 = vor.u32 %v14453_v44, %v11767_v29  ;;  %v11751_v46 = vld [vmem:[%s21108_s23 + $0x908] sm:$0xf]  ;;  %v14449_v29 = vld [vmem:[%s21108_s23 + $0x914] sm:$0xf0] }
 0x2dd   : > { %v4061_v33 = vadd.f32 %v4060_v28, %v4028_v52  ;;  %v10697_v52 = vld [vmem:[%s21108_s23 + $0xd8] sm:$0xf0]  ;;  %4402 = vmatpush.bf16.msrb.mxu3 %v11784_v34 }
 0x2de   : > { %v10700_v47 = vor.u32 %v14183_v50, %v10697_v52 }
 0x2df   : > { %v4030_v27 = vpop.f32.mrf.mxu3  ;;  %v18196_v31 = vpop.f32.mrf.mxu2  ;;  %v18208_v28 = vadd.f32 %v4093_v11, %v4061_v33  ;;  %v14211_v11 = vld [vmem:[%s21108_s23 + $0x1ac] sm:$0xf]  ;;  %v10809_v33 = vld [vmem:[%s21108_s23 + $0x1b8] sm:$0xf0]  ;;  %4497 = vmatpush.bf16.msra.mxu2 %v10828_v15 }
 0x2e0   : > { %v4031_v23 = vadd.f32 %v4030_v27, %v18057_v32  ;;  %v10681_v32 = vld [vmem:[%s21108_s23 + $0xb8] sm:$0xf0]  ;;  %4464 = vmatpush.bf16.msra.mxu1 %v10700_v47  ;;  %v10812_v27 = vor.u32 %v14211_v11, %v10809_v33  ;;  %v14175_v47 = vld [vmem:[%s21108_s23 + $0x8c] sm:$0xf]  ;;  %v15191_v11 = vld [vmem:[#allocation11] sm:$0xf] }
 0x2e1   : > { %21190 = vst [vmem:[#allocation72_spill] sm:$0xff] %v18208_v28  ;;  %v10684_v50 = vor.u32 %v14179_v21, %v10681_v32  ;;  %4403 = vmatpush.bf16.msrb.mxu3 %v11768_v12  ;;  %v11752_v21 = vor.u32 %v14449_v29, %v11751_v46  ;;  %v10665_v12 = vld [vmem:[%s21108_s23 + $0x98] sm:$0xf0]  ;;  %v18248_v33 = vperm.slane %v15191_v11, 2  ;;  %v11927_v29 = vld [vmem:[%s21108_s23 + $0xa68] sm:$0xf] }
 0x2e2   : > { %v10793_v32 = vld [vmem:[%s21108_s23 + $0x198] sm:$0xf0] }
 0x2e3   : > { %4498 = vmatpush.bf16.msra.mxu2 %v10812_v27  ;;  %v21192_v27 = vld [vmem:[#allocation57_spill] sm:$0xff] }
 0x2e4   : > { %v4063_v52 = vpop.f32.mrf.mxu0  ;;  %v4096_v34 = vpop.f32.mrf.mxu1  ;;  %4465 = vmatpush.bf16.msra.mxu1 %v10684_v50 }
 0x2e5   : > { %v4064_v37 = vadd.f32 %v4063_v52, %v4031_v23  ;;  %v14207_v23 = vld [vmem:[%s21108_s23 + $0x18c] sm:$0xf]  ;;  %v10668_v52 = vor.u32 %v14175_v47, %v10665_v12  ;;  %4404 = vmatpush.bf16.msrb.mxu3 %v11752_v21  ;;  %v4110_v21 = vadd.f32 %v18103_v9, %v18248_v33  ;;  %v21193_v12 = vld [vmem:[#allocation44_spill] sm:$0xff]  ;;  %v14489_v9 = vld [vmem:[%s21108_s23 + $0xa54] sm:$0xf0] }
 0x2e6   : > { %v10796_v46 = vor.u32 %v14207_v23, %v10793_v32  ;;  %v14203_v47 = vld [vmem:[%s21108_s23 + $0x16c] sm:$0xf]  ;;  %v21194_v23 = vld [vmem:[#allocation60_spill] sm:$0xff] }
 0x2e7   : > { %v4032_v44 = vpop.f32.mrf.mxu3  ;;  %v18237_v15 = vpop.f32.mrf.mxu2  ;;  %v18250_v50 = vadd.f32 %v4096_v34, %v4064_v37  ;;  %4316 = vmatmul.bf16.gmra.mxu0 %v21164_v22  ;;  %4349 = vmatmul.bf16.gmra.mxu1 %v21192_v27  ;;  %v14171_v34 = vld [vmem:[%s21108_s23 + $0x6c] sm:$0xf]  ;;  %v10649_v37 = vld [vmem:[%s21108_s23 + $0x78] sm:$0xf0]  ;;  %v14481_v27 = vld [vmem:[%s21108_s23 + $0xa14] sm:$0xf0] }
 0x2e8   : > { %4466 = vmatpush.bf16.msra.mxu1 %v10668_v52  ;;  %v14493_v44 = vld [vmem:[%s21108_s23 + $0xa74] sm:$0xf0]  ;;  %4499 = vmatpush.bf16.msra.mxu2 %v10796_v46  ;;  %v10652_v32 = vor.u32 %v14171_v34, %v10649_v37  ;;  %v10777_v52 = vld [vmem:[%s21108_s23 + $0x178] sm:$0xf0]  ;;  %v14167_v34 = vld [vmem:[%s21108_s23 + $0x4c] sm:$0xf] }
 0x2e9   : > { %21191 = vst [vmem:[#allocation73_spill] sm:$0xff] %v18250_v50  ;;  %v11928_v11 = vor.u32 %v14493_v44, %v11927_v29  ;;  %v10780_v44 = vor.u32 %v14203_v47, %v10777_v52  ;;  %v11911_v50 = vld [vmem:[%s21108_s23 + $0xa48] sm:$0xf]  ;;  %v14199_v47 = vld [vmem:[%s21108_s23 + $0x14c] sm:$0xf] }
 0x2eb   : > { %4434 = vmatpush.bf16.msra.mxu0 %v11928_v11  ;;  %v10633_v11 = vld [vmem:[%s21108_s23 + $0x58] sm:$0xf0] }
 0x2ec   : > { %4288 = vmatmul.bf16.gmra.mxu3 %v21193_v12  ;;  %4382 = vmatmul.bf16.gmra.mxu2 %v21194_v23  ;;  %v4065_v46 = vpop.f32.mrf.mxu0  ;;  %v4098_v29 = vpop.f32.mrf.mxu1 }
 0x2ed   : > { %4467 = vmatpush.bf16.msra.mxu1 %v10652_v32  ;;  %4500 = vmatpush.bf16.msra.mxu2 %v10780_v44  ;;  %v11912_v46 = vor.u32 %v14489_v9, %v11911_v50  ;;  %v10761_v32 = vld [vmem:[%s21108_s23 + $0x158] sm:$0xf0]  ;;  %v10636_v29 = vor.u32 %v14167_v34, %v10633_v11  ;;  %v11895_v44 = vld [vmem:[%s21108_s23 + $0xa28] sm:$0xf]  ;;  %v14485_v50 = vld [vmem:[%s21108_s23 + $0xa34] sm:$0xf0] }
 0x2ee   : > { %v10764_v1 = vor.u32 %v14199_v47, %v10761_v32  ;;  %v14163_v9 = vld [vmem:[%s21108_s23 + $0x2c] sm:$0xf]  ;;  %v11896_v43 = vor.u32 %v14485_v50, %v11895_v44  ;;  %v10745_v34 = vld [vmem:[%s21108_s23 + $0x138] sm:$0xf0]  ;;  %v11879_v50 = vld [vmem:[%s21108_s23 + $0xa08] sm:$0xf] }
 0x2ef   : > { %v18285_v37 = vpop.f32.mrf.mxu2  ;;  %v4142_v28 = vpop.f32.mrf.mxu3  ;;  %4435 = vmatpush.bf16.msra.mxu0 %v11912_v46  ;;  %v4112_v46 = vadd.f32 %v18108_v58, %v18248_v33  ;;  %v10601_v58 = vld [vmem:[%s21108_s23 + $0x18] sm:$0xf0] }
 0x2f0   : > { %v4143_v52 = vadd.f32 %v4142_v28, %v4110_v21  ;;  %v10617_v28 = vld [vmem:[%s21108_s23 + $0x38] sm:$0xf0]  ;;  %v14195_v21 = vld [vmem:[%s21108_s23 + $0x12c] sm:$0xf] }
 0x2f1   : > { %4468 = vmatpush.bf16.msra.mxu1 %v10636_v29  ;;  %v10620_v11 = vor.u32 %v14163_v9, %v10617_v28  ;;  %4501 = vmatpush.bf16.msra.mxu2 %v10764_v1  ;;  %v10748_v47 = vor.u32 %v14195_v21, %v10745_v34  ;;  %v14159_v1 = vld [vmem:[%s21108_s23 + $0xc] sm:$0xf]  ;;  %v10729_v28 = vld [vmem:[%s21108_s23 + $0x118] sm:$0xf0] }
 0x2f3   : > { %4436 = vmatpush.bf16.msra.mxu0 %v11896_v43  ;;  %v11880_v43 = vor.u32 %v14481_v27, %v11879_v50  ;;  %v4115_v50 = vadd.f32 %v18117_v24, %v18248_v33 }
 0x2f4   : > { %v4175_v32 = vpop.f32.mrf.mxu0  ;;  %v4208_v23 = vpop.f32.mrf.mxu1 }
 0x2f5   : > { %v4176_v44 = vadd.f32 %v4175_v32, %v4143_v52  ;;  %4469 = vmatpush.bf16.msra.mxu1 %v10620_v11  ;;  %4502 = vmatpush.bf16.msra.mxu2 %v10748_v47  ;;  %v14191_v52 = vld [vmem:[%s21108_s23 + $0x10c] sm:$0xf]  ;;  %v21195_v11 = vld [vmem:[#allocation46_spill] sm:$0xff]  ;;  %v10604_v47 = vor.u32 %v14159_v1, %v10601_v58 }
 0x2f6   : > { %v21196_v32 = vld [vmem:[#allocation62_spill] sm:$0xff]  ;;  %v10732_v27 = vor.u32 %v14191_v52, %v10729_v28  ;;  %v4117_v52 = vadd.f32 %v18122_v45, %v18248_v33 }
 0x2f7   : > { %v4131_v29 = vpop.f32.mrf.mxu2  ;;  %v4144_v9 = vpop.f32.mrf.mxu3  ;;  %v4209_v34 = vadd.f32 %v4208_v23, %v4176_v44  ;;  %4321 = vmatmul.bf16.gmra.mxu0 %v21195_v11  ;;  %4354 = vmatmul.bf16.gmra.mxu1 %v21196_v32 }
 0x2f8   : > { %v4145_v21 = vadd.f32 %v4144_v9, %v4112_v46  ;;  %4437 = vmatpush.bf16.msra.mxu0 %v11880_v43  ;;  %v21197_v29 = vld [vmem:[#allocation47_spill] sm:$0xff] }
 0x2f9   : > { %4470 = vmatpush.bf16.msra.mxu1 %v10604_v47  ;;  %4503 = vmatpush.bf16.msra.mxu2 %v10732_v27 }
 0x2fc   : > { %4293 = vmatmul.bf16.gmra.mxu3 %v21197_v29  ;;  %4387 = vmatmul.bf16.gmra.mxu2 %v17111_v48  ;;  %v4177_v22 = vpop.f32.mrf.mxu0  ;;  %v4210_v5 = vpop.f32.mrf.mxu1 }
 0x2fd   : > { %v4178_v46 = vadd.f32 %v4177_v22, %v4145_v21  ;;  %v21199_v22 = vld [vmem:[#allocation59_spill] sm:$0xff]  ;;  %v4120_v21 = vadd.f32 %v18143_v30, %v18248_v33 }
 0x2ff   : > { %v4147_v23 = vpop.f32.mrf.mxu3  ;;  %v4241_v44 = vpop.f32.mrf.mxu2  ;;  %v4211_v1 = vadd.f32 %v4210_v5, %v4178_v46  ;;  %v21200_v5 = vld [vmem:[#allocation52_spill] sm:$0xff] }
 0x300   : > { %v4148_v9 = vadd.f32 %v4147_v23, %v4115_v50  ;;  %v18340_v11 = vadd.f32 %v4241_v44, %v4209_v34 }
 0x304   : > { %v4180_v43 = vpop.f32.mrf.mxu0  ;;  %v4213_v58 = vpop.f32.mrf.mxu1 }
 0x305   : > { %v4181_v28 = vadd.f32 %v4180_v43, %v4148_v9 }
 0x307   : > { %v4149_v24 = vpop.f32.mrf.mxu3  ;;  %v4243_v47 = vpop.f32.mrf.mxu2  ;;  %v4214_v48 = vadd.f32 %v4213_v58, %v4181_v28  ;;  %4326 = vmatmul.bf16.gmra.mxu0 %v21198_v0  ;;  %4359 = vmatmul.bf16.gmra.mxu1 %v21199_v22  ;;  %v21201_v0 = vld [vmem:[#allocation54_spill] sm:$0xff] }
 0x308   : > { %v4150_v27 = vadd.f32 %v4149_v24, %v4117_v52  ;;  %v18344_v32 = vadd.f32 %v4243_v47, %v4211_v1  ;;  %v4122_v52 = vadd.f32 %v18160_v62, %v18248_v33  ;;  %v10969_v62 = vld [vmem:[%s21108_s23 + $0x2f8] sm:$0xf0] }
 0x30c   : > { %4392 = vmatmul.bf16.gmra.mxu2 %v17062_v42  ;;  %4405 = vmatmul.bf16.vlgmr.msrb.gmra.mxu3 %v21200_v5  ;;  %v4182_v34 = vpop.f32.mrf.mxu0  ;;  %v4215_v45 = vpop.f32.mrf.mxu1 }
 0x30d   : > { %v4183_v50 = vadd.f32 %v4182_v34, %v4150_v27  ;;  %v21202_v27 = vld [vmem:[#allocation36_spill] sm:$0xff]  ;;  %v4125_v34 = vadd.f32 %v18196_v31, %v18248_v33 }
 0x30f   : > { %v4152_v46 = vpop.f32.mrf.mxu3  ;;  %v4246_v23 = vpop.f32.mrf.mxu2  ;;  %v4216_v1 = vadd.f32 %v4215_v45, %v4183_v50  ;;  %v21203_v45 = vld [vmem:[#allocation56_spill] sm:$0xff] }
 0x310   : > { %v4153_v44 = vadd.f32 %v4152_v46, %v4120_v21  ;;  %v18352_v9 = vadd.f32 %v4246_v23, %v4214_v48  ;;  %v14251_v48 = vld [vmem:[%s21108_s23 + $0x2ec] sm:$0xf] }
 0x311   : > { %v10972_v21 = vor.u32 %v14251_v48, %v10969_v62  ;;  %v4127_v62 = vadd.f32 %v18237_v15, %v18248_v33  ;;  %v21205_v15 = vld [vmem:[#allocation35_spill] sm:$0xff] }
 0x313   : > { %4529 = vmatpush.bf16.msra.mxu3 %v10972_v21 }
 0x314   : > { %v4185_v43 = vpop.f32.mrf.mxu0  ;;  %v4218_v58 = vpop.f32.mrf.mxu1 }
 0x315   : > { %v4186_v28 = vadd.f32 %v4185_v43, %v4153_v44  ;;  %v14247_v44 = vld [vmem:[%s21108_s23 + $0x2cc] sm:$0xf] }
 0x317   : > { %v4154_v30 = vpop.f32.mrf.mxu3  ;;  %v4248_v24 = vpop.f32.mrf.mxu2  ;;  %v4219_v22 = vadd.f32 %v4218_v58, %v4186_v28  ;;  %11943 = vmatmul.msk.bf16.vlgmr.msra.gmra.mxu0 %vm1212_vm1, %v21201_v0  ;;  %4471 = vmatmul.bf16.vlgmr.msra.gmra.mxu1 %v21202_v27 }
 0x318   : > { %v4155_v47 = vadd.f32 %v4154_v30, %v4122_v52  ;;  %v18356_v42 = vadd.f32 %v4248_v24, %v4216_v1  ;;  %v10953_v1 = vld [vmem:[%s21108_s23 + $0x2d8] sm:$0xf0] }
 0x319   : > { %v10956_v52 = vor.u32 %v14247_v44, %v10953_v1  ;;  %v10937_v24 = vld [vmem:[%s21108_s23 + $0x2b8] sm:$0xf0] }
 0x31b   : > { %4530 = vmatpush.bf16.msra.mxu3 %v10956_v52  ;;  %v14235_v52 = vld [vmem:[%s21108_s23 + $0x26c] sm:$0xf] }
 0x31c   : > { %4410 = vmatmul.bf16.gmra.mxu3 %v21203_v45  ;;  %4504 = vmatmul.bf16.vlgmr.msra.gmra.mxu2 %v16255_v7  ;;  %v4187_v50 = vpop.f32.mrf.mxu0  ;;  %v4220_v46 = vpop.f32.mrf.mxu1  ;;  %v14243_v7 = vld [vmem:[%s21108_s23 + $0x2ac] sm:$0xf] }
 0x31d   : > { %v4188_v23 = vadd.f32 %v4187_v50, %v4155_v47  ;;  %v10940_v47 = vor.u32 %v14243_v7, %v10937_v24  ;;  %v11097_v24 = vld [vmem:[%s21108_s23 + $0x3f8] sm:$0xf0] }
 0x31f   : > { %v4157_v43 = vpop.f32.mrf.mxu3  ;;  %v4251_v58 = vpop.f32.mrf.mxu2  ;;  %v4221_v30 = vadd.f32 %v4220_v46, %v4188_v23  ;;  %4531 = vmatpush.bf16.msra.mxu3 %v10940_v47  ;;  %v14315_v47 = vld [vmem:[%s21108_s23 + $0x4ec] sm:$0xf] }
 0x320   : > { %v4158_v31 = vadd.f32 %v4157_v43, %v4125_v34  ;;  %v18377_v28 = vadd.f32 %v4251_v58, %v4219_v22  ;;  %v14239_v22 = vld [vmem:[%s21108_s23 + $0x28c] sm:$0xf]  ;;  %v10921_v34 = vld [vmem:[%s21108_s23 + $0x298] sm:$0xf0]  ;;  %v21204_v58 = vld [vmem:[#allocation58_spill] sm:$0xff] }
 0x321   : > { %v10924_v23 = vor.u32 %v14239_v22, %v10921_v34  ;;  %v14347_v34 = vld [vmem:[%s21108_s23 + $0x5ec] sm:$0xf] }
 0x323   : > { %4532 = vmatpush.bf16.msra.mxu3 %v10924_v23 }
 0x324   : > { %v4190_v27 = vpop.f32.mrf.mxu0  ;;  %v4223_v48 = vpop.f32.mrf.mxu1 }
 0x325   : > { %v4191_v21 = vadd.f32 %v4190_v27, %v4158_v31  ;;  %v10905_v31 = vld [vmem:[%s21108_s23 + $0x278] sm:$0xf0] }
 0x326   : > { %v10908_v7 = vor.u32 %v14235_v52, %v10905_v31  ;;  %v11225_v27 = vld [vmem:[%s21108_s23 + $0x4f8] sm:$0xf0] }
 0x327   : > { %v4159_v50 = vpop.f32.mrf.mxu3  ;;  %v4253_v46 = vpop.f32.mrf.mxu2  ;;  %v4224_v43 = vadd.f32 %v4223_v48, %v4191_v21  ;;  %11944 = vmatmul.msk.bf16.gmra.mxu0 %vm1212_vm1, %v21204_v58  ;;  %4476 = vmatmul.bf16.gmra.mxu1 %v21205_v15  ;;  %v4130_v48 = vadd.f32 %v18285_v37, %v18248_v33  ;;  %v11228_v22 = vor.u32 %v14315_v47, %v11225_v27  ;;  %v10889_v33 = vld [vmem:[%s21108_s23 + $0x258] sm:$0xf0]  ;;  %v14279_v37 = vld [vmem:[%s21108_s23 + $0x3cc] sm:$0xf] }
 0x328   : > { %v4160_v44 = vadd.f32 %v4159_v50, %v4127_v62  ;;  %v18393_v1 = vadd.f32 %v4253_v46, %v4221_v30  ;;  %v14283_v30 = vld [vmem:[%s21108_s23 + $0x3ec] sm:$0xf]  ;;  %v11353_v50 = vld [vmem:[%s21108_s23 + $0x5f8] sm:$0xf0]  ;;  %4533 = vmatpush.bf16.msra.mxu3 %v10908_v7 }
 0x329   : > { %v21206_v62 = vld [vmem:[#allocation61_spill] sm:$0xff]  ;;  %v11100_v21 = vor.u32 %v14283_v30, %v11097_v24  ;;  %v11356_v15 = vor.u32 %v14347_v34, %v11353_v50  ;;  %4595 = vmatpush.bf16.msrb.mxu1 %v11228_v22  ;;  %v11209_v47 = vld [vmem:[%s21108_s23 + $0x4d8] sm:$0xf0] }
 0x32a   : > { %v14311_v24 = vld [vmem:[%s21108_s23 + $0x4cc] sm:$0xf] }
 0x32b   : > { %4562 = vmatpush.bf16.msrb.mxu0 %v11100_v21  ;;  %4628 = vmatpush.bf16.msrb.mxu2 %v11356_v15  ;;  %v14343_v50 = vld [vmem:[%s21108_s23 + $0x5cc] sm:$0xf] }
 0x32c   : > { %4415 = vmatmul.bf16.gmra.mxu3 %v21206_v62  ;;  %4509 = vmatmul.bf16.gmra.mxu2 %v15959_v13  ;;  %v4192_v46 = vpop.f32.mrf.mxu0  ;;  %v4225_v23 = vpop.f32.mrf.mxu1  ;;  %v14231_v13 = vld [vmem:[%s21108_s23 + $0x24c] sm:$0xf] }
 0x32d   : > { %v4193_v52 = vadd.f32 %v4192_v46, %v4160_v44  ;;  %v10892_v7 = vor.u32 %v14231_v13, %v10889_v33  ;;  %v11081_v44 = vld [vmem:[%s21108_s23 + $0x3d8] sm:$0xf0]  ;;  %v14227_v15 = vld [vmem:[%s21108_s23 + $0x22c] sm:$0xf]  ;;  %v11212_v13 = vor.u32 %v14311_v24, %v11209_v47 }
 0x32e   : > { %v11084_v34 = vor.u32 %v14279_v37, %v11081_v44  ;;  %v11337_v46 = vld [vmem:[%s21108_s23 + $0x5d8] sm:$0xf0] }
 0x32f   : > { %v4162_v31 = vpop.f32.mrf.mxu3  ;;  %v4256_v30 = vpop.f32.mrf.mxu2  ;;  %v4226_v22 = vadd.f32 %v4225_v23, %v4193_v52  ;;  %4534 = vmatpush.bf16.msra.mxu3 %v10892_v7  ;;  %v11340_v33 = vor.u32 %v14343_v50, %v11337_v46  ;;  %v11065_v23 = vld [vmem:[%s21108_s23 + $0x3b8] sm:$0xf0]  ;;  %v14339_v7 = vld [vmem:[%s21108_s23 + $0x5ac] sm:$0xf]  ;;  %4596 = vmatpush.bf16.msrb.mxu1 %v11212_v13 }
 0x330   : > { %v4163_v27 = vadd.f32 %v4162_v31, %v4130_v48  ;;  %v18444_v21 = vadd.f32 %v4256_v30, %v4224_v43  ;;  %v10873_v43 = vld [vmem:[%s21108_s23 + $0x238] sm:$0xf0]  ;;  %v14275_v48 = vld [vmem:[%s21108_s23 + $0x3ac] sm:$0xf]  ;;  %4563 = vmatpush.bf16.msrb.mxu0 %v11084_v34 }
 0x331   : > { %v10876_v52 = vor.u32 %v14227_v15, %v10873_v43  ;;  %v11068_v37 = vor.u32 %v14275_v48, %v11065_v23  ;;  %v14307_v31 = vld [vmem:[%s21108_s23 + $0x4ac] sm:$0xf]  ;;  %v11193_v30 = vld [vmem:[%s21108_s23 + $0x4b8] sm:$0xf0]  ;;  %4629 = vmatpush.bf16.msrb.mxu2 %v11340_v33 }
 0x332   : > { %v11196_v44 = vor.u32 %v14307_v31, %v11193_v30  ;;  %v11321_v24 = vld [vmem:[%s21108_s23 + $0x5b8] sm:$0xf0]  ;;  %v14223_v15 = vld [vmem:[%s21108_s23 + $0x20c] sm:$0xf] }
 0x333   : > { %v11324_v47 = vor.u32 %v14339_v7, %v11321_v24  ;;  %4535 = vmatpush.bf16.msra.mxu3 %v10876_v52  ;;  %v10857_v13 = vld [vmem:[%s21108_s23 + $0x218] sm:$0xf0]  ;;  %v14271_v33 = vld [vmem:[%s21108_s23 + $0x38c] sm:$0xf] }
 0x334   : > { %v4195_v34 = vpop.f32.mrf.mxu0  ;;  %v4228_v50 = vpop.f32.mrf.mxu1  ;;  %4564 = vmatpush.bf16.msrb.mxu0 %v11068_v37  ;;  %4597 = vmatpush.bf16.msrb.mxu1 %v11196_v44  ;;  %v10860_v23 = vor.u32 %v14223_v15, %v10857_v13  ;;  %v14303_v52 = vld [vmem:[%s21108_s23 + $0x48c] sm:$0xf]  ;;  %v11177_v37 = vld [vmem:[%s21108_s23 + $0x498] sm:$0xf0]  ;;  %v21208_v44 = vld [vmem:[#allocation34_spill] sm:$0xff] }
 0x335   : > { %v4196_v46 = vadd.f32 %v4195_v34, %v4163_v27  ;;  %4630 = vmatpush.bf16.msrb.mxu2 %v11324_v47  ;;  %v11049_v27 = vld [vmem:[%s21108_s23 + $0x398] sm:$0xf0]  ;;  %v14335_v47 = vld [vmem:[%s21108_s23 + $0x58c] sm:$0xf]  ;;  %v11180_v15 = vor.u32 %v14303_v52, %v11177_v37 }
 0x336   : > { %v21207_v7 = vld [vmem:[#allocation63_spill] sm:$0xff]  ;;  %v11052_v24 = vor.u32 %v14271_v33, %v11049_v27 }
 0x337   : > { %v4164_v43 = vpop.f32.mrf.mxu3  ;;  %v4258_v48 = vpop.f32.mrf.mxu2  ;;  %v4229_v30 = vadd.f32 %v4228_v50, %v4196_v46  ;;  %11945 = vmatmul.msk.bf16.gmra.mxu0 %vm1212_vm1, %v21207_v7  ;;  %4481 = vmatmul.bf16.gmra.mxu1 %v21208_v44  ;;  %v11305_v34 = vld [vmem:[%s21108_s23 + $0x598] sm:$0xf0]  ;;  %v14299_v46 = vld [vmem:[%s21108_s23 + $0x46c] sm:$0xf] }
 0x338   : > { %v18494_v31 = vadd.f32 %v4258_v48, %v4226_v22  ;;  %4536 = vmatpush.bf16.msra.mxu3 %v10860_v23  ;;  %v11308_v13 = vor.u32 %v14335_v47, %v11305_v34  ;;  %4565 = vmatpush.bf16.msrb.mxu0 %v11052_v24  ;;  %v14267_v22 = vld [vmem:[%s21108_s23 + $0x36c] sm:$0xf]  ;;  %v11033_v50 = vld [vmem:[%s21108_s23 + $0x378] sm:$0xf0] }
 0x339   : > { %4598 = vmatpush.bf16.msrb.mxu1 %v11180_v15  ;;  %v11036_v33 = vor.u32 %v14267_v22, %v11033_v50  ;;  %v11161_v43 = vld [vmem:[%s21108_s23 + $0x478] sm:$0xf0]  ;;  %v14331_v48 = vld [vmem:[%s21108_s23 + $0x56c] sm:$0xf] }
 0x33a   : > { %4631 = vmatpush.bf16.msrb.mxu2 %v11308_v13  ;;  %v11289_v23 = vld [vmem:[%s21108_s23 + $0x578] sm:$0xf0]  ;;  %v11164_v27 = vor.u32 %v14299_v46, %v11161_v43  ;;  %v14263_v24 = vld [vmem:[%s21108_s23 + $0x34c] sm:$0xf] }
 0x33b   : > { %v11292_v52 = vor.u32 %v14331_v48, %v11289_v23  ;;  %v11017_v47 = vld [vmem:[%s21108_s23 + $0x358] sm:$0xf0]  ;;  %v14295_v34 = vld [vmem:[%s21108_s23 + $0x44c] sm:$0xf] }
 0x33c   : > { %4420 = vmatmul.bf16.gmra.mxu3 %v17117_v8  ;;  %4514 = vmatmul.bf16.gmra.mxu2 %v16025_v60  ;;  %v4197_v37 = vpop.f32.mrf.mxu0  ;;  %v4230_v44 = vpop.f32.mrf.mxu1  ;;  %v11020_v60 = vor.u32 %v14263_v24, %v11017_v47  ;;  %v11145_v22 = vld [vmem:[%s21108_s23 + $0x458] sm:$0xf0]  ;;  %v14327_v50 = vld [vmem:[%s21108_s23 + $0x54c] sm:$0xf] }
 0x33d   : > { %4566 = vmatpush.bf16.msrb.mxu0 %v11036_v33  ;;  %4599 = vmatpush.bf16.msrb.mxu1 %v11164_v27  ;;  %v11273_v46 = vld [vmem:[%s21108_s23 + $0x558] sm:$0xf0]  ;;  %v11148_v48 = vor.u32 %v14295_v34, %v11145_v22  ;;  %v14259_v27 = vld [vmem:[%s21108_s23 + $0x32c] sm:$0xf] }
 0x33e   : > { %4632 = vmatpush.bf16.msrb.mxu2 %v11292_v52  ;;  %v11276_v23 = vor.u32 %v14327_v50, %v11273_v46  ;;  %v11001_v52 = vld [vmem:[%s21108_s23 + $0x338] sm:$0xf0]  ;;  %v14291_v37 = vld [vmem:[%s21108_s23 + $0x42c] sm:$0xf] }
 0x33f   : > { %v4261_v15 = vpop.f32.mrf.mxu2  ;;  %v4274_v13 = vpop.f32.mrf.mxu3  ;;  %v11257_v44 = vld [vmem:[%s21108_s23 + $0x538] sm:$0xf0]  ;;  %v11004_v24 = vor.u32 %v14259_v27, %v11001_v52  ;;  %v14255_v50 = vld [vmem:[%s21108_s23 + $0x30c] sm:$0xf] }
 0x340   : > { %v18543_v33 = vadd.f32 %v4261_v15, %v4229_v30  ;;  %v4275_v43 = vadd.f32 %v4274_v13, %v18340_v11  ;;  %v11129_v30 = vld [vmem:[%s21108_s23 + $0x438] sm:$0xf0]  ;;  %v14323_v11 = vld [vmem:[%s21108_s23 + $0x52c] sm:$0xf] }
 0x341   : > { %4567 = vmatpush.bf16.msrb.mxu0 %v11020_v60  ;;  %4600 = vmatpush.bf16.msrb.mxu1 %v11148_v48  ;;  %v11132_v47 = vor.u32 %v14291_v37, %v11129_v30  ;;  %v11260_v34 = vor.u32 %v14323_v11, %v11257_v44  ;;  %v10985_v46 = vld [vmem:[%s21108_s23 + $0x318] sm:$0xf0]  ;;  %v14287_v60 = vld [vmem:[%s21108_s23 + $0x40c] sm:$0xf] }
 0x342   : > { %4633 = vmatpush.bf16.msrb.mxu2 %v11276_v23  ;;  %v10988_v27 = vor.u32 %v14255_v50, %v10985_v46  ;;  %v14319_v52 = vld [vmem:[%s21108_s23 + $0x50c] sm:$0xf]  ;;  %v11241_v37 = vld [vmem:[%s21108_s23 + $0x518] sm:$0xf0] }
 0x344   : > { %v4307_v15 = vpop.f32.mrf.mxu0  ;;  %v4340_v13 = vpop.f32.mrf.mxu1 }
 0x345   : > { %v4308_v22 = vadd.f32 %v4307_v15, %v4275_v43  ;;  %4568 = vmatpush.bf16.msrb.mxu0 %v11004_v24  ;;  %4601 = vmatpush.bf16.msrb.mxu1 %v11132_v47  ;;  %v11113_v43 = vld [vmem:[%s21108_s23 + $0x418] sm:$0xf0]  ;;  %v11244_v24 = vor.u32 %v14319_v52, %v11241_v37 }
 0x346   : > { %4634 = vmatpush.bf16.msrb.mxu2 %v11260_v34  ;;  %v11116_v44 = vor.u32 %v14287_v60, %v11113_v43 }
 0x347   : > { %v4263_v48 = vpop.f32.mrf.mxu2  ;;  %v4276_v23 = vpop.f32.mrf.mxu3  ;;  %v4341_v11 = vadd.f32 %v4340_v13, %v4308_v22  ;;  %11946 = vmatmul.msk.bf16.gmra.mxu0 %vm1212_vm1, %v17146_v18  ;;  %4486 = vmatmul.bf16.gmra.mxu1 %v15925_v35 }
 0x348   : > { %v4277_v30 = vadd.f32 %v4276_v23, %v18344_v32 }
 0x349   : > { %4569 = vmatpush.bf16.msrb.mxu0 %v10988_v27  ;;  %4602 = vmatpush.bf16.msrb.mxu1 %v11116_v44 }
 0x34a   : > { %4635 = vmatpush.bf16.msrb.mxu2 %v11244_v24 }
 0x34c   : > { %4425 = vmatmul.bf16.gmra.mxu3 %v17064_v40  ;;  %4519 = vmatmul.bf16.gmra.mxu2 %v16075_v51  ;;  %v4309_v47 = vpop.f32.mrf.mxu0  ;;  %v4342_v34 = vpop.f32.mrf.mxu1 }
 0x34d   : > { %v4310_v15 = vadd.f32 %v4309_v47, %v4277_v30 }
 0x34f   : > { %v4279_v50 = vpop.f32.mrf.mxu3  ;;  %v4373_v32 = vpop.f32.mrf.mxu2  ;;  %v4343_v46 = vadd.f32 %v4342_v34, %v4310_v15 }
 0x350   : > { %v4280_v13 = vadd.f32 %v4279_v50, %v18352_v9  ;;  %v18589_v22 = vadd.f32 %v4373_v32, %v4341_v11 }
 0x354   : > { %v4312_v35 = vpop.f32.mrf.mxu0  ;;  %v4345_v60 = vpop.f32.mrf.mxu1 }
 0x355   : > { %v4313_v48 = vadd.f32 %v4312_v35, %v4280_v13 }
 0x357   : > { %v4281_v23 = vpop.f32.mrf.mxu3  ;;  %v4375_v27 = vpop.f32.mrf.mxu2  ;;  %v4346_v51 = vadd.f32 %v4345_v60, %v4313_v48  ;;  %11947 = vmatmul.msk.bf16.gmra.mxu0 %vm1212_vm1, %v17119_v57  ;;  %4491 = vmatmul.bf16.gmra.mxu1 %v16489_v10 }
 0x358   : > { %v4282_v43 = vadd.f32 %v4281_v23, %v18356_v42  ;;  %v18592_v52 = vadd.f32 %v4375_v27, %v4343_v46  ;;  %v11481_v46 = vld [vmem:[%s21108_s23 + $0x6f8] sm:$0xf0] }
 0x35c   : > { %4524 = vmatmul.bf16.gmra.mxu2 %v16493_v16  ;;  %4537 = vmatmul.bf16.vlgmr.msra.gmra.mxu3 %v16261_v17  ;;  %v4314_v9 = vpop.f32.mrf.mxu0  ;;  %v4347_v37 = vpop.f32.mrf.mxu1 }
 0x35d   : > { %v4315_v30 = vadd.f32 %v4314_v9, %v4282_v43  ;;  %v14371_v9 = vld [vmem:[%s21108_s23 + $0x6ac] sm:$0xf] }
 0x35f   : > { %v4284_v11 = vpop.f32.mrf.mxu3  ;;  %v4378_v44 = vpop.f32.mrf.mxu2  ;;  %v4348_v47 = vadd.f32 %v4347_v37, %v4315_v30  ;;  %v11449_v37 = vld [vmem:[%s21108_s23 + $0x6b8] sm:$0xf0] }
 0x360   : > { %v4285_v24 = vadd.f32 %v4284_v11, %v18377_v28  ;;  %v18600_v42 = vadd.f32 %v4378_v44, %v4346_v51  ;;  %v14379_v28 = vld [vmem:[%s21108_s23 + $0x6ec] sm:$0xf]  ;;  %v11452_v30 = vor.u32 %v14371_v9, %v11449_v37 }
 0x361   : > { %v11484_v35 = vor.u32 %v14379_v28, %v11481_v46  ;;  %v11417_v28 = vld [vmem:[%s21108_s23 + $0x678] sm:$0xf0] }
 0x363   : > { %4661 = vmatpush.bf16.msrb.mxu3 %v11484_v35 }
 0x364   : > { %v4317_v34 = vpop.f32.mrf.mxu0  ;;  %v4350_v15 = vpop.f32.mrf.mxu1 }
 0x365   : > { %v4318_v50 = vadd.f32 %v4317_v34, %v4285_v24 }
 0x367   : > { %v4286_v32 = vpop.f32.mrf.mxu3  ;;  %v4380_v13 = vpop.f32.mrf.mxu2  ;;  %v4351_v17 = vadd.f32 %v4350_v15, %v4318_v50  ;;  %4570 = vmatmul.bf16.vlgmr.msrb.gmra.mxu0 %v16509_v25  ;;  %4603 = vmatmul.bf16.vlgmr.msrb.gmra.mxu1 %v16515_v6  ;;  %v14375_v25 = vld [vmem:[%s21108_s23 + $0x6cc] sm:$0xf]  ;;  %v11465_v6 = vld [vmem:[%s21108_s23 + $0x6d8] sm:$0xf0] }
 0x368   : > { %v4287_v10 = vadd.f32 %v4286_v32, %v18393_v1  ;;  %v18603_v16 = vadd.f32 %v4380_v13, %v4348_v47  ;;  %v11468_v43 = vor.u32 %v14375_v25, %v11465_v6  ;;  %v11433_v47 = vld [vmem:[%s21108_s23 + $0x698] sm:$0xf0] }
 0x36a   : > { %4662 = vmatpush.bf16.msrb.mxu3 %v11468_v43  ;;  %v11401_v43 = vld [vmem:[%s21108_s23 + $0x658] sm:$0xf0] }
 0x36c   : > { %4542 = vmatmul.bf16.gmra.mxu3 %v16083_v54  ;;  %4636 = vmatmul.bf16.vlgmr.msrb.gmra.mxu2 %v16518_v36  ;;  %v4319_v1 = vpop.f32.mrf.mxu0  ;;  %v4352_v60 = vpop.f32.mrf.mxu1 }
 0x36d   : > { %v4320_v48 = vadd.f32 %v4319_v1, %v4287_v10  ;;  %v11865_v1 = vld [vmem:[%s21108_s23 + $0x9f8] sm:$0xf0] }
 0x36e   : > { %4663 = vmatpush.bf16.msrb.mxu3 %v11452_v30  ;;  %v11593_v30 = vld [vmem:[%s21108_s23 + $0x7d8] sm:$0xf0] }
 0x36f   : > { %v4289_v23 = vpop.f32.mrf.mxu3  ;;  %v4383_v27 = vpop.f32.mrf.mxu2  ;;  %v4353_v36 = vadd.f32 %v4352_v60, %v4320_v48  ;;  %v14443_v60 = vld [vmem:[%s21108_s23 + $0x8ec] sm:$0xf]  ;;  %v11737_v48 = vld [vmem:[%s21108_s23 + $0x8f8] sm:$0xf0] }
 0x370   : > { %v4290_v51 = vadd.f32 %v4289_v23, %v18444_v21  ;;  %v18622_v54 = vadd.f32 %v4383_v27, %v4351_v17  ;;  %v14367_v21 = vld [vmem:[%s21108_s23 + $0x68c] sm:$0xf] }
 0x371   : > { %v11436_v50 = vor.u32 %v14367_v21, %v11433_v47  ;;  %v14363_v17 = vld [vmem:[%s21108_s23 + $0x66c] sm:$0xf] }
 0x372   : > { %v11420_v46 = vor.u32 %v14363_v17, %v11417_v28  ;;  %v14403_v28 = vld [vmem:[%s21108_s23 + $0x7ac] sm:$0xf] }
 0x373   : > { %4664 = vmatpush.bf16.msrb.mxu3 %v11436_v50  ;;  %v11721_v50 = vld [vmem:[%s21108_s23 + $0x8d8] sm:$0xf0] }
 0x374   : > { %v4322_v11 = vpop.f32.mrf.mxu0  ;;  %v4355_v44 = vpop.f32.mrf.mxu1 }
 0x375   : > { %v4323_v24 = vadd.f32 %v4322_v11, %v4290_v51  ;;  %v14407_v51 = vld [vmem:[%s21108_s23 + $0x7cc] sm:$0xf] }
 0x376   : > { %v14471_v11 = vld [vmem:[%s21108_s23 + $0x9cc] sm:$0xf] }
 0x377   : > { %v4291_v34 = vpop.f32.mrf.mxu3  ;;  %v4385_v15 = vpop.f32.mrf.mxu2  ;;  %v4356_v10 = vadd.f32 %v4355_v44, %v4323_v24  ;;  %4575 = vmatmul.bf16.gmra.mxu0 %v16524_v41  ;;  %4608 = vmatmul.bf16.gmra.mxu1 %v21153_v56  ;;  %v11609_v41 = vld [vmem:[%s21108_s23 + $0x7f8] sm:$0xf0]  ;;  %v14475_v56 = vld [vmem:[%s21108_s23 + $0x9ec] sm:$0xf] }
 0x378   : > { %v4292_v32 = vadd.f32 %v4291_v34, %v18494_v31  ;;  %v18637_v13 = vadd.f32 %v4385_v15, %v4353_v36  ;;  %v14411_v31 = vld [vmem:[%s21108_s23 + $0x7ec] sm:$0xf]  ;;  %4665 = vmatpush.bf16.msrb.mxu3 %v11420_v46  ;;  %v11868_v23 = vor.u32 %v14475_v56, %v11865_v1  ;;  %v11849_v44 = vld [vmem:[%s21108_s23 + $0x9d8] sm:$0xf0]  ;;  %v11596_v34 = vor.u32 %v14407_v51, %v11593_v30 }
 0x379   : > { %v11612_v35 = vor.u32 %v14411_v31, %v11609_v41  ;;  %v14439_v15 = vld [vmem:[%s21108_s23 + $0x8cc] sm:$0xf]  ;;  %v11577_v31 = vld [vmem:[%s21108_s23 + $0x7b8] sm:$0xf0] }
 0x37a   : > { %4760 = vmatpush.bf16.msra.mxu2 %v11868_v23  ;;  %v11724_v17 = vor.u32 %v14439_v15, %v11721_v50  ;;  %v14467_v41 = vld [vmem:[%s21108_s23 + $0x9ac] sm:$0xf]  ;;  %v11833_v56 = vld [vmem:[%s21108_s23 + $0x9b8] sm:$0xf0] }
 0x37b   : > { %4694 = vmatpush.bf16.msra.mxu0 %v11612_v35  ;;  %v11580_v35 = vor.u32 %v14403_v28, %v11577_v31  ;;  %v11836_v1 = vor.u32 %v14467_v41, %v11833_v56  ;;  %v14463_v30 = vld [vmem:[%s21108_s23 + $0x98c] sm:$0xf]  ;;  %v11689_v50 = vld [vmem:[%s21108_s23 + $0x898] sm:$0xf0] }
 0x37c   : > { %4547 = vmatmul.bf16.gmra.mxu3 %v16159_v39  ;;  %4641 = vmatmul.bf16.gmra.mxu2 %v21157_v59  ;;  %v4324_v25 = vpop.f32.mrf.mxu0  ;;  %v4357_v6 = vpop.f32.mrf.mxu1  ;;  %v11740_v39 = vor.u32 %v14443_v60, %v11737_v48  ;;  %v14359_v59 = vld [vmem:[%s21108_s23 + $0x64c] sm:$0xf]  ;;  %v11705_v48 = vld [vmem:[%s21108_s23 + $0x8b8] sm:$0xf0] }
 0x37d   : > { %v4325_v27 = vadd.f32 %v4324_v25, %v4292_v32  ;;  %v11404_v37 = vor.u32 %v14359_v59, %v11401_v43  ;;  %v11852_v32 = vor.u32 %v14471_v11, %v11849_v44  ;;  %v14435_v60 = vld [vmem:[%s21108_s23 + $0x8ac] sm:$0xf]  ;;  %v11369_v59 = vld [vmem:[%s21108_s23 + $0x618] sm:$0xf0] }
 0x37e   : > { %4727 = vmatpush.bf16.msra.mxu1 %v11740_v39  ;;  %v11708_v23 = vor.u32 %v14435_v60, %v11705_v48  ;;  %v14399_v43 = vld [vmem:[%s21108_s23 + $0x78c] sm:$0xf]  ;;  %v11817_v11 = vld [vmem:[%s21108_s23 + $0x998] sm:$0xf0] }
 0x37f   : > { %v4294_v36 = vpop.f32.mrf.mxu3  ;;  %v4388_v9 = vpop.f32.mrf.mxu2  ;;  %v4358_v47 = vadd.f32 %v4357_v6, %v4325_v27  ;;  %4666 = vmatpush.bf16.msrb.mxu3 %v11404_v37  ;;  %4695 = vmatpush.bf16.msra.mxu0 %v11596_v34  ;;  %v14351_v27 = vld [vmem:[%s21108_s23 + $0x60c] sm:$0xf]  ;;  %v11561_v37 = vld [vmem:[%s21108_s23 + $0x798] sm:$0xf0] }
 0x380   : > { %v4295_v24 = vadd.f32 %v4294_v36, %v18543_v33  ;;  %v18686_v21 = vadd.f32 %v4388_v9, %v4356_v10  ;;  %v14355_v33 = vld [vmem:[%s21108_s23 + $0x62c] sm:$0xf]  ;;  %v11385_v10 = vld [vmem:[%s21108_s23 + $0x638] sm:$0xf0]  ;;  %4761 = vmatpush.bf16.msra.mxu2 %v11852_v32  ;;  %v11372_v9 = vor.u32 %v14351_v27, %v11369_v59  ;;  %v11564_v34 = vor.u32 %v14399_v43, %v11561_v37 }
 0x381   : > { %v11388_v46 = vor.u32 %v14355_v33, %v11385_v10  ;;  %v14431_v15 = vld [vmem:[%s21108_s23 + $0x88c] sm:$0xf]  ;;  %v11820_v32 = vor.u32 %v14463_v30, %v11817_v11  ;;  %v11801_v10 = vld [vmem:[%s21108_s23 + $0x978] sm:$0xf0] }
 0x382   : > { %4728 = vmatpush.bf16.msra.mxu1 %v11724_v17  ;;  %v11692_v17 = vor.u32 %v14431_v15, %v11689_v50  ;;  %v11673_v31 = vld [vmem:[%s21108_s23 + $0x878] sm:$0xf0]  ;;  %v14423_v59 = vld [vmem:[%s21108_s23 + $0x84c] sm:$0xf] }
 0x383   : > { %4667 = vmatpush.bf16.msrb.mxu3 %v11388_v46  ;;  %4696 = vmatpush.bf16.msra.mxu0 %v11580_v35  ;;  %v14427_v46 = vld [vmem:[%s21108_s23 + $0x86c] sm:$0xf]  ;;  %v11657_v43 = vld [vmem:[%s21108_s23 + $0x858] sm:$0xf0] }
 0x384   : > { %v4327_v25 = vpop.f32.mrf.mxu0  ;;  %v4360_v6 = vpop.f32.mrf.mxu1  ;;  %4762 = vmatpush.bf16.msra.mxu2 %v11836_v1  ;;  %v11676_v35 = vor.u32 %v14427_v46, %v11673_v31  ;;  %v14391_v1 = vld [vmem:[%s21108_s23 + $0x74c] sm:$0xf]  ;;  %v11769_v30 = vld [vmem:[%s21108_s23 + $0x938] sm:$0xf0] }
 0x385   : > { %v4328_v39 = vadd.f32 %v4327_v25, %v4295_v24 }
 0x386   : > { %4729 = vmatpush.bf16.msra.mxu1 %v11708_v23 }
 0x387   : > { %v4296_v51 = vpop.f32.mrf.mxu3  ;;  %v4390_v36 = vpop.f32.mrf.mxu2  ;;  %v4361_v24 = vadd.f32 %v4360_v6, %v4328_v39  ;;  %4580 = vmatmul.bf16.gmra.mxu0 %v16566_v4  ;;  %4613 = vmatmul.bf16.gmra.mxu1 %v21159_v19  ;;  %v11545_v4 = vld [vmem:[%s21108_s23 + $0x778] sm:$0xf0]  ;;  %v14459_v19 = vld [vmem:[%s21108_s23 + $0x96c] sm:$0xf] }
 0x388   : > { %v18736_v44 = vadd.f32 %v4390_v36, %v4358_v47  ;;  %4668 = vmatpush.bf16.msrb.mxu3 %v11372_v9  ;;  %4697 = vmatpush.bf16.msra.mxu0 %v11564_v34  ;;  %v14395_v47 = vld [vmem:[%s21108_s23 + $0x76c] sm:$0xf]  ;;  %v11804_v28 = vor.u32 %v14459_v19, %v11801_v10  ;;  %v11785_v6 = vld [vmem:[%s21108_s23 + $0x958] sm:$0xf0]  ;;  %v11660_v51 = vor.u32 %v14423_v59, %v11657_v43 }
 0x389   : > { %4763 = vmatpush.bf16.msra.mxu2 %v11820_v32  ;;  %v11548_v33 = vor.u32 %v14395_v47, %v11545_v4  ;;  %v14387_v36 = vld [vmem:[%s21108_s23 + $0x72c] sm:$0xf]  ;;  %v11513_v9 = vld [vmem:[%s21108_s23 + $0x738] sm:$0xf0] }
 0x38a   : > { %4730 = vmatpush.bf16.msra.mxu1 %v11692_v17  ;;  %v11516_v37 = vor.u32 %v14387_v36, %v11513_v9  ;;  %v11641_v34 = vld [vmem:[%s21108_s23 + $0x838] sm:$0xf0]  ;;  %v14383_v47 = vld [vmem:[%s21108_s23 + $0x70c] sm:$0xf] }
 0x38b   : > { %v11497_v4 = vld [vmem:[%s21108_s23 + $0x718] sm:$0xf0]  ;;  %v14447_v19 = vld [vmem:[%s21108_s23 + $0x90c] sm:$0xf] }
 0x38c   : > { %4552 = vmatmul.bf16.gmra.mxu3 %v16240_v55  ;;  %4646 = vmatmul.bf16.gmra.mxu2 %v21163_v38  ;;  %v4329_v41 = vpop.f32.mrf.mxu0  ;;  %v4362_v56 = vpop.f32.mrf.mxu1  ;;  %v11529_v55 = vld [vmem:[%s21108_s23 + $0x758] sm:$0xf0]  ;;  %v14455_v38 = vld [vmem:[%s21108_s23 + $0x94c] sm:$0xf]  ;;  %v11500_v31 = vor.u32 %v14383_v47, %v11497_v4 }
 0x38d   : > { %4698 = vmatpush.bf16.msra.mxu0 %v11548_v33  ;;  %4764 = vmatpush.bf16.msra.mxu2 %v11804_v28  ;;  %v11532_v25 = vor.u32 %v14391_v1, %v11529_v55  ;;  %v11788_v27 = vor.u32 %v14455_v38, %v11785_v6  ;;  %v21209_v33 = vld [vmem:[#allocation66_spill] sm:$0xff]  ;;  %v11753_v41 = vld [vmem:[%s21108_s23 + $0x918] sm:$0xf0]  ;;  %v15192_v1 = vld [vmem:[#allocation11] sm:$0xf] }
 0x38e   : > { %4731 = vmatpush.bf16.msra.mxu1 %v11676_v35  ;;  %v4826_v10 = vmax.f32 %v21209_v33, 0.0  ;;  %v18819_v55 = vperm.slane %v15192_v1, 3  ;;  %v11756_v38 = vor.u32 %v14447_v19, %v11753_v41  ;;  %v21210_v43 = vld [vmem:[#allocation67_spill] sm:$0xff]  ;;  %v21212_v41 = vld [vmem:[#allocation69_spill] sm:$0xff] }
 0x38f   : > { %v4393_v60 = vpop.f32.mrf.mxu2  ;;  %v4406_v48 = vpop.f32.mrf.mxu3 }
 0x390   : > { %v18778_v23 = vadd.f32 %v4393_v60, %v4361_v24  ;;  %v4407_v39 = vadd.f32 %v4406_v48, %v18589_v22  ;;  %v14451_v22 = vld [vmem:[%s21108_s23 + $0x92c] sm:$0xf]  ;;  %v11625_v48 = vld [vmem:[%s21108_s23 + $0x818] sm:$0xf0] }
 0x391   : > { %4699 = vmatpush.bf16.msra.mxu0 %v11532_v25  ;;  %4765 = vmatpush.bf16.msra.mxu2 %v11788_v27  ;;  %v11772_v11 = vor.u32 %v14451_v22, %v11769_v30  ;;  %v14419_v24 = vld [vmem:[%s21108_s23 + $0x82c] sm:$0xf] }
 0x392   : > { %4732 = vmatpush.bf16.msra.mxu1 %v11660_v51  ;;  %v11644_v32 = vor.u32 %v14419_v24, %v11641_v34  ;;  %v14415_v60 = vld [vmem:[%s21108_s23 + $0x80c] sm:$0xf]  ;;  %v4830_v51 = vmax.f32 %v21210_v43, 0.0 }
 0x393   : > { %v11628_v25 = vor.u32 %v14415_v60, %v11625_v48 }
 0x394   : > { %v4439_v15 = vpop.f32.mrf.mxu0  ;;  %v4472_v50 = vpop.f32.mrf.mxu1 }
 0x395   : > { %v4440_v17 = vadd.f32 %v4439_v15, %v4407_v39  ;;  %4700 = vmatpush.bf16.msra.mxu0 %v11516_v37  ;;  %4766 = vmatpush.bf16.msra.mxu2 %v11772_v11 }
 0x396   : > { %4733 = vmatpush.bf16.msra.mxu1 %v11644_v32 }
 0x397   : > { %v4395_v28 = vpop.f32.mrf.mxu2  ;;  %v4408_v46 = vpop.f32.mrf.mxu3  ;;  %v4828_v35 = vmax.f32 %v4440_v17, 0.0  ;;  %4585 = vmatmul.bf16.gmra.mxu0 %v16660_v61  ;;  %4618 = vmatmul.bf16.gmra.mxu1 %v21165_v2 }
 0x398   : > { %v4409_v56 = vadd.f32 %v4408_v46, %v18592_v52  ;;  %v4473_v52 = vadd.f32 %v4472_v50, %v18819_v55  ;;  %v21211_v50 = vld [vmem:[#allocation68_spill] sm:$0xff] }
 0x399   : > { %v18829_v6 = vmax.f32 %v4826_v10, %v4828_v35  ;;  %4701 = vmatpush.bf16.msra.mxu0 %v11500_v31  ;;  %4767 = vmatpush.bf16.msra.mxu2 %v11756_v38  ;;  %v4834_v32 = vmax.f32 %v21211_v50, 0.0 }
 0x39a   : > { %4734 = vmatpush.bf16.msra.mxu1 %v11628_v25 }
 0x39c   : > { %4557 = vmatmul.bf16.gmra.mxu3 %v16497_v20  ;;  %4651 = vmatmul.bf16.gmra.mxu2 %v21193_v12  ;;  %v4441_v61 = vpop.f32.mrf.mxu0  ;;  %v4474_v2 = vpop.f32.mrf.mxu1 }
 0x39d   : > { %v4442_v39 = vadd.f32 %v4441_v61, %v4409_v56  ;;  %v4475_v30 = vadd.f32 %v4474_v2, %v18819_v55  ;;  %v4838_v56 = vmax.f32 %v21212_v41, 0.0 }
 0x39f   : > { %v4411_v27 = vpop.f32.mrf.mxu3  ;;  %v4505_v59 = vpop.f32.mrf.mxu2  ;;  %v4832_v22 = vmax.f32 %v4442_v39, 0.0 }
 0x3a0   : > { %v4412_v36 = vadd.f32 %v4411_v27, %v18600_v42  ;;  %v18836_v9 = vadd.f32 %v4505_v59, %v4473_v52  ;;  %v21213_v52 = vld [vmem:[#allocation37_spill] sm:$0xff] }
 0x3a1   : > { %v18838_v37 = vmax.f32 %v4830_v51, %v4832_v22  ;;  %v4842_v61 = vmax.f32 %v21213_v52, 0.0 }
 0x3a3   : > { %v4880_v20 = vpack.c.bf16 %v18838_v37, %v18829_v6 }
 0x3a4   : > { %v4444_v12 = vpop.f32.mrf.mxu0  ;;  %v4477_v11 = vpop.f32.mrf.mxu1 }
 0x3a5   : > { %v4445_v24 = vadd.f32 %v4444_v12, %v4412_v36  ;;  %v4478_v19 = vadd.f32 %v4477_v11, %v18819_v55  ;;  %v21214_v12 = vld [vmem:[#allocation39_spill] sm:$0xff] }
 0x3a6   : > { %v4846_v11 = vmax.f32 %v21214_v12, 0.0 }
 0x3a7   : > { %v4413_v34 = vpop.f32.mrf.mxu3  ;;  %v4507_v15 = vpop.f32.mrf.mxu2  ;;  %v4836_v42 = vmax.f32 %v4445_v24, 0.0  ;;  %4590 = vmatmul.bf16.gmra.mxu0 %v16763_v14  ;;  %4623 = vmatmul.bf16.gmra.mxu1 %v21170_v53 }
 0x3a8   : > { %v18844_v17 = vadd.f32 %v4507_v15, %v4475_v30  ;;  %v4414_v4 = vadd.f32 %v4413_v34, %v18603_v16 }
 0x3a9   : > { %v18848_v47 = vmax.f32 %v4834_v32, %v4836_v42 }
 0x3ac   : > { %4656 = vmatmul.bf16.gmra.mxu2 %v21197_v29  ;;  %4669 = vmatmul.bf16.vlgmr.msrb.gmra.mxu3 %v21152_v49  ;;  %v4446_v33 = vpop.f32.mrf.mxu0  ;;  %v4479_v10 = vpop.f32.mrf.mxu1 }
 0x3ad   : > { %v4447_v28 = vadd.f32 %v4446_v33, %v4414_v4  ;;  %v4480_v1 = vadd.f32 %v4479_v10, %v18819_v55  ;;  %v21215_v4 = vld [vmem:[#allocation50_spill] sm:$0xff] }
 0x3af   : > { %v4416_v46 = vpop.f32.mrf.mxu3  ;;  %v4510_v31 = vpop.f32.mrf.mxu2  ;;  %v4840_v53 = vmax.f32 %v4447_v28, 0.0  ;;  %v21216_v28 = vld [vmem:[#allocation53_spill] sm:$0xff] }
 0x3b0   : > { %v18855_v14 = vadd.f32 %v4510_v31, %v4478_v19  ;;  %v4417_v16 = vadd.f32 %v4416_v46, %v18622_v54  ;;  %v4850_v19 = vmax.f32 %v21215_v4, 0.0  ;;  %v21217_v46 = vld [vmem:[#allocation55_spill] sm:$0xff] }
 0x3b1   : > { %v18857_v35 = vmax.f32 %v4838_v56, %v4840_v53  ;;  %v11929_v31 = vld [vmem:[%s21108_s23 + $0xa78] sm:$0xf0] }
 0x3b3   : > { %v4882_v29 = vpack.c.bf16 %v18857_v35, %v18848_v47 }
 0x3b4   : > { %v4449_v49 = vpop.f32.mrf.mxu0  ;;  %v4482_v38 = vpop.f32.mrf.mxu1 }
 0x3b5   : > { %v4450_v60 = vadd.f32 %v4449_v49, %v4417_v16  ;;  %v4483_v59 = vadd.f32 %v4482_v38, %v18819_v55 }
 0x3b7   : > { %v4418_v48 = vpop.f32.mrf.mxu3  ;;  %v4512_v25 = vpop.f32.mrf.mxu2  ;;  %v4844_v39 = vmax.f32 %v4450_v60, 0.0  ;;  %4702 = vmatmul.bf16.vlgmr.msra.gmra.mxu0 %v21154_v3  ;;  %4735 = vmatmul.bf16.vlgmr.msra.gmra.mxu1 %v21174_v63 }
 0x3b8   : > { %v18864_v2 = vadd.f32 %v4512_v25, %v4480_v1  ;;  %v4419_v27 = vadd.f32 %v4418_v48, %v18637_v13  ;;  %v21218_v1 = vld [vmem:[#allocation43_spill] sm:$0xff]  ;;  %v14487_v48 = vld [vmem:[%s21108_s23 + $0xa4c] sm:$0xf] }
 0x3b9   : > { %v18868_v54 = vmax.f32 %v4842_v61, %v4844_v39  ;;  %v11913_v25 = vld [vmem:[%s21108_s23 + $0xa58] sm:$0xf0]  ;;  %v21219_v39 = vld [vmem:[#allocation38_spill] sm:$0xff] }
 0x3ba   : > { %v11916_v61 = vor.u32 %v14487_v48, %v11913_v25 }
 0x3bc   : > { %4674 = vmatmul.bf16.gmra.mxu3 %v21158_v26  ;;  %4768 = vmatmul.bf16.vlgmr.msra.gmra.mxu2 %v21200_v5  ;;  %v4451_v43 = vpop.f32.mrf.mxu0  ;;  %v4484_v51 = vpop.f32.mrf.mxu1 }
 0x3bd   : > { %v4452_v36 = vadd.f32 %v4451_v43, %v4419_v27  ;;  %v4485_v34 = vadd.f32 %v4484_v51, %v18819_v55  ;;  %v4854_v27 = vmax.f32 %v21219_v39, 0.0  ;;  %v14483_v43 = vld [vmem:[%s21108_s23 + $0xa2c] sm:$0xf]  ;;  %v11897_v51 = vld [vmem:[%s21108_s23 + $0xa38] sm:$0xf0] }
 0x3bf   : > { %v4421_v22 = vpop.f32.mrf.mxu3  ;;  %v4515_v30 = vpop.f32.mrf.mxu2  ;;  %v4848_v63 = vmax.f32 %v4452_v36, 0.0  ;;  %v11900_v36 = vor.u32 %v14483_v43, %v11897_v51 }
 0x3c0   : > { %v18875_v3 = vadd.f32 %v4515_v30, %v4483_v59  ;;  %v4422_v13 = vadd.f32 %v4421_v22, %v18686_v21  ;;  %v14491_v21 = vld [vmem:[%s21108_s23 + $0xa6c] sm:$0xf] }
 0x3c1   : > { %v18877_v24 = vmax.f32 %v4846_v11, %v4848_v63  ;;  %v11932_v41 = vor.u32 %v14491_v21, %v11929_v31  ;;  %v21223_v31 = vld [vmem:[#allocation46_spill] sm:$0xff] }
 0x3c3   : > { %v4884_v26 = vpack.c.bf16 %v18877_v24, %v18868_v54  ;;  %4797 = vmatpush.bf16.msra.mxu3 %v11932_v41 }
 0x3c4   : > { %v4454_v5 = vpop.f32.mrf.mxu0  ;;  %v4487_v15 = vpop.f32.mrf.mxu1 }
 0x3c5   : > { %v4455_v50 = vadd.f32 %v4454_v5, %v4422_v13  ;;  %v4488_v16 = vadd.f32 %v4487_v15, %v18819_v55  ;;  %v11881_v5 = vld [vmem:[%s21108_s23 + $0xa18] sm:$0xf0] }
 0x3c7   : > { %v4423_v32 = vpop.f32.mrf.mxu3  ;;  %v4517_v42 = vpop.f32.mrf.mxu2  ;;  %v4852_v10 = vmax.f32 %v4455_v50, 0.0  ;;  %4707 = vmatmul.bf16.gmra.mxu0 %v21216_v28  ;;  %4740 = vmatmul.bf16.gmra.mxu1 %v21217_v46 }
 0x3c8   : > { %v18884_v33 = vadd.f32 %v4517_v42, %v4485_v34  ;;  %v4424_v53 = vadd.f32 %v4423_v32, %v18736_v44  ;;  %4798 = vmatpush.bf16.msra.mxu3 %v11916_v61  ;;  %v14479_v34 = vld [vmem:[%s21108_s23 + $0xa0c] sm:$0xf]  ;;  %v21220_v42 = vld [vmem:[#allocation40_spill] sm:$0xff] }
 0x3c9   : > { %v4874_v56 = vmax.f32 %v4850_v19, %v4852_v10  ;;  %v11884_v32 = vor.u32 %v14479_v34, %v11881_v5  ;;  %v4858_v4 = vmax.f32 %v21220_v42, 0.0  ;;  %v21221_v19 = vld [vmem:[#allocation57_spill] sm:$0xff]  ;;  %v21222_v10 = vld [vmem:[#allocation60_spill] sm:$0xff] }
 0x3cc   : > { %4679 = vmatmul.bf16.gmra.mxu3 %v21218_v1  ;;  %4773 = vmatmul.bf16.gmra.mxu2 %v21203_v45  ;;  %v4456_v49 = vpop.f32.mrf.mxu0  ;;  %v18898_v38 = vpop.f32.mrf.mxu1 }
 0x3cd   : > { %v4457_v60 = vadd.f32 %v4456_v49, %v4424_v53  ;;  %4799 = vmatpush.bf16.msra.mxu3 %v11900_v36 }
 0x3cf   : > { %v4426_v52 = vpop.f32.mrf.mxu3  ;;  %v4520_v44 = vpop.f32.mrf.mxu2  ;;  %v4856_v45 = vmax.f32 %v4457_v60, 0.0 }
 0x3d0   : > { %v18907_v59 = vadd.f32 %v4520_v44, %v4488_v16  ;;  %v4427_v30 = vadd.f32 %v4426_v52, %v18778_v23 }
 0x3d1   : > { %v4876_v22 = vmax.f32 %v4854_v27, %v4856_v45  ;;  %4800 = vmatpush.bf16.msra.mxu3 %v11884_v32  ;;  %v21224_v27 = vld [vmem:[#allocation62_spill] sm:$0xff]  ;;  %v21225_v45 = vld [vmem:[#allocation65_spill] sm:$0xff] }
 0x3d3   : > { %v4886_v12 = vpack.c.bf16 %v4876_v22, %v4874_v56 }
 0x3d4   : > { %v4459_v11 = vpop.f32.mrf.mxu0  ;;  %v4492_v63 = vpop.f32.mrf.mxu1 }
 0x3d5   : > { %v4460_v13 = vadd.f32 %v4459_v11, %v4427_v30  ;;  %v4493_v21 = vadd.f32 %v4492_v63, %v18819_v55  ;;  %v21228_v11 = vld [vmem:[#allocation64_spill] sm:$0xff] }
 0x3d7   : > { %v4428_v15 = vpop.f32.mrf.mxu3  ;;  %v18922_v50 = vpop.f32.mrf.mxu2  ;;  %v4860_v23 = vmax.f32 %v4460_v13, 0.0  ;;  %4712 = vmatmul.bf16.gmra.mxu0 %v21221_v19  ;;  %4745 = vmatmul.bf16.gmra.mxu1 %v21222_v10 }
 0x3d9   : > { %v4878_v28 = vmax.f32 %v4858_v4, %v4860_v23 }
 0x3db   : > { %v4888_v46 = vpack.c.bf16 %v4878_v28, %v4878_v28 }
 0x3dc   : > { %4684 = vmatmul.bf16.gmra.mxu3 %v21223_v31  ;;  %4778 = vmatmul.bf16.gmra.mxu2 %v21206_v62  ;;  %v4461_v41 = vpop.f32.mrf.mxu0  ;;  %v4494_v56 = vpop.f32.mrf.mxu1 }
 0x3dd   : > { %v4940_v53 = vsel %vm4938_vm3, %v4888_v46, 0 }
 0x3de   : > { %4948 = vmatpush.bf16.msrb.mxu0 %v4940_v53 }
 0x3df   : > { %v4525_v16 = vpop.f32.mrf.mxu2  ;;  %v4538_v1 = vpop.f32.mrf.mxu3 }
 0x3e0   : > { %v18931_v49 = vadd.f32 %v4525_v16, %v4493_v21  ;;  %v4539_v60 = vadd.f32 %v4538_v1, %v18836_v9  ;;  %v21226_v9 = vld [vmem:[#allocation49_spill] sm:$0xff] }
 0x3e2   : > { %4949 = vmatpush.bf16.msrb.mxu0 %v4886_v12  ;;  %v21227_v12 = vld [vmem:[#allocation59_spill] sm:$0xff] }
 0x3e4   : > { %v4571_v48 = vpop.f32.mrf.mxu0  ;;  %v4604_v25 = vpop.f32.mrf.mxu1 }
 0x3e5   : > { %v4572_v52 = vadd.f32 %v4571_v48, %v4539_v60 }
 0x3e6   : > { %4950 = vmatpush.bf16.msrb.mxu0 %v4884_v26 }
 0x3e7   : > { %v4527_v44 = vpop.f32.mrf.mxu2  ;;  %v4540_v61 = vpop.f32.mrf.mxu3  ;;  %v4605_v39 = vadd.f32 %v4604_v25, %v4572_v52  ;;  %4717 = vmatmul.bf16.gmra.mxu0 %v21224_v27  ;;  %4750 = vmatmul.bf16.gmra.mxu1 %v21225_v45 }
 0x3e8   : > { %v18938_v62 = vadd.f32 %v4540_v61, %v18844_v17 }
 0x3ea   : > { %4951 = vmatpush.bf16.msrb.mxu0 %v4882_v29 }
 0x3ec   : > { %4689 = vmatmul.bf16.gmra.mxu3 %v21226_v9  ;;  %4783 = vmatmul.bf16.gmra.mxu2 %v17117_v8  ;;  %v18947_v43 = vpop.f32.mrf.mxu0  ;;  %v18949_v54 = vpop.f32.mrf.mxu1 }
 0x3ee   : > { %4952 = vmatpush.bf16.msrb.mxu0 %v4880_v20 }
 0x3ef   : > { %v4543_v24 = vpop.f32.mrf.mxu3  ;;  %v4637_v17 = vpop.f32.mrf.mxu2 }
 0x3f0   : > { %v4544_v26 = vadd.f32 %v4543_v24, %v18855_v14  ;;  %v4638_v51 = vadd.f32 %v4637_v17, %v4605_v39 }
 0x3f4   : > { %v4576_v36 = vpop.f32.mrf.mxu0  ;;  %v4609_v47 = vpop.f32.mrf.mxu1 }
 0x3f5   : > { %v4577_v35 = vadd.f32 %v4576_v36, %v4544_v26 }
 0x3f7   : > { %v4545_v29 = vpop.f32.mrf.mxu3  ;;  %v18955_v22 = vpop.f32.mrf.mxu2  ;;  %v4610_v30 = vadd.f32 %v4609_v47, %v4577_v35  ;;  %4722 = vmatmul.bf16.gmra.mxu0 %v21227_v12  ;;  %4755 = vmatmul.bf16.gmra.mxu1 %v21228_v11 }
 0x3f8   : > { %v18958_v8 = vadd.f32 %v4545_v29, %v18864_v2 }
 0x3fc   : > { %4788 = vmatmul.bf16.gmra.mxu2 %v17064_v40  ;;  %11948 = vmatmul.msk.bf16.vlgmr.msra.gmra.mxu3 %vm1212_vm1, %v21201_v0  ;;  %v18965_v6 = vpop.f32.mrf.mxu0  ;;  %v18967_v37 = vpop.f32.mrf.mxu1 }
 0x3ff   : > { %v4548_v20 = vpop.f32.mrf.mxu3  ;;  %v4642_v14 = vpop.f32.mrf.mxu2 }
 0x400   : > { %v4549_v63 = vadd.f32 %v4548_v20, %v18875_v3  ;;  %v4643_v2 = vadd.f32 %v4642_v14, %v4610_v30 }
 0x404   : > { %v4581_v13 = vpop.f32.mrf.mxu0  ;;  %v4614_v34 = vpop.f32.mrf.mxu1 }
 0x405   : > { %v4582_v5 = vadd.f32 %v4581_v13, %v4549_v63 }
 0x407   : > { %v4550_v15 = vpop.f32.mrf.mxu3  ;;  %v18970_v32 = vpop.f32.mrf.mxu2  ;;  %v4615_v42 = vadd.f32 %v4614_v34, %v4582_v5 }
 0x408   : > { %v18973_v40 = vadd.f32 %v4550_v15, %v18884_v33 }
 0x40c   : > { %11949 = vmatmul.msk.bf16.gmra.mxu3 %vm1212_vm1, %v21204_v58  ;;  %v18977_v0 = vpop.f32.mrf.mxu0  ;;  %v18979_v4 = vpop.f32.mrf.mxu1 }
 0x40f   : > { %v4553_v23 = vpop.f32.mrf.mxu3  ;;  %v4647_v3 = vpop.f32.mrf.mxu2 }
 0x410   : > { %v4554_v19 = vadd.f32 %v4553_v23, %v18907_v59  ;;  %v4648_v10 = vadd.f32 %v4647_v3, %v4615_v42 }
 0x414   : > { %v4586_v28 = vpop.f32.mrf.mxu0  ;;  %v4619_v46 = vpop.f32.mrf.mxu1 }
 0x415   : > { %v4587_v21 = vadd.f32 %v4586_v28, %v4554_v19 }
 0x417   : > { %v18982_v31 = vpop.f32.mrf.mxu3  ;;  %v18984_v33 = vpop.f32.mrf.mxu2  ;;  %v4620_v41 = vadd.f32 %v4619_v46, %v4587_v21 }
 0x41c   : > { %11950 = vmatmul.msk.bf16.gmra.mxu3 %vm1212_vm1, %v21207_v7  ;;  %v18988_v58 = vpop.f32.mrf.mxu0  ;;  %v18990_v56 = vpop.f32.mrf.mxu1 }
 0x41f   : > { %v4558_v53 = vpop.f32.mrf.mxu3  ;;  %v4652_v16 = vpop.f32.mrf.mxu2 }
 0x420   : > { %v4559_v59 = vadd.f32 %v4558_v53, %v18931_v49  ;;  %v4653_v1 = vadd.f32 %v4652_v16, %v4620_v41 }
 0x424   : > { %v4591_v60 = vpop.f32.mrf.mxu0  ;;  %v4624_v48 = vpop.f32.mrf.mxu1 }
 0x425   : > { %v4592_v25 = vadd.f32 %v4591_v60, %v4559_v59 }
 0x427   : > { %v4560_v52 = vpop.f32.mrf.mxu3  ;;  %v18993_v44 = vpop.f32.mrf.mxu2  ;;  %v4625_v61 = vadd.f32 %v4624_v48, %v4592_v25 }
 0x42c   : > { %11951 = vmatmul.msk.bf16.gmra.mxu3 %vm1212_vm1, %v17146_v18  ;;  %v4593_v7 = vpop.f32.mrf.mxu0  ;;  %v4626_v39 = vpop.f32.mrf.mxu1 }
 0x42f   : > { %v4657_v27 = vpop.f32.mrf.mxu2  ;;  %v4670_v45 = vpop.f32.mrf.mxu3 }
 0x430   : > { %v4658_v9 = vadd.f32 %v4657_v27, %v4625_v61  ;;  %v4671_v24 = vadd.f32 %v4670_v45, %v4638_v51 }
 0x434   : > { %v4703_v17 = vpop.f32.mrf.mxu0  ;;  %v4736_v26 = vpop.f32.mrf.mxu1 }
 0x435   : > { %v4704_v49 = vadd.f32 %v4703_v17, %v4671_v24 }
 0x437   : > { %v4659_v36 = vpop.f32.mrf.mxu2  ;;  %v4672_v47 = vpop.f32.mrf.mxu3  ;;  %v4737_v35 = vadd.f32 %v4736_v26, %v4704_v49 }
 0x43c   : > { %11952 = vmatmul.msk.bf16.gmra.mxu3 %vm1212_vm1, %v17119_v57  ;;  %v4705_v29 = vpop.f32.mrf.mxu0  ;;  %v4738_v30 = vpop.f32.mrf.mxu1 }
 0x43f   : > { %v4675_v12 = vpop.f32.mrf.mxu3  ;;  %v4769_v11 = vpop.f32.mrf.mxu2 }
 0x440   : > { %v4676_v18 = vadd.f32 %v4675_v12, %v4643_v2  ;;  %v4770_v20 = vadd.f32 %v4769_v11, %v4737_v35  ;;  %v4574_v11 = vadd.f32 %v18947_v43, %v18938_v62  ;;  %v21229_v43 = vld [vmem:[#allocation42_spill] sm:$0xff] }
 0x444   : > { %v4708_v14 = vpop.f32.mrf.mxu0  ;;  %v4741_v63 = vpop.f32.mrf.mxu1 }
 0x445   : > { %v4709_v13 = vadd.f32 %v4708_v14, %v4676_v18 }
 0x447   : > { %v18999_v34 = vpop.f32.mrf.mxu3  ;;  %v4771_v51 = vpop.f32.mrf.mxu2  ;;  %v4742_v5 = vadd.f32 %v4741_v63, %v4709_v13 }
 0x44c   : > { %v19001_v15 = vpop.f32.mrf.mxu0  ;;  %v19003_v42 = vpop.f32.mrf.mxu1 }
 0x44f   : > { %v4680_v23 = vpop.f32.mrf.mxu3  ;;  %v4774_v3 = vpop.f32.mrf.mxu2 }
 0x450   : > { %v4681_v57 = vadd.f32 %v4680_v23, %v4648_v10  ;;  %v19005_v19 = vadd.f32 %v4774_v3, %v4742_v5  ;;  %v4607_v5 = vadd.f32 %v18949_v54, %v4574_v11 }
 0x452   : > { %v4640_v23 = vadd.f32 %v18955_v22, %v4607_v5  ;;  %v4579_v22 = vadd.f32 %v18965_v6, %v18958_v8  ;;  %v19054_v8 = vld [vmem:[#allocation19 + $0x8] sm:$0xff] }
 0x454   : > { %v4713_v28 = vpop.f32.mrf.mxu0  ;;  %v4746_v46 = vpop.f32.mrf.mxu1 }
 0x455   : > { %v4714_v2 = vadd.f32 %v4713_v28, %v4681_v57 }
 0x457   : > { %v19007_v21 = vpop.f32.mrf.mxu3  ;;  %v19009_v41 = vpop.f32.mrf.mxu2  ;;  %v4747_v53 = vadd.f32 %v4746_v46, %v4714_v2  ;;  %v19037_v2 = vld [vmem:[#allocation19] sm:$0xff] }
 0x458   : > { %11969 = vmatmul.msk.bf16.vlgmr.msrb.gmra.mxu0 %vm4922_vm4, %v19037_v2 }
 0x45c   : > { %v19011_v16 = vpop.f32.mrf.mxu0  ;;  %v19013_v59 = vpop.f32.mrf.mxu1 }
 0x45f   : > { %v4685_v60 = vpop.f32.mrf.mxu3  ;;  %v4779_v48 = vpop.f32.mrf.mxu2 }
 0x460   : > { %v4686_v25 = vadd.f32 %v4685_v60, %v4653_v1  ;;  %v19015_v52 = vadd.f32 %v4779_v48, %v4747_v53  ;;  %v4827_v60 = vmax.f32 %v21229_v43, 0.0 }
 0x464   : > { %v4718_v10 = vpop.f32.mrf.mxu0  ;;  %v4751_v61 = vpop.f32.mrf.mxu1 }
 0x465   : > { %v4719_v7 = vadd.f32 %v4718_v10, %v4686_v25 }
 0x467   : > { %v19017_v39 = vpop.f32.mrf.mxu3  ;;  %v19019_v27 = vpop.f32.mrf.mxu2  ;;  %v4752_v45 = vadd.f32 %v4751_v61, %v4719_v7 }
 0x468   : > { %11970 = vmatmul.msk.bf16.gmra.mxu0 %vm4922_vm4, %v19054_v8 }
 0x46c   : > { %v19021_v24 = vpop.f32.mrf.mxu0  ;;  %v19023_v17 = vpop.f32.mrf.mxu1 }
 0x46f   : > { %v4690_v26 = vpop.f32.mrf.mxu3  ;;  %v4784_v49 = vpop.f32.mrf.mxu2 }
 0x470   : > { %v4691_v36 = vadd.f32 %v4690_v26, %v4658_v9  ;;  %v19025_v35 = vadd.f32 %v4784_v49, %v4752_v45  ;;  %v4673_v9 = vadd.f32 %v4672_v47, %v4640_v23  ;;  %v21230_v45 = vld [vmem:[#allocation41_spill] sm:$0xff] }
 0x472   : > { %v4706_v53 = vadd.f32 %v4705_v29, %v4673_v9  ;;  %v4831_v29 = vmax.f32 %v21230_v45, 0.0 }
 0x474   : > { %v4723_v1 = vpop.f32.mrf.mxu0  ;;  %v4756_v12 = vpop.f32.mrf.mxu1  ;;  %v4739_v54 = vadd.f32 %v4738_v30, %v4706_v53 }
 0x475   : > { %v4724_v18 = vadd.f32 %v4723_v1, %v4691_v36 }
 0x476   : > { %v4772_v47 = vadd.f32 %v4771_v51, %v4739_v54 }
 0x477   : > { %v4692_v14 = vpop.f32.mrf.mxu3  ;;  %v19029_v63 = vpop.f32.mrf.mxu2  ;;  %v19031_v13 = vadd.f32 %v4756_v12, %v4724_v18 }
 0x47c   : > { %v4725_v3 = vpop.f32.mrf.mxu0  ;;  %v4758_v57 = vpop.f32.mrf.mxu1 }
 0x47f   : > { %v19035_v28 = vpop.f32.mrf.mxu2  ;;  %v4802_v46 = vpop.f32.mrf.mxu3 }
 0x480   : > { %v4803_v62 = vadd.f32 %v4802_v46, %v4770_v20  ;;  %v4612_v20 = vadd.f32 %v18967_v37, %v4579_v22  ;;  %v21231_v37 = vld [vmem:[#allocation45_spill] sm:$0xff] }
 0x481   : > { %v4835_v11 = vmax.f32 %v21231_v37, 0.0 }
 0x482   : > { %v4829_v48 = vmax.f32 %v4803_v62, 0.0  ;;  %v4645_v49 = vadd.f32 %v18970_v32, %v4612_v20 }
 0x484   : > { %v19042_v25 = vmax.f32 %v4827_v60, %v4829_v48  ;;  %v4678_v30 = vadd.f32 %v18999_v34, %v4645_v49  ;;  %v4584_v34 = vadd.f32 %v18977_v0, %v18973_v40  ;;  %v14496_v0 = vld [vmem:[#allocation19 + $0x10] sm:$0xff] }
 0x485   : > { %11971 = vmatmul.msk.bf16.gmra.mxu0 %vm4922_vm4, %v14496_v0 }
 0x486   : > { %v4711_v6 = vadd.f32 %v19001_v15, %v4678_v30  ;;  %v21232_v15 = vld [vmem:[#allocation48_spill] sm:$0xff] }
 0x487   : > { %v4804_v10 = vpop.f32.mrf.mxu3  ;;  %v4791_v61 = vpop.f32.mrf.mxu2  ;;  %v4839_v57 = vmax.f32 %v21232_v15, 0.0 }
 0x488   : > { %v4805_v7 = vadd.f32 %v4804_v10, %v4772_v47  ;;  %v4744_v18 = vadd.f32 %v19003_v42, %v4711_v6  ;;  %v4490_v42 = vadd.f32 %v18898_v38, %v18819_v55  ;;  %v21234_v61 = vld [vmem:[#allocation70_spill] sm:$0xff] }
 0x48a   : > { %v4833_v26 = vmax.f32 %v4805_v7, 0.0  ;;  %v4777_v5 = vadd.f32 %v19009_v41, %v4744_v18 }
 0x48c   : > { %v19049_v36 = vmax.f32 %v4831_v29, %v4833_v26 }
 0x48e   : > { %v4881_v1 = vpack.c.bf16 %v19049_v36, %v19042_v25 }
 0x48f   : > { %v4807_v12 = vpop.f32.mrf.mxu3 }
 0x490   : > { %v4808_v51 = vadd.f32 %v4807_v12, %v19005_v19  ;;  %v4617_v19 = vadd.f32 %v18979_v4, %v4584_v34  ;;  %v21233_v4 = vld [vmem:[#allocation51_spill] sm:$0xff] }
 0x491   : > { %v4843_v48 = vmax.f32 %v21233_v4, 0.0 }
 0x492   : > { %v4837_v32 = vmax.f32 %v4808_v51, 0.0  ;;  %v4650_v46 = vadd.f32 %v18984_v33, %v4617_v19  ;;  %v4523_v33 = vadd.f32 %v18922_v50, %v4490_v42 }
 0x494   : > { %v19062_v14 = vmax.f32 %v4835_v11, %v4837_v32  ;;  %v4683_v62 = vadd.f32 %v19007_v21, %v4650_v46  ;;  %v4556_v22 = vadd.f32 %v18982_v31, %v4523_v33 }
 0x496   : > { %v4716_v41 = vadd.f32 %v19011_v16, %v4683_v62  ;;  %v4589_v21 = vadd.f32 %v18988_v58, %v4556_v22 }
 0x497   : > { %v4809_v23 = vpop.f32.mrf.mxu3 }
 0x498   : > { %v4810_v3 = vadd.f32 %v4809_v23, %v4777_v5  ;;  %v4749_v55 = vadd.f32 %v19013_v59, %v4716_v41  ;;  %v4622_v7 = vadd.f32 %v18990_v56, %v4589_v21  ;;  %v14497_v59 = vld [vmem:[#allocation19 + $0x18] sm:$0xff]  ;;  %v21237_v5 = vld [vmem:[#allocation73_spill] sm:$0xff] }
 0x499   : > { %11972 = vmatmul.msk.bf16.gmra.mxu0 %vm4922_vm4, %v14497_v59  ;;  %v4859_v23 = vmax.f32 %v21237_v5, 0.0 }
 0x49a   : > { %v4841_v9 = vmax.f32 %v4810_v3, 0.0  ;;  %v4782_v47 = vadd.f32 %v19019_v27, %v4749_v55  ;;  %v4655_v29 = vadd.f32 %v18993_v44, %v4622_v7  ;;  %v21235_v27 = vld [vmem:[#allocation71_spill] sm:$0xff] }
 0x49b   : > { %v4851_v30 = vmax.f32 %v21235_v27, 0.0 }
 0x49c   : > { %v4869_v53 = vmax.f32 %v4839_v57, %v4841_v9  ;;  %v4688_v20 = vadd.f32 %v19017_v39, %v4655_v29  ;;  %v21236_v39 = vld [vmem:[#allocation72_spill] sm:$0xff] }
 0x49d   : > { %v4855_v11 = vmax.f32 %v21236_v39, 0.0  ;;  %v14556_v39 = vld [vmem:[%s21238_s26 + $0x1cc] sm:$0xf0] }
 0x49e   : > { %v4883_v43 = vpack.c.bf16 %v4869_v53, %v19062_v14  ;;  %v4721_v49 = vadd.f32 %v19021_v24, %v4688_v20  ;;  %v4790_v24 = vadd.f32 %v19035_v28, %v19031_v13 }
 0x49f   : > { %v4812_v40 = vpop.f32.mrf.mxu3 }
 0x4a0   : > { %v4813_v60 = vadd.f32 %v4812_v40, %v19015_v52  ;;  %v4847_v52 = vmax.f32 %v21234_v61, 0.0  ;;  %v4754_v56 = vadd.f32 %v19023_v17, %v4721_v49  ;;  %v4898_v17 = vld [vmem:[#allocation19 + $0x20] sm:$0xf]  ;;  %v14528_v49 = vld [vmem:[%s21238_s26 + $0xec] sm:$0xf0] }
 0x4a1   : > { %v4916_v57 = vunpack.c.l.b16 %v4898_v17 }
 0x4a2   : > { %v4845_v54 = vmax.f32 %v4813_v60, 0.0  ;;  %v4787_v44 = vadd.f32 %v19029_v63, %v4754_v56 }
 0x4a3   : > { %v4921_v9 = vpack.c.b16 %v4916_v57, %v4916_v57  ;;  %v14548_v57 = vld [vmem:[%s21238_s26 + $0x18c] sm:$0xf0] }
 0x4a4   : > { %v4871_v38 = vmax.f32 %v4843_v48, %v4845_v54 }
 0x4a7   : > { %v4814_v10 = vpop.f32.mrf.mxu3 }
 0x4a8   : > { %v4815_v16 = vadd.f32 %v4814_v10, %v4782_v47  ;;  %v15640_v10 = vmov 0.0  }
 0x4a9   : > { %11973 = vmatmul.msk.bf16.gmra.mxu0 %vm4922_vm4, %v4921_v9  ;;  %9832 = vst [vmem:[#allocation5] sm:$0x1] %v15640_v10 }
 0x4aa   : > { %v4849_v45 = vmax.f32 %v4815_v16, 0.0  ;;  %9833 = vst [vmem:[#allocation5 + $0x6] sm:$0x1] %v15640_v10 }
 0x4ab   : > { %10374 = vst [vmem:[%s826_s22] sm:$0xff] %v15640_v10 }
 0x4ac   : > { %v4873_v50 = vmax.f32 %v4847_v52, %v4849_v45 }
 0x4ae   : > { %v4885_v31 = vpack.c.bf16 %v4873_v50, %v4871_v38  ;;  %v5059_v38 = vlaneseq }
 0x4af   : > { %v4817_v26 = vpop.f32.mrf.mxu3 }
 0x4b0   : > { %v4818_v58 = vadd.f32 %v4817_v26, %v19025_v35  ;;  %vm5061_vm6 = vcmp.lt.s32.totalorder %v5059_v38, 256 }
 0x4b1   : > { %5063 = vst.msk [vmem:[#allocation2] ss:$8 sm:$0x3] %vm5061_vm6, %v15640_v10 }
 0x4b2   : > { %v4853_v12 = vmax.f32 %v4818_v58, 0.0  ;;  %5066 = vst.msk [vmem:[#allocation2 + $0x45] ss:$8 sm:$0x3] %vm5061_vm6, %v15640_v10  ;;  %v12221_v58 = vld [vmem:[%s21238_s26 + $0x1e0] sm:$0xf] }
 0x4b3   : > { %7119 = vst.msk [vmem:[#allocation3] ss:$8 sm:$0x3] %vm5061_vm6, %v15640_v10 }
 0x4b4   : > { %v4875_v6 = vmax.f32 %v4851_v30, %v4853_v12  ;;  %7122 = vst.msk [vmem:[#allocation3 + $0x23] ss:$8 sm:$0x3] %vm5061_vm6, %v15640_v10  ;;  %v14560_v30 = vld [vmem:[%s21238_s26 + $0x1ec] sm:$0xf0] }
 0x4b5   : > { %8949 = vst.msk [vmem:[#allocation4] ss:$8 sm:$0x3] %vm5061_vm6, %v15640_v10  ;;  %v12222_v12 = vor.u32 %v14560_v30, %v12221_v58  ;;  %v14680_v58 = vld [vmem:[%s21238_s26 + $0x5ac] sm:$0xf0] }
 0x4b6   : > { %8952 = vst.msk [vmem:[#allocation4 + $0x12] ss:$8 sm:$0x3] %vm5061_vm6, %v15640_v10  ;;  %v14500_v30 = vld [vmem:[%s21238_s26 + $0xc] sm:$0xf0] }
 0x4b7   : > { %v4819_v51 = vpop.f32.mrf.mxu3  ;;  %6444 = vmatpush.bf16.msrb.mxu3 %v12222_v12 }
 0x4b8   : > { %v4820_v37 = vadd.f32 %v4819_v51, %v4787_v44  ;;  %v14524_v44 = vld [vmem:[%s21238_s26 + $0xcc] sm:$0xf0]  ;;  %v12205_v51 = vld [vmem:[%s21238_s26 + $0x1c0] sm:$0xf] }
 0x4ba   : > { %v4857_v32 = vmax.f32 %v4820_v37, 0.0 }
 0x4bc   : > { %v4877_v18 = vmax.f32 %v4855_v11, %v4857_v32  ;;  %v12206_v11 = vor.u32 %v14556_v39, %v12205_v51  ;;  %v12061_v32 = vld [vmem:[%s21238_s26 + $0xa0] sm:$0xf]  ;;  %v14532_v51 = vld [vmem:[%s21238_s26 + $0x10c] sm:$0xf0] }
 0x4bd   : > { %v12557_v39 = vld [vmem:[%s21238_s26 + $0x480] sm:$0xf] }
 0x4be   : > { %v4887_v35 = vpack.c.bf16 %v4877_v18, %v4875_v6  ;;  %v12077_v6 = vld [vmem:[%s21238_s26 + $0xc0] sm:$0xf]  ;;  %6445 = vmatpush.bf16.msrb.mxu3 %v12206_v11  ;;  %v14520_v18 = vld [vmem:[%s21238_s26 + $0xac] sm:$0xf0] }
 0x4bf   : > { %v4822_v14 = vpop.f32.mrf.mxu3  ;;  %v12078_v37 = vor.u32 %v14524_v44, %v12077_v6  ;;  %v12109_v44 = vld [vmem:[%s21238_s26 + $0x100] sm:$0xf]  ;;  %v14644_v11 = vld [vmem:[%s21238_s26 + $0x48c] sm:$0xf0] }
 0x4c0   : > { %v4823_v34 = vadd.f32 %v4822_v14, %v4790_v24  ;;  %v12189_v24 = vld [vmem:[%s21238_s26 + $0x1a0] sm:$0xf]  ;;  %v14552_v14 = vld [vmem:[%s21238_s26 + $0x1ac] sm:$0xf0] }
 0x4c2   : > { %v4861_v3 = vmax.f32 %v4823_v34, 0.0  ;;  %v12190_v34 = vor.u32 %v14552_v14, %v12189_v24  ;;  %v14676_v24 = vld [vmem:[%s21238_s26 + $0x58c] sm:$0xf0] }
 0x4c4   : > { %v4879_v15 = vmax.f32 %v4859_v23, %v4861_v3  ;;  %6446 = vmatpush.bf16.msrb.mxu3 %v12190_v34  ;;  %v12045_v23 = vld [vmem:[%s21238_s26 + $0x80] sm:$0xf]  ;;  %v14516_v3 = vld [vmem:[%s21238_s26 + $0x8c] sm:$0xf0] }
 0x4c5   : > { %v12046_v17 = vor.u32 %v14516_v3, %v12045_v23  ;;  %v12541_v34 = vld [vmem:[%s21238_s26 + $0x460] sm:$0xf]  ;;  %v14640_v23 = vld [vmem:[%s21238_s26 + $0x46c] sm:$0xf0] }
 0x4c6   : > { %v4889_v19 = vpack.c.bf16 %v4879_v15, %v4879_v15  ;;  %v12173_v15 = vld [vmem:[%s21238_s26 + $0x180] sm:$0xf]  ;;  %v12542_v3 = vor.u32 %v14640_v23, %v12541_v34  ;;  %v14612_v23 = vld [vmem:[%s21238_s26 + $0x38c] sm:$0xf0] }
 0x4c7   : > { %v4824_v63 = vpop.f32.mrf.mxu3  ;;  %v12429_v34 = vld [vmem:[%s21238_s26 + $0x380] sm:$0xf] }
 0x4c8   : > { %v4943_v46 = vsel %vm4938_vm3, %v4889_v19, 0  ;;  %v12174_v19 = vor.u32 %v14548_v57, %v12173_v15  ;;  %v12029_v63 = vld [vmem:[%s21238_s26 + $0x60] sm:$0xf] }
 0x4c9   : > { %4981 = vmatpush.bf16.msrb.mxu1 %v4943_v46  ;;  %v12157_v46 = vld [vmem:[%s21238_s26 + $0x160] sm:$0xf] }
 0x4ca   : > { %6447 = vmatpush.bf16.msrb.mxu3 %v12174_v19  ;;  %v12669_v15 = vld [vmem:[%s21238_s26 + $0x560] sm:$0xf] }
 0x4cb   : > { %v12525_v19 = vld [vmem:[%s21238_s26 + $0x440] sm:$0xf] }
 0x4cd   : > { %4982 = vmatpush.bf16.msrb.mxu1 %v4887_v35  ;;  %v12062_v35 = vor.u32 %v14520_v18, %v12061_v32  ;;  %v12685_v32 = vld [vmem:[%s21238_s26 + $0x580] sm:$0xf]  ;;  %v12558_v18 = vor.u32 %v14644_v11, %v12557_v39 }
 0x4d1   : > { %4983 = vmatpush.bf16.msrb.mxu1 %v4885_v31 }
 0x4d5   : > { %4984 = vmatpush.bf16.msrb.mxu1 %v4883_v43  ;;  %v4954_v13 = vpop.f32.mrf.mxu0 }
 0x4d9   : > { %4985 = vmatpush.bf16.msrb.mxu1 %v4881_v1 }
 0x4dc   : > { %11974 = vmatmul.msk.bf16.vlgmr.msrb.gmra.mxu1 %vm4922_vm4, %v19037_v2 }
 0x4dd   : > { %v4956_v28 = vpop.f32.mrf.mxu0 }
 0x4e5   : > { %v4959_v53 = vpop.f32.mrf.mxu0 }
 0x4ec   : > { %11975 = vmatmul.msk.bf16.gmra.mxu1 %vm4922_vm4, %v19054_v8 }
 0x4ed   : > { %v4961_v42 = vpop.f32.mrf.mxu0 }
 0x4fc   : > { %11976 = vmatmul.msk.bf16.gmra.mxu1 %vm4922_vm4, %v14496_v0 }
 0x502   : > { %v4964_v62 = vpop.f32.mrf.mxu0 }
 0x503   : > { %v5021_v36 = vrot.slane %v4964_v62, 4 }
 0x50a   : > { %v4966_v43 = vpop.f32.mrf.mxu0 }
 0x50b   : > { %v5022_v40 = vrot.slane %v4966_v43, 4  ;;  %v14656_v43 = vld [vmem:[%s21238_s26 + $0x4ec] sm:$0xf0] }
 0x50c   : > { %11977 = vmatmul.msk.bf16.gmra.mxu1 %vm4922_vm4, %v14497_v59  ;;  %v12093_v59 = vld [vmem:[%s21238_s26 + $0xe0] sm:$0xf] }
 0x50d   : > { %v5023_v8 = vsel %vm4938_vm3, %v5021_v36, %v5022_v40  ;;  %v12094_v27 = vor.u32 %v14528_v49, %v12093_v59  ;;  %v12701_v59 = vld [vmem:[%s21238_s26 + $0x5a0] sm:$0xf] }
 0x50e   : > { %v5049_v4 = vmax.f32 %v4954_v13, %v5023_v8  ;;  %v12702_v12 = vor.u32 %v14680_v58, %v12701_v59  ;;  %v12461_v59 = vld [vmem:[%s21238_s26 + $0x3c0] sm:$0xf] }
 0x50f   : > { %6421 = vmatpush.bf16.msrb.mxu2 %v12094_v27  ;;  %v11981_v27 = vld [vmem:[%s21238_s26] sm:$0xf] }
 0x510   : > { %v5079_v54 = vrot.slane %v5049_v4, 7  ;;  %v11982_v6 = vor.u32 %v14500_v30, %v11981_v27  ;;  %v14620_v27 = vld [vmem:[%s21238_s26 + $0x3cc] sm:$0xf0]  ;;  %v12317_v30 = vld [vmem:[%s21238_s26 + $0x2a0] sm:$0xf] }
 0x512   : > { %5107 = vst [vmem:[#allocation2] sm:$0xfe] %v5079_v54 }
 0x513   : > { %6422 = vmatpush.bf16.msrb.mxu2 %v12078_v37  ;;  %v12110_v37 = vor.u32 %v14532_v51, %v12109_v44  ;;  %v12462_v44 = vor.u32 %v14620_v27, %v12461_v59  ;;  %v12445_v51 = vld [vmem:[%s21238_s26 + $0x3a0] sm:$0xf]  ;;  %v12335_v27 = vld [vmem:[%s21238_s26 + $0x2d0] sm:$0xf0] }
 0x516   : > { %v4969_v25 = vpop.f32.mrf.mxu0 }
 0x517   : > { %v5027_v2 = vrot.slane %v4969_v25, 4  ;;  %6423 = vmatpush.bf16.msrb.mxu2 %v12062_v35  ;;  %v12733_v25 = vld [vmem:[%s21238_s26 + $0x5e0] sm:$0xf]  ;;  %v12686_v35 = vor.u32 %v14676_v24, %v12685_v32 }
 0x518   : > { %v12301_v24 = vld [vmem:[%s21238_s26 + $0x280] sm:$0xf] }
 0x519   : > { %v5028_v0 = vsel %vm4938_vm3, %v5022_v40, %v5027_v2  ;;  %v12013_v40 = vld [vmem:[%s21238_s26 + $0x40] sm:$0xf]  ;;  %v5117_v11 = vld [vmem:[#allocation2] sm:$0xff] }
 0x51a   : > { %v5051_v48 = vmax.f32 %v4956_v28, %v5028_v0  ;;  %v14544_v28 = vld [vmem:[%s21238_s26 + $0x16c] sm:$0xf0]  ;;  %v12141_v0 = vld [vmem:[%s21238_s26 + $0x140] sm:$0xf] }
 0x51b   : > { %6424 = vmatpush.bf16.msrb.mxu2 %v12046_v17  ;;  %v14672_v17 = vld [vmem:[%s21238_s26 + $0x56c] sm:$0xf0] }
 0x51c   : > { %11978 = vmatmul.msk.bf16.gmra.mxu1 %vm4922_vm4, %v4921_v9  ;;  %v5081_v22 = vrot.slane %v5051_v48, 7  ;;  %v14512_v9 = vld [vmem:[%s21238_s26 + $0x6c] sm:$0xf0]  ;;  %v12589_v48 = vld [vmem:[%s21238_s26 + $0x4c0] sm:$0xf]  ;;  %v12670_v57 = vor.u32 %v14672_v17, %v12669_v15 }
 0x51d   : > { %v12030_v13 = vor.u32 %v14512_v9, %v12029_v63  ;;  %v14636_v63 = vld [vmem:[%s21238_s26 + $0x44c] sm:$0xf0]  ;;  %v12653_v9 = vld [vmem:[%s21238_s26 + $0x540] sm:$0xf] }
 0x51e   : > { %v4971_v1 = vpop.f32.mrf.mxu0  ;;  %v19113_v21 = vsel %vm5078_vm5, %v5079_v54, %v5081_v22  ;;  %v12717_v54 = vld [vmem:[%s21238_s26 + $0x5c0] sm:$0xf] }
 0x51f   : > { %v5031_v41 = vrot.slane %v4971_v1, 4  ;;  %6425 = vmatpush.bf16.msrb.mxu2 %v12030_v13  ;;  %v14688_v1 = vld [vmem:[%s21238_s26 + $0x5ec] sm:$0xf0] }
 0x520   : > { %v14668_v13 = vld [vmem:[%s21238_s26 + $0x54c] sm:$0xf0] }
 0x521   : > { %v5032_v60 = vsel %vm4938_vm3, %v5027_v2, %v5031_v41  ;;  %v14508_v2 = vld [vmem:[%s21238_s26 + $0x4c] sm:$0xf0] }
 0x522   : > { %v5053_v33 = vmax.f32 %v4959_v53, %v5032_v60  ;;  %v12158_v53 = vor.u32 %v14544_v28, %v12157_v46  ;;  %v12014_v8 = vor.u32 %v14508_v2, %v12013_v40  ;;  %v14540_v60 = vld [vmem:[%s21238_s26 + $0x14c] sm:$0xf0]  ;;  %v12526_v46 = vor.u32 %v14636_v63, %v12525_v19  ;;  %v12637_v40 = vld [vmem:[%s21238_s26 + $0x520] sm:$0xf] }
 0x523   : > { %v12142_v4 = vor.u32 %v14540_v60, %v12141_v0  ;;  %v12654_v28 = vor.u32 %v14668_v13, %v12653_v9  ;;  %v14664_v2 = vld [vmem:[%s21238_s26 + $0x52c] sm:$0xf0]  ;;  %v12493_v60 = vld [vmem:[%s21238_s26 + $0x400] sm:$0xf]  ;;  %v12430_v13 = vor.u32 %v14612_v23, %v12429_v34  ;;  %v14582_v34 = vld [vmem:[%s21238_s26 + $0x2a4] sm:$0xf] }
 0x524   : > { %v5085_v55 = vrot.slane %v5053_v33, 7  ;;  %6448 = vmatpush.bf16.msrb.mxu3 %v12158_v53  ;;  %6426 = vmatpush.bf16.msrb.mxu2 %v12014_v8  ;;  %v14652_v33 = vld [vmem:[%s21238_s26 + $0x4cc] sm:$0xf0]  ;;  %v12638_v8 = vor.u32 %v14664_v2, %v12637_v40  ;;  %v12285_v40 = vld [vmem:[%s21238_s26 + $0x260] sm:$0xf] }
 0x525   : > { %v14576_v2 = vld [vmem:[%s21238_s26 + $0x26c] sm:$0xf0]  ;;  %v12319_v23 = vld [vmem:[%s21238_s26 + $0x2b0] sm:$0xf0] }
 0x526   : > { %v19116_v47 = vsel %vm5078_vm5, %v5081_v22, %v5085_v55  ;;  %v4974_v16 = vpop.f32.mrf.mxu0  ;;  %v12590_v22 = vor.u32 %v14652_v33, %v12589_v48  ;;  %v12621_v48 = vld [vmem:[%s21238_s26 + $0x500] sm:$0xf] }
 0x527   : > { %v5035_v61 = vrot.slane %v4974_v16, 4  ;;  %v11997_v16 = vld [vmem:[%s21238_s26 + $0x20] sm:$0xf] }
 0x528   : > { %6449 = vmatpush.bf16.msrb.mxu3 %v12142_v4  ;;  %v14628_v4 = vld [vmem:[%s21238_s26 + $0x40c] sm:$0xf0] }
 0x529   : > { %v5036_v52 = vsel %vm4938_vm3, %v5031_v41, %v5035_v61  ;;  %v5057_v45 = vmax.f32 %v4964_v62, %v5035_v61  ;;  %v12605_v62 = vld [vmem:[%s21238_s26 + $0x4e0] sm:$0xf]  ;;  %v12734_v41 = vor.u32 %v14688_v1, %v12733_v25  ;;  %v14504_v61 = vld [vmem:[%s21238_s26 + $0x2c] sm:$0xf0] }
 0x52a   : > { %v5055_v7 = vmax.f32 %v4961_v42, %v5036_v52  ;;  %v12606_v36 = vor.u32 %v14656_v43, %v12605_v62  ;;  %v12125_v52 = vld [vmem:[%s21238_s26 + $0x120] sm:$0xf] }
 0x52b   : > { %v5093_v50 = vrot.slane %v5057_v45, 7  ;;  %6536 = vmatpush.bf16.msra.mxu1 %v12734_v41  ;;  %v14536_v45 = vld [vmem:[%s21238_s26 + $0x12c] sm:$0xf0]  ;;  %v12509_v25 = vld [vmem:[%s21238_s26 + $0x420] sm:$0xf] }
 0x52c   : > { %v5089_v29 = vrot.slane %v5055_v7, 7  ;;  %6513 = vmatpush.bf16.msra.mxu0 %v12606_v36  ;;  %v11998_v7 = vor.u32 %v14504_v61, %v11997_v16  ;;  %v14632_v36 = vld [vmem:[%s21238_s26 + $0x42c] sm:$0xf0]  ;;  %v12477_v16 = vld [vmem:[%s21238_s26 + $0x3e0] sm:$0xf] }
 0x52d   : > { %v12510_v1 = vor.u32 %v14632_v36, %v12509_v25  ;;  %v14624_v61 = vld [vmem:[%s21238_s26 + $0x3ec] sm:$0xf0] }
 0x52e   : > { %v19128_v20 = vsel %vm5078_vm5, %v5085_v55, %v5089_v29  ;;  %v5094_v31 = vsel %vm5078_vm5, %v5089_v29, %v5093_v50  ;;  %v4976_v26 = vpop.f32.mrf.mxu0  ;;  %v14684_v55 = vld [vmem:[%s21238_s26 + $0x5cc] sm:$0xf0]  ;;  %v12126_v50 = vor.u32 %v14536_v45, %v12125_v52  ;;  %6427 = vmatpush.bf16.msrb.mxu2 %v11998_v7  ;;  %v12478_v45 = vor.u32 %v14624_v61, %v12477_v16  ;;  %v12479_v16 = vld [vmem:[%s21238_s26 + $0x3f0] sm:$0xf0]  ;;  %v12269_v61 = vld [vmem:[%s21238_s26 + $0x240] sm:$0xf] }
 0x52f   : > { %5115 = vst [vmem:[#allocation2 + $0x40] sm:$0x1f] %v5094_v31  ;;  %v12718_v38 = vor.u32 %v14684_v55, %v12717_v54  ;;  %v12573_v31 = vld [vmem:[%s21238_s26 + $0x4a0] sm:$0xf]  ;;  %v14648_v26 = vld [vmem:[%s21238_s26 + $0x4ac] sm:$0xf0]  ;;  %v12494_v54 = vor.u32 %v14628_v4, %v12493_v60 }
 0x530   : > { %6514 = vmatpush.bf16.msra.mxu0 %v12590_v22  ;;  %6450 = vmatpush.bf16.msrb.mxu3 %v12126_v50  ;;  %v12574_v49 = vor.u32 %v14648_v26, %v12573_v31  ;;  %v12349_v22 = vld [vmem:[%s21238_s26 + $0x2e0] sm:$0xf]  ;;  %v14588_v26 = vld [vmem:[%s21238_s26 + $0x2cc] sm:$0xf0]  ;;  %v5138_v4 = vld [vmem:[#allocation2] sm:$0xfc] }
 0x531   : > { %6537 = vmatpush.bf16.msra.mxu1 %v12718_v38  ;;  %v14592_v38 = vld [vmem:[%s21238_s26 + $0x2ec] sm:$0xf0]  ;;  %v12333_v31 = vld [vmem:[%s21238_s26 + $0x2c0] sm:$0xf] }
 0x532   : > { %6428 = vmatpush.bf16.msrb.mxu2 %v11982_v6  ;;  %v12350_v7 = vor.u32 %v14592_v38, %v12349_v22  ;;  %v12334_v58 = vor.u32 %v14588_v26, %v12333_v31  ;;  %v12351_v22 = vld [vmem:[%s21238_s26 + $0x2f0] sm:$0xf0]  ;;  %v14622_v38 = vld [vmem:[%s21238_s26 + $0x3e4] sm:$0xf]  ;;  %v14604_v31 = vld [vmem:[%s21238_s26 + $0x34c] sm:$0xf0] }
 0x533   : > { %v12482_v59 = vor.u32 %v14622_v38, %v12479_v16  ;;  %v14610_v38 = vld [vmem:[%s21238_s26 + $0x384] sm:$0xf]  ;;  %v12431_v16 = vld [vmem:[%s21238_s26 + $0x390] sm:$0xf0] }
 0x534   : > { %6515 = vmatpush.bf16.msra.mxu0 %v12574_v49  ;;  %6451 = vmatpush.bf16.msrb.mxu3 %v12110_v37  ;;  %v14616_v37 = vld [vmem:[%s21238_s26 + $0x3ac] sm:$0xf0] }
 0x535   : > { %6538 = vmatpush.bf16.msra.mxu1 %v12702_v12  ;;  %v14584_v12 = vld [vmem:[%s21238_s26 + $0x2ac] sm:$0xf0] }
 0x536   : > { %6467 = vmatpush.bf16.msra.mxu2 %v12350_v7  ;;  %v12318_v32 = vor.u32 %v14584_v12, %v12317_v30  ;;  %v14618_v30 = vld [vmem:[%s21238_s26 + $0x3c4] sm:$0xf] }
 0x538   : > { %6516 = vmatpush.bf16.msra.mxu0 %v12558_v18  ;;  %6490 = vmatpush.bf16.msra.mxu3 %v12478_v45  ;;  %v12446_v18 = vor.u32 %v14616_v37, %v12445_v51  ;;  %v14572_v45 = vld [vmem:[%s21238_s26 + $0x24c] sm:$0xf0]  ;;  %v12253_v51 = vld [vmem:[%s21238_s26 + $0x220] sm:$0xf] }
 0x539   : > { %6539 = vmatpush.bf16.msra.mxu1 %v12686_v35 }
 0x53a   : > { %6468 = vmatpush.bf16.msra.mxu2 %v12334_v58 }
 0x53c   : > { %6517 = vmatpush.bf16.msra.mxu0 %v12542_v3  ;;  %6491 = vmatpush.bf16.msra.mxu3 %v12462_v44 }
 0x53d   : > { %6540 = vmatpush.bf16.msra.mxu1 %v12670_v57 }
 0x53e   : > { %6469 = vmatpush.bf16.msra.mxu2 %v12318_v32  ;;  %v14568_v32 = vld [vmem:[%s21238_s26 + $0x22c] sm:$0xf0] }
 0x540   : > { %6518 = vmatpush.bf16.msra.mxu0 %v12526_v46  ;;  %6492 = vmatpush.bf16.msra.mxu3 %v12446_v18  ;;  %v12381_v18 = vld [vmem:[%s21238_s26 + $0x320] sm:$0xf] }
 0x541   : > { %6541 = vmatpush.bf16.msra.mxu1 %v12654_v28 }
 0x544   : > { %6519 = vmatpush.bf16.msra.mxu0 %v12510_v1  ;;  %6493 = vmatpush.bf16.msra.mxu3 %v12430_v13 }
 0x545   : > { %6542 = vmatpush.bf16.msra.mxu1 %v12638_v8  ;;  %v14608_v8 = vld [vmem:[%s21238_s26 + $0x36c] sm:$0xf0] }
 0x548   : > { %6520 = vmatpush.bf16.msra.mxu0 %v12494_v54 }
 0x559   : > { %v19143_v56 = vpop.f32.mrf.mxu1 }
 0x561   : > { %v19169_v5 = vpop.f32.mrf.mxu1 }
 0x569   : > { %v19195_v42 = vpop.f32.mrf.mxu1 }
 0x571   : > { %v19245_v29 = vpop.f32.mrf.mxu1 }
 0x579   : > { %v19283_v14 = vpop.f32.mrf.mxu1 }
 0x57a   : > { %v5024_v62 = vrot.slane %v19283_v14, 4 }
 0x581   : > { %v4999_v53 = vpop.f32.mrf.mxu1 }
 0x582   : > { %v5025_v43 = vrot.slane %v4999_v53, 4 }
 0x584   : > { %v5026_v41 = vsel %vm4938_vm3, %v5024_v62, %v5025_v43 }
 0x585   : > { %v5050_v0 = vmax.f32 %v19143_v56, %v5026_v41  ;;  %v14660_v56 = vld [vmem:[%s21238_s26 + $0x50c] sm:$0xf0]  ;;  %v12413_v41 = vld [vmem:[%s21238_s26 + $0x360] sm:$0xf] }
 0x586   : > { %v12622_v55 = vor.u32 %v14660_v56, %v12621_v48  ;;  %v12414_v48 = vor.u32 %v14608_v8, %v12413_v41  ;;  %v14590_v56 = vld [vmem:[%s21238_s26 + $0x2e4] sm:$0xf] }
 0x587   : > { %v5080_v33 = vrot.slane %v5050_v0, 7 }
 0x588   : > { %6543 = vmatpush.bf16.msra.mxu1 %v12622_v55  ;;  %6494 = vmatpush.bf16.msra.mxu3 %v12414_v48  ;;  %v12354_v55 = vor.u32 %v14590_v56, %v12351_v22  ;;  %v14578_v22 = vld [vmem:[%s21238_s26 + $0x284] sm:$0xf] }
 0x589   : > { %5108 = vst [vmem:[#allocation2 + $0x8] sm:$0xfe] %v5080_v33  ;;  %v5002_v52 = vpop.f32.mrf.mxu1 }
 0x58a   : > { %v5029_v50 = vrot.slane %v5002_v52, 4  ;;  %6605 = vmatpush.bf16.msrb.mxu0 %v12354_v55  ;;  %v12303_v55 = vld [vmem:[%s21238_s26 + $0x290] sm:$0xf0] }
 0x58c   : > { %v5030_v49 = vsel %vm4938_vm3, %v5025_v43, %v5029_v50  ;;  %6628 = vmatpush.bf16.msrb.mxu1 %v12482_v59  ;;  %v14574_v59 = vld [vmem:[%s21238_s26 + $0x264] sm:$0xf] }
 0x58d   : > { %v5052_v6 = vmax.f32 %v19169_v5, %v5030_v49  ;;  %v14580_v5 = vld [vmem:[%s21238_s26 + $0x28c] sm:$0xf0]  ;;  %v12270_v49 = vor.u32 %v14572_v45, %v12269_v61  ;;  %v5140_v45 = vld [vmem:[#allocation2 + $0x40] sm:$0x3f] }
 0x58e   : > { %v12302_v46 = vor.u32 %v14580_v5, %v12301_v24  ;;  %v12254_v5 = vor.u32 %v14568_v32, %v12253_v51  ;;  %v14602_v32 = vld [vmem:[%s21238_s26 + $0x344] sm:$0xf] }
 0x58f   : > { %v5083_v39 = vrot.slane %v5052_v6, 7 }
 0x590   : > { %v5118_v35 = vld [vmem:[#allocation2 + $0x8] sm:$0xff]  ;;  %6470 = vmatpush.bf16.msra.mxu2 %v12302_v46 }
 0x591   : > { %v5084_v3 = vsel %vm5078_vm5, %v5080_v33, %v5083_v39  ;;  %v5004_v15 = vpop.f32.mrf.mxu1  ;;  %v5127_v17 = vpack.c.bf16 %v5118_v35, %v5117_v11  ;;  %v14600_v35 = vld [vmem:[%s21238_s26 + $0x32c] sm:$0xf0] }
 0x592   : > { %v5033_v57 = vrot.slane %v5004_v15, 4  ;;  %v5128_v19 = vpack.c.bf16 %v5084_v3, %v19113_v21  ;;  %v5139_v21 = vld [vmem:[#allocation2 + $0x8] sm:$0xfc] }
 0x593   : > { %v5149_v63 = vunpack.c.l.b16 %v5127_v17  ;;  %v5150_v9 = vunpack.c.h.b16 %v5127_v17  ;;  %v5142_v54 = vpack.c.bf16 %v5139_v21, %v5138_v4  ;;  %v5133_v51 = vld [vmem:[#allocation2 + $0x8] sm:$0xfe] }
 0x594   : > { %v5034_v28 = vsel %vm4938_vm3, %v5029_v50, %v5033_v57  ;;  %v19389_v53 = vunpack.c.l.b16 %v5128_v19  ;;  %v19391_v62 = vunpack.c.h.b16 %v5128_v19  ;;  %v12397_v50 = vld [vmem:[%s21238_s26 + $0x340] sm:$0xf]  ;;  %v14614_v19 = vld [vmem:[%s21238_s26 + $0x3a4] sm:$0xf] }
 0x595   : > { %v5054_v43 = vmax.f32 %v19195_v42, %v5034_v28  ;;  %v12286_v42 = vor.u32 %v14576_v2, %v12285_v40  ;;  %v12398_v58 = vor.u32 %v14604_v31, %v12397_v50  ;;  %v5235_v6 = vunpack.c.l.b16 %v5142_v54  ;;  %v14564_v28 = vld [vmem:[%s21238_s26 + $0x20c] sm:$0xf0] }
 0x596   : > { %v19395_v25 = vpack.c.b16 %v19389_v53, %v5149_v63  ;;  %v19398_v36 = vpack.c.b16 %v19391_v62, %v5150_v9  ;;  %v12447_v63 = vld [vmem:[%s21238_s26 + $0x3b0] sm:$0xf0]  ;;  %v12237_v9 = vld [vmem:[%s21238_s26 + $0x200] sm:$0xf] }
 0x597   : > { %v5087_v1 = vrot.slane %v5054_v43, 7  ;;  %6471 = vmatpush.bf16.msra.mxu2 %v12286_v42  ;;  %6495 = vmatpush.bf16.msra.mxu3 %v12398_v58  ;;  %v5239_v13 = vpack.c.b16 %v19389_v53, %v5235_v6  ;;  %v12365_v43 = vld [vmem:[%s21238_s26 + $0x300] sm:$0xf]  ;;  %v12238_v40 = vor.u32 %v14564_v28, %v12237_v9  ;;  %v14606_v58 = vld [vmem:[%s21238_s26 + $0x364] sm:$0xf] }
 0x598   : > { %6429 = vmatmul.bf16.vlgmr.msrb.gmra.mxu2 %v19395_v25  ;;  %6452 = vmatmul.bf16.vlgmr.msrb.gmra.mxu3 %v19398_v36 }
 0x599   : > { %v5088_v0 = vsel %vm5078_vm5, %v5083_v39, %v5087_v1  ;;  %v5007_v60 = vpop.f32.mrf.mxu1  ;;  %v5236_v39 = vunpack.c.h.b16 %v5142_v54  ;;  %v5243_v48 = vrot.slane %v5239_v13, 1 }
 0x59a   : > { %v5037_v33 = vrot.slane %v5007_v60, 4  ;;  %v5129_v24 = vpack.c.bf16 %v5088_v0, %v19116_v47  ;;  %v12382_v47 = vor.u32 %v14600_v35, %v12381_v18  ;;  %v12399_v18 = vld [vmem:[%s21238_s26 + $0x350] sm:$0xf0] }
 0x59b   : > { %6472 = vmatpush.bf16.msra.mxu2 %v12270_v49  ;;  %v5240_v21 = vpack.c.b16 %v19391_v62, %v5236_v39  ;;  %v12287_v49 = vld [vmem:[%s21238_s26 + $0x270] sm:$0xf0]  ;;  %v14570_v39 = vld [vmem:[%s21238_s26 + $0x244] sm:$0xf] }
 0x59c   : > { %v5038_v52 = vsel %vm4938_vm3, %v5033_v57, %v5037_v33  ;;  %v5058_v7 = vmax.f32 %v19283_v14, %v5037_v33  ;;  %v14586_v14 = vld [vmem:[%s21238_s26 + $0x2c4] sm:$0xf]  ;;  %v12322_v57 = vor.u32 %v14582_v34, %v12319_v23  ;;  %v5153_v2 = vunpack.c.l.b16 %v5129_v24  ;;  %6496 = vmatpush.bf16.msra.mxu3 %v12382_v47 }
 0x59d   : > { %v5056_v26 = vmax.f32 %v19245_v29, %v5038_v52  ;;  %v12338_v44 = vor.u32 %v14586_v14, %v12335_v27  ;;  %v12463_v29 = vld [vmem:[%s21238_s26 + $0x3d0] sm:$0xf0]  ;;  %v5154_v41 = vunpack.c.h.b16 %v5129_v24  ;;  %v5246_v54 = vrot.slane %v5240_v21, 1  ;;  %v5125_v14 = vld [vmem:[#allocation2 + $0x40] sm:$0xf] }
 0x59e   : > { %v5095_v12 = vrot.slane %v5058_v7, 7  ;;  %v12466_v11 = vor.u32 %v14618_v30, %v12463_v29  ;;  %v12434_v27 = vor.u32 %v14610_v38, %v12431_v16  ;;  %v12415_v30 = vld [vmem:[%s21238_s26 + $0x370] sm:$0xf0]  ;;  %v12290_v6 = vor.u32 %v14574_v59, %v12287_v49  ;;  %v5132_v24 = vld [vmem:[#allocation2] sm:$0xfe] }
 0x59f   : > { %v5091_v37 = vrot.slane %v5056_v26, 7  ;;  %6606 = vmatpush.bf16.msrb.mxu0 %v12338_v44  ;;  %6473 = vmatpush.bf16.msra.mxu2 %v12254_v5  ;;  %v12306_v26 = vor.u32 %v14578_v22, %v12303_v55  ;;  %v5136_v35 = vpack.c.bf16 %v5133_v51, %v5132_v24  ;;  %v14566_v47 = vld [vmem:[%s21238_s26 + $0x224] sm:$0xf]  ;;  %v12095_v38 = vld [vmem:[%s21238_s26 + $0xf0] sm:$0xf0] }
 0x5a0   : > { %6629 = vmatpush.bf16.msrb.mxu1 %v12466_v11  ;;  %v12271_v11 = vld [vmem:[%s21238_s26 + $0x250] sm:$0xf0]  ;;  %v14526_v22 = vld [vmem:[%s21238_s26 + $0xe4] sm:$0xf] }
 0x5a1   : > { %v5092_v3 = vsel %vm5078_vm5, %v5087_v1, %v5091_v37  ;;  %v5096_v15 = vsel %vm5078_vm5, %v5091_v37, %v5095_v12  ;;  %v5009_v17 = vpop.f32.mrf.mxu1  ;;  %v12450_v1 = vor.u32 %v14614_v19, %v12447_v63  ;;  %v12418_v37 = vor.u32 %v14606_v58, %v12415_v30  ;;  %v14598_v19 = vld [vmem:[%s21238_s26 + $0x324] sm:$0xf]  ;;  %v12383_v63 = vld [vmem:[%s21238_s26 + $0x330] sm:$0xf0]  ;;  %v5134_v58 = vld [vmem:[#allocation2 + $0x40] sm:$0x1f] }
 0x5a2   : > { %v5130_v46 = vpack.c.bf16 %v5092_v3, %v19128_v20  ;;  %5116 = vst [vmem:[#allocation2 + $0x48] sm:$0x1f] %v5096_v15  ;;  %v14596_v20 = vld [vmem:[%s21238_s26 + $0x30c] sm:$0xf0]  ;;  %v12274_v34 = vor.u32 %v14570_v39, %v12271_v11  ;;  %v12402_v17 = vor.u32 %v14602_v32, %v12399_v18  ;;  %v5174_v13 = vunpack.c.h.b16 %v5136_v35  ;;  %v14558_v16 = vld [vmem:[%s21238_s26 + $0x1e4] sm:$0xf] }
 0x5a3   : > { %6607 = vmatpush.bf16.msrb.mxu0 %v12322_v57  ;;  %v12366_v0 = vor.u32 %v14596_v20, %v12365_v43  ;;  %6474 = vmatpush.bf16.msra.mxu2 %v12238_v40  ;;  %v12255_v57 = vld [vmem:[%s21238_s26 + $0x230] sm:$0xf0]  ;;  %v12386_v40 = vor.u32 %v14598_v19, %v12383_v63  ;;  %v14562_v20 = vld [vmem:[%s21238_s26 + $0x204] sm:$0xf] }
 0x5a4   : > { %v5155_v42 = vunpack.c.l.b16 %v5130_v46  ;;  %v5156_v8 = vunpack.c.h.b16 %v5130_v46  ;;  %6630 = vmatpush.bf16.msrb.mxu1 %v12450_v1  ;;  %v5173_v46 = vunpack.c.l.b16 %v5136_v35  ;;  %v12258_v28 = vor.u32 %v14566_v47, %v12255_v57  ;;  %v14550_v51 = vld [vmem:[%s21238_s26 + $0x1a4] sm:$0xf]  ;;  %v12175_v57 = vld [vmem:[%s21238_s26 + $0x190] sm:$0xf0] }
 0x5a5   : > { %6497 = vmatpush.bf16.msra.mxu3 %v12366_v0  ;;  %v14546_v47 = vld [vmem:[%s21238_s26 + $0x184] sm:$0xf] }
 0x5a6   : > { %v19496_v60 = vpack.c.b16 %v5155_v42, %v5153_v2  ;;  %v19498_v4 = vpack.c.b16 %v5156_v8, %v5154_v41  ;;  %v12239_v2 = vld [vmem:[%s21238_s26 + $0x210] sm:$0xf0]  ;;  %v5177_v42 = vpack.c.b16 %v19389_v53, %v5173_v46  ;;  %v5178_v41 = vpack.c.b16 %v19391_v62, %v5174_v13 }
 0x5a7   : > { %6608 = vmatpush.bf16.msrb.mxu0 %v12306_v26  ;;  %v12242_v0 = vor.u32 %v14562_v20, %v12239_v2  ;;  %v12207_v26 = vld [vmem:[%s21238_s26 + $0x1d0] sm:$0xf0] }
 0x5a8   : > { %6434 = vmatmul.bf16.gmra.mxu2 %v19496_v60  ;;  %6457 = vmatmul.bf16.gmra.mxu3 %v19498_v4  ;;  %v5244_v33 = vrot.slane %v19496_v60, 1  ;;  %v5247_v56 = vrot.slane %v19498_v4, 1  ;;  %v5184_v59 = vshll.u32 %v5177_v42, 16  ;;  %v5196_v49 = vshll.u32 %v5178_v41, 16 }
 0x5a9   : > { %v5126_v7 = vld [vmem:[#allocation2 + $0x48] sm:$0xf]  ;;  %6631 = vmatpush.bf16.msrb.mxu1 %v12434_v27  ;;  %v5182_v39 = vshrl.u32 %v5177_v42, 16  ;;  %v5194_v24 = vshrl.u32 %v5178_v41, 16  ;;  %v14510_v42 = vld [vmem:[%s21238_s26 + $0x64] sm:$0xf] }
 0x5aa   : > { %v19519_v61 = vsel %vm1263_vm2, %v5243_v48, %v5244_v33  ;;  %v19524_v52 = vsel %vm1263_vm2, %v5246_v54, %v5247_v56  ;;  %v5141_v50 = vld [vmem:[#allocation2 + $0x48] sm:$0x3f]  ;;  %v5131_v12 = vpack.c.bf16 %v5126_v7, %v5125_v14  ;;  %v14594_v48 = vld [vmem:[%s21238_s26 + $0x304] sm:$0xf]  ;;  %v5186_v11 = vrot.slane %v5184_v59, 1 }
 0x5ab   : > { %6521 = vmatmul.bf16.vlgmr.msra.gmra.mxu0 %v19519_v61  ;;  %6544 = vmatmul.bf16.vlgmr.msra.gmra.mxu1 %v19524_v52  ;;  %v5143_v31 = vpack.c.bf16 %v5141_v50, %v5140_v45  ;;  %v5135_v8 = vld [vmem:[#allocation2 + $0x48] sm:$0x1f]  ;;  %v14522_v45 = vld [vmem:[%s21238_s26 + $0xc4] sm:$0xf]  ;;  %v5198_v32 = vrot.slane %v5196_v49, 1 }
 0x5ac   : > { %v5157_v5 = vunpack.c.l.b16 %v5131_v12  ;;  %6609 = vmatpush.bf16.msrb.mxu0 %v12290_v6  ;;  %v5158_v23 = vunpack.c.h.b16 %v5131_v12  ;;  %v12367_v54 = vld [vmem:[%s21238_s26 + $0x310] sm:$0xf0]  ;;  %v5137_v27 = vpack.c.bf16 %v5135_v8, %v5134_v58  ;;  %v14518_v12 = vld [vmem:[%s21238_s26 + $0xa4] sm:$0xf]  ;;  %v5187_v19 = vor.u32 %v5186_v11, %v5182_v39  ;;  %v12085_v58 = vld [vmem:[%s21238_s26 + $0xc8] sm:$0xf] }
 0x5ad   : > { %v5237_v44 = vunpack.c.l.b16 %v5143_v31  ;;  %v5238_v29 = vunpack.c.h.b16 %v5143_v31  ;;  %6632 = vmatpush.bf16.msrb.mxu1 %v12418_v37  ;;  %v12370_v55 = vor.u32 %v14594_v48, %v12367_v54  ;;  %v12079_v50 = vld [vmem:[%s21238_s26 + $0xd0] sm:$0xf0]  ;;  %v14554_v31 = vld [vmem:[%s21238_s26 + $0x1c4] sm:$0xf]  ;;  %v5199_v63 = vor.u32 %v5198_v32, %v5194_v24  ;;  %v12069_v11 = vld [vmem:[%s21238_s26 + $0xa8] sm:$0xf] }
 0x5ae   : > { %v19564_v9 = vpack.c.b16 %v5157_v5, %v5157_v5  ;;  %v19566_v43 = vpack.c.b16 %v5158_v23, %v5158_v23  ;;  %v12082_v14 = vor.u32 %v14522_v45, %v12079_v50  ;;  %v12210_v30 = vor.u32 %v14554_v31, %v12207_v26  ;;  %v12063_v6 = vld [vmem:[%s21238_s26 + $0xb0] sm:$0xf0]  ;;  %v14514_v23 = vld [vmem:[%s21238_s26 + $0x84] sm:$0xf]  ;;  %v14521_v32 = vld [vmem:[%s21238_s26 + $0xb4] sm:$0xf0] }
 0x5af   : > { %v5241_v3 = vpack.c.b16 %v5237_v44, %v5237_v44  ;;  %v5242_v15 = vpack.c.b16 %v5238_v29, %v5238_v29  ;;  %v5189_v44 = vshll.u32 %v19496_v60, 16  ;;  %v5201_v29 = vshll.u32 %v19498_v4, 16  ;;  %v12191_v37 = vld [vmem:[%s21238_s26 + $0x1b0] sm:$0xf0]  ;;  %v14542_v8 = vld [vmem:[%s21238_s26 + $0x164] sm:$0xf] }
 0x5b0   : > { %6610 = vmatpush.bf16.msrb.mxu0 %v12274_v34  ;;  %v12066_v18 = vor.u32 %v14518_v12, %v12063_v6  ;;  %v5175_v5 = vunpack.c.l.b16 %v5137_v27  ;;  %v5176_v35 = vunpack.c.h.b16 %v5137_v27  ;;  %v12194_v34 = vor.u32 %v14550_v51, %v12191_v37  ;;  %v12031_v41 = vld [vmem:[%s21238_s26 + $0x70] sm:$0xf0]  ;;  %v14506_v45 = vld [vmem:[%s21238_s26 + $0x44] sm:$0xf]  ;;  %v14525_v27 = vld [vmem:[%s21238_s26 + $0xd4] sm:$0xf0] }
 0x5b1   : > { %v19568_v21 = vrot.slane %v5241_v3, 1  ;;  %v19570_v1 = vrot.slane %v5242_v15, 1  ;;  %6633 = vmatpush.bf16.msrb.mxu1 %v12402_v17  ;;  %v12047_v3 = vld [vmem:[%s21238_s26 + $0x90] sm:$0xf0]  ;;  %v19646_v15 = vrot.slane %v5189_v44, 1  ;;  %v19648_v17 = vrot.slane %v5201_v29, 1 }
 0x5b2   : > { %v12050_v46 = vor.u32 %v14514_v23, %v12047_v3  ;;  %v19656_v13 = vpack.c.b16 %v5175_v5, %v5175_v5  ;;  %v12159_v48 = vld [vmem:[%s21238_s26 + $0x170] sm:$0xf0]  ;;  %v14538_v59 = vld [vmem:[%s21238_s26 + $0x144] sm:$0xf]  ;;  %v14557_v12 = vld [vmem:[%s21238_s26 + $0x1d4] sm:$0xf0]  ;;  %v12086_v6 = vor.u32 %v14525_v27, %v12085_v58  ;;  %v12070_v3 = vor.u32 %v14521_v32, %v12069_v11 }
 0x5b3   : > { %v19595_v53 = vsel %vm1263_vm2, %v5244_v33, %v19568_v21  ;;  %v19601_v62 = vsel %vm1263_vm2, %v5247_v56, %v19570_v1  ;;  %v12223_v33 = vld [vmem:[%s21238_s26 + $0x1f0] sm:$0xf0]  ;;  %v12098_v56 = vor.u32 %v14526_v22, %v12095_v38  ;;  %v19662_v20 = vsel %vm1015_vm0, %v5187_v19, %v19646_v15  ;;  %v12101_v38 = vld [vmem:[%s21238_s26 + $0xe8] sm:$0xf]  ;;  %v14502_v29 = vld [vmem:[%s21238_s26 + $0x24] sm:$0xf] }
 0x5b4   : > { %6611 = vmatpush.bf16.msrb.mxu0 %v12258_v28  ;;  %v12226_v7 = vor.u32 %v14558_v16, %v12223_v33  ;;  %v19658_v28 = vpack.c.b16 %v5176_v35, %v5176_v35  ;;  %v19666_v2 = vsel %vm1015_vm0, %v5199_v63, %v19648_v17  ;;  %v5209_v54 = vshll.u32 %v19656_v13, 16  ;;  %v14529_v16 = vld [vmem:[%s21238_s26 + $0xf4] sm:$0xf0]  ;;  %v12229_v33 = vld [vmem:[%s21238_s26 + $0x1e8] sm:$0xf] }
 0x5b5   : > { %6634 = vmatpush.bf16.msrb.mxu1 %v12386_v40  ;;  %6559 = vmatpush.bf16.msrb.mxu2 %v12098_v56  ;;  %v12178_v40 = vor.u32 %v14546_v47, %v12175_v57  ;;  %v12102_v56 = vor.u32 %v14529_v16, %v12101_v38  ;;  %v12015_v50 = vld [vmem:[%s21238_s26 + $0x50] sm:$0xf0]  ;;  %v14534_v37 = vld [vmem:[%s21238_s26 + $0x124] sm:$0xf]  ;;  %v12197_v24 = vld [vmem:[%s21238_s26 + $0x1a8] sm:$0xf] }
 0x5b6   : > { %6582 = vmatpush.bf16.msrb.mxu3 %v12226_v7  ;;  %v5217_v22 = vshll.u32 %v19658_v28, 16  ;;  %v14561_v7 = vld [vmem:[%s21238_s26 + $0x1f4] sm:$0xf0]  ;;  %v12018_v26 = vor.u32 %v14506_v45, %v12015_v50  ;;  %v12143_v49 = vld [vmem:[%s21238_s26 + $0x150] sm:$0xf0]  ;;  %v5205_v35 = vshrl.u32 %v19496_v60, 16 }
 0x5b7   : > { %v12230_v31 = vor.u32 %v14561_v7, %v12229_v33  ;;  %v11999_v51 = vld [vmem:[%s21238_s26 + $0x30] sm:$0xf0]  ;;  %v14553_v5 = vld [vmem:[%s21238_s26 + $0x1b4] sm:$0xf0]  ;;  %v14498_v47 = vld [vmem:[%s21238_s26 + $0x4] sm:$0xf] }
 0x5b8   : > { %6439 = vmatmul.bf16.gmra.mxu2 %v19564_v9  ;;  %6462 = vmatmul.bf16.gmra.mxu3 %v19566_v43  ;;  %v12127_v39 = vld [vmem:[%s21238_s26 + $0x130] sm:$0xf0]  ;;  %v5211_v19 = vrot.slane %v5209_v54, 1  ;;  %v5219_v63 = vrot.slane %v5217_v22, 1  ;;  %v14549_v16 = vld [vmem:[%s21238_s26 + $0x194] sm:$0xf0] }
 0x5b9   : > { %6612 = vmatpush.bf16.msrb.mxu0 %v12242_v0  ;;  %6635 = vmatpush.bf16.msrb.mxu1 %v12370_v55  ;;  %v12034_v0 = vor.u32 %v14510_v42, %v12031_v41  ;;  %v12162_v55 = vor.u32 %v14542_v8, %v12159_v48  ;;  %v12130_v23 = vor.u32 %v14534_v37, %v12127_v39  ;;  %v11983_v57 = vld [vmem:[%s21238_s26 + $0x10] sm:$0xf0]  ;;  %v14513_v7 = vld [vmem:[%s21238_s26 + $0x74] sm:$0xf0]  ;;  %v12165_v45 = vld [vmem:[%s21238_s26 + $0x168] sm:$0xf] }
 0x5ba   : > { %6560 = vmatpush.bf16.msrb.mxu2 %v12082_v14  ;;  %6583 = vmatpush.bf16.msrb.mxu3 %v12210_v30  ;;  %v12146_v14 = vor.u32 %v14538_v59, %v12143_v49  ;;  %v12213_v30 = vld [vmem:[%s21238_s26 + $0x1c8] sm:$0xf]  ;;  %v12111_v42 = vld [vmem:[%s21238_s26 + $0x110] sm:$0xf0]  ;;  %v5207_v41 = vor.u32 %v5205_v35, %v19646_v15  ;;  %v14509_v49 = vld [vmem:[%s21238_s26 + $0x54] sm:$0xf0] }
 0x5bb   : > { %6526 = vmatmul.bf16.gmra.mxu0 %v19595_v53  ;;  %6549 = vmatmul.bf16.gmra.mxu1 %v19601_v62  ;;  %v12214_v44 = vor.u32 %v14557_v12, %v12213_v30  ;;  %v12053_v15 = vld [vmem:[%s21238_s26 + $0x88] sm:$0xf]  ;;  %v5224_v37 = vshrl.u32 %v19658_v28, 16  ;;  %v14533_v35 = vld [vmem:[%s21238_s26 + $0x114] sm:$0xf0] }
 0x5bc   : > { %v19763_v54 = vsel %vm1015_vm0, %v5207_v41, %v5211_v19  ;;  %v12149_v58 = vld [vmem:[%s21238_s26 + $0x148] sm:$0xf] }
 0x5bd   : > { %6697 = vmatpush.bf16.msra.mxu0 %v12102_v56  ;;  %6720 = vmatpush.bf16.msra.mxu1 %v12230_v31  ;;  %v12037_v56 = vld [vmem:[%s21238_s26 + $0x68] sm:$0xf]  ;;  %v14545_v31 = vld [vmem:[%s21238_s26 + $0x174] sm:$0xf0] }
 0x5be   : > { %6561 = vmatpush.bf16.msrb.mxu2 %v12066_v18  ;;  %6584 = vmatpush.bf16.msrb.mxu3 %v12194_v34  ;;  %v12002_v18 = vor.u32 %v14502_v29, %v11999_v51  ;;  %v5213_v34 = vshrl.u32 %v19498_v4, 16  ;;  %v12038_v50 = vor.u32 %v14513_v7, %v12037_v56  ;;  %v12166_v59 = vor.u32 %v14545_v31, %v12165_v45  ;;  %v12005_v12 = vld [vmem:[%s21238_s26 + $0x28] sm:$0xf]  ;;  %v14537_v29 = vld [vmem:[%s21238_s26 + $0x134] sm:$0xf0] }
 0x5bf   : > { %v5221_v51 = vshrl.u32 %v19656_v13, 16  ;;  %v14501_v13 = vld [vmem:[%s21238_s26 + $0x14] sm:$0xf0]  ;;  %v12117_v28 = vld [vmem:[%s21238_s26 + $0x108] sm:$0xf] }
 0x5c0   : > { %v5215_v8 = vor.u32 %v5213_v34, %v19648_v17  ;;  %v14517_v17 = vld [vmem:[%s21238_s26 + $0x94] sm:$0xf0]  ;;  %v14654_v34 = vld [vmem:[%s21238_s26 + $0x4e4] sm:$0xf]  ;;  %v12559_v56 = vld [vmem:[%s21238_s26 + $0x490] sm:$0xf0] }
 0x5c1   : > { %6698 = vmatpush.bf16.msra.mxu0 %v12086_v6  ;;  %6721 = vmatpush.bf16.msra.mxu1 %v12214_v44  ;;  %v12054_v38 = vor.u32 %v14517_v17, %v12053_v15  ;;  %v14505_v6 = vld [vmem:[%s21238_s26 + $0x34] sm:$0xf0]  ;;  %v12133_v44 = vld [vmem:[%s21238_s26 + $0x128] sm:$0xf]  ;;  %v19822_v32 = vor.u32 %v5221_v51, %v5211_v19  ;;  %v12735_v19 = vld [vmem:[%s21238_s26 + $0x5f0] sm:$0xf0] }
 0x5c2   : > { %6562 = vmatpush.bf16.msrb.mxu2 %v12050_v46  ;;  %6585 = vmatpush.bf16.msrb.mxu3 %v12178_v40  ;;  %v12198_v46 = vor.u32 %v14553_v5, %v12197_v24  ;;  %v14530_v40 = vld [vmem:[%s21238_s26 + $0x104] sm:$0xf]  ;;  %v19766_v22 = vsel %vm1015_vm0, %v5215_v8, %v5219_v63  ;;  %v12006_v39 = vor.u32 %v14505_v6, %v12005_v12  ;;  %v11989_v24 = vld [vmem:[%s21238_s26 + $0x8] sm:$0xf]  ;;  %v12719_v8 = vld [vmem:[%s21238_s26 + $0x5d0] sm:$0xf0] }
 0x5c3   : > { %v12114_v48 = vor.u32 %v14530_v40, %v12111_v42  ;;  %v12134_v11 = vor.u32 %v14537_v29, %v12133_v44  ;;  %v11990_v5 = vor.u32 %v14501_v13, %v11989_v24  ;;  %v12591_v40 = vld [vmem:[%s21238_s26 + $0x4d0] sm:$0xf0]  ;;  %v14682_v42 = vld [vmem:[%s21238_s26 + $0x5c4] sm:$0xf]  ;;  %v14657_v12 = vld [vmem:[%s21238_s26 + $0x4f4] sm:$0xf0] }
 0x5c4   : > { %v12722_v15 = vor.u32 %v14682_v42, %v12719_v8  ;;  %v14678_v17 = vld [vmem:[%s21238_s26 + $0x5a4] sm:$0xf]  ;;  %v12687_v45 = vld [vmem:[%s21238_s26 + $0x590] sm:$0xf0]  ;;  %v12741_v6 = vld [vmem:[%s21238_s26 + $0x5e8] sm:$0xf] }
 0x5c5   : > { %6699 = vmatpush.bf16.msra.mxu0 %v12070_v3  ;;  %6722 = vmatpush.bf16.msra.mxu1 %v12198_v46  ;;  %v12118_v3 = vor.u32 %v14533_v35, %v12117_v28  ;;  %v14650_v46 = vld [vmem:[%s21238_s26 + $0x4c4] sm:$0xf]  ;;  %v14689_v29 = vld [vmem:[%s21238_s26 + $0x5f4] sm:$0xf0]  ;;  %v12655_v13 = vld [vmem:[%s21238_s26 + $0x550] sm:$0xf0] }
 0x5c6   : > { %6563 = vmatpush.bf16.msrb.mxu2 %v12034_v0  ;;  %6586 = vmatpush.bf16.msrb.mxu3 %v12162_v55  ;;  %v11986_v0 = vor.u32 %v14498_v47, %v11983_v57  ;;  %v12181_v55 = vld [vmem:[%s21238_s26 + $0x188] sm:$0xf]  ;;  %v14686_v57 = vld [vmem:[%s21238_s26 + $0x5e4] sm:$0xf]  ;;  %v12594_v41 = vor.u32 %v14650_v46, %v12591_v40  ;;  %v14653_v35 = vld [vmem:[%s21238_s26 + $0x4d4] sm:$0xf0] }
 0x5c7   : > { %v12182_v33 = vor.u32 %v14549_v16, %v12181_v55  ;;  %v12703_v55 = vld [vmem:[%s21238_s26 + $0x5b0] sm:$0xf0]  ;;  %v14674_v7 = vld [vmem:[%s21238_s26 + $0x584] sm:$0xf]  ;;  %v12597_v28 = vld [vmem:[%s21238_s26 + $0x4c8] sm:$0xf] }
 0x5c8   : > { %6475 = vmatmul.bf16.vlgmr.msra.gmra.mxu2 %v19662_v20  ;;  %6498 = vmatmul.bf16.vlgmr.msra.gmra.mxu3 %v19666_v2  ;;  %v12706_v16 = vor.u32 %v14678_v17, %v12703_v55  ;;  %v12690_v31 = vor.u32 %v14674_v7, %v12687_v45  ;;  %v14634_v51 = vld [vmem:[%s21238_s26 + $0x444] sm:$0xf]  ;;  %v12639_v40 = vld [vmem:[%s21238_s26 + $0x530] sm:$0xf0]  ;;  %v14649_v8 = vld [vmem:[%s21238_s26 + $0x4b4] sm:$0xf0] }
 0x5c9   : > { %6700 = vmatpush.bf16.msra.mxu0 %v12054_v38  ;;  %6723 = vmatpush.bf16.msra.mxu1 %v12182_v33  ;;  %v14642_v33 = vld [vmem:[%s21238_s26 + $0x484] sm:$0xf]  ;;  %v12495_v55 = vld [vmem:[%s21238_s26 + $0x410] sm:$0xf0]  ;;  %v12565_v7 = vld [vmem:[%s21238_s26 + $0x488] sm:$0xf] }
 0x5ca   : > { %6564 = vmatpush.bf16.msrb.mxu2 %v12018_v26  ;;  %6587 = vmatpush.bf16.msrb.mxu3 %v12146_v14  ;;  %v12021_v26 = vld [vmem:[%s21238_s26 + $0x48] sm:$0xf]  ;;  %v14541_v14 = vld [vmem:[%s21238_s26 + $0x154] sm:$0xf0]  ;;  %v14666_v24 = vld [vmem:[%s21238_s26 + $0x544] sm:$0xf] }
 0x5cb   : > { %6531 = vmatmul.bf16.gmra.mxu0 %v19568_v21  ;;  %6554 = vmatmul.bf16.gmra.mxu1 %v19570_v1  ;;  %v12022_v27 = vor.u32 %v14509_v49, %v12021_v26  ;;  %v12150_v30 = vor.u32 %v14541_v14, %v12149_v58  ;;  %v14638_v26 = vld [vmem:[%s21238_s26 + $0x464] sm:$0xf]  ;;  %v12671_v14 = vld [vmem:[%s21238_s26 + $0x570] sm:$0xf0] }
 0x5cc   : > { %v14670_v49 = vld [vmem:[%s21238_s26 + $0x564] sm:$0xf] }
 0x5cd   : > { %6701 = vmatpush.bf16.msra.mxu0 %v12038_v50  ;;  %6724 = vmatpush.bf16.msra.mxu1 %v12166_v59  ;;  %v12562_v50 = vor.u32 %v14642_v33, %v12559_v56  ;;  %v12543_v59 = vld [vmem:[%s21238_s26 + $0x470] sm:$0xf0]  ;;  %v14626_v17 = vld [vmem:[%s21238_s26 + $0x404] sm:$0xf] }
 0x5ce   : > { %6565 = vmatpush.bf16.msrb.mxu2 %v12002_v18  ;;  %6588 = vmatpush.bf16.msrb.mxu3 %v12130_v23  ;;  %v19824_v18 = vor.u32 %v5224_v37, %v5219_v63  ;;  %v12607_v23 = vld [vmem:[%s21238_s26 + $0x4f0] sm:$0xf0]  ;;  %v12738_v63 = vor.u32 %v14686_v57, %v12735_v19  ;;  %v12546_v58 = vor.u32 %v14638_v26, %v12543_v59  ;;  %v14630_v57 = vld [vmem:[%s21238_s26 + $0x424] sm:$0xf]  ;;  %v14677_v26 = vld [vmem:[%s21238_s26 + $0x594] sm:$0xf0] }
 0x5cf   : > { %v12610_v47 = vor.u32 %v14654_v34, %v12607_v23  ;;  %v12527_v37 = vld [vmem:[%s21238_s26 + $0x450] sm:$0xf0]  ;;  %v12725_v34 = vld [vmem:[%s21238_s26 + $0x5c8] sm:$0xf]  ;;  %v14685_v23 = vld [vmem:[%s21238_s26 + $0x5d4] sm:$0xf0] }
 0x5d0   : > { %v12511_v19 = vld [vmem:[%s21238_s26 + $0x430] sm:$0xf0]  ;;  %v14658_v33 = vld [vmem:[%s21238_s26 + $0x504] sm:$0xf] }
 0x5d1   : > { %6702 = vmatpush.bf16.msra.mxu0 %v12022_v27  ;;  %6725 = vmatpush.bf16.msra.mxu1 %v12150_v30  ;;  %v12674_v27 = vor.u32 %v14670_v49, %v12671_v14  ;;  %v12613_v30 = vld [vmem:[%s21238_s26 + $0x4e8] sm:$0xf]  ;;  %v12514_v46 = vor.u32 %v14630_v57, %v12511_v19  ;;  %v12623_v56 = vld [vmem:[%s21238_s26 + $0x510] sm:$0xf0]  ;;  %v14641_v14 = vld [vmem:[%s21238_s26 + $0x474] sm:$0xf0] }
 0x5d2   : > { %6566 = vmatpush.bf16.msrb.mxu2 %v11986_v0  ;;  %6589 = vmatpush.bf16.msrb.mxu3 %v12114_v48  ;;  %v14646_v0 = vld [vmem:[%s21238_s26 + $0x4a4] sm:$0xf]  ;;  %v12575_v48 = vld [vmem:[%s21238_s26 + $0x4b0] sm:$0xf0]  ;;  %v12614_v44 = vor.u32 %v14657_v12, %v12613_v30  ;;  %v12626_v45 = vor.u32 %v14658_v33, %v12623_v56  ;;  %v14673_v12 = vld [vmem:[%s21238_s26 + $0x574] sm:$0xf0] }
 0x5d3   : > { %v12578_v38 = vor.u32 %v14646_v0, %v12575_v48  ;;  %v12709_v0 = vld [vmem:[%s21238_s26 + $0x5a8] sm:$0xf]  ;;  %v14629_v57 = vld [vmem:[%s21238_s26 + $0x414] sm:$0xf0] }
 0x5d4   : > { %v12629_v19 = vld [vmem:[%s21238_s26 + $0x508] sm:$0xf]  ;;  %v14589_v56 = vld [vmem:[%s21238_s26 + $0x2d4] sm:$0xf0] }
 0x5d5   : > { %6703 = vmatpush.bf16.msra.mxu0 %v12006_v39  ;;  %6726 = vmatpush.bf16.msra.mxu1 %v12134_v11  ;;  %v12742_v39 = vor.u32 %v14689_v29, %v12741_v6  ;;  %v12530_v11 = vor.u32 %v14634_v51, %v12527_v37  ;;  %v14637_v29 = vld [vmem:[%s21238_s26 + $0x454] sm:$0xf0]  ;;  %v12661_v51 = vld [vmem:[%s21238_s26 + $0x548] sm:$0xf] }
 0x5d6   : > { %6651 = vmatpush.bf16.msra.mxu2 %v12610_v47  ;;  %6674 = vmatpush.bf16.msra.mxu3 %v12738_v63  ;;  %v12726_v47 = vor.u32 %v14685_v23, %v12725_v34  ;;  %v14662_v63 = vld [vmem:[%s21238_s26 + $0x524] sm:$0xf]  ;;  %v14665_v23 = vld [vmem:[%s21238_s26 + $0x534] sm:$0xf0]  ;;  %v12341_v33 = vld [vmem:[%s21238_s26 + $0x2c8] sm:$0xf] }
 0x5d7   : > { %v12642_v42 = vor.u32 %v14662_v63, %v12639_v40  ;;  %v12357_v40 = vld [vmem:[%s21238_s26 + $0x2e8] sm:$0xf] }
 0x5d8   : > { %6480 = vmatmul.bf16.gmra.mxu2 %v19763_v54  ;;  %6503 = vmatmul.bf16.gmra.mxu3 %v19766_v22 }
 0x5d9   : > { %6704 = vmatpush.bf16.msra.mxu0 %v11990_v5  ;;  %6727 = vmatpush.bf16.msra.mxu1 %v12118_v3  ;;  %v12658_v5 = vor.u32 %v14666_v24, %v12655_v13  ;;  %v12598_v3 = vor.u32 %v14653_v35, %v12597_v28  ;;  %v20018_v24 = vld [vmem:[#allocation13] sm:$0xf]  ;;  %v12517_v13 = vld [vmem:[%s21238_s26 + $0x428] sm:$0xf]  ;;  %v14633_v28 = vld [vmem:[%s21238_s26 + $0x434] sm:$0xf0] }
 0x5da   : > { %6652 = vmatpush.bf16.msra.mxu2 %v12594_v41  ;;  %6675 = vmatpush.bf16.msra.mxu3 %v12722_v15  ;;  %v12581_v41 = vld [vmem:[%s21238_s26 + $0x4a8] sm:$0xf]  ;;  %v14681_v15 = vld [vmem:[%s21238_s26 + $0x5b4] sm:$0xf0]  ;;  %v20030_v35 = vperm.slane %v20018_v24, 0  ;;  %v12518_v34 = vor.u32 %v14633_v28, %v12517_v13 }
 0x5db   : > { %6613 = vmatmul.bf16.vlgmr.msrb.gmra.mxu0 %v19662_v20  ;;  %6636 = vmatmul.bf16.vlgmr.msrb.gmra.mxu1 %v19666_v2  ;;  %v12582_v48 = vor.u32 %v14649_v8, %v12581_v41 }
 0x5dd   : > { %6789 = vmatpush.bf16.msrb.mxu0 %v12614_v44  ;;  %6812 = vmatpush.bf16.msrb.mxu1 %v12742_v39  ;;  %v12533_v44 = vld [vmem:[%s21238_s26 + $0x448] sm:$0xf]  ;;  %v14669_v39 = vld [vmem:[%s21238_s26 + $0x554] sm:$0xf0] }
 0x5de   : > { %6653 = vmatpush.bf16.msra.mxu2 %v12578_v38  ;;  %6676 = vmatpush.bf16.msra.mxu3 %v12706_v16  ;;  %v12710_v38 = vor.u32 %v14681_v15, %v12709_v0  ;;  %v12498_v16 = vor.u32 %v14626_v17, %v12495_v55  ;;  %v12534_v37 = vor.u32 %v14637_v29, %v12533_v44  ;;  %v12485_v0 = vld [vmem:[%s21238_s26 + $0x3e8] sm:$0xf]  ;;  %v14581_v44 = vld [vmem:[%s21238_s26 + $0x294] sm:$0xf0] }
 0x5df   : > { %v12437_v29 = vld [vmem:[%s21238_s26 + $0x388] sm:$0xf] }
 0x5e1   : > { %6790 = vmatpush.bf16.msrb.mxu0 %v12598_v3  ;;  %6813 = vmatpush.bf16.msrb.mxu1 %v12726_v47  ;;  %v12501_v47 = vld [vmem:[%s21238_s26 + $0x408] sm:$0xf] }
 0x5e2   : > { %6654 = vmatpush.bf16.msra.mxu2 %v12562_v50  ;;  %6677 = vmatpush.bf16.msra.mxu3 %v12690_v31  ;;  %v14645_v50 = vld [vmem:[%s21238_s26 + $0x494] sm:$0xf0]  ;;  %v12693_v31 = vld [vmem:[%s21238_s26 + $0x588] sm:$0xf]  ;;  %v12502_v63 = vor.u32 %v14629_v57, %v12501_v47 }
 0x5e3   : > { %v12566_v59 = vor.u32 %v14645_v50, %v12565_v7  ;;  %v12694_v49 = vor.u32 %v14677_v26, %v12693_v31  ;;  %v12469_v7 = vld [vmem:[%s21238_s26 + $0x3c8] sm:$0xf]  ;;  %v14621_v50 = vld [vmem:[%s21238_s26 + $0x3d4] sm:$0xf0] }
 0x5e4   : > { %v12470_v31 = vor.u32 %v14621_v50, %v12469_v7  ;;  %v12325_v26 = vld [vmem:[%s21238_s26 + $0x2a8] sm:$0xf]  ;;  %v14609_v57 = vld [vmem:[%s21238_s26 + $0x374] sm:$0xf0] }
 0x5e5   : > { %6791 = vmatpush.bf16.msrb.mxu0 %v12582_v48  ;;  %6814 = vmatpush.bf16.msrb.mxu1 %v12710_v38  ;;  %v14625_v48 = vld [vmem:[%s21238_s26 + $0x3f4] sm:$0xf0]  ;;  %v12277_v7 = vld [vmem:[%s21238_s26 + $0x248] sm:$0xf] }
 0x5e6   : > { %6655 = vmatpush.bf16.msra.mxu2 %v12546_v58  ;;  %6678 = vmatpush.bf16.msra.mxu3 %v12674_v27  ;;  %v12549_v58 = vld [vmem:[%s21238_s26 + $0x468] sm:$0xf]  ;;  %v12486_v55 = vor.u32 %v14625_v48, %v12485_v0 }
 0x5e7   : > { %v12677_v27 = vld [vmem:[%s21238_s26 + $0x568] sm:$0xf]  ;;  %v12550_v30 = vor.u32 %v14641_v14, %v12549_v58  ;;  %v14617_v14 = vld [vmem:[%s21238_s26 + $0x3b4] sm:$0xf0] }
 0x5e8   : > { %6485 = vmatmul.bf16.gmra.mxu2 %v19822_v32  ;;  %6508 = vmatmul.bf16.gmra.mxu3 %v19824_v18  ;;  %v12678_v6 = vor.u32 %v14673_v12, %v12677_v27 }
 0x5e9   : > { %6792 = vmatpush.bf16.msrb.mxu0 %v12566_v59  ;;  %6815 = vmatpush.bf16.msrb.mxu1 %v12694_v49  ;;  %v14585_v59 = vld [vmem:[%s21238_s26 + $0x2b4] sm:$0xf0]  ;;  %v12453_v49 = vld [vmem:[%s21238_s26 + $0x3a8] sm:$0xf] }
 0x5ea   : > { %6656 = vmatpush.bf16.msra.mxu2 %v12530_v11  ;;  %6679 = vmatpush.bf16.msra.mxu3 %v12658_v5  ;;  %v12662_v11 = vor.u32 %v14669_v39, %v12661_v51  ;;  %v12645_v5 = vld [vmem:[%s21238_s26 + $0x528] sm:$0xf]  ;;  %v12326_v58 = vor.u32 %v14585_v59, %v12325_v26  ;;  %v12454_v27 = vor.u32 %v14617_v14, %v12453_v49  ;;  %v14605_v59 = vld [vmem:[%s21238_s26 + $0x354] sm:$0xf0]  ;;  %v14587_v49 = vld [vmem:[%s21238_s26 + $0x2cc] sm:$0xf] }
 0x5eb   : > { %6618 = vmatmul.bf16.gmra.mxu0 %v19763_v54  ;;  %6641 = vmatmul.bf16.gmra.mxu1 %v19766_v22  ;;  %v12646_v3 = vor.u32 %v14665_v23, %v12645_v5  ;;  %v14577_v23 = vld [vmem:[%s21238_s26 + $0x274] sm:$0xf0]  ;;  %v12405_v26 = vld [vmem:[%s21238_s26 + $0x348] sm:$0xf] }
 0x5ec   : > { %v12406_v14 = vor.u32 %v14605_v59, %v12405_v26  ;;  %v12439_v26 = vld [vmem:[%s21238_s26 + $0x398] sm:$0xf0] }
 0x5ed   : > { %6793 = vmatpush.bf16.msrb.mxu0 %v12550_v30  ;;  %6816 = vmatpush.bf16.msrb.mxu1 %v12678_v6  ;;  %v12309_v6 = vld [vmem:[%s21238_s26 + $0x288] sm:$0xf] }
 0x5ee   : > { %6657 = vmatpush.bf16.msra.mxu2 %v12514_v46  ;;  %6680 = vmatpush.bf16.msra.mxu3 %v12642_v42  ;;  %v14661_v46 = vld [vmem:[%s21238_s26 + $0x514] sm:$0xf0]  ;;  %v12310_v39 = vor.u32 %v14581_v44, %v12309_v6  ;;  %v12261_v44 = vld [vmem:[%s21238_s26 + $0x228] sm:$0xf] }
 0x5ef   : > { %v14593_v42 = vld [vmem:[%s21238_s26 + $0x2f4] sm:$0xf0]  ;;  %v12630_v41 = vor.u32 %v14661_v46, %v12629_v19 }
 0x5f0   : > { %v12358_v8 = vor.u32 %v14593_v42, %v12357_v40 }
 0x5f1   : > { %6794 = vmatpush.bf16.msrb.mxu0 %v12534_v37  ;;  %6817 = vmatpush.bf16.msrb.mxu1 %v12662_v11  ;;  %v14613_v37 = vld [vmem:[%s21238_s26 + $0x394] sm:$0xf0] }
 0x5f2   : > { %6658 = vmatpush.bf16.msra.mxu2 %v12498_v16  ;;  %6681 = vmatpush.bf16.msra.mxu3 %v12626_v45  ;;  %v12342_v45 = vor.u32 %v14589_v56, %v12341_v33  ;;  %v12438_v13 = vor.u32 %v14613_v37, %v12437_v29  ;;  %v12487_v56 = vld [vmem:[%s21238_s26 + $0x3f8] sm:$0xf0]  ;;  %v14569_v29 = vld [vmem:[%s21238_s26 + $0x234] sm:$0xf0] }
 0x5f5   : > { %6795 = vmatpush.bf16.msrb.mxu0 %v12518_v34  ;;  %6818 = vmatpush.bf16.msrb.mxu1 %v12646_v3  ;;  %v12293_v34 = vld [vmem:[%s21238_s26 + $0x268] sm:$0xf] }
 0x5f6   : > { %v12421_v3 = vld [vmem:[%s21238_s26 + $0x368] sm:$0xf]  ;;  %v12294_v47 = vor.u32 %v14577_v23, %v12293_v34  ;;  %v12262_v34 = vor.u32 %v14569_v29, %v12261_v44  ;;  %v14601_v23 = vld [vmem:[%s21238_s26 + $0x334] sm:$0xf0]  ;;  %v12295_v44 = vld [vmem:[%s21238_s26 + $0x278] sm:$0xf0] }
 0x5f7   : > { %v12422_v19 = vor.u32 %v14609_v57, %v12421_v3  ;;  %v14607_v29 = vld [vmem:[%s21238_s26 + $0x36c] sm:$0xf] }
 0x5f8   : > { %6567 = vmatmul.bf16.vlgmr.msrb.gmra.mxu2 %v19395_v25  ;;  %6590 = vmatmul.bf16.vlgmr.msrb.gmra.mxu3 %v19398_v36 }
 0x5f9   : > { %6743 = vmatpush.bf16.msrb.mxu2 %v12358_v8  ;;  %6796 = vmatpush.bf16.msrb.mxu0 %v12502_v63 }
 0x5fa   : > { %6766 = vmatpush.bf16.msrb.mxu3 %v12486_v55  ;;  %6819 = vmatpush.bf16.msrb.mxu1 %v12630_v41  ;;  %v14623_v55 = vld [vmem:[%s21238_s26 + $0x3ec] sm:$0xf] }
 0x5fb   : > { %6623 = vmatmul.bf16.gmra.mxu0 %v19822_v32  ;;  %6646 = vmatmul.bf16.gmra.mxu1 %v19824_v18  ;;  %v12490_v50 = vor.u32 %v14623_v55, %v12487_v56  ;;  %v14579_v56 = vld [vmem:[%s21238_s26 + $0x28c] sm:$0xf] }
 0x5fd   : > { %6744 = vmatpush.bf16.msrb.mxu2 %v12342_v45  ;;  %v14573_v45 = vld [vmem:[%s21238_s26 + $0x254] sm:$0xf0] }
 0x5fe   : > { %6767 = vmatpush.bf16.msrb.mxu3 %v12470_v31  ;;  %v12278_v31 = vor.u32 %v14573_v45, %v12277_v7 }
 0x601   : > { %6745 = vmatpush.bf16.msrb.mxu2 %v12326_v58 }
 0x602   : > { %6768 = vmatpush.bf16.msrb.mxu3 %v12454_v27  ;;  %v12343_v27 = vld [vmem:[%s21238_s26 + $0x2d8] sm:$0xf0] }
 0x603   : > { %v12346_v6 = vor.u32 %v14587_v49, %v12343_v27 }
 0x605   : > { %6746 = vmatpush.bf16.msrb.mxu2 %v12310_v39 }
 0x606   : > { %6769 = vmatpush.bf16.msrb.mxu3 %v12438_v13 }
 0x608   : > { %6572 = vmatmul.bf16.gmra.mxu2 %v19496_v60  ;;  %6595 = vmatmul.bf16.gmra.mxu3 %v19498_v4 }
 0x609   : > { %6747 = vmatpush.bf16.msrb.mxu2 %v12294_v47 }
 0x60a   : > { %6770 = vmatpush.bf16.msrb.mxu3 %v12422_v19  ;;  %v14583_v19 = vld [vmem:[%s21238_s26 + $0x2ac] sm:$0xf] }
 0x60b   : > { %6705 = vmatmul.bf16.vlgmr.msra.gmra.mxu0 %v19395_v25  ;;  %6728 = vmatmul.bf16.vlgmr.msra.gmra.mxu1 %v19398_v36 }
 0x60c   : > { %6904 = vmatpush.bf16.msra.mxu1 %v12490_v50  ;;  %v12311_v50 = vld [vmem:[%s21238_s26 + $0x298] sm:$0xf0] }
 0x60d   : > { %6748 = vmatpush.bf16.msrb.mxu2 %v12278_v31  ;;  %v14611_v31 = vld [vmem:[%s21238_s26 + $0x38c] sm:$0xf]  ;;  %v12314_v59 = vor.u32 %v14579_v56, %v12311_v50 }
 0x60e   : > { %6771 = vmatpush.bf16.msrb.mxu3 %v12406_v14  ;;  %v12442_v27 = vor.u32 %v14611_v31, %v12439_v26  ;;  %v14563_v56 = vld [vmem:[%s21238_s26 + $0x20c] sm:$0xf] }
 0x60f   : > { %v14595_v31 = vld [vmem:[%s21238_s26 + $0x30c] sm:$0xf] }
 0x610   : > { %v14527_v26 = vld [vmem:[%s21238_s26 + $0xec] sm:$0xf] }
 0x611   : > { %6749 = vmatpush.bf16.msrb.mxu2 %v12262_v34  ;;  %v14571_v34 = vld [vmem:[%s21238_s26 + $0x24c] sm:$0xf] }
 0x618   : > { %6577 = vmatmul.bf16.gmra.mxu2 %v19564_v9  ;;  %6600 = vmatmul.bf16.gmra.mxu3 %v19566_v43 }
 0x61b   : > { %v6430_v15 = vpop.f32.mrf.mxu2  ;;  %v6453_v17 = vpop.f32.mrf.mxu3  ;;  %6710 = vmatmul.bf16.gmra.mxu0 %v19496_v60  ;;  %6733 = vmatmul.bf16.gmra.mxu1 %v19498_v4 }
 0x61c   : > { %v6431_v38 = vadd.f32 %v6430_v15, %v20030_v35  ;;  %v14591_v15 = vld [vmem:[%s21238_s26 + $0x2ec] sm:$0xf] }
 0x61e   : > { %v20064_v16 = vadd.f32 %v6453_v17, %v6431_v38  ;;  %v12359_v17 = vld [vmem:[%s21238_s26 + $0x2f8] sm:$0xf0] }
 0x61f   : > { %v12362_v33 = vor.u32 %v14591_v15, %v12359_v17  ;;  %v12245_v15 = vld [vmem:[%s21238_s26 + $0x208] sm:$0xf]  ;;  %v14565_v17 = vld [vmem:[%s21238_s26 + $0x214] sm:$0xf0] }
 0x621   : > { %6881 = vmatpush.bf16.msra.mxu0 %v12362_v33  ;;  %v14597_v33 = vld [vmem:[%s21238_s26 + $0x314] sm:$0xf0] }
 0x623   : > { %v6432_v30 = vpop.f32.mrf.mxu2  ;;  %v6455_v12 = vpop.f32.mrf.mxu3 }
 0x624   : > { %v6433_v51 = vadd.f32 %v6432_v30, %v20030_v35  ;;  %v14619_v30 = vld [vmem:[%s21238_s26 + $0x3cc] sm:$0xf] }
 0x625   : > { %6882 = vmatpush.bf16.msra.mxu0 %v12346_v6  ;;  %v14575_v6 = vld [vmem:[%s21238_s26 + $0x26c] sm:$0xf] }
 0x626   : > { %v20103_v11 = vadd.f32 %v6455_v12, %v6433_v51  ;;  %v12471_v12 = vld [vmem:[%s21238_s26 + $0x3d8] sm:$0xf0]  ;;  %v12389_v51 = vld [vmem:[%s21238_s26 + $0x328] sm:$0xf] }
 0x627   : > { %v12474_v13 = vor.u32 %v14619_v30, %v12471_v12  ;;  %v12390_v3 = vor.u32 %v14601_v23, %v12389_v51  ;;  %v12298_v51 = vor.u32 %v14575_v6, %v12295_v44  ;;  %v12279_v23 = vld [vmem:[%s21238_s26 + $0x258] sm:$0xf0] }
 0x628   : > { %v20105_v28 = vpop.f32.mrf.mxu0  ;;  %v20107_v5 = vpop.f32.mrf.mxu1  ;;  %6659 = vmatmul.bf16.vlgmr.msra.gmra.mxu2 %v19519_v61  ;;  %6682 = vmatmul.bf16.vlgmr.msra.gmra.mxu3 %v19524_v52  ;;  %v12231_v6 = vld [vmem:[%s21238_s26 + $0x1f8] sm:$0xf0] }
 0x629   : > { %6905 = vmatpush.bf16.msra.mxu1 %v12474_v13  ;;  %6772 = vmatpush.bf16.msrb.mxu3 %v12390_v3  ;;  %v12423_v13 = vld [vmem:[%s21238_s26 + $0x378] sm:$0xf0] }
 0x62a   : > { %v12426_v3 = vor.u32 %v14607_v29, %v12423_v13 }
 0x62b   : > { %v6435_v63 = vpop.f32.mrf.mxu2  ;;  %v6458_v46 = vpop.f32.mrf.mxu3  ;;  %6715 = vmatmul.bf16.gmra.mxu0 %v19564_v9  ;;  %6738 = vmatmul.bf16.gmra.mxu1 %v19566_v43 }
 0x62c   : > { %v6436_v40 = vadd.f32 %v6435_v63, %v20030_v35  ;;  %v12327_v63 = vld [vmem:[%s21238_s26 + $0x2b8] sm:$0xf0] }
 0x62e   : > { %v20126_v42 = vadd.f32 %v6458_v46, %v6436_v40  ;;  %v14615_v46 = vld [vmem:[%s21238_s26 + $0x3ac] sm:$0xf] }
 0x630   : > { %v20128_v41 = vpop.f32.mrf.mxu0  ;;  %v20130_v8 = vpop.f32.mrf.mxu1 }
 0x633   : > { %v6437_v0 = vpop.f32.mrf.mxu2  ;;  %v6460_v48 = vpop.f32.mrf.mxu3 }
 0x634   : > { %v6438_v38 = vadd.f32 %v6437_v0, %v20030_v35  ;;  %v12330_v0 = vor.u32 %v14583_v19, %v12327_v63  ;;  %v12407_v19 = vld [vmem:[%s21238_s26 + $0x358] sm:$0xf0] }
 0x636   : > { %v20160_v58 = vadd.f32 %v6460_v48, %v6438_v38  ;;  %v12455_v48 = vld [vmem:[%s21238_s26 + $0x3b8] sm:$0xf0]  ;;  %v12246_v38 = vor.u32 %v14565_v17, %v12245_v15  ;;  %6883 = vmatpush.bf16.msra.mxu0 %v12330_v0  ;;  %v14567_v15 = vld [vmem:[%s21238_s26 + $0x22c] sm:$0xf] }
 0x637   : > { %v12458_v55 = vor.u32 %v14615_v46, %v12455_v48  ;;  %v12263_v17 = vld [vmem:[%s21238_s26 + $0x238] sm:$0xf0] }
 0x638   : > { %v20180_v37 = vpop.f32.mrf.mxu0  ;;  %v20182_v39 = vpop.f32.mrf.mxu1  ;;  %6664 = vmatmul.bf16.gmra.mxu2 %v19595_v53  ;;  %6687 = vmatmul.bf16.gmra.mxu3 %v19601_v62 }
 0x639   : > { %6906 = vmatpush.bf16.msra.mxu1 %v12458_v55  ;;  %6750 = vmatpush.bf16.msrb.mxu2 %v12246_v38  ;;  %v14599_v55 = vld [vmem:[%s21238_s26 + $0x32c] sm:$0xf] }
 0x63a   : > { %6884 = vmatpush.bf16.msra.mxu0 %v12314_v59 }
 0x63b   : > { %v6440_v47 = vpop.f32.mrf.mxu2  ;;  %v6463_v57 = vpop.f32.mrf.mxu3  ;;  %6797 = vmatmul.bf16.vlgmr.msrb.gmra.mxu0 %v19519_v61  ;;  %6820 = vmatmul.bf16.vlgmr.msrb.gmra.mxu1 %v19524_v52 }
 0x63c   : > { %v6441_v40 = vadd.f32 %v6440_v47, %v20030_v35  ;;  %v12373_v35 = vld [vmem:[%s21238_s26 + $0x308] sm:$0xf]  ;;  %v12282_v47 = vor.u32 %v14571_v34, %v12279_v23 }
 0x63d   : > { %v12374_v45 = vor.u32 %v14597_v33, %v12373_v35  ;;  %6907 = vmatpush.bf16.msra.mxu1 %v12442_v27  ;;  %v12266_v35 = vor.u32 %v14567_v15, %v12263_v17  ;;  %v12391_v33 = vld [vmem:[%s21238_s26 + $0x338] sm:$0xf0] }
 0x63e   : > { %v20219_v7 = vadd.f32 %v6463_v57, %v6441_v40  ;;  %6885 = vmatpush.bf16.msra.mxu0 %v12298_v51  ;;  %v14603_v57 = vld [vmem:[%s21238_s26 + $0x34c] sm:$0xf]  ;;  %v12394_v50 = vor.u32 %v14599_v55, %v12391_v33  ;;  %v12071_v55 = vld [vmem:[%s21238_s26 + $0xb8] sm:$0xf0] }
 0x63f   : > { %6773 = vmatpush.bf16.msrb.mxu3 %v12374_v45  ;;  %v12410_v40 = vor.u32 %v14603_v57, %v12407_v19  ;;  %v12247_v45 = vld [vmem:[%s21238_s26 + $0x218] sm:$0xf0] }
 0x640   : > { %v20230_v49 = vpop.f32.mrf.mxu0  ;;  %v20232_v14 = vpop.f32.mrf.mxu1  ;;  %v12250_v27 = vor.u32 %v14563_v56, %v12247_v45 }
 0x641   : > { %6908 = vmatpush.bf16.msra.mxu1 %v12426_v3 }
 0x642   : > { %6886 = vmatpush.bf16.msra.mxu0 %v12282_v47 }
 0x643   : > { %v6442_v30 = vpop.f32.mrf.mxu2  ;;  %v6465_v12 = vpop.f32.mrf.mxu3 }
 0x644   : > { %v12103_v30 = vld [vmem:[%s21238_s26 + $0xf8] sm:$0xf0]  ;;  %v14559_v12 = vld [vmem:[%s21238_s26 + $0x1ec] sm:$0xf] }
 0x645   : > { %6909 = vmatpush.bf16.msra.mxu1 %v12410_v40  ;;  %v12106_v44 = vor.u32 %v14527_v26, %v12103_v30  ;;  %v12234_v29 = vor.u32 %v14559_v12, %v12231_v6  ;;  %v14523_v40 = vld [vmem:[%s21238_s26 + $0xcc] sm:$0xf]  ;;  %v12055_v26 = vld [vmem:[%s21238_s26 + $0x98] sm:$0xf0] }
 0x646   : > { %6887 = vmatpush.bf16.msra.mxu0 %v12266_v35  ;;  %v12199_v35 = vld [vmem:[%s21238_s26 + $0x1b8] sm:$0xf0] }
 0x647   : > { %6835 = vmatpush.bf16.msra.mxu2 %v12106_v44  ;;  %6858 = vmatpush.bf16.msra.mxu3 %v12234_v29  ;;  %v14511_v29 = vld [vmem:[%s21238_s26 + $0x6c] sm:$0xf] }
 0x648   : > { %v20258_v63 = vpop.f32.mrf.mxu0  ;;  %v20260_v46 = vpop.f32.mrf.mxu1  ;;  %6669 = vmatmul.bf16.gmra.mxu2 %v19568_v21  ;;  %6692 = vmatmul.bf16.gmra.mxu3 %v19570_v1 }
 0x649   : > { %6910 = vmatpush.bf16.msra.mxu1 %v12394_v50 }
 0x64a   : > { %6888 = vmatpush.bf16.msra.mxu0 %v12250_v27  ;;  %v12183_v27 = vld [vmem:[%s21238_s26 + $0x198] sm:$0xf0] }
 0x64b   : > { %v6476_v0 = vpop.f32.mrf.mxu2  ;;  %v6499_v48 = vpop.f32.mrf.mxu3  ;;  %6802 = vmatmul.bf16.gmra.mxu0 %v19595_v53  ;;  %6825 = vmatmul.bf16.gmra.mxu1 %v19601_v62 }
 0x64c   : > { %v6477_v38 = vadd.f32 %v6476_v0, %v20064_v16  ;;  %v12375_v16 = vld [vmem:[%s21238_s26 + $0x318] sm:$0xf0] }
 0x64d   : > { %v12378_v23 = vor.u32 %v14595_v31, %v12375_v16  ;;  %v14515_v16 = vld [vmem:[%s21238_s26 + $0x8c] sm:$0xf] }
 0x64e   : > { %v6500_v59 = vadd.f32 %v6499_v48, %v6477_v38  ;;  %v12215_v48 = vld [vmem:[%s21238_s26 + $0x1d8] sm:$0xf0]  ;;  %v14551_v38 = vld [vmem:[%s21238_s26 + $0x1ac] sm:$0xf]  ;;  %v12058_v44 = vor.u32 %v14515_v16, %v12055_v26 }
 0x64f   : > { %6911 = vmatpush.bf16.msra.mxu1 %v12378_v23  ;;  %v12202_v31 = vor.u32 %v14551_v38, %v12199_v35  ;;  %v14503_v38 = vld [vmem:[%s21238_s26 + $0x2c] sm:$0xf] }
 0x650   : > { %v6523_v51 = vadd.f32 %v20105_v28, %v6500_v59  ;;  %v6534_v13 = vpop.f32.mrf.mxu0  ;;  %v6557_v34 = vpop.f32.mrf.mxu1  ;;  %v12087_v28 = vld [vmem:[%s21238_s26 + $0xd8] sm:$0xf0]  ;;  %v14547_v59 = vld [vmem:[%s21238_s26 + $0x18c] sm:$0xf] }
 0x651   : > { %v12090_v0 = vor.u32 %v14523_v40, %v12087_v28  ;;  %v14543_v34 = vld [vmem:[%s21238_s26 + $0x16c] sm:$0xf] }
 0x652   : > { %v20305_v3 = vadd.f32 %v20107_v5, %v6523_v51  ;;  %v14555_v5 = vld [vmem:[%s21238_s26 + $0x1cc] sm:$0xf]  ;;  %v12039_v51 = vld [vmem:[%s21238_s26 + $0x78] sm:$0xf0] }
 0x653   : > { %v6478_v47 = vpop.f32.mrf.mxu2  ;;  %v6501_v57 = vpop.f32.mrf.mxu3  ;;  %v12218_v17 = vor.u32 %v14555_v5, %v12215_v48  ;;  %6836 = vmatpush.bf16.msra.mxu2 %v12090_v0  ;;  %v14507_v28 = vld [vmem:[%s21238_s26 + $0x4c] sm:$0xf]  ;;  %v12023_v5 = vld [vmem:[%s21238_s26 + $0x58] sm:$0xf0] }
 0x654   : > { %v6479_v19 = vadd.f32 %v6478_v47, %v20103_v11  ;;  %v14519_v11 = vld [vmem:[%s21238_s26 + $0xac] sm:$0xf]  ;;  %v12151_v48 = vld [vmem:[%s21238_s26 + $0x158] sm:$0xf0] }
 0x655   : > { %v12074_v50 = vor.u32 %v14519_v11, %v12071_v55  ;;  %6859 = vmatpush.bf16.msra.mxu3 %v12218_v17 }
 0x656   : > { %v6502_v15 = vadd.f32 %v6501_v57, %v6479_v19  ;;  %v12042_v19 = vor.u32 %v14511_v29, %v12039_v51 }
 0x657   : > { %6837 = vmatpush.bf16.msra.mxu2 %v12074_v50  ;;  %v14535_v50 = vld [vmem:[%s21238_s26 + $0x12c] sm:$0xf] }
 0x658   : > { %v6525_v33 = vadd.f32 %v20128_v41, %v6502_v15  ;;  %v20333_v56 = vpop.f32.mrf.mxu0  ;;  %v20335_v45 = vpop.f32.mrf.mxu1  ;;  %6751 = vmatmul.bf16.vlgmr.msrb.gmra.mxu2 %v19662_v20  ;;  %6774 = vmatmul.bf16.vlgmr.msrb.gmra.mxu3 %v19666_v2 }
 0x659   : > { %6860 = vmatpush.bf16.msra.mxu3 %v12202_v31 }
 0x65a   : > { %v20346_v41 = vadd.f32 %v20130_v8, %v6525_v33  ;;  %v12186_v8 = vor.u32 %v14547_v59, %v12183_v27  ;;  %v12007_v33 = vld [vmem:[%s21238_s26 + $0x38] sm:$0xf0] }
 0x65b   : > { %v6481_v30 = vpop.f32.mrf.mxu2  ;;  %v6504_v12 = vpop.f32.mrf.mxu3  ;;  %6807 = vmatmul.bf16.gmra.mxu0 %v19568_v21  ;;  %6830 = vmatmul.bf16.gmra.mxu1 %v19570_v1  ;;  %v12010_v59 = vor.u32 %v14503_v38, %v12007_v33  ;;  %v14651_v33 = vld [vmem:[%s21238_s26 + $0x4cc] sm:$0xf] }
 0x65c   : > { %v6482_v6 = vadd.f32 %v6481_v30, %v20126_v42  ;;  %v12167_v42 = vld [vmem:[%s21238_s26 + $0x178] sm:$0xf0]  ;;  %6838 = vmatpush.bf16.msra.mxu2 %v12058_v44  ;;  %v14499_v30 = vld [vmem:[%s21238_s26 + $0xc] sm:$0xf] }
 0x65d   : > { %6861 = vmatpush.bf16.msra.mxu3 %v12186_v8  ;;  %v12170_v40 = vor.u32 %v14543_v34, %v12167_v42  ;;  %v12119_v44 = vld [vmem:[%s21238_s26 + $0x118] sm:$0xf0] }
 0x65e   : > { %v6505_v13 = vadd.f32 %v6504_v12, %v6482_v6  ;;  %v14531_v6 = vld [vmem:[%s21238_s26 + $0x10c] sm:$0xf] }
 0x660   : > { %v6528_v23 = vadd.f32 %v20180_v37, %v6505_v13  ;;  %v20370_v47 = vpop.f32.mrf.mxu0  ;;  %v20372_v57 = vpop.f32.mrf.mxu1  ;;  %v14539_v37 = vld [vmem:[%s21238_s26 + $0x14c] sm:$0xf]  ;;  %6839 = vmatpush.bf16.msra.mxu2 %v12042_v19  ;;  %v12122_v13 = vor.u32 %v14531_v6, %v12119_v44  ;;  %v12583_v44 = vld [vmem:[%s21238_s26 + $0x4b8] sm:$0xf0] }
 0x661   : > { %6862 = vmatpush.bf16.msra.mxu3 %v12170_v40  ;;  %v12154_v55 = vor.u32 %v14539_v37, %v12151_v48  ;;  %v12615_v48 = vld [vmem:[%s21238_s26 + $0x4f8] sm:$0xf0]  ;;  %v14647_v6 = vld [vmem:[%s21238_s26 + $0x4ac] sm:$0xf] }
 0x662   : > { %v20378_v0 = vadd.f32 %v20182_v39, %v6528_v23  ;;  %v12026_v39 = vor.u32 %v14507_v28, %v12023_v5 }
 0x663   : > { %v6483_v11 = vpop.f32.mrf.mxu2  ;;  %v6506_v15 = vpop.f32.mrf.mxu3 }
 0x664   : > { %v6484_v17 = vadd.f32 %v6483_v11, %v20160_v58  ;;  %v12135_v58 = vld [vmem:[%s21238_s26 + $0x138] sm:$0xf0]  ;;  %6840 = vmatpush.bf16.msra.mxu2 %v12026_v39  ;;  %v14687_v11 = vld [vmem:[%s21238_s26 + $0x5ec] sm:$0xf] }
 0x665   : > { %6863 = vmatpush.bf16.msra.mxu3 %v12154_v55  ;;  %v12138_v27 = vor.u32 %v14535_v50, %v12135_v58  ;;  %v12599_v50 = vld [vmem:[%s21238_s26 + $0x4d8] sm:$0xf0]  ;;  %v14683_v58 = vld [vmem:[%s21238_s26 + $0x5cc] sm:$0xf] }
 0x666   : > { %v6507_v35 = vadd.f32 %v6506_v15, %v6484_v17 }
 0x668   : > { %v6530_v31 = vadd.f32 %v20230_v49, %v6507_v35  ;;  %v20403_v16 = vpop.f32.mrf.mxu0  ;;  %v20405_v26 = vpop.f32.mrf.mxu1  ;;  %6756 = vmatmul.bf16.gmra.mxu2 %v19763_v54  ;;  %6779 = vmatmul.bf16.gmra.mxu3 %v19766_v22  ;;  %v11991_v49 = vld [vmem:[%s21238_s26 + $0x18] sm:$0xf0] }
 0x669   : > { %6841 = vmatpush.bf16.msra.mxu2 %v12010_v59  ;;  %6864 = vmatpush.bf16.msra.mxu3 %v12138_v27  ;;  %v11994_v51 = vor.u32 %v14499_v30, %v11991_v49  ;;  %v12727_v59 = vld [vmem:[%s21238_s26 + $0x5d8] sm:$0xf0] }
 0x66a   : > { %v20413_v12 = vadd.f32 %v20232_v14, %v6530_v31  ;;  %v12602_v31 = vor.u32 %v14651_v33, %v12599_v50 }
 0x66b   : > { %v6486_v8 = vpop.f32.mrf.mxu2  ;;  %v6509_v29 = vpop.f32.mrf.mxu3  ;;  %6889 = vmatmul.bf16.vlgmr.msra.gmra.mxu0 %v19662_v20  ;;  %6912 = vmatmul.bf16.vlgmr.msra.gmra.mxu1 %v19666_v2 }
 0x66c   : > { %v6487_v14 = vadd.f32 %v6486_v8, %v20219_v7  ;;  %v14679_v8 = vld [vmem:[%s21238_s26 + $0x5ac] sm:$0xf] }
 0x66d   : > { %6842 = vmatpush.bf16.msra.mxu2 %v11994_v51  ;;  %6865 = vmatpush.bf16.msra.mxu3 %v12122_v13  ;;  %v20489_v51 = vperm.slane %v20018_v24, 2 }
 0x66e   : > { %v6510_v34 = vadd.f32 %v6509_v29, %v6487_v14  ;;  %v12711_v14 = vld [vmem:[%s21238_s26 + $0x5b8] sm:$0xf0] }
 0x66f   : > { %v12714_v13 = vor.u32 %v14679_v8, %v12711_v14  ;;  %v12647_v8 = vld [vmem:[%s21238_s26 + $0x538] sm:$0xf0] }
 0x670   : > { %v6533_v42 = vadd.f32 %v20258_v63, %v6510_v34  ;;  %v20428_v23 = vpop.f32.mrf.mxu0  ;;  %v20430_v19 = vpop.f32.mrf.mxu1  ;;  %v20442_v63 = vperm.slane %v20018_v24, 1  ;;  %v14643_v34 = vld [vmem:[%s21238_s26 + $0x48c] sm:$0xf]  ;;  %v12695_v24 = vld [vmem:[%s21238_s26 + $0x598] sm:$0xf0] }
 0x672   : > { %v20433_v40 = vadd.f32 %v20260_v46, %v6533_v42  ;;  %v14655_v46 = vld [vmem:[%s21238_s26 + $0x4ec] sm:$0xf]  ;;  %v12567_v42 = vld [vmem:[%s21238_s26 + $0x498] sm:$0xf0] }
 0x673   : > { %v6488_v20 = vpop.f32.mrf.mxu2  ;;  %v6511_v2 = vpop.f32.mrf.mxu3  ;;  %v12618_v17 = vor.u32 %v14655_v46, %v12615_v48  ;;  %v12570_v46 = vor.u32 %v14643_v34, %v12567_v42 }
 0x674   : > { %v14675_v2 = vld [vmem:[%s21238_s26 + $0x58c] sm:$0xf] }
 0x675   : > { %6927 = vmatpush.bf16.msrb.mxu2 %v12618_v17 }
 0x678   : > { %v20435_v28 = vpop.f32.mrf.mxu0  ;;  %v20437_v7 = vpop.f32.mrf.mxu1  ;;  %6761 = vmatmul.bf16.gmra.mxu2 %v19822_v32  ;;  %6784 = vmatmul.bf16.gmra.mxu3 %v19824_v18 }
 0x679   : > { %6928 = vmatpush.bf16.msrb.mxu2 %v12602_v31  ;;  %v12535_v31 = vld [vmem:[%s21238_s26 + $0x458] sm:$0xf0] }
 0x67b   : > { %v6568_v5 = vpop.f32.mrf.mxu2  ;;  %v6591_v37 = vpop.f32.mrf.mxu3  ;;  %6894 = vmatmul.bf16.gmra.mxu0 %v19763_v54  ;;  %6917 = vmatmul.bf16.gmra.mxu1 %v19766_v22  ;;  %v12743_v54 = vld [vmem:[%s21238_s26 + $0x5f8] sm:$0xf0] }
 0x67c   : > { %v6569_v15 = vadd.f32 %v6568_v5, %v20442_v63  ;;  %v12746_v22 = vor.u32 %v14687_v11, %v12743_v54  ;;  %v12698_v11 = vor.u32 %v14675_v2, %v12695_v24 }
 0x67e   : > { %v6592_v39 = vadd.f32 %v6591_v37, %v6569_v15  ;;  %6950 = vmatpush.bf16.msrb.mxu3 %v12746_v22  ;;  %v14639_v22 = vld [vmem:[%s21238_s26 + $0x46c] sm:$0xf] }
 0x680   : > { %v6615_v55 = vadd.f32 %v20333_v56, %v6592_v39  ;;  %v6626_v38 = vpop.f32.mrf.mxu0  ;;  %v6649_v35 = vpop.f32.mrf.mxu1  ;;  %v12730_v56 = vor.u32 %v14683_v58, %v12727_v59  ;;  %v14635_v58 = vld [vmem:[%s21238_s26 + $0x44c] sm:$0xf] }
 0x681   : > { %v14667_v59 = vld [vmem:[%s21238_s26 + $0x54c] sm:$0xf] }
 0x682   : > { %v20473_v27 = vadd.f32 %v20335_v45, %v6615_v55  ;;  %6951 = vmatpush.bf16.msrb.mxu3 %v12730_v56  ;;  %v12586_v45 = vor.u32 %v14647_v6, %v12583_v44  ;;  %v12538_v56 = vor.u32 %v14635_v58, %v12535_v31  ;;  %v12519_v6 = vld [vmem:[%s21238_s26 + $0x438] sm:$0xf0]  ;;  %v14663_v44 = vld [vmem:[%s21238_s26 + $0x52c] sm:$0xf] }
 0x683   : > { %v6570_v30 = vpop.f32.mrf.mxu2  ;;  %v6593_v49 = vpop.f32.mrf.mxu3  ;;  %v12650_v42 = vor.u32 %v14663_v44, %v12647_v8 }
 0x684   : > { %v6571_v29 = vadd.f32 %v6570_v30, %v20442_v63  ;;  %6929 = vmatpush.bf16.msrb.mxu2 %v12586_v45  ;;  %v14631_v30 = vld [vmem:[%s21238_s26 + $0x42c] sm:$0xf] }
 0x685   : > { %v12522_v34 = vor.u32 %v14631_v30, %v12519_v6 }
 0x686   : > { %v20497_v20 = vadd.f32 %v6593_v49, %v6571_v29  ;;  %6952 = vmatpush.bf16.msrb.mxu3 %v12714_v13 }
 0x688   : > { %v6706_v5 = vpop.f32.mrf.mxu0  ;;  %v6729_v37 = vpop.f32.mrf.mxu1  ;;  %6843 = vmatmul.bf16.vlgmr.msra.gmra.mxu2 %v19395_v25  ;;  %6866 = vmatmul.bf16.vlgmr.msra.gmra.mxu3 %v19398_v36  ;;  %v12551_v25 = vld [vmem:[%s21238_s26 + $0x478] sm:$0xf0]  ;;  %v14671_v36 = vld [vmem:[%s21238_s26 + $0x56c] sm:$0xf] }
 0x689   : > { %v6707_v48 = vadd.f32 %v6706_v5, %v20489_v51  ;;  %6930 = vmatpush.bf16.msrb.mxu2 %v12570_v46  ;;  %v12554_v55 = vor.u32 %v14639_v22, %v12551_v25  ;;  %v14659_v46 = vld [vmem:[%s21238_s26 + $0x50c] sm:$0xf] }
 0x68a   : > { %6953 = vmatpush.bf16.msrb.mxu3 %v12698_v11 }
 0x68b   : > { %v20508_v15 = vadd.f32 %v6729_v37, %v6707_v48  ;;  %v6573_v17 = vpop.f32.mrf.mxu2  ;;  %v6596_v54 = vpop.f32.mrf.mxu3  ;;  %6899 = vmatmul.bf16.gmra.mxu0 %v19822_v32  ;;  %6922 = vmatmul.bf16.gmra.mxu1 %v19824_v18  ;;  %v12679_v32 = vld [vmem:[%s21238_s26 + $0x578] sm:$0xf0] }
 0x68c   : > { %v6574_v39 = vadd.f32 %v6573_v17, %v20442_v63  ;;  %v12682_v18 = vor.u32 %v14671_v36, %v12679_v32  ;;  %v12503_v37 = vld [vmem:[%s21238_s26 + $0x418] sm:$0xf0] }
 0x68d   : > { %6931 = vmatpush.bf16.msrb.mxu2 %v12554_v55 }
 0x68e   : > { %v6597_v38 = vadd.f32 %v6596_v54, %v6574_v39  ;;  %6954 = vmatpush.bf16.msrb.mxu3 %v12682_v18 }
 0x690   : > { %v6620_v35 = vadd.f32 %v20403_v16, %v6597_v38  ;;  %v20526_v33 = vpop.f32.mrf.mxu0  ;;  %v20528_v50 = vpop.f32.mrf.mxu1  ;;  %v12663_v16 = vld [vmem:[%s21238_s26 + $0x558] sm:$0xf0] }
 0x691   : > { %v12666_v49 = vor.u32 %v14667_v59, %v12663_v16  ;;  %6932 = vmatpush.bf16.msrb.mxu2 %v12538_v56 }
 0x692   : > { %v6643_v29 = vadd.f32 %v20405_v26, %v6620_v35  ;;  %v14627_v26 = vld [vmem:[%s21238_s26 + $0x40c] sm:$0xf] }
 0x693   : > { %v6575_v45 = vpop.f32.mrf.mxu2  ;;  %v6598_v14 = vpop.f32.mrf.mxu3  ;;  %6955 = vmatpush.bf16.msrb.mxu3 %v12666_v49  ;;  %v12506_v11 = vor.u32 %v14627_v26, %v12503_v37 }
 0x694   : > { %v6576_v13 = vadd.f32 %v6575_v45, %v20442_v63 }
 0x695   : > { %6933 = vmatpush.bf16.msrb.mxu2 %v12522_v34 }
 0x696   : > { %v20556_v2 = vadd.f32 %v6598_v14, %v6576_v13 }
 0x697   : > { %6956 = vmatpush.bf16.msrb.mxu3 %v12650_v42 }
 0x698   : > { %v6711_v24 = vpop.f32.mrf.mxu0  ;;  %v6734_v5 = vpop.f32.mrf.mxu1  ;;  %6848 = vmatmul.bf16.gmra.mxu2 %v19496_v60  ;;  %6871 = vmatmul.bf16.gmra.mxu3 %v19498_v4  ;;  %v12631_v60 = vld [vmem:[%s21238_s26 + $0x518] sm:$0xf0] }
 0x699   : > { %v6712_v48 = vadd.f32 %v6711_v24, %v20489_v51  ;;  %v12634_v4 = vor.u32 %v14659_v46, %v12631_v60  ;;  %6934 = vmatpush.bf16.msrb.mxu2 %v12506_v11 }
 0x69b   : > { %v20573_v17 = vadd.f32 %v6734_v5, %v6712_v48  ;;  %v6578_v54 = vpop.f32.mrf.mxu2  ;;  %v6601_v22 = vpop.f32.mrf.mxu3  ;;  %6957 = vmatpush.bf16.msrb.mxu3 %v12634_v4 }
 0x69c   : > { %v6579_v25 = vadd.f32 %v6578_v54, %v20442_v63 }
 0x69e   : > { %v6602_v36 = vadd.f32 %v6601_v22, %v6579_v25 }
 0x6a0   : > { %v6625_v39 = vadd.f32 %v20435_v28, %v6602_v36  ;;  %v20577_v55 = vpop.f32.mrf.mxu0  ;;  %v20579_v32 = vpop.f32.mrf.mxu1 }
 0x6a2   : > { %v6648_v18 = vadd.f32 %v20437_v7, %v6625_v39 }
 0x6a3   : > { %v6580_v38 = vpop.f32.mrf.mxu2  ;;  %v6603_v35 = vpop.f32.mrf.mxu3 }
 0x6a8   : > { %v6716_v58 = vpop.f32.mrf.mxu0  ;;  %v6739_v31 = vpop.f32.mrf.mxu1  ;;  %6853 = vmatmul.bf16.gmra.mxu2 %v19564_v9  ;;  %6876 = vmatmul.bf16.gmra.mxu3 %v19566_v43 }
 0x6a9   : > { %v6717_v63 = vadd.f32 %v6716_v58, %v20489_v51 }
 0x6ab   : > { %v20585_v59 = vadd.f32 %v6739_v31, %v6717_v63  ;;  %v6660_v56 = vpop.f32.mrf.mxu2  ;;  %v6683_v28 = vpop.f32.mrf.mxu3 }
 0x6ac   : > { %v6661_v16 = vadd.f32 %v6660_v56, %v20473_v27 }
 0x6ae   : > { %v20588_v30 = vadd.f32 %v6683_v28, %v6661_v16 }
 0x6b0   : > { %v6718_v49 = vpop.f32.mrf.mxu0  ;;  %v6741_v7 = vpop.f32.mrf.mxu1 }
 0x6b3   : > { %v20590_v6 = vpop.f32.mrf.mxu2  ;;  %v20592_v44 = vpop.f32.mrf.mxu3 }
 0x6b8   : > { %v6798_v8 = vpop.f32.mrf.mxu0  ;;  %v6821_v9 = vpop.f32.mrf.mxu1  ;;  %6935 = vmatmul.bf16.vlgmr.msrb.gmra.mxu2 %v19519_v61  ;;  %6958 = vmatmul.bf16.vlgmr.msrb.gmra.mxu3 %v19524_v52 }
 0x6bb   : > { %v6665_v43 = vpop.f32.mrf.mxu2  ;;  %v6688_v45 = vpop.f32.mrf.mxu3 }
 0x6bc   : > { %v6666_v14 = vadd.f32 %v6665_v43, %v6643_v29 }
 0x6be   : > { %v20596_v13 = vadd.f32 %v6688_v45, %v6666_v14  ;;  %v6977_v45 = vmax.f32 %v20346_v41, 0.0 }
 0x6c0   : > { %v6800_v27 = vpop.f32.mrf.mxu0  ;;  %v6823_v34 = vpop.f32.mrf.mxu1 }
 0x6c3   : > { %v20598_v42 = vpop.f32.mrf.mxu2  ;;  %v20600_v24 = vpop.f32.mrf.mxu3 }
 0x6c8   : > { %v6803_v5 = vpop.f32.mrf.mxu0  ;;  %v6826_v26 = vpop.f32.mrf.mxu1  ;;  %6940 = vmatmul.bf16.gmra.mxu2 %v19595_v53  ;;  %6963 = vmatmul.bf16.gmra.mxu3 %v19601_v62  ;;  %v6709_v62 = vadd.f32 %v20526_v33, %v20489_v51 }
 0x6ca   : > { %v6732_v35 = vadd.f32 %v20528_v50, %v6709_v62 }
 0x6cb   : > { %v6670_v61 = vpop.f32.mrf.mxu2  ;;  %v6693_v37 = vpop.f32.mrf.mxu3 }
 0x6cc   : > { %v6671_v52 = vadd.f32 %v6670_v61, %v6648_v18 }
 0x6ce   : > { %v20604_v46 = vadd.f32 %v6693_v37, %v6671_v52 }
 0x6d0   : > { %v6805_v29 = vpop.f32.mrf.mxu0  ;;  %v6828_v48 = vpop.f32.mrf.mxu1 }
 0x6d3   : > { %v6672_v11 = vpop.f32.mrf.mxu2  ;;  %v6695_v60 = vpop.f32.mrf.mxu3 }
 0x6d8   : > { %v6808_v4 = vpop.f32.mrf.mxu0  ;;  %v6831_v54 = vpop.f32.mrf.mxu1  ;;  %6945 = vmatmul.bf16.gmra.mxu2 %v19568_v21  ;;  %6968 = vmatmul.bf16.gmra.mxu3 %v19570_v1  ;;  %v6973_v21 = vmax.f32 %v20305_v3, 0.0 }
 0x6db   : > { %v6752_v22 = vpop.f32.mrf.mxu2  ;;  %v6775_v25 = vpop.f32.mrf.mxu3 }
 0x6dc   : > { %v6753_v53 = vadd.f32 %v6752_v22, %v20508_v15 }
 0x6de   : > { %v6776_v36 = vadd.f32 %v6775_v25, %v6753_v53  ;;  %v6981_v25 = vmax.f32 %v20378_v0, 0.0 }
 0x6e0   : > { %v6799_v39 = vadd.f32 %v6798_v8, %v6776_v36  ;;  %v6810_v18 = vpop.f32.mrf.mxu0  ;;  %v6833_v38 = vpop.f32.mrf.mxu1 }
 0x6e2   : > { %v6822_v58 = vadd.f32 %v6821_v9, %v6799_v39  ;;  %v6714_v9 = vadd.f32 %v20577_v55, %v20489_v51 }
 0x6e3   : > { %v6754_v31 = vpop.f32.mrf.mxu2  ;;  %v6777_v63 = vpop.f32.mrf.mxu3 }
 0x6e4   : > { %v6975_v56 = vmax.f32 %v6822_v58, 0.0  ;;  %v6755_v1 = vadd.f32 %v6754_v31, %v6732_v35  ;;  %v6985_v35 = vmax.f32 %v20413_v12, 0.0 }
 0x6e6   : > { %v6778_v28 = vadd.f32 %v6777_v63, %v6755_v1  ;;  %v20613_v16 = vmax.f32 %v6973_v21, %v6975_v56 }
 0x6e8   : > { %v6801_v15 = vadd.f32 %v6800_v27, %v6778_v28  ;;  %v6890_v49 = vpop.f32.mrf.mxu0  ;;  %v6913_v7 = vpop.f32.mrf.mxu1 }
 0x6ea   : > { %v6824_v33 = vadd.f32 %v6823_v34, %v6801_v15  ;;  %v6737_v34 = vadd.f32 %v20579_v32, %v6714_v9 }
 0x6eb   : > { %v6757_v43 = vpop.f32.mrf.mxu2  ;;  %v6780_v8 = vpop.f32.mrf.mxu3 }
 0x6ec   : > { %v6979_v14 = vmax.f32 %v6824_v33, 0.0  ;;  %v6758_v50 = vadd.f32 %v6757_v43, %v20573_v17  ;;  %v15193_v43 = vld [vmem:[#allocation13] sm:$0xf] }
 0x6ee   : > { %v6781_v3 = vadd.f32 %v6780_v8, %v6758_v50  ;;  %v6995_v61 = vmax.f32 %v6977_v45, %v6979_v14 }
 0x6f0   : > { %v6804_v37 = vadd.f32 %v6803_v5, %v6781_v3  ;;  %v20619_v52 = vpop.f32.mrf.mxu0  ;;  %v20621_v11 = vpop.f32.mrf.mxu1  ;;  %v7003_v27 = vpack.c.bf16 %v6995_v61, %v20613_v16 }
 0x6f2   : > { %v6827_v60 = vadd.f32 %v6826_v26, %v6804_v37 }
 0x6f3   : > { %v6759_v22 = vpop.f32.mrf.mxu2  ;;  %v6782_v41 = vpop.f32.mrf.mxu3 }
 0x6f4   : > { %v6983_v17 = vmax.f32 %v6827_v60, 0.0  ;;  %v6760_v53 = vadd.f32 %v6759_v22, %v6737_v34 }
 0x6f6   : > { %v6783_v62 = vadd.f32 %v6782_v41, %v6760_v53  ;;  %v6997_v51 = vmax.f32 %v6981_v25, %v6983_v17 }
 0x6f8   : > { %v6806_v55 = vadd.f32 %v6805_v29, %v6783_v62  ;;  %v6895_v36 = vpop.f32.mrf.mxu0  ;;  %v6918_v5 = vpop.f32.mrf.mxu1 }
 0x6fa   : > { %v6829_v39 = vadd.f32 %v6828_v48, %v6806_v55  ;;  %v6989_v48 = vmax.f32 %v20433_v40, 0.0 }
 0x6fb   : > { %v6762_v18 = vpop.f32.mrf.mxu2  ;;  %v6785_v38 = vpop.f32.mrf.mxu3 }
 0x6fc   : > { %v6987_v58 = vmax.f32 %v6829_v39, 0.0  ;;  %v6763_v32 = vadd.f32 %v6762_v18, %v20585_v59  ;;  %v5456_v59 = vperm.slane %v15193_v43, 3 }
 0x6fe   : > { %v6786_v26 = vadd.f32 %v6785_v38, %v6763_v32  ;;  %v6999_v31 = vmax.f32 %v6985_v35, %v6987_v58 }
 0x700   : > { %v6809_v63 = vadd.f32 %v6808_v4, %v6786_v26  ;;  %v20628_v21 = vpop.f32.mrf.mxu0  ;;  %v20630_v0 = vpop.f32.mrf.mxu1  ;;  %v7005_v56 = vpack.c.bf16 %v6999_v31, %v6997_v51 }
 0x702   : > { %v6832_v1 = vadd.f32 %v6831_v54, %v6809_v63 }
 0x703   : > { %v6764_v29 = vpop.f32.mrf.mxu2  ;;  %v6787_v28 = vpop.f32.mrf.mxu3 }
 0x704   : > { %v6991_v16 = vmax.f32 %v6832_v1, 0.0  ;;  %v6974_v28 = vmax.f32 %v20588_v30, 0.0  ;;  %v6622_v30 = vadd.f32 %v20428_v23, %v20556_v2 }
 0x706   : > { %v7001_v15 = vmax.f32 %v6989_v48, %v6991_v16 }
 0x708   : > { %v6900_v12 = vpop.f32.mrf.mxu0  ;;  %v6923_v33 = vpop.f32.mrf.mxu1  ;;  %v7007_v8 = vpack.c.bf16 %v7001_v15, %v7001_v15 }
 0x70a   : > { %v7039_v4 = vsel %vm7037_vm7, %v7007_v8, 0 }
 0x70b   : > { %v6844_v45 = vpop.f32.mrf.mxu2  ;;  %v6867_v14 = vpop.f32.mrf.mxu3  ;;  %7049 = vmatpush.bf16.msrb.mxu0 %v7039_v4 }
 0x70c   : > { %v6845_v50 = vadd.f32 %v6844_v45, %v5456_v59 }
 0x70e   : > { %v6868_v9 = vadd.f32 %v6867_v14, %v6845_v50 }
 0x70f   : > { %7050 = vmatpush.bf16.msrb.mxu0 %v7005_v56 }
 0x710   : > { %v6891_v54 = vadd.f32 %v6890_v49, %v6868_v9  ;;  %v6902_v3 = vpop.f32.mrf.mxu0  ;;  %v6925_v61 = vpop.f32.mrf.mxu1 }
 0x711   : > { %v6982_v61 = vmax.f32 %v20596_v13, 0.0 }
 0x712   : > { %v6914_v40 = vadd.f32 %v6913_v7, %v6891_v54 }
 0x713   : > { %v6846_v37 = vpop.f32.mrf.mxu2  ;;  %v6869_v34 = vpop.f32.mrf.mxu3  ;;  %7051 = vmatpush.bf16.msrb.mxu0 %v7003_v27  ;;  %v20637_v27 = vld [vmem:[%s21005_s12] sm:$0xff] }
 0x714   : > { %v6847_v7 = vadd.f32 %v6846_v37, %v5456_v59 }
 0x716   : > { %12755 = vmatmul.msk.bf16.vlgmr.msrb.gmra.mxu0 %vm7027_vm8, %v20637_v27 }
 0x71b   : > { %v6849_v60 = vpop.f32.mrf.mxu2  ;;  %v6872_v22 = vpop.f32.mrf.mxu3 }
 0x71c   : > { %v6850_v41 = vadd.f32 %v6849_v60, %v5456_v59 }
 0x71e   : > { %v6873_v25 = vadd.f32 %v6872_v22, %v6850_v41 }
 0x720   : > { %v6896_v17 = vadd.f32 %v6895_v36, %v6873_v25  ;;  %v6617_v36 = vadd.f32 %v20370_v47, %v20497_v20 }
 0x722   : > { %v6919_v53 = vadd.f32 %v6918_v5, %v6896_v17  ;;  %v6870_v5 = vadd.f32 %v6869_v34, %v6847_v7  ;;  %v6640_v56 = vadd.f32 %v20372_v57, %v6617_v36  ;;  %v14691_v57 = vld [vmem:[%s21005_s12 + $0x8] sm:$0xff] }
 0x723   : > { %v6851_v62 = vpop.f32.mrf.mxu2  ;;  %v6874_v51 = vpop.f32.mrf.mxu3 }
 0x724   : > { %v6893_v1 = vadd.f32 %v20619_v52, %v6870_v5  ;;  %v6663_v48 = vadd.f32 %v20590_v6, %v6640_v56  ;;  %v6852_v8 = vadd.f32 %v6851_v62, %v5456_v59 }
 0x726   : > { %v6686_v47 = vadd.f32 %v20592_v44, %v6663_v48  ;;  %12756 = vmatmul.msk.bf16.gmra.mxu0 %vm7027_vm8, %v14691_v57  ;;  %v6875_v6 = vadd.f32 %v6874_v51, %v6852_v8  ;;  %v14722_v8 = vld [vmem:[#allocation6 + $0xec] sm:$0xf0] }
 0x728   : > { %v6978_v52 = vmax.f32 %v6686_v47, 0.0  ;;  %v6898_v54 = vadd.f32 %v20628_v21, %v6875_v6  ;;  %v14718_v6 = vld [vmem:[#allocation6 + $0xcc] sm:$0xf0] }
 0x72a   : > { %v6921_v60 = vadd.f32 %v20630_v0, %v6898_v54  ;;  %v12971_v54 = vld [vmem:[#allocation6 + $0x1a0] sm:$0xf] }
 0x72b   : > { %v6854_v55 = vpop.f32.mrf.mxu2  ;;  %v6877_v39 = vpop.f32.mrf.mxu3 }
 0x72c   : > { %v6855_v18 = vadd.f32 %v6854_v55, %v5456_v59  ;;  %v6645_v59 = vadd.f32 %v20430_v19, %v6622_v30  ;;  %v7013_v19 = vld [vmem:[%s21005_s12 + $0x10] sm:$0x3] }
 0x72d   : > { %v7023_v25 = vunpack.c.l.b16 %v7013_v19  ;;  %v12859_v30 = vld [vmem:[#allocation6 + $0xc0] sm:$0xf] }
 0x72e   : > { %v6878_v38 = vadd.f32 %v6877_v39, %v6855_v18  ;;  %v12827_v19 = vld [vmem:[#allocation6 + $0x80] sm:$0xf] }
 0x72f   : > { %v7026_v17 = vpack.c.b16 %v7023_v25, %v7023_v25  ;;  %v14710_v25 = vld [vmem:[#allocation6 + $0x8c] sm:$0xf0] }
 0x730   : > { %v6901_v35 = vadd.f32 %v6900_v12, %v6878_v38  ;;  %v6916_v12 = vadd.f32 %v20621_v11, %v6893_v1 }
 0x732   : > { %v6924_v49 = vadd.f32 %v6923_v33, %v6901_v35 }
 0x733   : > { %v6856_v58 = vpop.f32.mrf.mxu2  ;;  %v6879_v32 = vpop.f32.mrf.mxu3 }
 0x736   : > { %12757 = vmatmul.msk.bf16.gmra.mxu0 %vm7027_vm8, %v7026_v17 }
 0x73b   : > { %v6936_v26 = vpop.f32.mrf.mxu2  ;;  %v6959_v31 = vpop.f32.mrf.mxu3 }
 0x73c   : > { %v6937_v63 = vadd.f32 %v6936_v26, %v6914_v40  ;;  %v6668_v40 = vadd.f32 %v20598_v42, %v6645_v59  ;;  %v14714_v59 = vld [vmem:[#allocation6 + $0xac] sm:$0xf0] }
 0x73e   : > { %v6960_v29 = vadd.f32 %v6959_v31, %v6937_v63  ;;  %v6691_v22 = vadd.f32 %v20600_v24, %v6668_v40  ;;  %v6990_v24 = vmax.f32 %v20604_v46, 0.0  ;;  %v14786_v40 = vld [vmem:[#allocation6 + $0x2ec] sm:$0xf0] }
 0x740   : > { %v6976_v16 = vmax.f32 %v6960_v29, 0.0 }
 0x742   : > { %v6994_v15 = vmax.f32 %v6974_v28, %v6976_v16 }
 0x743   : > { %v6938_v33 = vpop.f32.mrf.mxu2  ;;  %v6961_v43 = vpop.f32.mrf.mxu3 }
 0x744   : > { %v6939_v20 = vadd.f32 %v6938_v33, %v6916_v12 }
 0x746   : > { %v6962_v4 = vadd.f32 %v6961_v43, %v6939_v20  ;;  %v12875_v20 = vld [vmem:[#allocation6 + $0xe0] sm:$0xf] }
 0x748   : > { %v6980_v45 = vmax.f32 %v6962_v4, 0.0  ;;  %v13003_v4 = vld [vmem:[#allocation6 + $0x1e0] sm:$0xf] }
 0x74a   : > { %v6996_v11 = vmax.f32 %v6978_v52, %v6980_v45  ;;  %v14754_v52 = vld [vmem:[#allocation6 + $0x1ec] sm:$0xf0] }
 0x74b   : > { %v6941_v14 = vpop.f32.mrf.mxu2  ;;  %v6964_v50 = vpop.f32.mrf.mxu3  ;;  %v13004_v45 = vor.u32 %v14754_v52, %v13003_v4  ;;  %v14770_v52 = vld [vmem:[#allocation6 + $0x26c] sm:$0xf0] }
 0x74c   : > { %v6942_v9 = vadd.f32 %v6941_v14, %v6919_v53  ;;  %v7004_v44 = vpack.c.bf16 %v6996_v11, %v6994_v15  ;;  %v6986_v53 = vmax.f32 %v6691_v22, 0.0  ;;  %v12987_v11 = vld [vmem:[#allocation6 + $0x1c0] sm:$0xf]  ;;  %v12860_v14 = vor.u32 %v14718_v6, %v12859_v30  ;;  %v14730_v6 = vld [vmem:[#allocation6 + $0x12c] sm:$0xf0] }
 0x74d   : > { %8434 = vmatpush.bf16.msra.mxu3 %v13004_v45  ;;  %v12907_v30 = vld [vmem:[#allocation6 + $0x120] sm:$0xf] }
 0x74e   : > { %v6965_v3 = vadd.f32 %v6964_v50, %v6942_v9  ;;  %v14750_v50 = vld [vmem:[#allocation6 + $0x1cc] sm:$0xf0] }
 0x74f   : > { %v12988_v9 = vor.u32 %v14750_v50, %v12987_v11  ;;  %v13195_v11 = vld [vmem:[#allocation6 + $0x360] sm:$0xf]  ;;  %v12908_v50 = vor.u32 %v14730_v6, %v12907_v30  ;;  %v14716_v6 = vld [vmem:[#allocation6 + $0xc4] sm:$0xf] }
 0x750   : > { %v6984_v37 = vmax.f32 %v6965_v3, 0.0 }
 0x751   : > { %8435 = vmatpush.bf16.msra.mxu3 %v12988_v9  ;;  %v12763_v9 = vld [vmem:[#allocation6] sm:$0xf] }
 0x752   : > { %v6998_v34 = vmax.f32 %v6982_v61, %v6984_v37  ;;  %v13131_v61 = vld [vmem:[#allocation6 + $0x2e0] sm:$0xf] }
 0x753   : > { %v6943_v23 = vpop.f32.mrf.mxu2  ;;  %v6966_v2 = vpop.f32.mrf.mxu3  ;;  %v13259_v37 = vld [vmem:[#allocation6 + $0x3e0] sm:$0xf] }
 0x754   : > { %v6944_v41 = vadd.f32 %v6943_v23, %v6921_v60  ;;  %v13132_v60 = vor.u32 %v14786_v40, %v13131_v61  ;;  %v14818_v23 = vld [vmem:[#allocation6 + $0x3ec] sm:$0xf0]  ;;  %v12891_v61 = vld [vmem:[#allocation6 + $0x100] sm:$0xf] }
 0x755   : > { %v13260_v22 = vor.u32 %v14818_v23, %v13259_v37  ;;  %v14726_v40 = vld [vmem:[#allocation6 + $0x10c] sm:$0xf0] }
 0x756   : > { %v6967_v21 = vadd.f32 %v6966_v2, %v6944_v41  ;;  %v14746_v2 = vld [vmem:[#allocation6 + $0x1ac] sm:$0xf0]  ;;  %8452 = vmatpush.bf16.msra.mxu0 %v13132_v60  ;;  %v13179_v60 = vld [vmem:[#allocation6 + $0x340] sm:$0xf] }
 0x757   : > { %v12972_v41 = vor.u32 %v14746_v2, %v12971_v54  ;;  %v13051_v54 = vld [vmem:[#allocation6 + $0x240] sm:$0xf]  ;;  %v14798_v23 = vld [vmem:[#allocation6 + $0x34c] sm:$0xf0] }
 0x758   : > { %v6988_v13 = vmax.f32 %v6967_v21, 0.0  ;;  %v12955_v21 = vld [vmem:[#allocation6 + $0x180] sm:$0xf] }
 0x759   : > { %8436 = vmatpush.bf16.msra.mxu3 %v12972_v41  ;;  %v13387_v41 = vld [vmem:[#allocation6 + $0x4e0] sm:$0xf] }
 0x75a   : > { %v7000_v42 = vmax.f32 %v6986_v53, %v6988_v13  ;;  %v14742_v53 = vld [vmem:[#allocation6 + $0x18c] sm:$0xf0] }
 0x75b   : > { %v6946_v62 = vpop.f32.mrf.mxu2  ;;  %v6969_v51 = vpop.f32.mrf.mxu3  ;;  %v12956_v13 = vor.u32 %v14742_v53, %v12955_v21 }
 0x75c   : > { %v6947_v0 = vadd.f32 %v6946_v62, %v6924_v49  ;;  %v7006_v55 = vpack.c.bf16 %v7000_v42, %v6998_v34  ;;  %v12811_v42 = vld [vmem:[#allocation6 + $0x60] sm:$0xf]  ;;  %v14706_v62 = vld [vmem:[#allocation6 + $0x6c] sm:$0xf0] }
 0x75d   : > { %8437 = vmatpush.bf16.msra.mxu3 %v12956_v13  ;;  %v13035_v13 = vld [vmem:[#allocation6 + $0x220] sm:$0xf] }
 0x75e   : > { %v6970_v39 = vadd.f32 %v6969_v51, %v6947_v0  ;;  %v12939_v51 = vld [vmem:[#allocation6 + $0x160] sm:$0xf] }
 0x760   : > { %v6992_v18 = vmax.f32 %v6970_v39, 0.0  ;;  %v14782_v39 = vld [vmem:[#allocation6 + $0x2cc] sm:$0xf0] }
 0x762   : > { %v7002_v38 = vmax.f32 %v6990_v24, %v6992_v18  ;;  %v13243_v24 = vld [vmem:[#allocation6 + $0x3c0] sm:$0xf]  ;;  %v12812_v18 = vor.u32 %v14706_v62, %v12811_v42  ;;  %v14762_v42 = vld [vmem:[#allocation6 + $0x22c] sm:$0xf0] }
 0x763   : > { %v6948_v35 = vpop.f32.mrf.mxu2  ;;  %v6971_v58 = vpop.f32.mrf.mxu3 }
 0x764   : > { %v7008_v32 = vpack.c.bf16 %v7002_v38, %v7002_v38  ;;  %v14814_v35 = vld [vmem:[#allocation6 + $0x3cc] sm:$0xf0] }
 0x765   : > { %v14738_v58 = vld [vmem:[#allocation6 + $0x16c] sm:$0xf0] }
 0x766   : > { %v7042_v7 = vsel %vm7037_vm7, %v7008_v32, 0  ;;  %v13244_v32 = vor.u32 %v14814_v35, %v13243_v24  ;;  %v14846_v24 = vld [vmem:[#allocation6 + $0x4cc] sm:$0xf0] }
 0x767   : > { %7072 = vmatpush.bf16.msrb.mxu1 %v7042_v7  ;;  %v13099_v7 = vld [vmem:[#allocation6 + $0x2a0] sm:$0xf] }
 0x76b   : > { %7073 = vmatpush.bf16.msrb.mxu1 %v7006_v55  ;;  %v13115_v55 = vld [vmem:[#allocation6 + $0x2c0] sm:$0xf] }
 0x76c   : > { %v13116_v38 = vor.u32 %v14782_v39, %v13115_v55  ;;  %v13180_v39 = vor.u32 %v14798_v23, %v13179_v60  ;;  %v14870_v60 = vld [vmem:[#allocation6 + $0x58c] sm:$0xf0]  ;;  %v14712_v23 = vld [vmem:[#allocation6 + $0xa4] sm:$0xf] }
 0x76e   : > { %8453 = vmatpush.bf16.msra.mxu0 %v13116_v38  ;;  %v14878_v38 = vld [vmem:[#allocation6 + $0x5cc] sm:$0xf0] }
 0x76f   : > { %7074 = vmatpush.bf16.msrb.mxu1 %v7004_v44  ;;  %v12843_v44 = vld [vmem:[#allocation6 + $0xa0] sm:$0xf] }
 0x770   : > { %v12844_v34 = vor.u32 %v14714_v59, %v12843_v44  ;;  %v14694_v44 = vld [vmem:[#allocation6 + $0xc] sm:$0xf0] }
 0x771   : > { %v12764_v2 = vor.u32 %v14694_v44, %v12763_v9  ;;  %v14748_v9 = vld [vmem:[#allocation6 + $0x1c4] sm:$0xf]  ;;  %v12989_v44 = vld [vmem:[#allocation6 + $0x1d0] sm:$0xf0] }
 0x772   : > { %12758 = vmatmul.msk.bf16.vlgmr.msrb.gmra.mxu1 %vm7027_vm8, %v20637_v27 }
 0x773   : > { %8470 = vmatpush.bf16.msra.mxu1 %v13260_v22  ;;  %v12892_v22 = vor.u32 %v14726_v40, %v12891_v61  ;;  %v13467_v61 = vld [vmem:[#allocation6 + $0x580] sm:$0xf] }
 0x777   : > { %8471 = vmatpush.bf16.msra.mxu1 %v13244_v32  ;;  %v13163_v32 = vld [vmem:[#allocation6 + $0x320] sm:$0xf] }
 0x782   : > { %12759 = vmatmul.msk.bf16.gmra.mxu1 %vm7027_vm8, %v14691_v57  ;;  %v12876_v57 = vor.u32 %v14722_v8, %v12875_v20  ;;  %v12779_v20 = vld [vmem:[#allocation6 + $0x20] sm:$0xf]  ;;  %v14698_v8 = vld [vmem:[#allocation6 + $0x2c] sm:$0xf0] }
 0x783   : > { %v12780_v45 = vor.u32 %v14698_v8, %v12779_v20  ;;  %v14842_v20 = vld [vmem:[#allocation6 + $0x4ac] sm:$0xf0]  ;;  %v13483_v8 = vld [vmem:[#allocation6 + $0x5a0] sm:$0xf] }
 0x784   : > { %8416 = vmatpush.bf16.msra.mxu2 %v12876_v57 }
 0x788   : > { %8417 = vmatpush.bf16.msra.mxu2 %v12860_v14  ;;  %v14802_v14 = vld [vmem:[#allocation6 + $0x36c] sm:$0xf0] }
 0x789   : > { %v13196_v37 = vor.u32 %v14802_v14, %v13195_v11  ;;  %v12861_v11 = vld [vmem:[#allocation6 + $0xd0] sm:$0xf0] }
 0x78c   : > { %8418 = vmatpush.bf16.msra.mxu2 %v12844_v34  ;;  %v14766_v34 = vld [vmem:[#allocation6 + $0x24c] sm:$0xf0] }
 0x78d   : > { %v13052_v53 = vor.u32 %v14766_v34, %v13051_v54  ;;  %v14838_v54 = vld [vmem:[#allocation6 + $0x48c] sm:$0xf0] }
 0x792   : > { %12760 = vmatmul.msk.bf16.gmra.mxu1 %vm7027_vm8, %v7026_v17  ;;  %v12828_v17 = vor.u32 %v14710_v25, %v12827_v19  ;;  %v14850_v19 = vld [vmem:[#allocation6 + $0x4ec] sm:$0xf0]  ;;  %v13515_v25 = vld [vmem:[#allocation6 + $0x5e0] sm:$0xf] }
 0x793   : > { %v7053_v49 = vpop.f32.mrf.mxu0  ;;  %v13388_v21 = vor.u32 %v14850_v19, %v13387_v41  ;;  %v13468_v41 = vor.u32 %v14870_v60, %v13467_v61  ;;  %v12845_v19 = vld [vmem:[#allocation6 + $0xb0] sm:$0xf0] }
 0x794   : > { %8419 = vmatpush.bf16.msra.mxu2 %v12828_v17  ;;  %v14882_v17 = vld [vmem:[#allocation6 + $0x5ec] sm:$0xf0] }
 0x795   : > { %v13516_v62 = vor.u32 %v14882_v17, %v13515_v25  ;;  %v14744_v25 = vld [vmem:[#allocation6 + $0x1a4] sm:$0xf] }
 0x798   : > { %8420 = vmatpush.bf16.msra.mxu2 %v12812_v18  ;;  %v13499_v18 = vld [vmem:[#allocation6 + $0x5c0] sm:$0xf] }
 0x79b   : > { %v7055_v36 = vpop.f32.mrf.mxu0 }
 0x7a3   : > { %v7058_v46 = vpop.f32.mrf.mxu0 }
 0x7a4   : > { %v7097_v31 = vrot.slane %v7058_v46, 2 }
 0x7ab   : > { %v7060_v5 = vpop.f32.mrf.mxu0 }
 0x7ac   : > { %v7098_v63 = vrot.slane %v7060_v5, 2 }
 0x7ae   : > { %v7099_v1 = vsel %vm7096_vm9, %v7097_v31, %v7098_v63  ;;  %v13083_v31 = vld [vmem:[#allocation6 + $0x280] sm:$0xf] }
 0x7af   : > { %v7113_v28 = vmax.f32 %v7053_v49, %v7099_v1  ;;  %v14778_v49 = vld [vmem:[#allocation6 + $0x2ac] sm:$0xf0]  ;;  %v13211_v1 = vld [vmem:[#allocation6 + $0x380] sm:$0xf] }
 0x7b0   : > { %v13100_v5 = vor.u32 %v14778_v49, %v13099_v7  ;;  %v14794_v7 = vld [vmem:[#allocation6 + $0x32c] sm:$0xf0] }
 0x7b1   : > { %v7130_v16 = vrot.slane %v7113_v28, 7  ;;  %v12795_v28 = vld [vmem:[#allocation6 + $0x40] sm:$0xf] }
 0x7b2   : > { %8454 = vmatpush.bf16.msra.mxu0 %v13100_v5  ;;  %v13036_v5 = vor.u32 %v14762_v42, %v13035_v13  ;;  %v12992_v13 = vor.u32 %v14748_v9, %v12989_v44  ;;  %v14834_v42 = vld [vmem:[#allocation6 + $0x46c] sm:$0xf0]  ;;  %v13291_v9 = vld [vmem:[#allocation6 + $0x420] sm:$0xf] }
 0x7b3   : > { %v7063_v26 = vpop.f32.mrf.mxu0  ;;  %7146 = vst [vmem:[#allocation3] sm:$0xfe] %v7130_v16  ;;  %v14826_v44 = vld [vmem:[#allocation6 + $0x42c] sm:$0xf0] }
 0x7b4   : > { %v7103_v56 = vrot.slane %v7063_v26, 2  ;;  %v14810_v26 = vld [vmem:[#allocation6 + $0x3ac] sm:$0xf0]  ;;  %v13292_v60 = vor.u32 %v14826_v44, %v13291_v9 }
 0x7b6   : > { %v7104_v29 = vsel %vm7096_vm9, %v7098_v63, %v7103_v56  ;;  %v7117_v27 = vmax.f32 %v7058_v46, %v7103_v56  ;;  %v12940_v46 = vor.u32 %v14738_v58, %v12939_v51  ;;  %v14774_v63 = vld [vmem:[#allocation6 + $0x28c] sm:$0xf0]  ;;  %v13371_v51 = vld [vmem:[#allocation6 + $0x4c0] sm:$0xf] }
 0x7b7   : > { %v7115_v48 = vmax.f32 %v7055_v36, %v7104_v29  ;;  %v13227_v36 = vld [vmem:[#allocation6 + $0x3a0] sm:$0xf]  ;;  %v14806_v29 = vld [vmem:[#allocation6 + $0x38c] sm:$0xf0]  ;;  %v13372_v49 = vor.u32 %v14846_v24, %v13371_v51 }
 0x7b8   : > { %v7136_v12 = vrot.slane %v7117_v27, 7  ;;  %v13228_v56 = vor.u32 %v14810_v26, %v13227_v36  ;;  %8438 = vmatpush.bf16.msra.mxu3 %v12940_v46  ;;  %v12923_v27 = vld [vmem:[#allocation6 + $0x140] sm:$0xf]  ;;  %v13212_v57 = vor.u32 %v14806_v29, %v13211_v1  ;;  %v13500_v36 = vor.u32 %v14878_v38, %v13499_v18  ;;  %v14790_v29 = vld [vmem:[#allocation6 + $0x30c] sm:$0xf0] }
 0x7b9   : > { %v7132_v15 = vrot.slane %v7115_v48, 7  ;;  %v14702_v48 = vld [vmem:[#allocation6 + $0x4c] sm:$0xf0]  ;;  %v13019_v26 = vld [vmem:[#allocation6 + $0x200] sm:$0xf]  ;;  %v12848_v38 = vor.u32 %v14712_v23, %v12845_v19 }
 0x7ba   : > { %8472 = vmatpush.bf16.msra.mxu1 %v13228_v56  ;;  %v14758_v56 = vld [vmem:[#allocation6 + $0x20c] sm:$0xf0]  ;;  %v13147_v1 = vld [vmem:[#allocation6 + $0x300] sm:$0xf]  ;;  %v7152_v51 = vld [vmem:[#allocation3] sm:$0xff] }
 0x7bb   : > { %v20674_v33 = vsel %vm5078_vm5, %v7130_v16, %v7132_v15  ;;  %v7137_v43 = vsel %vm5078_vm5, %v7132_v15, %v7136_v12  ;;  %v7065_v47 = vpop.f32.mrf.mxu0  ;;  %v14734_v16 = vld [vmem:[#allocation6 + $0x14c] sm:$0xf0]  ;;  %v12796_v15 = vor.u32 %v14702_v48, %v12795_v28  ;;  %v14720_v28 = vld [vmem:[#allocation6 + $0xe4] sm:$0xf]  ;;  %v12877_v48 = vld [vmem:[#allocation6 + $0xf0] sm:$0xf0] }
 0x7bc   : > { %7150 = vst [vmem:[#allocation3 + $0x20] sm:$0x7] %v7137_v43  ;;  %v12924_v12 = vor.u32 %v14734_v16, %v12923_v27  ;;  %v13084_v43 = vor.u32 %v14774_v63, %v13083_v31  ;;  %v13067_v47 = vld [vmem:[#allocation6 + $0x260] sm:$0xf]  ;;  %v13164_v63 = vor.u32 %v14794_v7, %v13163_v32  ;;  %v14752_v27 = vld [vmem:[#allocation6 + $0x1e4] sm:$0xf] }
 0x7bd   : > { %8421 = vmatpush.bf16.msra.mxu2 %v12796_v15  ;;  %v13068_v59 = vor.u32 %v14770_v52, %v13067_v47  ;;  %v13005_v15 = vld [vmem:[#allocation6 + $0x1f0] sm:$0xf0]  ;;  %v13148_v47 = vor.u32 %v14790_v29, %v13147_v1  ;;  %v12880_v52 = vor.u32 %v14720_v28, %v12877_v48  ;;  %v14830_v29 = vld [vmem:[#allocation6 + $0x44c] sm:$0xf0]  ;;  %v13435_v28 = vld [vmem:[#allocation6 + $0x540] sm:$0xf] }
 0x7be   : > { %8439 = vmatpush.bf16.msra.mxu3 %v12924_v12  ;;  %8455 = vmatpush.bf16.msra.mxu0 %v13084_v43  ;;  %v13355_v12 = vld [vmem:[#allocation6 + $0x4a0] sm:$0xf]  ;;  %v13020_v43 = vor.u32 %v14758_v56, %v13019_v26  ;;  %v12829_v32 = vld [vmem:[#allocation6 + $0x90] sm:$0xf0]  ;;  %v14740_v26 = vld [vmem:[#allocation6 + $0x184] sm:$0xf] }
 0x7bf   : > { %8473 = vmatpush.bf16.msra.mxu1 %v13212_v57  ;;  %v14874_v57 = vld [vmem:[#allocation6 + $0x5ac] sm:$0xf0] }
 0x7c0   : > { %v13484_v30 = vor.u32 %v14874_v57, %v13483_v8  ;;  %v14858_v23 = vld [vmem:[#allocation6 + $0x52c] sm:$0xf0] }
 0x7c1   : > { %8422 = vmatpush.bf16.msra.mxu2 %v12780_v45  ;;  %v13356_v45 = vor.u32 %v14842_v20, %v13355_v12  ;;  %v14862_v12 = vld [vmem:[#allocation6 + $0x54c] sm:$0xf0] }
 0x7c2   : > { %8440 = vmatpush.bf16.msra.mxu3 %v12908_v50  ;;  %8456 = vmatpush.bf16.msra.mxu0 %v13068_v59  ;;  %v13008_v50 = vor.u32 %v14752_v27, %v13005_v15  ;;  %v13339_v59 = vld [vmem:[#allocation6 + $0x480] sm:$0xf]  ;;  %v13436_v8 = vor.u32 %v14862_v12, %v13435_v28  ;;  %v13261_v28 = vld [vmem:[#allocation6 + $0x3f0] sm:$0xf0] }
 0x7c3   : > { %8474 = vmatpush.bf16.msra.mxu1 %v13196_v37  ;;  %v13340_v34 = vor.u32 %v14838_v54, %v13339_v59  ;;  %v7163_v59 = vld [vmem:[#allocation3 + $0x20] sm:$0x7] }
 0x7c5   : > { %8423 = vmatpush.bf16.msra.mxu2 %v12764_v2 }
 0x7c6   : > { %8441 = vmatpush.bf16.msra.mxu3 %v12892_v22  ;;  %8457 = vmatpush.bf16.msra.mxu0 %v13052_v53  ;;  %v12864_v22 = vor.u32 %v14716_v6, %v12861_v11  ;;  %v7161_v53 = vld [vmem:[#allocation3] sm:$0xfe]  ;;  %v14704_v6 = vld [vmem:[#allocation6 + $0x64] sm:$0xf]  ;;  %v12813_v11 = vld [vmem:[#allocation6 + $0x70] sm:$0xf0] }
 0x7c7   : > { %8475 = vmatpush.bf16.msra.mxu1 %v13180_v39 }
 0x7c9   : > { %8488 = vmatpush.bf16.msrb.mxu2 %v13388_v21  ;;  %v13323_v21 = vld [vmem:[#allocation6 + $0x460] sm:$0xf] }
 0x7ca   : > { %8506 = vmatpush.bf16.msrb.mxu3 %v13516_v62  ;;  %8458 = vmatpush.bf16.msra.mxu0 %v13036_v5  ;;  %v13451_v62 = vld [vmem:[#allocation6 + $0x560] sm:$0xf]  ;;  %v13324_v39 = vor.u32 %v14834_v42, %v13323_v21  ;;  %v14732_v42 = vld [vmem:[#allocation6 + $0x144] sm:$0xf] }
 0x7cb   : > { %8476 = vmatpush.bf16.msra.mxu1 %v13164_v63  ;;  %v13307_v63 = vld [vmem:[#allocation6 + $0x440] sm:$0xf] }
 0x7cc   : > { %v13308_v20 = vor.u32 %v14830_v29, %v13307_v63  ;;  %v14784_v63 = vld [vmem:[#allocation6 + $0x2e4] sm:$0xf] }
 0x7cd   : > { %8489 = vmatpush.bf16.msrb.mxu2 %v13372_v49  ;;  %v14816_v29 = vld [vmem:[#allocation6 + $0x3e4] sm:$0xf] }
 0x7ce   : > { %8507 = vmatpush.bf16.msrb.mxu3 %v13500_v36  ;;  %8459 = vmatpush.bf16.msra.mxu0 %v13020_v43  ;;  %v13264_v44 = vor.u32 %v14816_v29, %v13261_v28  ;;  %v14840_v29 = vld [vmem:[#allocation6 + $0x4a4] sm:$0xf]  ;;  %v13357_v28 = vld [vmem:[#allocation6 + $0x4b0] sm:$0xf0] }
 0x7cf   : > { %8477 = vmatpush.bf16.msra.mxu1 %v13148_v47 }
 0x7d1   : > { %8490 = vmatpush.bf16.msrb.mxu2 %v13356_v45 }
 0x7d2   : > { %8508 = vmatpush.bf16.msrb.mxu3 %v13484_v30  ;;  %8524 = vmatpush.bf16.msrb.mxu0 %v12880_v52 }
 0x7d3   : > { %8542 = vmatpush.bf16.msrb.mxu1 %v13008_v50  ;;  %v12941_v50 = vld [vmem:[#allocation6 + $0x170] sm:$0xf0] }
 0x7d5   : > { %8491 = vmatpush.bf16.msrb.mxu2 %v13340_v34  ;;  %v12816_v34 = vor.u32 %v14704_v6, %v12813_v11  ;;  %v12765_v6 = vld [vmem:[#allocation6 + $0x10] sm:$0xf0]  ;;  %v14780_v11 = vld [vmem:[#allocation6 + $0x2c4] sm:$0xf] }
 0x7d6   : > { %8509 = vmatpush.bf16.msrb.mxu3 %v13468_v41  ;;  %8525 = vmatpush.bf16.msrb.mxu0 %v12864_v22  ;;  %v12797_v22 = vld [vmem:[#allocation6 + $0x50] sm:$0xf0] }
 0x7d7   : > { %8543 = vmatpush.bf16.msrb.mxu1 %v12992_v13 }
 0x7d9   : > { %8492 = vmatpush.bf16.msrb.mxu2 %v13324_v39  ;;  %v14854_v39 = vld [vmem:[#allocation6 + $0x50c] sm:$0xf0] }
 0x7da   : > { %8526 = vmatpush.bf16.msrb.mxu0 %v12848_v38  ;;  %v7156_v38 = vld [vmem:[#allocation3 + $0x20] sm:$0x3] }
 0x7dd   : > { %8493 = vmatpush.bf16.msrb.mxu2 %v13308_v20 }
 0x7e1   : > { %8494 = vmatpush.bf16.msrb.mxu2 %v13292_v60 }
 0x7ef   : > { %v20677_v3 = vpop.f32.mrf.mxu1 }
 0x7f7   : > { %v20679_v0 = vpop.f32.mrf.mxu1 }
 0x7ff   : > { %v20681_v4 = vpop.f32.mrf.mxu1 }
 0x800   : > { %v7100_v35 = vrot.slane %v20681_v4, 2 }
 0x807   : > { %v7083_v55 = vpop.f32.mrf.mxu1 }
 0x808   : > { %v7101_v58 = vrot.slane %v7083_v55, 2  ;;  %v12973_v55 = vld [vmem:[#allocation6 + $0x1b0] sm:$0xf0] }
 0x809   : > { %v12976_v1 = vor.u32 %v14744_v25, %v12973_v55  ;;  %v13403_v55 = vld [vmem:[#allocation6 + $0x500] sm:$0xf] }
 0x80a   : > { %v7102_v46 = vsel %vm7096_vm9, %v7100_v35, %v7101_v58 }
 0x80b   : > { %v7114_v31 = vmax.f32 %v20677_v3, %v7102_v46  ;;  %8544 = vmatpush.bf16.msrb.mxu1 %v12976_v1  ;;  %v12909_v1 = vld [vmem:[#allocation6 + $0x130] sm:$0xf0] }
 0x80d   : > { %v7131_v16 = vrot.slane %v7114_v31, 7  ;;  %v12957_v31 = vld [vmem:[#allocation6 + $0x190] sm:$0xf0] }
 0x80e   : > { %v12960_v57 = vor.u32 %v14740_v26, %v12957_v31  ;;  %v14728_v31 = vld [vmem:[#allocation6 + $0x124] sm:$0xf] }
 0x80f   : > { %7147 = vst [vmem:[#allocation3 + $0x8] sm:$0xfe] %v7131_v16  ;;  %v7086_v3 = vpop.f32.mrf.mxu1  ;;  %v12912_v9 = vor.u32 %v14728_v31, %v12909_v1  ;;  %v14772_v31 = vld [vmem:[#allocation6 + $0x284] sm:$0xf] }
 0x810   : > { %v7105_v14 = vrot.slane %v7086_v3, 2  ;;  %8545 = vmatpush.bf16.msrb.mxu1 %v12960_v57 }
 0x812   : > { %v7106_v40 = vsel %vm7096_vm9, %v7101_v58, %v7105_v14  ;;  %v7118_v37 = vmax.f32 %v20681_v4, %v7105_v14  ;;  %v14708_v58 = vld [vmem:[#allocation6 + $0x84] sm:$0xf] }
 0x813   : > { %v7116_v2 = vmax.f32 %v20679_v0, %v7106_v40  ;;  %v14866_v0 = vld [vmem:[#allocation6 + $0x56c] sm:$0xf0]  ;;  %v14736_v14 = vld [vmem:[#allocation6 + $0x164] sm:$0xf] }
 0x814   : > { %v7138_v17 = vrot.slane %v7118_v37, 7  ;;  %v13452_v35 = vor.u32 %v14866_v0, %v13451_v62  ;;  %v13419_v37 = vld [vmem:[#allocation6 + $0x520] sm:$0xf]  ;;  %v12925_v62 = vld [vmem:[#allocation6 + $0x150] sm:$0xf0] }
 0x815   : > { %v7134_v4 = vrot.slane %v7116_v2, 7  ;;  %v14700_v2 = vld [vmem:[#allocation6 + $0x44] sm:$0xf] }
 0x816   : > { %v7153_v24 = vld [vmem:[#allocation3 + $0x8] sm:$0xff]  ;;  %8510 = vmatpush.bf16.msrb.mxu3 %v13452_v35  ;;  %v12800_v35 = vor.u32 %v14700_v2, %v12797_v22  ;;  %v7167_v2 = vld [vmem:[#allocation3] sm:$0xfc] }
 0x817   : > { %v7162_v18 = vld [vmem:[#allocation3 + $0x8] sm:$0xfe]  ;;  %v7135_v7 = vsel %vm5078_vm5, %v7131_v16, %v7134_v4  ;;  %v7139_v49 = vsel %vm5078_vm5, %v7134_v4, %v7138_v17  ;;  %v7158_v36 = vpack.c.bf16 %v7153_v24, %v7152_v51  ;;  %v7088_v5 = vpop.f32.mrf.mxu1  ;;  %v12944_v17 = vor.u32 %v14736_v14, %v12941_v50  ;;  %v13275_v4 = vld [vmem:[#allocation6 + $0x400] sm:$0xf] }
 0x818   : > { %v7165_v46 = vpack.c.bf16 %v7162_v18, %v7161_v53  ;;  %v7159_v56 = vpack.c.bf16 %v7135_v7, %v20674_v33  ;;  %7151 = vst [vmem:[#allocation3 + $0x28] sm:$0x7] %v7139_v49  ;;  %v12832_v33 = vor.u32 %v14708_v58, %v12829_v32  ;;  %v13420_v53 = vor.u32 %v14858_v23, %v13419_v37  ;;  %v14822_v51 = vld [vmem:[#allocation6 + $0x40c] sm:$0xf0]  ;;  %v14812_v37 = vld [vmem:[#allocation6 + $0x3c4] sm:$0xf] }
 0x819   : > { %v7176_v48 = vunpack.c.l.b16 %v7158_v36  ;;  %v7177_v27 = vunpack.c.h.b16 %v7158_v36  ;;  %8546 = vmatpush.bf16.msrb.mxu1 %v12944_v17  ;;  %v12928_v32 = vor.u32 %v14732_v42, %v12925_v62  ;;  %v13276_v7 = vor.u32 %v14822_v51, %v13275_v4  ;;  %v14696_v36 = vld [vmem:[#allocation6 + $0x24] sm:$0xf]  ;;  %v7168_v22 = vld [vmem:[#allocation3 + $0x8] sm:$0xfc] }
 0x81a   : > { %v7192_v15 = vunpack.c.l.b16 %v7165_v46  ;;  %v7193_v16 = vunpack.c.h.b16 %v7165_v46  ;;  %v20692_v43 = vunpack.c.l.b16 %v7159_v56  ;;  %v20694_v47 = vunpack.c.h.b16 %v7159_v56  ;;  %8511 = vmatpush.bf16.msrb.mxu3 %v13436_v8  ;;  %8527 = vmatpush.bf16.msrb.mxu0 %v12832_v33  ;;  %v12781_v46 = vld [vmem:[#allocation6 + $0x30] sm:$0xf0]  ;;  %v14848_v17 = vld [vmem:[#allocation6 + $0x4e4] sm:$0xf] }
 0x81b   : > { %v13404_v49 = vor.u32 %v14854_v39, %v13403_v55  ;;  %v13133_v56 = vld [vmem:[#allocation6 + $0x2f0] sm:$0xf0]  ;;  %8495 = vmatpush.bf16.msrb.mxu2 %v13276_v7  ;;  %v12784_v20 = vor.u32 %v14696_v36, %v12781_v46  ;;  %v14776_v55 = vld [vmem:[#allocation6 + $0x2a4] sm:$0xf] }
 0x81c   : > { %v20697_v3 = vpack.c.b16 %v20692_v43, %v7176_v48  ;;  %v20700_v52 = vpack.c.b16 %v20694_v47, %v7177_v27  ;;  %v20703_v45 = vpack.c.b16 %v20692_v43, %v7192_v15  ;;  %v20706_v30 = vpack.c.b16 %v20694_v47, %v7193_v16  ;;  %v7169_v16 = vld [vmem:[#allocation3 + $0x20] sm:$0xf]  ;;  %v13517_v51 = vld [vmem:[#allocation6 + $0x5f0] sm:$0xf0] }
 0x81d   : > { %8547 = vmatpush.bf16.msrb.mxu1 %v12928_v32  ;;  %v13101_v39 = vld [vmem:[#allocation6 + $0x2b0] sm:$0xf0] }
 0x81e   : > { %8424 = vmatmul.bf16.vlgmr.msra.gmra.mxu2 %v20697_v3  ;;  %8442 = vmatmul.bf16.vlgmr.msra.gmra.mxu3 %v20700_v52  ;;  %v7201_v54 = vshrl.u32 %v20703_v45, 16  ;;  %v7203_v61 = vshll.u32 %v20703_v45, 16  ;;  %v7215_v40 = vshll.u32 %v20706_v30, 16  ;;  %v7213_v25 = vshrl.u32 %v20706_v30, 16  ;;  %v14692_v30 = vld [vmem:[#allocation6 + $0x4] sm:$0xf] }
 0x81f   : > { %v7164_v41 = vld [vmem:[#allocation3 + $0x28] sm:$0x7]  ;;  %8512 = vmatpush.bf16.msrb.mxu3 %v13420_v53  ;;  %8528 = vmatpush.bf16.msrb.mxu0 %v12816_v34  ;;  %v13136_v45 = vor.u32 %v14784_v63, %v13133_v56  ;;  %v13245_v34 = vld [vmem:[#allocation6 + $0x3d0] sm:$0xf0]  ;;  %v13104_v32 = vor.u32 %v14776_v55, %v13101_v39 }
 0x820   : > { %v7205_v19 = vrot.slane %v7203_v61, 1  ;;  %v7157_v21 = vld [vmem:[#allocation3 + $0x28] sm:$0x3]  ;;  %v7166_v13 = vpack.c.bf16 %v7164_v41, %v7163_v59  ;;  %v7217_v18 = vrot.slane %v7215_v40, 1  ;;  %v14724_v59 = vld [vmem:[#allocation6 + $0x104] sm:$0xf]  ;;  %v12768_v41 = vor.u32 %v14692_v30, %v12765_v6 }
 0x821   : > { %v7160_v58 = vpack.c.bf16 %v7157_v21, %v7156_v38  ;;  %v7170_v12 = vld [vmem:[#allocation3 + $0x28] sm:$0xf]  ;;  %8560 = vmatpush.bf16.msra.mxu2 %v13136_v45  ;;  %v12893_v40 = vld [vmem:[#allocation6 + $0x110] sm:$0xf0]  ;;  %8548 = vmatpush.bf16.msrb.mxu1 %v12912_v9  ;;  %v13248_v62 = vor.u32 %v14812_v37, %v13245_v34  ;;  %v13360_v45 = vor.u32 %v14840_v29, %v13357_v28  ;;  %v14768_v30 = vld [vmem:[#allocation6 + $0x264] sm:$0xf] }
 0x822   : > { %v7194_v0 = vunpack.c.l.b16 %v7166_v13  ;;  %v7195_v24 = vunpack.c.h.b16 %v7166_v13  ;;  %v7206_v48 = vor.u32 %v7205_v19, %v7201_v54  ;;  %v7218_v8 = vor.u32 %v7217_v18, %v7213_v25  ;;  %v13117_v54 = vld [vmem:[#allocation6 + $0x2d0] sm:$0xf0]  ;;  %v14880_v13 = vld [vmem:[#allocation6 + $0x5e4] sm:$0xf] }
 0x823   : > { %8513 = vmatpush.bf16.msrb.mxu3 %v13404_v49  ;;  %8529 = vmatpush.bf16.msrb.mxu0 %v12800_v35  ;;  %v7180_v33 = vunpack.c.l.b16 %v7160_v58  ;;  %v7181_v57 = vunpack.c.h.b16 %v7160_v58  ;;  %v20724_v61 = vpack.c.bf16 %v7170_v12, %v7169_v16  ;;  %v13120_v19 = vor.u32 %v14780_v11, %v13117_v54  ;;  %v13389_v53 = vld [vmem:[#allocation6 + $0x4f0] sm:$0xf0]  ;;  %v14808_v18 = vld [vmem:[#allocation6 + $0x3a4] sm:$0xf] }
 0x824   : > { %v20714_v5 = vpack.c.b16 %v7194_v0, %v7194_v0  ;;  %v20716_v26 = vpack.c.b16 %v7195_v24, %v7195_v24  ;;  %v12896_v42 = vor.u32 %v14724_v59, %v12893_v40  ;;  %v13392_v4 = vor.u32 %v14848_v17, %v13389_v53  ;;  %v13229_v38 = vld [vmem:[#allocation6 + $0x3b0] sm:$0xf0]  ;;  %v14844_v35 = vld [vmem:[#allocation6 + $0x4c4] sm:$0xf] }
 0x825   : > { %v20736_v25 = vpack.c.b16 %v7180_v33, %v7180_v33  ;;  %v20738_v21 = vpack.c.b16 %v7181_v57, %v7181_v57  ;;  %v7171_v0 = vpack.c.bf16 %v7168_v22, %v7167_v2  ;;  %v13520_v24 = vor.u32 %v14880_v13, %v13517_v51  ;;  %8561 = vmatpush.bf16.msra.mxu2 %v13120_v19  ;;  %v13373_v7 = vld [vmem:[#allocation6 + $0x4d0] sm:$0xf0]  ;;  %v14876_v49 = vld [vmem:[#allocation6 + $0x5c4] sm:$0xf] }
 0x826   : > { %v7208_v27 = vshll.u32 %v20714_v5, 16  ;;  %v7220_v15 = vshll.u32 %v20716_v26, 16  ;;  %v7238_v58 = vunpack.c.l.b16 %v20724_v61  ;;  %v13501_v36 = vld [vmem:[#allocation6 + $0x5d0] sm:$0xf0]  ;;  %v13376_v46 = vor.u32 %v14844_v35, %v13373_v7  ;;  %8549 = vmatpush.bf16.msrb.mxu1 %v12896_v42  ;;  %v14804_v16 = vld [vmem:[#allocation6 + $0x384] sm:$0xf] }
 0x827   : > { %8530 = vmatpush.bf16.msrb.mxu0 %v12784_v20  ;;  %8578 = vmatpush.bf16.msra.mxu3 %v13264_v44  ;;  %v13085_v63 = vld [vmem:[#allocation6 + $0x290] sm:$0xf0]  ;;  %v7239_v56 = vunpack.c.h.b16 %v20724_v61  ;;  %v13232_v1 = vor.u32 %v14808_v18, %v13229_v38  ;;  %v14872_v33 = vld [vmem:[#allocation6 + $0x5a4] sm:$0xf]  ;;  %v7224_v2 = vshrl.u32 %v20714_v5, 16  ;;  %v7227_v22 = vshrl.u32 %v20716_v26, 16 }
 0x828   : > { %v20720_v14 = vrot.slane %v7208_v27, 1  ;;  %v20722_v50 = vrot.slane %v7220_v15, 1  ;;  %v7237_v27 = vunpack.c.h.b16 %v7171_v0  ;;  %v13504_v15 = vor.u32 %v14876_v49, %v13501_v36  ;;  %v13213_v12 = vld [vmem:[#allocation6 + $0x390] sm:$0xf0]  ;;  %v14800_v44 = vld [vmem:[#allocation6 + $0x364] sm:$0xf] }
 0x829   : > { %v7242_v20 = vpack.c.b16 %v7238_v58, %v7238_v58  ;;  %8562 = vmatpush.bf16.msra.mxu2 %v13104_v32  ;;  %v13485_v57 = vld [vmem:[#allocation6 + $0x5b0] sm:$0xf0]  ;;  %v7243_v11 = vpack.c.b16 %v7239_v56, %v7239_v56  ;;  %v13216_v9 = vor.u32 %v14804_v16, %v13213_v12  ;;  %v14836_v37 = vld [vmem:[#allocation6 + $0x484] sm:$0xf] }
 0x82a   : > { %v20728_v60 = vsel %vm1015_vm0, %v7206_v48, %v20720_v14  ;;  %v20732_v23 = vsel %vm1015_vm0, %v7218_v8, %v20722_v50  ;;  %v7236_v48 = vunpack.c.l.b16 %v7171_v0  ;;  %v13088_v8 = vor.u32 %v14772_v31, %v13085_v63  ;;  %v13069_v6 = vld [vmem:[#allocation6 + $0x270] sm:$0xf0]  ;;  %v14868_v17 = vld [vmem:[#allocation6 + $0x584] sm:$0xf] }
 0x82b   : > { %8460 = vmatmul.bf16.vlgmr.msra.gmra.mxu0 %v20728_v60  ;;  %8478 = vmatmul.bf16.vlgmr.msra.gmra.mxu1 %v20732_v23  ;;  %v7241_v54 = vpack.c.b16 %v20694_v47, %v7237_v27  ;;  %v13488_v61 = vor.u32 %v14872_v33, %v13485_v57  ;;  %v13197_v40 = vld [vmem:[#allocation6 + $0x370] sm:$0xf0]  ;;  %v13072_v19 = vor.u32 %v14768_v30, %v13069_v6  ;;  %v14764_v13 = vld [vmem:[#allocation6 + $0x244] sm:$0xf]  ;;  %v20750_v42 = vrot.slane %v7243_v11, 1 }
 0x82c   : > { %8531 = vmatpush.bf16.msrb.mxu0 %v12768_v41  ;;  %8579 = vmatpush.bf16.msra.mxu3 %v13248_v62  ;;  %v7240_v59 = vpack.c.b16 %v20692_v43, %v7236_v48  ;;  %v13341_v34 = vld [vmem:[#allocation6 + $0x490] sm:$0xf0]  ;;  %v20748_v41 = vrot.slane %v7242_v20, 1  ;;  %v13200_v47 = vor.u32 %v14800_v44, %v13197_v40  ;;  %v20756_v5 = vor.u32 %v7227_v22, %v20722_v50  ;;  %v14796_v51 = vld [vmem:[#allocation6 + $0x344] sm:$0xf] }
 0x82d   : > { %8614 = vmatpush.bf16.msra.mxu1 %v13520_v24  ;;  %8563 = vmatpush.bf16.msra.mxu2 %v13088_v8  ;;  %v13469_v53 = vld [vmem:[#allocation6 + $0x590] sm:$0xf0]  ;;  %v13344_v62 = vor.u32 %v14836_v37, %v13341_v34  ;;  %v7247_v39 = vrot.slane %v7241_v54, 1  ;;  %v14864_v50 = vld [vmem:[#allocation6 + $0x564] sm:$0xf]  ;;  %vm10375_vm0 = vcmask 49152  }
 0x82e   : > { %8429 = vmatmul.bf16.gmra.mxu2 %v20736_v25  ;;  %8447 = vmatmul.bf16.gmra.mxu3 %v20738_v21  ;;  %v13053_v43 = vld [vmem:[#allocation6 + $0x250] sm:$0xf0]  ;;  %v7244_v26 = vrot.slane %v7240_v59, 1  ;;  %v13472_v0 = vor.u32 %v14868_v17, %v13469_v53  ;;  %v14760_v49 = vld [vmem:[#allocation6 + $0x224] sm:$0xf] }
 0x82f   : > { %v13181_v55 = vld [vmem:[#allocation6 + $0x350] sm:$0xf0]  ;;  %v13056_v24 = vor.u32 %v14764_v13, %v13053_v43  ;;  %v20766_v35 = vsel %vm1263_vm2, %v7247_v39, %v20750_v42  ;;  %v14828_v63 = vld [vmem:[#allocation6 + $0x444] sm:$0xf]  ;;  %v14723_v11 = vld [vmem:[#allocation6 + $0xf4] sm:$0xf0] }
 0x830   : > { %8596 = vmatpush.bf16.msra.mxu0 %v13392_v4  ;;  %8580 = vmatpush.bf16.msra.mxu3 %v13232_v1  ;;  %v20753_v4 = vor.u32 %v7224_v2, %v20720_v14  ;;  %v20762_v18 = vsel %vm1263_vm2, %v7244_v26, %v20748_v41  ;;  %v14832_v14 = vld [vmem:[#allocation6 + $0x464] sm:$0xf]  ;;  %v13325_v38 = vld [vmem:[#allocation6 + $0x470] sm:$0xf0]  ;;  %v13184_v58 = vor.u32 %v14796_v51, %v13181_v55  ;;  %v14755_v44 = vld [vmem:[#allocation6 + $0x1f4] sm:$0xf0] }
 0x831   : > { %8615 = vmatpush.bf16.msra.mxu1 %v13504_v15  ;;  %8564 = vmatpush.bf16.msra.mxu2 %v13072_v19  ;;  %v13328_v32 = vor.u32 %v14832_v14, %v13325_v38  ;;  %v13453_v7 = vld [vmem:[#allocation6 + $0x570] sm:$0xf0]  ;;  %v14860_v28 = vld [vmem:[#allocation6 + $0x544] sm:$0xf]  ;;  %v12867_v19 = vld [vmem:[#allocation6 + $0xc8] sm:$0xf] }
 0x832   : > { %v13037_v36 = vld [vmem:[#allocation6 + $0x230] sm:$0xf0]  ;;  %v13456_v56 = vor.u32 %v14864_v50, %v13453_v7  ;;  %v14756_v27 = vld [vmem:[#allocation6 + $0x204] sm:$0xf]  ;;  %v14719_v17 = vld [vmem:[#allocation6 + $0xd4] sm:$0xf0] }
 0x833   : > { %v13165_v31 = vld [vmem:[#allocation6 + $0x330] sm:$0xf0]  ;;  %v13040_v1 = vor.u32 %v14760_v49, %v13037_v36  ;;  %v14788_v20 = vld [vmem:[#allocation6 + $0x304] sm:$0xf]  ;;  %v12868_v51 = vor.u32 %v14719_v17, %v12867_v19  ;;  %v13267_v14 = vld [vmem:[#allocation6 + $0x3e8] sm:$0xf] }
 0x834   : > { %8597 = vmatpush.bf16.msra.mxu0 %v13376_v46  ;;  %8581 = vmatpush.bf16.msra.mxu3 %v13216_v9  ;;  %v14792_v46 = vld [vmem:[#allocation6 + $0x324] sm:$0xf]  ;;  %v13309_v29 = vld [vmem:[#allocation6 + $0x450] sm:$0xf0]  ;;  %v13011_v9 = vld [vmem:[#allocation6 + $0x1e8] sm:$0xf] }
 0x835   : > { %8616 = vmatpush.bf16.msra.mxu1 %v13488_v61  ;;  %8565 = vmatpush.bf16.msra.mxu2 %v13056_v24  ;;  %v13437_v48 = vld [vmem:[#allocation6 + $0x550] sm:$0xf0]  ;;  %v13168_v16 = vor.u32 %v14792_v46, %v13165_v31  ;;  %v13312_v12 = vor.u32 %v14828_v63, %v13309_v29  ;;  %v14824_v33 = vld [vmem:[#allocation6 + $0x424] sm:$0xf]  ;;  %v13012_v2 = vor.u32 %v14755_v44, %v13011_v9  ;;  %v14787_v24 = vld [vmem:[#allocation6 + $0x2f4] sm:$0xf0] }
 0x836   : > { %v13021_v15 = vld [vmem:[#allocation6 + $0x210] sm:$0xf0]  ;;  %v13440_v30 = vor.u32 %v14860_v28, %v13437_v48  ;;  %v14856_v59 = vld [vmem:[#allocation6 + $0x524] sm:$0xf]  ;;  %v14819_v50 = vld [vmem:[#allocation6 + $0x3f4] sm:$0xf0] }
 0x837   : > { %v13149_v8 = vld [vmem:[#allocation6 + $0x310] sm:$0xf0]  ;;  %v13024_v6 = vor.u32 %v14756_v27, %v13021_v15  ;;  %v14820_v34 = vld [vmem:[#allocation6 + $0x404] sm:$0xf]  ;;  %v13268_v7 = vor.u32 %v14819_v50, %v13267_v14  ;;  %v12979_v36 = vld [vmem:[#allocation6 + $0x1a8] sm:$0xf] }
 0x838   : > { %8598 = vmatpush.bf16.msra.mxu0 %v13360_v45  ;;  %8582 = vmatpush.bf16.msra.mxu3 %v13200_v47  ;;  %v13293_v57 = vld [vmem:[#allocation6 + $0x430] sm:$0xf0]  ;;  %v12883_v45 = vld [vmem:[#allocation6 + $0xe8] sm:$0xf]  ;;  %v13152_v40 = vor.u32 %v14788_v20, %v13149_v8  ;;  %v14852_v13 = vld [vmem:[#allocation6 + $0x504] sm:$0xf] }
 0x839   : > { %8617 = vmatpush.bf16.msra.mxu1 %v13472_v0  ;;  %8566 = vmatpush.bf16.msra.mxu2 %v13040_v1  ;;  %v13421_v54 = vld [vmem:[#allocation6 + $0x530] sm:$0xf0]  ;;  %v12884_v61 = vor.u32 %v14723_v11, %v12883_v45  ;;  %v13296_v37 = vor.u32 %v14824_v33, %v13293_v57  ;;  %v12995_v47 = vld [vmem:[#allocation6 + $0x1c8] sm:$0xf]  ;;  %v14747_v46 = vld [vmem:[#allocation6 + $0x1b4] sm:$0xf0] }
 0x83a   : > { %v13277_v22 = vld [vmem:[#allocation6 + $0x410] sm:$0xf0]  ;;  %v13424_v53 = vor.u32 %v14856_v59, %v13421_v54  ;;  %v13139_v0 = vld [vmem:[#allocation6 + $0x2e8] sm:$0xf]  ;;  %v12980_v63 = vor.u32 %v14747_v46, %v12979_v36  ;;  %v14815_v29 = vld [vmem:[#allocation6 + $0x3d4] sm:$0xf0] }
 0x83b   : > { %8465 = vmatmul.bf16.gmra.mxu0 %v20753_v4  ;;  %8483 = vmatmul.bf16.gmra.mxu1 %v20756_v5  ;;  %v13405_v43 = vld [vmem:[#allocation6 + $0x510] sm:$0xf0]  ;;  %v13280_v26 = vor.u32 %v14820_v34, %v13277_v22  ;;  %v13140_v38 = vor.u32 %v14787_v24, %v13139_v0  ;;  %v13123_v31 = vld [vmem:[#allocation6 + $0x2c8] sm:$0xf]  ;;  %v14711_v15 = vld [vmem:[#allocation6 + $0x94] sm:$0xf0] }
 0x83c   : > { %8599 = vmatpush.bf16.msra.mxu0 %v13344_v62  ;;  %8583 = vmatpush.bf16.msra.mxu3 %v13184_v58  ;;  %v14751_v62 = vld [vmem:[#allocation6 + $0x1d4] sm:$0xf0]  ;;  %v13408_v55 = vor.u32 %v14852_v13, %v13405_v43  ;;  %v12851_v58 = vld [vmem:[#allocation6 + $0xa8] sm:$0xf] }
 0x83d   : > { %8618 = vmatpush.bf16.msra.mxu1 %v13456_v56  ;;  %8567 = vmatpush.bf16.msra.mxu2 %v13024_v6  ;;  %v12996_v39 = vor.u32 %v14751_v62, %v12995_v47  ;;  %v14783_v56 = vld [vmem:[#allocation6 + $0x2d4] sm:$0xf0]  ;;  %v13251_v1 = vld [vmem:[#allocation6 + $0x3c8] sm:$0xf] }
 0x83e   : > { %8496 = vmatmul.bf16.vlgmr.msrb.gmra.mxu2 %v20762_v18  ;;  %8514 = vmatmul.bf16.vlgmr.msrb.gmra.mxu3 %v20766_v35  ;;  %v13124_v28 = vor.u32 %v14783_v56, %v13123_v31  ;;  %v13252_v48 = vor.u32 %v14815_v29, %v13251_v1  ;;  %v12835_v27 = vld [vmem:[#allocation6 + $0x88] sm:$0xf]  ;;  %v14743_v20 = vld [vmem:[#allocation6 + $0x194] sm:$0xf0] }
 0x83f   : > { %v13107_v8 = vld [vmem:[#allocation6 + $0x2a8] sm:$0xf]  ;;  %v14779_v33 = vld [vmem:[#allocation6 + $0x2b4] sm:$0xf0] }
 0x840   : > { %8600 = vmatpush.bf16.msra.mxu0 %v13328_v32  ;;  %8584 = vmatpush.bf16.msra.mxu3 %v13168_v16  ;;  %v14715_v32 = vld [vmem:[#allocation6 + $0xb4] sm:$0xf0]  ;;  %v12963_v16 = vld [vmem:[#allocation6 + $0x188] sm:$0xf]  ;;  %v13108_v9 = vor.u32 %v14779_v33, %v13107_v8 }
 0x841   : > { %8619 = vmatpush.bf16.msra.mxu1 %v13440_v30  ;;  %8632 = vmatpush.bf16.msrb.mxu2 %v12884_v61  ;;  %v12852_v49 = vor.u32 %v14715_v32, %v12851_v58  ;;  %v13235_v57 = vld [vmem:[#allocation6 + $0x3a8] sm:$0xf]  ;;  %v14811_v45 = vld [vmem:[#allocation6 + $0x3b4] sm:$0xf0]  ;;  %v12964_v6 = vor.u32 %v14743_v20, %v12963_v16 }
 0x842   : > { %v12819_v30 = vld [vmem:[#allocation6 + $0x68] sm:$0xf]  ;;  %v14707_v11 = vld [vmem:[#allocation6 + $0x74] sm:$0xf0]  ;;  %v13236_v44 = vor.u32 %v14811_v45, %v13235_v57 }
 0x843   : > { %v12947_v59 = vld [vmem:[#allocation6 + $0x168] sm:$0xf]  ;;  %v14739_v54 = vld [vmem:[#allocation6 + $0x174] sm:$0xf0]  ;;  %v12820_v61 = vor.u32 %v14707_v11, %v12819_v30 }
 0x844   : > { %8601 = vmatpush.bf16.msra.mxu0 %v13312_v12  ;;  %8585 = vmatpush.bf16.msra.mxu3 %v13152_v40  ;;  %v12836_v12 = vor.u32 %v14711_v15, %v12835_v27  ;;  %v13091_v40 = vld [vmem:[#allocation6 + $0x288] sm:$0xf]  ;;  %v12948_v22 = vor.u32 %v14739_v54, %v12947_v59  ;;  %v14703_v17 = vld [vmem:[#allocation6 + $0x54] sm:$0xf0] }
 0x845   : > { %8620 = vmatpush.bf16.msra.mxu1 %v13424_v53  ;;  %8633 = vmatpush.bf16.msrb.mxu2 %v12868_v51  ;;  %v13219_v34 = vld [vmem:[#allocation6 + $0x388] sm:$0xf]  ;;  %v14735_v13 = vld [vmem:[#allocation6 + $0x154] sm:$0xf0] }
 0x846   : > { %v12803_v19 = vld [vmem:[#allocation6 + $0x48] sm:$0xf]  ;;  %v14803_v24 = vld [vmem:[#allocation6 + $0x374] sm:$0xf0] }
 0x847   : > { %v12931_v53 = vld [vmem:[#allocation6 + $0x148] sm:$0xf]  ;;  %v12804_v62 = vor.u32 %v14703_v17, %v12803_v19  ;;  %v14731_v32 = vld [vmem:[#allocation6 + $0x134] sm:$0xf0] }
 0x848   : > { %8602 = vmatpush.bf16.msra.mxu0 %v13296_v37  ;;  %8650 = vmatpush.bf16.msrb.mxu3 %v13012_v2  ;;  %v14775_v37 = vld [vmem:[#allocation6 + $0x294] sm:$0xf0]  ;;  %v13075_v51 = vld [vmem:[#allocation6 + $0x268] sm:$0xf] }
 0x849   : > { %8621 = vmatpush.bf16.msra.mxu1 %v13408_v55  ;;  %8634 = vmatpush.bf16.msrb.mxu2 %v12852_v49  ;;  %v14807_v2 = vld [vmem:[#allocation6 + $0x394] sm:$0xf0]  ;;  %v13092_v43 = vor.u32 %v14775_v37, %v13091_v40  ;;  %v12787_v14 = vld [vmem:[#allocation6 + $0x28] sm:$0xf] }
 0x84a   : > { %v13220_v47 = vor.u32 %v14807_v2, %v13219_v34  ;;  %v14771_v55 = vld [vmem:[#allocation6 + $0x274] sm:$0xf0]  ;;  %v12915_v58 = vld [vmem:[#allocation6 + $0x128] sm:$0xf] }
 0x84b   : > { %8532 = vmatmul.bf16.vlgmr.msrb.gmra.mxu0 %v20697_v3  ;;  %8550 = vmatmul.bf16.vlgmr.msrb.gmra.mxu1 %v20700_v52  ;;  %v13076_v0 = vor.u32 %v14771_v55, %v13075_v51  ;;  %v12916_v36 = vor.u32 %v14731_v32, %v12915_v58  ;;  %v14767_v46 = vld [vmem:[#allocation6 + $0x254] sm:$0xf0]  ;;  %v13187_v31 = vld [vmem:[#allocation6 + $0x348] sm:$0xf]  ;;  %v13013_v55 = vld [vmem:[#allocation6 + $0x1f8] sm:$0xf0] }
 0x84c   : > { %8603 = vmatpush.bf16.msra.mxu0 %v13280_v26  ;;  %8651 = vmatpush.bf16.msrb.mxu3 %v12996_v39  ;;  %v12932_v26 = vor.u32 %v14735_v13, %v12931_v53  ;;  %v13203_v39 = vld [vmem:[#allocation6 + $0x368] sm:$0xf]  ;;  %v14695_v1 = vld [vmem:[#allocation6 + $0x14] sm:$0xf0] }
 0x84d   : > { %8686 = vmatpush.bf16.msrb.mxu1 %v13268_v7  ;;  %8635 = vmatpush.bf16.msrb.mxu2 %v12836_v12  ;;  %v13204_v50 = vor.u32 %v14803_v24, %v13203_v39  ;;  %v13059_v7 = vld [vmem:[#allocation6 + $0x248] sm:$0xf]  ;;  %v14727_v27 = vld [vmem:[#allocation6 + $0x114] sm:$0xf0] }
 0x84e   : > { %8501 = vmatmul.bf16.gmra.mxu2 %v20748_v41  ;;  %8519 = vmatmul.bf16.gmra.mxu3 %v20750_v42  ;;  %v12771_v56 = vld [vmem:[#allocation6 + $0x8] sm:$0xf]  ;;  %v14763_v16 = vld [vmem:[#allocation6 + $0x234] sm:$0xf0] }
 0x84f   : > { %v12899_v29 = vld [vmem:[#allocation6 + $0x108] sm:$0xf]  ;;  %v14795_v20 = vld [vmem:[#allocation6 + $0x334] sm:$0xf0]  ;;  %v12772_v33 = vor.u32 %v14695_v1, %v12771_v56 }
 0x850   : > { %8668 = vmatpush.bf16.msrb.mxu0 %v13140_v38  ;;  %8652 = vmatpush.bf16.msrb.mxu3 %v12980_v63  ;;  %v14699_v38 = vld [vmem:[#allocation6 + $0x34] sm:$0xf0]  ;;  %v13043_v15 = vld [vmem:[#allocation6 + $0x228] sm:$0xf]  ;;  %v12900_v57 = vor.u32 %v14727_v27, %v12899_v29  ;;  %v14745_v27 = vld [vmem:[#allocation6 + $0x1ac] sm:$0xf] }
 0x851   : > { %8687 = vmatpush.bf16.msrb.mxu1 %v13252_v48  ;;  %8636 = vmatpush.bf16.msrb.mxu2 %v12820_v61  ;;  %v12788_v49 = vor.u32 %v14699_v38, %v12787_v14  ;;  %v14799_v63 = vld [vmem:[#allocation6 + $0x354] sm:$0xf0]  ;;  %v13171_v12 = vld [vmem:[#allocation6 + $0x328] sm:$0xf] }
 0x852   : > { %v13188_v48 = vor.u32 %v14799_v63, %v13187_v31  ;;  %v13395_v8 = vld [vmem:[#allocation6 + $0x4e8] sm:$0xf]  ;;  %v14851_v45 = vld [vmem:[#allocation6 + $0x4f4] sm:$0xf0]  ;;  %v13172_v59 = vor.u32 %v14795_v20, %v13171_v12 }
 0x853   : > { %v13523_v30 = vld [vmem:[#allocation6 + $0x5e8] sm:$0xf]  ;;  %v13396_v11 = vor.u32 %v14851_v45, %v13395_v8  ;;  %v14759_v61 = vld [vmem:[#allocation6 + $0x214] sm:$0xf0] }
 0x854   : > { %8669 = vmatpush.bf16.msrb.mxu0 %v13124_v28  ;;  %8653 = vmatpush.bf16.msrb.mxu3 %v12964_v6  ;;  %v13060_v28 = vor.u32 %v14767_v46, %v13059_v7  ;;  %v14883_v6 = vld [vmem:[#allocation6 + $0x5f4] sm:$0xf0]  ;;  %v13027_v54 = vld [vmem:[#allocation6 + $0x208] sm:$0xf]  ;;  %v12869_v7 = vld [vmem:[#allocation6 + $0xd8] sm:$0xf0] }
 0x855   : > { %8688 = vmatpush.bf16.msrb.mxu1 %v13236_v44  ;;  %8637 = vmatpush.bf16.msrb.mxu2 %v12804_v62  ;;  %v13044_v44 = vor.u32 %v14763_v16, %v13043_v15  ;;  %v13155_v40 = vld [vmem:[#allocation6 + $0x308] sm:$0xf]  ;;  %v14791_v37 = vld [vmem:[#allocation6 + $0x314] sm:$0xf0]  ;;  %v13028_v17 = vor.u32 %v14759_v61, %v13027_v54  ;;  %v12885_v62 = vld [vmem:[#allocation6 + $0xf8] sm:$0xf0] }
 0x856   : > { %v13379_v34 = vld [vmem:[#allocation6 + $0x4c8] sm:$0xf]  ;;  %v14847_v2 = vld [vmem:[#allocation6 + $0x4d4] sm:$0xf0]  ;;  %v13156_v53 = vor.u32 %v14791_v37, %v13155_v40  ;;  %v12981_v15 = vld [vmem:[#allocation6 + $0x1b8] sm:$0xf0] }
 0x857   : > { %v14879_v19 = vld [vmem:[#allocation6 + $0x5d4] sm:$0xf0]  ;;  %v13380_v13 = vor.u32 %v14847_v2, %v13379_v34  ;;  %v13363_v39 = vld [vmem:[#allocation6 + $0x4a8] sm:$0xf] }
 0x858   : > { %8670 = vmatpush.bf16.msrb.mxu0 %v13108_v9  ;;  %8654 = vmatpush.bf16.msrb.mxu3 %v12948_v22  ;;  %v13524_v9 = vor.u32 %v14883_v6, %v13523_v30  ;;  %v13507_v22 = vld [vmem:[#allocation6 + $0x5c8] sm:$0xf]  ;;  %v14875_v38 = vld [vmem:[#allocation6 + $0x5b4] sm:$0xf0]  ;;  %v14709_v6 = vld [vmem:[#allocation6 + $0x8c] sm:$0xf] }
 0x859   : > { %8689 = vmatpush.bf16.msrb.mxu1 %v13220_v47  ;;  %8638 = vmatpush.bf16.msrb.mxu2 %v12788_v49  ;;  %v14721_v47 = vld [vmem:[#allocation6 + $0xec] sm:$0xf]  ;;  %v13491_v14 = vld [vmem:[#allocation6 + $0x5a8] sm:$0xf]  ;;  %v14839_v56 = vld [vmem:[#allocation6 + $0x494] sm:$0xf0] }
 0x85a   : > { %v12888_v51 = vor.u32 %v14721_v47, %v12885_v62  ;;  %v13492_v32 = vor.u32 %v14875_v38, %v13491_v14  ;;  %v14749_v49 = vld [vmem:[#allocation6 + $0x1cc] sm:$0xf]  ;;  %v13347_v63 = vld [vmem:[#allocation6 + $0x488] sm:$0xf]  ;;  %v14871_v29 = vld [vmem:[#allocation6 + $0x594] sm:$0xf0] }
 0x85b   : > { %8537 = vmatmul.bf16.gmra.mxu0 %v20736_v25  ;;  %8555 = vmatmul.bf16.gmra.mxu1 %v20738_v21  ;;  %v13475_v1 = vld [vmem:[#allocation6 + $0x588] sm:$0xf]  ;;  %v13348_v16 = vor.u32 %v14839_v56, %v13347_v63  ;;  %v14867_v30 = vld [vmem:[#allocation6 + $0x574] sm:$0xf0]  ;;  %v12949_v62 = vld [vmem:[#allocation6 + $0x178] sm:$0xf0] }
 0x85c   : > { %8671 = vmatpush.bf16.msrb.mxu0 %v13092_v43  ;;  %8655 = vmatpush.bf16.msrb.mxu3 %v12932_v26  ;;  %v13508_v43 = vor.u32 %v14879_v19, %v13507_v22  ;;  %v14753_v26 = vld [vmem:[#allocation6 + $0x1ec] sm:$0xf]  ;;  %v13476_v12 = vor.u32 %v14871_v29, %v13475_v1  ;;  %v13331_v20 = vld [vmem:[#allocation6 + $0x468] sm:$0xf]  ;;  %v14831_v40 = vld [vmem:[#allocation6 + $0x454] sm:$0xf0] }
 0x85d   : > { %8690 = vmatpush.bf16.msrb.mxu1 %v13204_v50  ;;  %8639 = vmatpush.bf16.msrb.mxu2 %v12772_v33  ;;  %v13016_v24 = vor.u32 %v14753_v26, %v13013_v55  ;;  %v14717_v50 = vld [vmem:[#allocation6 + $0xcc] sm:$0xf]  ;;  %v12984_v33 = vor.u32 %v14745_v27, %v12981_v15  ;;  %v13459_v45 = vld [vmem:[#allocation6 + $0x568] sm:$0xf]  ;;  %v14863_v34 = vld [vmem:[#allocation6 + $0x554] sm:$0xf0] }
 0x85e   : > { %8568 = vmatmul.bf16.vlgmr.msra.gmra.mxu2 %v20728_v60  ;;  %8586 = vmatmul.bf16.vlgmr.msra.gmra.mxu3 %v20732_v23  ;;  %v12872_v46 = vor.u32 %v14717_v50, %v12869_v7  ;;  %v13460_v54 = vor.u32 %v14867_v30, %v13459_v45  ;;  %v13315_v61 = vld [vmem:[#allocation6 + $0x448] sm:$0xf]  ;;  %v12805_v50 = vld [vmem:[#allocation6 + $0x58] sm:$0xf0]  ;;  %v14855_v63 = vld [vmem:[#allocation6 + $0x514] sm:$0xf0] }
 0x85f   : > { %v13443_v37 = vld [vmem:[#allocation6 + $0x548] sm:$0xf]  ;;  %v13316_v19 = vor.u32 %v14831_v40, %v13315_v61  ;;  %v14697_v56 = vld [vmem:[#allocation6 + $0x2c] sm:$0xf]  ;;  %v12789_v1 = vld [vmem:[#allocation6 + $0x38] sm:$0xf0] }
 0x860   : > { %8672 = vmatpush.bf16.msrb.mxu0 %v13076_v0  ;;  %8656 = vmatpush.bf16.msrb.mxu3 %v12916_v36  ;;  %v14843_v0 = vld [vmem:[#allocation6 + $0x4b4] sm:$0xf0]  ;;  %v12997_v36 = vld [vmem:[#allocation6 + $0x1d8] sm:$0xf0]  ;;  %v13299_v26 = vld [vmem:[#allocation6 + $0x428] sm:$0xf] }
 0x861   : > { %8691 = vmatpush.bf16.msrb.mxu1 %v13188_v48  ;;  %8704 = vmatpush.bf16.msra.mxu2 %v13396_v11  ;;  %v13364_v58 = vor.u32 %v14843_v0, %v13363_v39  ;;  %v13000_v31 = vor.u32 %v14749_v49, %v12997_v36  ;;  %v12853_v48 = vld [vmem:[#allocation6 + $0xb8] sm:$0xf0]  ;;  %v13427_v39 = vld [vmem:[#allocation6 + $0x528] sm:$0xf]  ;;  %v14859_v0 = vld [vmem:[#allocation6 + $0x534] sm:$0xf0] }
 0x862   : > { %v12837_v11 = vld [vmem:[#allocation6 + $0x98] sm:$0xf0]  ;;  %v13428_v38 = vor.u32 %v14859_v0, %v13427_v39  ;;  %v13283_v7 = vld [vmem:[#allocation6 + $0x408] sm:$0xf]  ;;  %v14823_v49 = vld [vmem:[#allocation6 + $0x414] sm:$0xf0] }
 0x863   : > { %v12840_v2 = vor.u32 %v14709_v6, %v12837_v11  ;;  %v13411_v36 = vld [vmem:[#allocation6 + $0x508] sm:$0xf]  ;;  %v14729_v29 = vld [vmem:[#allocation6 + $0x12c] sm:$0xf]  ;;  %v13284_v27 = vor.u32 %v14823_v49, %v13283_v7  ;;  %v13125_v6 = vld [vmem:[#allocation6 + $0x2d8] sm:$0xf0] }
 0x864   : > { %8673 = vmatpush.bf16.msrb.mxu0 %v13060_v28  ;;  %8657 = vmatpush.bf16.msrb.mxu3 %v12900_v57  ;;  %v14713_v28 = vld [vmem:[#allocation6 + $0xac] sm:$0xf]  ;;  %v14835_v57 = vld [vmem:[#allocation6 + $0x474] sm:$0xf0]  ;;  %v13412_v15 = vor.u32 %v14855_v63, %v13411_v36  ;;  %v13365_v63 = vld [vmem:[#allocation6 + $0x4b8] sm:$0xf0] }
 0x865   : > { %8692 = vmatpush.bf16.msrb.mxu1 %v13172_v59  ;;  %8705 = vmatpush.bf16.msra.mxu2 %v13380_v13  ;;  %v12856_v8 = vor.u32 %v14713_v28, %v12853_v48  ;;  %v13332_v59 = vor.u32 %v14835_v57, %v13331_v20  ;;  %v12821_v13 = vld [vmem:[#allocation6 + $0x78] sm:$0xf0]  ;;  %v14785_v48 = vld [vmem:[#allocation6 + $0x2ec] sm:$0xf]  ;;  %v12792_v57 = vor.u32 %v14697_v56, %v12789_v1 }
 0x866   : > { %v12917_v28 = vld [vmem:[#allocation6 + $0x138] sm:$0xf0]  ;;  %v14781_v30 = vld [vmem:[#allocation6 + $0x2cc] sm:$0xf] }
 0x867   : > { %v13269_v20 = vld [vmem:[#allocation6 + $0x3f8] sm:$0xf0]  ;;  %v12920_v45 = vor.u32 %v14729_v29, %v12917_v28  ;;  %v14813_v11 = vld [vmem:[#allocation6 + $0x3cc] sm:$0xf] }
 0x868   : > { %8722 = vmatpush.bf16.msra.mxu3 %v13524_v9  ;;  %8674 = vmatpush.bf16.msrb.mxu0 %v13044_v44  ;;  %v14741_v9 = vld [vmem:[#allocation6 + $0x18c] sm:$0xf]  ;;  %v12965_v44 = vld [vmem:[#allocation6 + $0x198] sm:$0xf0] }
 0x869   : > { %8693 = vmatpush.bf16.msrb.mxu1 %v13156_v53  ;;  %8706 = vmatpush.bf16.msra.mxu2 %v13364_v58  ;;  %v12968_v22 = vor.u32 %v14741_v9, %v12965_v44  ;;  %v14705_v53 = vld [vmem:[#allocation6 + $0x6c] sm:$0xf]  ;;  %v13128_v9 = vor.u32 %v14781_v30, %v13125_v6  ;;  %v13253_v44 = vld [vmem:[#allocation6 + $0x3d8] sm:$0xf0] }
 0x86a   : > { %v12824_v47 = vor.u32 %v14705_v53, %v12821_v13  ;;  %v14733_v58 = vld [vmem:[#allocation6 + $0x14c] sm:$0xf]  ;;  %v13256_v40 = vor.u32 %v14813_v11, %v13253_v44  ;;  %v13525_v13 = vld [vmem:[#allocation6 + $0x5f8] sm:$0xf0] }
 0x86b   : > { %8604 = vmatmul.bf16.vlgmr.msra.gmra.mxu0 %v20762_v18  ;;  %8622 = vmatmul.bf16.vlgmr.msra.gmra.mxu1 %v20766_v35  ;;  %v14725_v61 = vld [vmem:[#allocation6 + $0x10c] sm:$0xf]  ;;  %v13493_v29 = vld [vmem:[#allocation6 + $0x5b8] sm:$0xf0] }
 0x86c   : > { %8675 = vmatpush.bf16.msrb.mxu0 %v13028_v17  ;;  %8723 = vmatpush.bf16.msra.mxu3 %v13508_v43  ;;  %v13444_v17 = vor.u32 %v14863_v34, %v13443_v37  ;;  %v14737_v43 = vld [vmem:[#allocation6 + $0x16c] sm:$0xf]  ;;  %v12901_v34 = vld [vmem:[#allocation6 + $0x118] sm:$0xf0] }
 0x86d   : > { %8758 = vmatpush.bf16.msra.mxu1 %v13016_v24  ;;  %8707 = vmatpush.bf16.msra.mxu2 %v13348_v16  ;;  %v12952_v55 = vor.u32 %v14737_v43, %v12949_v62  ;;  %v14701_v24 = vld [vmem:[#allocation6 + $0x4c] sm:$0xf]  ;;  %v13141_v16 = vld [vmem:[#allocation6 + $0x2f8] sm:$0xf0] }
 0x86e   : > { %8573 = vmatmul.bf16.gmra.mxu2 %v20753_v4  ;;  %8591 = vmatmul.bf16.gmra.mxu3 %v20756_v5  ;;  %v14881_v53 = vld [vmem:[#allocation6 + $0x5ec] sm:$0xf]  ;;  %v13109_v62 = vld [vmem:[#allocation6 + $0x2b8] sm:$0xf0] }
 0x86f   : > { %v14777_v43 = vld [vmem:[#allocation6 + $0x2ac] sm:$0xf] }
 0x870   : > { %8740 = vmatpush.bf16.msra.mxu0 %v12888_v51  ;;  %8724 = vmatpush.bf16.msra.mxu3 %v13492_v32  ;;  %v14827_v51 = vld [vmem:[#allocation6 + $0x434] sm:$0xf0]  ;;  %v12933_v32 = vld [vmem:[#allocation6 + $0x158] sm:$0xf0]  ;;  %v14773_v0 = vld [vmem:[#allocation6 + $0x28c] sm:$0xf] }
 0x871   : > { %8759 = vmatpush.bf16.msra.mxu1 %v13000_v31  ;;  %8708 = vmatpush.bf16.msra.mxu2 %v13332_v59  ;;  %v13300_v14 = vor.u32 %v14827_v51, %v13299_v26  ;;  %v12936_v31 = vor.u32 %v14733_v58, %v12933_v32  ;;  %v14693_v59 = vld [vmem:[#allocation6 + $0xc] sm:$0xf]  ;;  %v13237_v51 = vld [vmem:[#allocation6 + $0x3b8] sm:$0xf0] }
 0x872   : > { %v14809_v26 = vld [vmem:[#allocation6 + $0x3ac] sm:$0xf]  ;;  %v13381_v32 = vld [vmem:[#allocation6 + $0x4d8] sm:$0xf0] }
 0x873   : > { %v13240_v39 = vor.u32 %v14809_v26, %v13237_v51  ;;  %v14845_v58 = vld [vmem:[#allocation6 + $0x4cc] sm:$0xf] }
 0x874   : > { %8741 = vmatpush.bf16.msra.mxu0 %v12872_v46  ;;  %8725 = vmatpush.bf16.msra.mxu3 %v13476_v12  ;;  %v12808_v46 = vor.u32 %v14701_v24, %v12805_v50  ;;  %v14817_v12 = vld [vmem:[#allocation6 + $0x3ec] sm:$0xf]  ;;  %v13093_v24 = vld [vmem:[#allocation6 + $0x298] sm:$0xf0]  ;;  %v13384_v36 = vor.u32 %v14845_v58, %v13381_v32 }
 0x875   : > { %8760 = vmatpush.bf16.msra.mxu1 %v12984_v33  ;;  %8709 = vmatpush.bf16.msra.mxu2 %v13316_v19  ;;  %v13272_v33 = vor.u32 %v14817_v12, %v13269_v20  ;;  %v12904_v19 = vor.u32 %v14725_v61, %v12901_v34  ;;  %v13221_v50 = vld [vmem:[#allocation6 + $0x398] sm:$0xf0]  ;;  %v14877_v7 = vld [vmem:[#allocation6 + $0x5cc] sm:$0xf]  ;;  %v20790_v12 = vld [vmem:[#allocation14] sm:$0xf] }
 0x876   : > { %v14873_v1 = vld [vmem:[#allocation6 + $0x5ac] sm:$0xf]  ;;  %v20793_v6 = vperm.slane %v20790_v12, 0  ;;  %v13445_v58 = vld [vmem:[#allocation6 + $0x558] sm:$0xf0] }
 0x877   : > { %v14769_v28 = vld [vmem:[#allocation6 + $0x26c] sm:$0xf] }
 0x878   : > { %8742 = vmatpush.bf16.msra.mxu0 %v12856_v8  ;;  %8726 = vmatpush.bf16.msra.mxu3 %v13460_v54  ;;  %v13144_v8 = vor.u32 %v14785_v48, %v13141_v16  ;;  %v12773_v54 = vld [vmem:[#allocation6 + $0x18] sm:$0xf0]  ;;  %v14797_v30 = vld [vmem:[#allocation6 + $0x34c] sm:$0xf] }
 0x879   : > { %8761 = vmatpush.bf16.msra.mxu1 %v12968_v22  ;;  %8710 = vmatpush.bf16.msra.mxu2 %v13300_v14  ;;  %v12776_v37 = vor.u32 %v14693_v59, %v12773_v54  ;;  %v13397_v22 = vld [vmem:[#allocation6 + $0x4f8] sm:$0xf0]  ;;  %v14805_v14 = vld [vmem:[#allocation6 + $0x38c] sm:$0xf] }
 0x87a   : > { %v13224_v49 = vor.u32 %v14805_v14, %v13221_v50  ;;  %v13205_v16 = vld [vmem:[#allocation6 + $0x378] sm:$0xf0]  ;;  %v14837_v44 = vld [vmem:[#allocation6 + $0x48c] sm:$0xf] }
 0x87b   : > { %8609 = vmatmul.bf16.gmra.mxu0 %v20748_v41  ;;  %8627 = vmatmul.bf16.gmra.mxu1 %v20750_v42  ;;  %v13349_v59 = vld [vmem:[#allocation6 + $0x498] sm:$0xf0]  ;;  %v14869_v54 = vld [vmem:[#allocation6 + $0x58c] sm:$0xf] }
 0x87c   : > { %8743 = vmatpush.bf16.msra.mxu0 %v12840_v2  ;;  %8727 = vmatpush.bf16.msra.mxu3 %v13444_v17  ;;  %v14849_v2 = vld [vmem:[#allocation6 + $0x4ec] sm:$0xf]  ;;  %v13317_v14 = vld [vmem:[#allocation6 + $0x458] sm:$0xf0] }
 0x87d   : > { %8762 = vmatpush.bf16.msra.mxu1 %v12952_v55  ;;  %8711 = vmatpush.bf16.msra.mxu2 %v13284_v27  ;;  %v13400_v17 = vor.u32 %v14849_v2, %v13397_v22  ;;  %v13112_v55 = vor.u32 %v14777_v43, %v13109_v62  ;;  %v13077_v27 = vld [vmem:[#allocation6 + $0x278] sm:$0xf0]  ;;  %v14833_v34 = vld [vmem:[#allocation6 + $0x46c] sm:$0xf] }
 0x87e   : > { %8640 = vmatmul.bf16.vlgmr.msrb.gmra.mxu2 %v20697_v3  ;;  %8658 = vmatmul.bf16.vlgmr.msrb.gmra.mxu3 %v20700_v52  ;;  %v13080_v20 = vor.u32 %v14769_v28, %v13077_v27  ;;  %v13333_v2 = vld [vmem:[#allocation6 + $0x478] sm:$0xf0]  ;;  %v14757_v32 = vld [vmem:[#allocation6 + $0x20c] sm:$0xf] }
 0x87f   : > { %v13045_v43 = vld [vmem:[#allocation6 + $0x238] sm:$0xf0] }
 0x880   : > { %8744 = vmatpush.bf16.msra.mxu0 %v12824_v47  ;;  %8728 = vmatpush.bf16.msra.mxu3 %v13428_v38  ;;  %v13528_v47 = vor.u32 %v14881_v53, %v13525_v13  ;;  %v13096_v38 = vor.u32 %v14773_v0, %v13093_v24  ;;  %v14761_v53 = vld [vmem:[#allocation6 + $0x22c] sm:$0xf]  ;;  %v13336_v13 = vor.u32 %v14833_v34, %v13333_v2  ;;  %v13173_v62 = vld [vmem:[#allocation6 + $0x338] sm:$0xf0] }
 0x881   : > { %8763 = vmatpush.bf16.msra.mxu1 %v12936_v31  ;;  %8776 = vmatpush.bf16.msrb.mxu2 %v13144_v8  ;;  %v14841_v31 = vld [vmem:[#allocation6 + $0x4ac] sm:$0xf]  ;;  %v13048_v26 = vor.u32 %v14761_v53, %v13045_v43  ;;  %v13429_v27 = vld [vmem:[#allocation6 + $0x538] sm:$0xf0] }
 0x882   : > { %v13368_v48 = vor.u32 %v14841_v31, %v13365_v63  ;;  %v14829_v24 = vld [vmem:[#allocation6 + $0x44c] sm:$0xf]  ;;  %v13157_v31 = vld [vmem:[#allocation6 + $0x318] sm:$0xf0] }
 0x884   : > { %8745 = vmatpush.bf16.msra.mxu0 %v12808_v46  ;;  %8729 = vmatpush.bf16.msra.mxu3 %v13412_v15  ;;  %v13509_v46 = vld [vmem:[#allocation6 + $0x5d8] sm:$0xf0]  ;;  %v14801_v15 = vld [vmem:[#allocation6 + $0x36c] sm:$0xf] }
 0x885   : > { %8764 = vmatpush.bf16.msra.mxu1 %v12920_v45  ;;  %8777 = vmatpush.bf16.msrb.mxu2 %v13128_v9  ;;  %v13512_v56 = vor.u32 %v14877_v7, %v13509_v46  ;;  %v13208_v8 = vor.u32 %v14801_v15, %v13205_v16  ;;  %v13061_v45 = vld [vmem:[#allocation6 + $0x258] sm:$0xf0]  ;;  %v14789_v46 = vld [vmem:[#allocation6 + $0x30c] sm:$0xf] }
 0x886   : > { %v13189_v9 = vld [vmem:[#allocation6 + $0x358] sm:$0xf0] }
 0x887   : > { %v13192_v61 = vor.u32 %v14797_v30, %v13189_v9  ;;  %v13029_v7 = vld [vmem:[#allocation6 + $0x218] sm:$0xf0] }
 0x888   : > { %8794 = vmatpush.bf16.msrb.mxu3 %v13272_v33  ;;  %8746 = vmatpush.bf16.msra.mxu0 %v12792_v57  ;;  %v13496_v33 = vor.u32 %v14873_v1, %v13493_v29  ;;  %v14765_v57 = vld [vmem:[#allocation6 + $0x24c] sm:$0xf]  ;;  %v13301_v29 = vld [vmem:[#allocation6 + $0x438] sm:$0xf0] }
 0x889   : > { %8765 = vmatpush.bf16.msra.mxu1 %v12904_v19  ;;  %8778 = vmatpush.bf16.msrb.mxu2 %v13112_v55  ;;  %v13064_v11 = vor.u32 %v14765_v57, %v13061_v45  ;;  %v14865_v19 = vld [vmem:[#allocation6 + $0x56c] sm:$0xf]  ;;  %v13285_v9 = vld [vmem:[#allocation6 + $0x418] sm:$0xf0] }
 0x88a   : > { %v14825_v1 = vld [vmem:[#allocation6 + $0x42c] sm:$0xf] }
 0x88b   : > { %8676 = vmatmul.bf16.vlgmr.msrb.gmra.mxu0 %v20728_v60  ;;  %8694 = vmatmul.bf16.vlgmr.msrb.gmra.mxu1 %v20732_v23  ;;  %v13304_v15 = vor.u32 %v14825_v1, %v13301_v29 }
 0x88c   : > { %8747 = vmatpush.bf16.msra.mxu0 %v12776_v37  ;;  %8795 = vmatpush.bf16.msrb.mxu3 %v13256_v40  ;;  %v13352_v40 = vor.u32 %v14837_v44, %v13349_v59  ;;  %v13477_v37 = vld [vmem:[#allocation6 + $0x598] sm:$0xf0]  ;;  %v14853_v44 = vld [vmem:[#allocation6 + $0x50c] sm:$0xf] }
 0x88d   : > { %8830 = vmatpush.bf16.msrb.mxu1 %v13528_v47  ;;  %8779 = vmatpush.bf16.msrb.mxu2 %v13096_v38  ;;  %v13480_v22 = vor.u32 %v14869_v54, %v13477_v37  ;;  %v14793_v47 = vld [vmem:[#allocation6 + $0x32c] sm:$0xf]  ;;  %v13413_v54 = vld [vmem:[#allocation6 + $0x518] sm:$0xf0] }
 0x88e   : > { %8645 = vmatmul.bf16.gmra.mxu2 %v20736_v25  ;;  %8663 = vmatmul.bf16.gmra.mxu3 %v20738_v21  ;;  %v13176_v51 = vor.u32 %v14793_v47, %v13173_v62  ;;  %v14861_v38 = vld [vmem:[#allocation6 + $0x54c] sm:$0xf] }
 0x88f   : > { %v13448_v28 = vor.u32 %v14861_v38, %v13445_v58 }
 0x890   : > { %8812 = vmatpush.bf16.msrb.mxu0 %v13400_v17  ;;  %8796 = vmatpush.bf16.msrb.mxu3 %v13240_v39  ;;  %v13461_v17 = vld [vmem:[#allocation6 + $0x578] sm:$0xf0] }
 0x891   : > { %8831 = vmatpush.bf16.msrb.mxu1 %v13512_v56  ;;  %8780 = vmatpush.bf16.msrb.mxu2 %v13080_v20  ;;  %v13464_v0 = vor.u32 %v14865_v19, %v13461_v17  ;;  %v13160_v56 = vor.u32 %v14789_v46, %v13157_v31 }
 0x894   : > { %8813 = vmatpush.bf16.msrb.mxu0 %v13384_v36  ;;  %8797 = vmatpush.bf16.msrb.mxu3 %v13224_v49  ;;  %v13320_v49 = vor.u32 %v14829_v24, %v13317_v14  ;;  %v13032_v36 = vor.u32 %v14757_v32, %v13029_v7 }
 0x895   : > { %8832 = vmatpush.bf16.msrb.mxu1 %v13496_v33  ;;  %8781 = vmatpush.bf16.msrb.mxu2 %v13064_v11  ;;  %v14821_v11 = vld [vmem:[#allocation6 + $0x40c] sm:$0xf] }
 0x896   : > { %v13288_v59 = vor.u32 %v14821_v11, %v13285_v9 }
 0x898   : > { %8814 = vmatpush.bf16.msrb.mxu0 %v13368_v48  ;;  %8798 = vmatpush.bf16.msrb.mxu3 %v13208_v8  ;;  %v14857_v48 = vld [vmem:[#allocation6 + $0x52c] sm:$0xf] }
 0x899   : > { %8833 = vmatpush.bf16.msrb.mxu1 %v13480_v22  ;;  %8782 = vmatpush.bf16.msrb.mxu2 %v13048_v26  ;;  %v13432_v8 = vor.u32 %v14857_v48, %v13429_v27 }
 0x89b   : > { %8681 = vmatmul.bf16.gmra.mxu0 %v20753_v4  ;;  %8699 = vmatmul.bf16.gmra.mxu1 %v20756_v5 }
 0x89c   : > { %8815 = vmatpush.bf16.msrb.mxu0 %v13352_v40  ;;  %8799 = vmatpush.bf16.msrb.mxu3 %v13192_v61  ;;  %v13416_v61 = vor.u32 %v14853_v44, %v13413_v54 }
 0x89d   : > { %8834 = vmatpush.bf16.msrb.mxu1 %v13464_v0  ;;  %8783 = vmatpush.bf16.msrb.mxu2 %v13032_v36  ;;  %v20820_v0 = vperm.slane %v20790_v12, 1 }
 0x89e   : > { %8712 = vmatmul.bf16.vlgmr.msra.gmra.mxu2 %v20762_v18  ;;  %8730 = vmatmul.bf16.vlgmr.msra.gmra.mxu3 %v20766_v35 }
 0x8a0   : > { %8816 = vmatpush.bf16.msrb.mxu0 %v13336_v13  ;;  %8800 = vmatpush.bf16.msrb.mxu3 %v13176_v51 }
 0x8a1   : > { %v8425_v55 = vpop.f32.mrf.mxu2  ;;  %v8443_v39 = vpop.f32.mrf.mxu3  ;;  %8835 = vmatpush.bf16.msrb.mxu1 %v13448_v28 }
 0x8a2   : > { %v8426_v50 = vadd.f32 %v8425_v55, %v20793_v6 }
 0x8a4   : > { %v8444_v63 = vadd.f32 %v8443_v39, %v8426_v50  ;;  %8817 = vmatpush.bf16.msrb.mxu0 %v13320_v49  ;;  %8801 = vmatpush.bf16.msrb.mxu3 %v13160_v56 }
 0x8a5   : > { %8836 = vmatpush.bf16.msrb.mxu1 %v13432_v8 }
 0x8a8   : > { %v8461_v16 = vpop.f32.mrf.mxu0  ;;  %v8479_v20 = vpop.f32.mrf.mxu1  ;;  %8818 = vmatpush.bf16.msrb.mxu0 %v13304_v15 }
 0x8a9   : > { %v8462_v33 = vadd.f32 %v8461_v16, %v8444_v63  ;;  %v20800_v57 = vpop.f32.mrf.mxu2  ;;  %v20802_v45 = vpop.f32.mrf.mxu3  ;;  %8837 = vmatpush.bf16.msrb.mxu1 %v13416_v61 }
 0x8ab   : > { %v8480_v30 = vadd.f32 %v8479_v20, %v8462_v33  ;;  %8748 = vmatmul.bf16.vlgmr.msra.gmra.mxu0 %v20697_v3  ;;  %8766 = vmatmul.bf16.vlgmr.msra.gmra.mxu1 %v20700_v52 }
 0x8ac   : > { %8819 = vmatpush.bf16.msrb.mxu0 %v13288_v59 }
 0x8ae   : > { %8717 = vmatmul.bf16.gmra.mxu2 %v20748_v41  ;;  %8735 = vmatmul.bf16.gmra.mxu3 %v20750_v42 }
 0x8b0   : > { %v20808_v40 = vpop.f32.mrf.mxu0  ;;  %v20810_v37 = vpop.f32.mrf.mxu1 }
 0x8b1   : > { %v8430_v3 = vpop.f32.mrf.mxu2  ;;  %v8448_v34 = vpop.f32.mrf.mxu3 }
 0x8b2   : > { %v8431_v52 = vadd.f32 %v8430_v3, %v20793_v6 }
 0x8b4   : > { %v8449_v2 = vadd.f32 %v8448_v34, %v8431_v52 }
 0x8b8   : > { %v8466_v22 = vpop.f32.mrf.mxu0  ;;  %v8484_v19 = vpop.f32.mrf.mxu1 }
 0x8b9   : > { %v8467_v17 = vadd.f32 %v8466_v22, %v8449_v2  ;;  %v8432_v53 = vpop.f32.mrf.mxu2  ;;  %v8450_v13 = vpop.f32.mrf.mxu3 }
 0x8bb   : > { %v8485_v43 = vadd.f32 %v8484_v19, %v8467_v17  ;;  %8753 = vmatmul.bf16.gmra.mxu0 %v20736_v25  ;;  %8771 = vmatmul.bf16.gmra.mxu1 %v20738_v21 }
 0x8be   : > { %8784 = vmatmul.bf16.vlgmr.msrb.gmra.mxu2 %v20728_v60  ;;  %8802 = vmatmul.bf16.vlgmr.msrb.gmra.mxu3 %v20732_v23 }
 0x8c0   : > { %v8468_v47 = vpop.f32.mrf.mxu0  ;;  %v8486_v62 = vpop.f32.mrf.mxu1 }
 0x8c1   : > { %v8497_v26 = vpop.f32.mrf.mxu2  ;;  %v8515_v51 = vpop.f32.mrf.mxu3 }
 0x8c2   : > { %v8498_v55 = vadd.f32 %v8497_v26, %v8480_v30 }
 0x8c4   : > { %v20817_v39 = vadd.f32 %v8515_v51, %v8498_v55 }
 0x8c8   : > { %v8533_v24 = vpop.f32.mrf.mxu0  ;;  %v8551_v14 = vpop.f32.mrf.mxu1 }
 0x8c9   : > { %v8534_v25 = vadd.f32 %v8533_v24, %v20820_v0  ;;  %v20823_v38 = vpop.f32.mrf.mxu2  ;;  %v20825_v21 = vpop.f32.mrf.mxu3 }
 0x8cb   : > { %v8552_v60 = vadd.f32 %v8551_v14, %v8534_v25  ;;  %8820 = vmatmul.bf16.vlgmr.msrb.gmra.mxu0 %v20762_v18  ;;  %8838 = vmatmul.bf16.vlgmr.msrb.gmra.mxu1 %v20766_v35 }
 0x8ce   : > { %8789 = vmatmul.bf16.gmra.mxu2 %v20753_v4  ;;  %8807 = vmatmul.bf16.gmra.mxu3 %v20756_v5 }
 0x8d0   : > { %v20831_v23 = vpop.f32.mrf.mxu0  ;;  %v20833_v50 = vpop.f32.mrf.mxu1 }
 0x8d1   : > { %v8502_v58 = vpop.f32.mrf.mxu2  ;;  %v8520_v32 = vpop.f32.mrf.mxu3 }
 0x8d2   : > { %v8503_v7 = vadd.f32 %v8502_v58, %v8485_v43 }
 0x8d4   : > { %v20835_v49 = vadd.f32 %v8520_v32, %v8503_v7  ;;  %v7450_v32 = vperm.slane %v20790_v12, 2 }
 0x8d8   : > { %v8538_v36 = vpop.f32.mrf.mxu0  ;;  %v8556_v46 = vpop.f32.mrf.mxu1 }
 0x8d9   : > { %v8539_v31 = vadd.f32 %v8538_v36, %v20820_v0  ;;  %v8504_v18 = vpop.f32.mrf.mxu2  ;;  %v8522_v63 = vpop.f32.mrf.mxu3 }
 0x8db   : > { %v8557_v35 = vadd.f32 %v8556_v46, %v8539_v31  ;;  %8825 = vmatmul.bf16.gmra.mxu0 %v20748_v41  ;;  %8843 = vmatmul.bf16.gmra.mxu1 %v20750_v42  ;;  %v8428_v31 = vadd.f32 %v20800_v57, %v20793_v6 }
 0x8e0   : > { %v8540_v4 = vpop.f32.mrf.mxu0  ;;  %v8558_v5 = vpop.f32.mrf.mxu1 }
 0x8e1   : > { %v8569_v56 = vpop.f32.mrf.mxu2  ;;  %v8587_v1 = vpop.f32.mrf.mxu3 }
 0x8e2   : > { %v8570_v29 = vadd.f32 %v8569_v56, %v8552_v60  ;;  %v8446_v56 = vadd.f32 %v20802_v45, %v8428_v31 }
 0x8e4   : > { %v8588_v28 = vadd.f32 %v8587_v1, %v8570_v29 }
 0x8e8   : > { %v8605_v48 = vpop.f32.mrf.mxu0  ;;  %v8623_v27 = vpop.f32.mrf.mxu1 }
 0x8e9   : > { %v8606_v15 = vadd.f32 %v8605_v48, %v8588_v28  ;;  %v20840_v16 = vpop.f32.mrf.mxu2  ;;  %v20842_v20 = vpop.f32.mrf.mxu3 }
 0x8eb   : > { %v20844_v8 = vadd.f32 %v8623_v27, %v8606_v15  ;;  %v8464_v15 = vadd.f32 %v20808_v40, %v8446_v56  ;;  %v8536_v56 = vadd.f32 %v20831_v23, %v20820_v0 }
 0x8ed   : > { %v8482_v6 = vadd.f32 %v20810_v37, %v8464_v15  ;;  %v8554_v15 = vadd.f32 %v20833_v50, %v8536_v56  ;;  %v14912_v56 = vld [vmem:[#allocation8 + $0xd4] sm:$0xf0] }
 0x8f0   : > { %v20846_v33 = vpop.f32.mrf.mxu0  ;;  %v20848_v41 = vpop.f32.mrf.mxu1 }
 0x8f1   : > { %v8574_v42 = vpop.f32.mrf.mxu2  ;;  %v8592_v30 = vpop.f32.mrf.mxu3 }
 0x8f2   : > { %v8575_v11 = vadd.f32 %v8574_v42, %v8557_v35 }
 0x8f4   : > { %v8593_v9 = vadd.f32 %v8592_v30, %v8575_v11 }
 0x8f8   : > { %v8610_v44 = vpop.f32.mrf.mxu0  ;;  %v8628_v59 = vpop.f32.mrf.mxu1 }
 0x8f9   : > { %v8611_v54 = vadd.f32 %v8610_v44, %v8593_v9  ;;  %v8576_v61 = vpop.f32.mrf.mxu2  ;;  %v8594_v3 = vpop.f32.mrf.mxu3 }
 0x8fa   : > { %v8500_v61 = vadd.f32 %v20823_v38, %v8482_v6 }
 0x8fb   : > { %v20850_v34 = vadd.f32 %v8628_v59, %v8611_v54 }
 0x8fc   : > { %v8518_v40 = vadd.f32 %v20825_v21, %v8500_v61 }
 0x900   : > { %v8612_v52 = vpop.f32.mrf.mxu0  ;;  %v8630_v2 = vpop.f32.mrf.mxu1 }
 0x901   : > { %v8641_v22 = vpop.f32.mrf.mxu2  ;;  %v8659_v19 = vpop.f32.mrf.mxu3 }
 0x902   : > { %v8642_v18 = vadd.f32 %v8641_v22, %v7450_v32 }
 0x904   : > { %v8660_v1 = vadd.f32 %v8659_v19, %v8642_v18 }
 0x908   : > { %v8677_v17 = vpop.f32.mrf.mxu0  ;;  %v8695_v53 = vpop.f32.mrf.mxu1 }
 0x909   : > { %v8643_v13 = vpop.f32.mrf.mxu2  ;;  %v8661_v43 = vpop.f32.mrf.mxu3  ;;  %v8678_v42 = vadd.f32 %v8677_v17, %v8660_v1 }
 0x90a   : > { %v8644_v46 = vadd.f32 %v8643_v13, %v7450_v32  ;;  %v8856_v13 = vmax.f32 %v20835_v49, 0.0 }
 0x90b   : > { %v8696_v57 = vadd.f32 %v8695_v53, %v8678_v42 }
 0x90c   : > { %v8662_v35 = vadd.f32 %v8661_v43, %v8644_v46 }
 0x910   : > { %v8679_v47 = vpop.f32.mrf.mxu0  ;;  %v8697_v62 = vpop.f32.mrf.mxu1 }
 0x911   : > { %v8646_v26 = vpop.f32.mrf.mxu2  ;;  %v8664_v51 = vpop.f32.mrf.mxu3  ;;  %v8680_v29 = vadd.f32 %v8679_v47, %v8662_v35 }
 0x912   : > { %v8647_v63 = vadd.f32 %v8646_v26, %v7450_v32  ;;  %v8852_v26 = vmax.f32 %v8518_v40, 0.0 }
 0x913   : > { %v8698_v11 = vadd.f32 %v8697_v62, %v8680_v29 }
 0x914   : > { %v8665_v27 = vadd.f32 %v8664_v51, %v8647_v63 }
 0x918   : > { %v8682_v55 = vpop.f32.mrf.mxu0  ;;  %v8700_v24 = vpop.f32.mrf.mxu1 }
 0x919   : > { %v8648_v14 = vpop.f32.mrf.mxu2  ;;  %v8666_v25 = vpop.f32.mrf.mxu3  ;;  %v8683_v30 = vadd.f32 %v8682_v55, %v8665_v27 }
 0x91a   : > { %v8848_v14 = vmax.f32 %v20817_v39, 0.0  ;;  %v7451_v39 = vperm.slane %v20790_v12, 3 }
 0x91b   : > { %v8701_v44 = vadd.f32 %v8700_v24, %v8683_v30  ;;  %v8572_v30 = vadd.f32 %v20840_v16, %v8554_v15  ;;  %v13787_v15 = vld [vmem:[#allocation8 + $0x1f0] sm:$0xf] }
 0x91d   : > { %v8590_v61 = vadd.f32 %v20842_v20, %v8572_v30 }
 0x920   : > { %v8684_v60 = vpop.f32.mrf.mxu0  ;;  %v8702_v58 = vpop.f32.mrf.mxu1 }
 0x921   : > { %v8713_v7 = vpop.f32.mrf.mxu2  ;;  %v8731_v36 = vpop.f32.mrf.mxu3 }
 0x922   : > { %v8714_v45 = vadd.f32 %v8713_v7, %v8696_v57  ;;  %v20868_v7 = vld [vmem:[%s21006_s13] sm:$0xff] }
 0x924   : > { %v8732_v17 = vadd.f32 %v8731_v36, %v8714_v45 }
 0x926   : > { %v8850_v51 = vmax.f32 %v8732_v17, 0.0 }
 0x928   : > { %v8749_v4 = vpop.f32.mrf.mxu0  ;;  %v20855_v5 = vpop.f32.mrf.mxu1  ;;  %v8860_v58 = vmax.f32 %v8848_v14, %v8850_v51  ;;  %v13587_v51 = vld [vmem:[#allocation8 + $0x60] sm:$0xf] }
 0x929   : > { %v8715_v28 = vpop.f32.mrf.mxu2  ;;  %v8733_v48 = vpop.f32.mrf.mxu3  ;;  %v8750_v29 = vadd.f32 %v8749_v4, %v7451_v39  ;;  %v13651_v14 = vld [vmem:[#allocation8 + $0xe0] sm:$0xf] }
 0x92a   : > { %v8716_v9 = vadd.f32 %v8715_v28, %v8698_v11  ;;  %v8872_v28 = vld [vmem:[%s21006_s13 + $0x8] sm:$0x1] }
 0x92b   : > { %v8768_v12 = vadd.f32 %v20855_v5, %v8750_v29  ;;  %v8608_v5 = vadd.f32 %v20846_v33, %v8590_v61  ;;  %v14898_v33 = vld [vmem:[#allocation8 + $0x64] sm:$0xf0]  ;;  %v8849_v29 = vmax.f32 %v20844_v8, 0.0 }
 0x92c   : > { %v8734_v22 = vadd.f32 %v8733_v48, %v8716_v9  ;;  %v8878_v48 = vunpack.c.l.b16 %v8872_v28  ;;  %v14910_v8 = vld [vmem:[#allocation8 + $0xc4] sm:$0xf0] }
 0x92d   : > { %v8626_v17 = vadd.f32 %v20848_v41, %v8608_v5  ;;  %v13588_v41 = vor.u32 %v14898_v33, %v13587_v51  ;;  %v13779_v5 = vld [vmem:[#allocation8 + $0x1e0] sm:$0xf]  ;;  %v14942_v33 = vld [vmem:[#allocation8 + $0x1c4] sm:$0xf0] }
 0x92e   : > { %v8854_v37 = vmax.f32 %v8734_v22, 0.0  ;;  %v20881_v9 = vpack.c.b16 %v8878_v48, %v8878_v48  ;;  %v14930_v48 = vld [vmem:[#allocation8 + $0x164] sm:$0xf0] }
 0x930   : > { %v8751_v59 = vpop.f32.mrf.mxu0  ;;  %v8769_v54 = vpop.f32.mrf.mxu1  ;;  %v8862_v25 = vmax.f32 %v8852_v26, %v8854_v37  ;;  %v13595_v37 = vld [vmem:[#allocation8 + $0x70] sm:$0xf]  ;;  %v14916_v26 = vld [vmem:[#allocation8 + $0xf4] sm:$0xf0] }
 0x931   : > { %v8718_v3 = vpop.f32.mrf.mxu2  ;;  %v8736_v52 = vpop.f32.mrf.mxu3  ;;  %v8752_v1 = vadd.f32 %v8751_v59, %v7451_v39 }
 0x932   : > { %v8719_v2 = vadd.f32 %v8718_v3, %v8701_v44  ;;  %v8866_v21 = vpack.c.bf16 %v8862_v25, %v8860_v58  ;;  %v14914_v25 = vld [vmem:[#allocation8 + $0xe4] sm:$0xf0] }
 0x933   : > { %v8770_v42 = vadd.f32 %v8769_v54, %v8752_v1  ;;  %v13715_v1 = vld [vmem:[#allocation8 + $0x160] sm:$0xf] }
 0x934   : > { %v8737_v19 = vadd.f32 %v8736_v52, %v8719_v2  ;;  %v13716_v30 = vor.u32 %v14930_v48, %v13715_v1  ;;  %v14922_v1 = vld [vmem:[#allocation8 + $0x124] sm:$0xf0] }
 0x936   : > { %v8858_v43 = vmax.f32 %v8737_v19, 0.0 }
 0x938   : > { %v8864_v53 = vmax.f32 %v8856_v13, %v8858_v43  ;;  %v8754_v47 = vpop.f32.mrf.mxu0  ;;  %v8772_v62 = vpop.f32.mrf.mxu1 }
 0x939   : > { %v8720_v55 = vpop.f32.mrf.mxu2  ;;  %v8738_v38 = vpop.f32.mrf.mxu3  ;;  %v8755_v27 = vadd.f32 %v8754_v47, %v7451_v39  ;;  %v13659_v47 = vld [vmem:[#allocation8 + $0xf0] sm:$0xf] }
 0x93a   : > { %v8868_v24 = vpack.c.bf16 %v8864_v53, %v8864_v53  ;;  %v14900_v53 = vld [vmem:[#allocation8 + $0x74] sm:$0xf0]  ;;  %v8857_v55 = vmax.f32 %v20850_v34, 0.0  ;;  %v13643_v34 = vld [vmem:[#allocation8 + $0xd0] sm:$0xf] }
 0x93b   : > { %v8773_v0 = vadd.f32 %v8772_v62, %v8755_v27  ;;  %v13596_v62 = vor.u32 %v14900_v53, %v13595_v37 }
 0x93c   : > { %v8889_v60 = vsel %vm5078_vm5, %v8868_v24, 0  ;;  %v13660_v24 = vor.u32 %v14916_v26, %v13659_v47  ;;  %v13699_v47 = vld [vmem:[#allocation8 + $0x140] sm:$0xf] }
 0x93d   : > { %8900 = vmatpush.bf16.msra.mxu2 %v8889_v60  ;;  %v8853_v60 = vmax.f32 %v8626_v17, 0.0  ;;  %9618 = vmatpush.bf16.msra.mxu0 %v13596_v62  ;;  %v13771_v17 = vld [vmem:[#allocation8 + $0x1d0] sm:$0xf]  ;;  %v14926_v62 = vld [vmem:[#allocation8 + $0x144] sm:$0xf0] }
 0x93e   : > { %9632 = vmatpush.bf16.msra.mxu1 %v13660_v24  ;;  %v13763_v26 = vld [vmem:[#allocation8 + $0x1c0] sm:$0xf]  ;;  %v13700_v51 = vor.u32 %v14926_v62, %v13699_v47 }
 0x93f   : > { %v13764_v24 = vor.u32 %v14942_v33, %v13763_v26  ;;  %v14918_v33 = vld [vmem:[#allocation8 + $0x104] sm:$0xf0] }
 0x940   : > { %v8756_v32 = vpop.f32.mrf.mxu0  ;;  %v8774_v49 = vpop.f32.mrf.mxu1 }
 0x941   : > { %v8785_v36 = vpop.f32.mrf.mxu2  ;;  %v8803_v46 = vpop.f32.mrf.mxu3  ;;  %8901 = vmatpush.bf16.msra.mxu2 %v8866_v21  ;;  %v13723_v21 = vld [vmem:[#allocation8 + $0x170] sm:$0xf]  ;;  %v14932_v32 = vld [vmem:[#allocation8 + $0x174] sm:$0xf0]  ;;  %9619 = vmatpush.bf16.msra.mxu0 %v13588_v41 }
 0x942   : > { %v8786_v23 = vadd.f32 %v8785_v36, %v8768_v12  ;;  %v13724_v39 = vor.u32 %v14932_v32, %v13723_v21  ;;  %v14924_v21 = vld [vmem:[#allocation8 + $0x134] sm:$0xf0] }
 0x943   : > { %v14940_v32 = vld [vmem:[#allocation8 + $0x1b4] sm:$0xf0] }
 0x944   : > { %13533 = vmatmul.msk.bf16.vlgmr.msra.gmra.mxu2 %vm8881_vm10, %v20868_v7  ;;  %v8804_v50 = vadd.f32 %v8803_v46, %v8786_v23  ;;  %v13652_v46 = vor.u32 %v14914_v25, %v13651_v14  ;;  %v13707_v23 = vld [vmem:[#allocation8 + $0x150] sm:$0xf]  ;;  %v13619_v25 = vld [vmem:[#allocation8 + $0xa0] sm:$0xf] }
 0x945   : > { %9646 = vmatpush.bf16.msrb.mxu2 %v13724_v39  ;;  %v14888_v39 = vld [vmem:[#allocation8 + $0x14] sm:$0xf0] }
 0x946   : > { %9633 = vmatpush.bf16.msra.mxu1 %v13652_v46  ;;  %v13547_v46 = vld [vmem:[#allocation8 + $0x10] sm:$0xf] }
 0x948   : > { %v8821_v31 = vpop.f32.mrf.mxu0  ;;  %v8839_v18 = vpop.f32.mrf.mxu1 }
 0x949   : > { %v8787_v63 = vpop.f32.mrf.mxu2  ;;  %v8805_v35 = vpop.f32.mrf.mxu3  ;;  %v8822_v54 = vadd.f32 %v8821_v31, %v8804_v50  ;;  %v13579_v31 = vld [vmem:[#allocation8 + $0x50] sm:$0xf]  ;;  %9647 = vmatpush.bf16.msrb.mxu2 %v13716_v30 }
 0x94a   : > { %v8788_v11 = vadd.f32 %v8787_v63, %v8770_v42  ;;  %v14948_v42 = vld [vmem:[#allocation8 + $0x1f4] sm:$0xf0] }
 0x94b   : > { %v8840_v43 = vadd.f32 %v8839_v18, %v8822_v54  ;;  %v14896_v18 = vld [vmem:[#allocation8 + $0x54] sm:$0xf0]  ;;  %v13788_v61 = vor.u32 %v14948_v42, %v13787_v15  ;;  %v13539_v15 = vld [vmem:[#allocation8] sm:$0xf]  ;;  %v14886_v42 = vld [vmem:[#allocation8 + $0x4] sm:$0xf0] }
 0x94c   : > { %v8806_v45 = vadd.f32 %v8805_v35, %v8788_v11  ;;  %v13580_v12 = vor.u32 %v14896_v18, %v13579_v31  ;;  %v13571_v11 = vld [vmem:[#allocation8 + $0x40] sm:$0xf]  ;;  %v13611_v31 = vld [vmem:[#allocation8 + $0x90] sm:$0xf]  ;;  %v13548_v18 = vor.u32 %v14888_v39, %v13547_v46  ;;  %v13540_v30 = vor.u32 %v14886_v42, %v13539_v15  ;;  %v14897_v46 = vld [vmem:[#allocation8 + $0x64] sm:$0xf] }
 0x94d   : > { %v8851_v49 = vmax.f32 %v8840_v43, 0.0  ;;  %v13581_v15 = vld [vmem:[#allocation8 + $0x58] sm:$0xf0] }
 0x94e   : > { %9620 = vmatpush.bf16.msra.mxu0 %v13580_v12 }
 0x950   : > { %v8823_v6 = vpop.f32.mrf.mxu0  ;;  %v8841_v57 = vpop.f32.mrf.mxu1 }
 0x951   : > { %v8790_v4 = vpop.f32.mrf.mxu2  ;;  %v8808_v44 = vpop.f32.mrf.mxu3  ;;  %v8824_v16 = vadd.f32 %v8823_v6, %v8806_v45 }
 0x952   : > { %v8791_v59 = vadd.f32 %v8790_v4, %v8773_v0  ;;  %v14894_v0 = vld [vmem:[#allocation8 + $0x44] sm:$0xf0]  ;;  %v8861_v4 = vmax.f32 %v8849_v29, %v8851_v49  ;;  %v13747_v29 = vld [vmem:[#allocation8 + $0x1a0] sm:$0xf] }
 0x953   : > { %v8842_v13 = vadd.f32 %v8841_v57, %v8824_v16  ;;  %v13644_v57 = vor.u32 %v14912_v56, %v13643_v34  ;;  %v14946_v16 = vld [vmem:[#allocation8 + $0x1e4] sm:$0xf0]  ;;  %v13572_v54 = vor.u32 %v14894_v0, %v13571_v11  ;;  %v13683_v56 = vld [vmem:[#allocation8 + $0x120] sm:$0xf] }
 0x954   : > { %13534 = vmatmul.msk.bf16.gmra.mxu2 %vm8881_vm10, %v20881_v9  ;;  %v8809_v3 = vadd.f32 %v8808_v44, %v8791_v59  ;;  %v13635_v44 = vld [vmem:[#allocation8 + $0xc0] sm:$0xf]  ;;  %v14928_v59 = vld [vmem:[#allocation8 + $0x154] sm:$0xf0]  ;;  %v13684_v48 = vor.u32 %v14922_v1, %v13683_v56  ;;  %v14958_v1 = vld [vmem:[#allocation8 + $0x244] sm:$0xf0] }
 0x955   : > { %v8855_v58 = vmax.f32 %v8842_v13, 0.0  ;;  %v13708_v45 = vor.u32 %v14928_v59, %v13707_v23  ;;  %9634 = vmatpush.bf16.msra.mxu1 %v13644_v57  ;;  %9621 = vmatpush.bf16.msra.mxu0 %v13572_v54  ;;  %v14944_v13 = vld [vmem:[#allocation8 + $0x1d4] sm:$0xf0]  ;;  %v13603_v11 = vld [vmem:[#allocation8 + $0x80] sm:$0xf] }
 0x956   : > { %v13772_v37 = vor.u32 %v14944_v13, %v13771_v17  ;;  %v13851_v57 = vld [vmem:[#allocation8 + $0x270] sm:$0xf]  ;;  %v14964_v23 = vld [vmem:[#allocation8 + $0x274] sm:$0xf0]  ;;  %v13843_v54 = vld [vmem:[#allocation8 + $0x260] sm:$0xf] }
 0x957   : > { %v8863_v27 = vmax.f32 %v8853_v60, %v8855_v58  ;;  %9648 = vmatpush.bf16.msrb.mxu2 %v13708_v45  ;;  %v14906_v60 = vld [vmem:[#allocation8 + $0xa4] sm:$0xf0]  ;;  %v13691_v58 = vld [vmem:[#allocation8 + $0x130] sm:$0xf]  ;;  %v14920_v45 = vld [vmem:[#allocation8 + $0x114] sm:$0xf0] }
 0x958   : > { %v8826_v52 = vpop.f32.mrf.mxu0  ;;  %v8844_v2 = vpop.f32.mrf.mxu1  ;;  %v13620_v41 = vor.u32 %v14906_v60, %v13619_v25  ;;  %v13692_v49 = vor.u32 %v14924_v21, %v13691_v58  ;;  %v14899_v25 = vld [vmem:[#allocation8 + $0x74] sm:$0xf]  ;;  %v13597_v60 = vld [vmem:[#allocation8 + $0x78] sm:$0xf0]  ;;  %v14960_v21 = vld [vmem:[#allocation8 + $0x254] sm:$0xf0] }
 0x959   : > { %v8827_v22 = vadd.f32 %v8826_v52, %v8809_v3  ;;  %v8792_v19 = vpop.f32.mrf.mxu2  ;;  %v8810_v40 = vpop.f32.mrf.mxu3  ;;  %v8867_v50 = vpack.c.bf16 %v8863_v27, %v8861_v4  ;;  %v13636_v3 = vor.u32 %v14910_v8, %v13635_v44  ;;  %v13563_v52 = vld [vmem:[#allocation8 + $0x30] sm:$0xf]  ;;  %v14938_v27 = vld [vmem:[#allocation8 + $0x1a4] sm:$0xf0]  ;;  %v14980_v44 = vld [vmem:[#allocation8 + $0x2f4] sm:$0xf0]  ;;  %v13852_v8 = vor.u32 %v14964_v23, %v13851_v57 }
 0x95a   : > { %v14908_v19 = vld [vmem:[#allocation8 + $0xb4] sm:$0xf0]  ;;  %v13780_v40 = vor.u32 %v14946_v16, %v13779_v5  ;;  %v13748_v12 = vor.u32 %v14938_v27, %v13747_v29  ;;  %v13915_v4 = vld [vmem:[#allocation8 + $0x2f0] sm:$0xf]  ;;  %v13600_v58 = vor.u32 %v14899_v25, %v13597_v60  ;;  %v13827_v56 = vld [vmem:[#allocation8 + $0x240] sm:$0xf] }
 0x95b   : > { %v8845_v20 = vadd.f32 %v8844_v2, %v8827_v22  ;;  %v14892_v2 = vld [vmem:[#allocation8 + $0x34] sm:$0xf0]  ;;  %v13627_v22 = vld [vmem:[#allocation8 + $0xb0] sm:$0xf]  ;;  %9635 = vmatpush.bf16.msra.mxu1 %v13636_v3  ;;  %9649 = vmatpush.bf16.msrb.mxu2 %v13700_v51  ;;  %v13916_v59 = vor.u32 %v14980_v44, %v13915_v4  ;;  %v14962_v3 = vld [vmem:[#allocation8 + $0x264] sm:$0xf0] }
 0x95c   : > { %v13564_v43 = vor.u32 %v14892_v2, %v13563_v52  ;;  %v14936_v16 = vld [vmem:[#allocation8 + $0x194] sm:$0xf0]  ;;  %v13844_v2 = vor.u32 %v14962_v3, %v13843_v54  ;;  %v13667_v51 = vld [vmem:[#allocation8 + $0x100] sm:$0xf]  ;;  %v14895_v27 = vld [vmem:[#allocation8 + $0x54] sm:$0xf] }
 0x95d   : > { %v8859_v38 = vmax.f32 %v8845_v20, 0.0  ;;  %v13628_v20 = vor.u32 %v14908_v19, %v13627_v22  ;;  %v13907_v22 = vld [vmem:[#allocation8 + $0x2e0] sm:$0xf]  ;;  %v14978_v19 = vld [vmem:[#allocation8 + $0x2e4] sm:$0xf0] }
 0x95e   : > { %9622 = vmatpush.bf16.msra.mxu0 %v13564_v43  ;;  %v13908_v17 = vor.u32 %v14978_v19, %v13907_v22  ;;  %v13891_v29 = vld [vmem:[#allocation8 + $0x2c0] sm:$0xf]  ;;  %v14956_v57 = vld [vmem:[#allocation8 + $0x234] sm:$0xf0]  ;;  %v14954_v54 = vld [vmem:[#allocation8 + $0x224] sm:$0xf0] }
 0x95f   : > { %v8865_v36 = vmax.f32 %v8857_v55, %v8859_v38  ;;  %9636 = vmatpush.bf16.msra.mxu1 %v13628_v20  ;;  %v13555_v55 = vld [vmem:[#allocation8 + $0x20] sm:$0xf]  ;;  %v14890_v38 = vld [vmem:[#allocation8 + $0x24] sm:$0xf0]  ;;  %9650 = vmatpush.bf16.msrb.mxu2 %v13692_v49  ;;  %v13899_v49 = vld [vmem:[#allocation8 + $0x2d0] sm:$0xf] }
 0x960   : > { %v8828_v63 = vpop.f32.mrf.mxu0  ;;  %v8846_v35 = vpop.f32.mrf.mxu1  ;;  %v13556_v14 = vor.u32 %v14890_v38, %v13555_v55  ;;  %v13668_v55 = vor.u32 %v14918_v33, %v13667_v51  ;;  %v13731_v38 = vld [vmem:[#allocation8 + $0x180] sm:$0xf]  ;;  %v14972_v23 = vld [vmem:[#allocation8 + $0x2b4] sm:$0xf0]  ;;  %v14905_v25 = vld [vmem:[#allocation8 + $0xa4] sm:$0xf] }
 0x961   : > { %v8869_v28 = vpack.c.bf16 %v8865_v36, %v8865_v36  ;;  %v14904_v63 = vld [vmem:[#allocation8 + $0x94] sm:$0xf0]  ;;  %v13875_v3 = vld [vmem:[#allocation8 + $0x2a0] sm:$0xf] }
 0x962   : > { %9623 = vmatpush.bf16.msra.mxu0 %v13556_v14  ;;  %v13612_v35 = vor.u32 %v14904_v63, %v13611_v31  ;;  %v13589_v31 = vld [vmem:[#allocation8 + $0x68] sm:$0xf0] }
 0x963   : > { %v8892_v6 = vsel %vm5078_vm5, %v8869_v28, 0  ;;  %9637 = vmatpush.bf16.msra.mxu1 %v13620_v41  ;;  %9651 = vmatpush.bf16.msrb.mxu2 %v13684_v48  ;;  %v13835_v41 = vld [vmem:[#allocation8 + $0x250] sm:$0xf]  ;;  %v13653_v63 = vld [vmem:[#allocation8 + $0xe8] sm:$0xf0] }
 0x964   : > { %8918 = vmatpush.bf16.msra.mxu3 %v8892_v6  ;;  %v14902_v6 = vld [vmem:[#allocation8 + $0x84] sm:$0xf0] }
 0x965   : > { %v13604_v0 = vor.u32 %v14902_v6, %v13603_v11  ;;  %v14974_v48 = vld [vmem:[#allocation8 + $0x2c4] sm:$0xf0]  ;;  %v13819_v11 = vld [vmem:[#allocation8 + $0x230] sm:$0xf]  ;;  %v13584_v6 = vor.u32 %v14895_v27, %v13581_v15  ;;  %v13605_v27 = vld [vmem:[#allocation8 + $0x88] sm:$0xf0] }
 0x966   : > { %9624 = vmatpush.bf16.msra.mxu0 %v13548_v18  ;;  %v14913_v18 = vld [vmem:[#allocation8 + $0xe4] sm:$0xf]  ;;  %v13892_v42 = vor.u32 %v14974_v48, %v13891_v29 }
 0x967   : > { %9638 = vmatpush.bf16.msra.mxu1 %v13612_v35  ;;  %v13592_v35 = vor.u32 %v14897_v46, %v13589_v31  ;;  %v13549_v46 = vld [vmem:[#allocation8 + $0x18] sm:$0xf0]  ;;  %v14903_v31 = vld [vmem:[#allocation8 + $0x94] sm:$0xf]  ;;  %v14901_v48 = vld [vmem:[#allocation8 + $0x84] sm:$0xf] }
 0x968   : > { %8919 = vmatpush.bf16.msra.mxu3 %v8867_v50  ;;  %v13739_v50 = vld [vmem:[#allocation8 + $0x190] sm:$0xf] }
 0x969   : > { %v13740_v52 = vor.u32 %v14936_v16, %v13739_v50  ;;  %v13811_v16 = vld [vmem:[#allocation8 + $0x220] sm:$0xf] }
 0x96a   : > { %9625 = vmatpush.bf16.msra.mxu0 %v13540_v30  ;;  %v13645_v30 = vld [vmem:[#allocation8 + $0xd8] sm:$0xf0]  ;;  %v13812_v19 = vor.u32 %v14954_v54, %v13811_v16 }
 0x96b   : > { %13535 = vmatmul.msk.bf16.vlgmr.msra.gmra.mxu3 %vm8881_vm10, %v20868_v7  ;;  %9639 = vmatpush.bf16.msra.mxu1 %v13604_v0  ;;  %v13883_v0 = vld [vmem:[#allocation8 + $0x2b0] sm:$0xf] }
 0x96c   : > { %9660 = vmatpush.bf16.msrb.mxu3 %v13788_v61  ;;  %v13675_v61 = vld [vmem:[#allocation8 + $0x110] sm:$0xf]  ;;  %v13884_v50 = vor.u32 %v14972_v23, %v13883_v0 }
 0x96d   : > { %v13676_v5 = vor.u32 %v14920_v45, %v13675_v61  ;;  %v13573_v61 = vld [vmem:[#allocation8 + $0x48] sm:$0xf0]  ;;  %v14909_v45 = vld [vmem:[#allocation8 + $0xc4] sm:$0xf] }
 0x96e   : > { %9674 = vmatpush.bf16.msrb.mxu0 %v13852_v8  ;;  %v13820_v8 = vor.u32 %v14956_v57, %v13819_v11  ;;  %v13608_v11 = vor.u32 %v14901_v48, %v13605_v27 }
 0x96f   : > { %9688 = vmatpush.bf16.msrb.mxu1 %v13916_v59  ;;  %9652 = vmatpush.bf16.msrb.mxu2 %v13676_v5  ;;  %v14893_v59 = vld [vmem:[#allocation8 + $0x44] sm:$0xf]  ;;  %v13637_v5 = vld [vmem:[#allocation8 + $0xc8] sm:$0xf0] }
 0x970   : > { %9661 = vmatpush.bf16.msrb.mxu3 %v13780_v40  ;;  %v13640_v22 = vor.u32 %v14909_v45, %v13637_v5 }
 0x972   : > { %9675 = vmatpush.bf16.msrb.mxu0 %v13844_v2  ;;  %v13576_v2 = vor.u32 %v14893_v59, %v13573_v61  ;;  %v14931_v61 = vld [vmem:[#allocation8 + $0x174] sm:$0xf] }
 0x973   : > { %9689 = vmatpush.bf16.msrb.mxu1 %v13908_v17  ;;  %9653 = vmatpush.bf16.msrb.mxu2 %v13668_v55  ;;  %v13565_v17 = vld [vmem:[#allocation8 + $0x38] sm:$0xf0] }
 0x974   : > { %9662 = vmatpush.bf16.msrb.mxu3 %v13772_v37 }
 0x977   : > { %9702 = vmatpush.bf16.msra.mxu2 %v13600_v58  ;;  %v13795_v58 = vld [vmem:[#allocation8 + $0x200] sm:$0xf] }
 0x978   : > { %9663 = vmatpush.bf16.msrb.mxu3 %v13764_v24  ;;  %v14934_v24 = vld [vmem:[#allocation8 + $0x184] sm:$0xf0] }
 0x979   : > { %v13732_v14 = vor.u32 %v14934_v24, %v13731_v38  ;;  %v14889_v24 = vld [vmem:[#allocation8 + $0x24] sm:$0xf] }
 0x97b   : > { %13536 = vmatmul.msk.bf16.gmra.mxu3 %vm8881_vm10, %v20881_v9  ;;  %v13755_v9 = vld [vmem:[#allocation8 + $0x1b0] sm:$0xf]  ;;  %9703 = vmatpush.bf16.msra.mxu2 %v13592_v35 }
 0x97c   : > { %v13756_v36 = vor.u32 %v14940_v32, %v13755_v9  ;;  %v13836_v32 = vor.u32 %v14960_v21, %v13835_v41  ;;  %v13859_v41 = vld [vmem:[#allocation8 + $0x280] sm:$0xf]  ;;  %v14966_v21 = vld [vmem:[#allocation8 + $0x284] sm:$0xf0] }
 0x97e   : > { %9664 = vmatpush.bf16.msrb.mxu3 %v13756_v36  ;;  %v14976_v36 = vld [vmem:[#allocation8 + $0x2d4] sm:$0xf0]  ;;  %9676 = vmatpush.bf16.msrb.mxu0 %v13836_v32 }
 0x97f   : > { %v13900_v39 = vor.u32 %v14976_v36, %v13899_v49  ;;  %9704 = vmatpush.bf16.msra.mxu2 %v13584_v6  ;;  %v14887_v36 = vld [vmem:[#allocation8 + $0x14] sm:$0xf] }
 0x981   : > { %9690 = vmatpush.bf16.msrb.mxu1 %v13900_v39  ;;  %v13860_v39 = vor.u32 %v14966_v21, %v13859_v41 }
 0x982   : > { %9665 = vmatpush.bf16.msrb.mxu3 %v13748_v12  ;;  %v14911_v12 = vld [vmem:[#allocation8 + $0xd4] sm:$0xf] }
 0x983   : > { %v13648_v44 = vor.u32 %v14911_v12, %v13645_v30  ;;  %9705 = vmatpush.bf16.msra.mxu2 %v13576_v2  ;;  %v13725_v2 = vld [vmem:[#allocation8 + $0x178] sm:$0xf0] }
 0x985   : > { %9691 = vmatpush.bf16.msrb.mxu1 %v13892_v42 }
 0x986   : > { %9666 = vmatpush.bf16.msrb.mxu3 %v13740_v52  ;;  %v14970_v52 = vld [vmem:[#allocation8 + $0x2a4] sm:$0xf0] }
 0x989   : > { %9692 = vmatpush.bf16.msrb.mxu1 %v13884_v50 }
 0x98a   : > { %9667 = vmatpush.bf16.msrb.mxu3 %v13732_v14  ;;  %v13557_v14 = vld [vmem:[#allocation8 + $0x28] sm:$0xf0] }
 0x9c7   : > { %v20895_v53 = vpop.f32.mrf.mxu2 }
 0x9cf   : > { %v20897_v7 = vpop.f32.mrf.mxu2 }
 0x9d0   : > { %v8935_v34 = vrot.slane %v20897_v7, 1 }
 0x9d7   : > { %v8908_v28 = vpop.f32.mrf.mxu2 }
 0x9d8   : > { %v8936_v40 = vrot.slane %v8908_v28, 1  ;;  %v13828_v28 = vor.u32 %v14958_v1, %v13827_v56  ;;  %v14885_v56 = vld [vmem:[#allocation8 + $0x4] sm:$0xf]  ;;  %v13541_v1 = vld [vmem:[#allocation8 + $0x8] sm:$0xf0] }
 0x9d9   : > { %v13544_v12 = vor.u32 %v14885_v56, %v13541_v1  ;;  %v14943_v56 = vld [vmem:[#allocation8 + $0x1d4] sm:$0xf] }
 0x9da   : > { %v8937_v13 = vsel %vm1263_vm2, %v8935_v34, %v8936_v40  ;;  %v8947_v43 = vmax.f32 %v20897_v7, %v8936_v40  ;;  %v14915_v7 = vld [vmem:[#allocation8 + $0xf4] sm:$0xf]  ;;  %v13656_v34 = vor.u32 %v14913_v18, %v13653_v63  ;;  %9677 = vmatpush.bf16.msrb.mxu0 %v13828_v28  ;;  %v13613_v18 = vld [vmem:[#allocation8 + $0x98] sm:$0xf0]  ;;  %v13552_v63 = vor.u32 %v14887_v36, %v13549_v46 }
 0x9db   : > { %v8945_v37 = vmax.f32 %v20895_v53, %v8937_v13  ;;  %v13661_v53 = vld [vmem:[#allocation8 + $0xf8] sm:$0xf0]  ;;  %v14891_v40 = vld [vmem:[#allocation8 + $0x34] sm:$0xf] }
 0x9dc   : > { %v8960_v47 = vrot.slane %v8947_v43, 7  ;;  %v13664_v9 = vor.u32 %v14915_v7, %v13661_v53  ;;  %v14907_v13 = vld [vmem:[#allocation8 + $0xb4] sm:$0xf]  ;;  %v13876_v43 = vor.u32 %v14970_v52, %v13875_v3  ;;  %v13568_v51 = vor.u32 %v14891_v40, %v13565_v17  ;;  %v13621_v7 = vld [vmem:[#allocation8 + $0xa8] sm:$0xf0] }
 0x9dd   : > { %v8958_v62 = vrot.slane %v8945_v37, 7  ;;  %v13803_v37 = vld [vmem:[#allocation8 + $0x210] sm:$0xf]  ;;  %v14950_v53 = vld [vmem:[#allocation8 + $0x204] sm:$0xf0]  ;;  %v13624_v32 = vor.u32 %v14905_v25, %v13621_v7 }
 0x9de   : > { %9716 = vmatpush.bf16.msra.mxu3 %v13664_v9  ;;  %9678 = vmatpush.bf16.msrb.mxu0 %v13820_v8  ;;  %v13560_v9 = vor.u32 %v14889_v24, %v13557_v14  ;;  %v13796_v49 = vor.u32 %v14950_v53, %v13795_v58  ;;  %v14945_v24 = vld [vmem:[#allocation8 + $0x1e4] sm:$0xf]  ;;  %v13781_v14 = vld [vmem:[#allocation8 + $0x1e8] sm:$0xf0]  ;;  %v14963_v53 = vld [vmem:[#allocation8 + $0x274] sm:$0xf] }
 0x9df   : > { %v8910_v20 = vpop.f32.mrf.mxu2  ;;  %v8961_v26 = vsel %vm5078_vm5, %v8958_v62, %v8960_v47  ;;  %8968 = vst [vmem:[#allocation4] sm:$0xfe] %v8958_v62  ;;  %v14952_v47 = vld [vmem:[#allocation8 + $0x214] sm:$0xf0]  ;;  %v13867_v62 = vld [vmem:[#allocation8 + $0x290] sm:$0xf]  ;;  %9693 = vmatpush.bf16.msrb.mxu1 %v13876_v43  ;;  %9706 = vmatpush.bf16.msra.mxu2 %v13568_v51 }
 0x9e0   : > { %8970 = vst [vmem:[#allocation4 + $0x10] sm:$0x3] %v8961_v26  ;;  %v13629_v20 = vld [vmem:[#allocation8 + $0xb8] sm:$0xf0]  ;;  %v14968_v26 = vld [vmem:[#allocation8 + $0x294] sm:$0xf0]  ;;  %v13804_v38 = vor.u32 %v14952_v47, %v13803_v37 }
 0x9e1   : > { %v13632_v55 = vor.u32 %v14907_v13, %v13629_v20  ;;  %v13868_v60 = vor.u32 %v14968_v26, %v13867_v62  ;;  %v14929_v62 = vld [vmem:[#allocation8 + $0x164] sm:$0xf] }
 0x9e2   : > { %9717 = vmatpush.bf16.msra.mxu3 %v13656_v34  ;;  %9679 = vmatpush.bf16.msrb.mxu0 %v13812_v19  ;;  %v13616_v34 = vor.u32 %v14903_v31, %v13613_v18  ;;  %v13789_v19 = vld [vmem:[#allocation8 + $0x1f8] sm:$0xf0] }
 0x9e3   : > { %9694 = vmatpush.bf16.msrb.mxu1 %v13868_v60  ;;  %9707 = vmatpush.bf16.msra.mxu2 %v13560_v9  ;;  %v13853_v9 = vld [vmem:[#allocation8 + $0x278] sm:$0xf0] }
 0x9e6   : > { %9718 = vmatpush.bf16.msra.mxu3 %v13648_v44  ;;  %9680 = vmatpush.bf16.msrb.mxu0 %v13804_v38  ;;  %v8972_v44 = vld [vmem:[#allocation4] sm:$0xff]  ;;  %v13717_v38 = vld [vmem:[#allocation8 + $0x168] sm:$0xf0] }
 0x9e7   : > { %9695 = vmatpush.bf16.msrb.mxu1 %v13860_v39  ;;  %9708 = vmatpush.bf16.msra.mxu2 %v13552_v63  ;;  %v8974_v8 = vld [vmem:[#allocation4 + $0x10] sm:$0x1]  ;;  %v8978_v45 = vld [vmem:[#allocation4] sm:$0xfe]  ;;  %v13720_v36 = vor.u32 %v14929_v62, %v13717_v38  ;;  %v13784_v63 = vor.u32 %v14945_v24, %v13781_v14  ;;  %v14957_v38 = vld [vmem:[#allocation8 + $0x244] sm:$0xf] }
 0x9e8   : > { %v8984_v31 = vld [vmem:[#allocation4] sm:$0xfc]  ;;  %v8986_v18 = vld [vmem:[#allocation4 + $0x10] sm:$0x7]  ;;  %v13829_v24 = vld [vmem:[#allocation8 + $0x248] sm:$0xf0] }
 0x9e9   : > { %v13693_v62 = vld [vmem:[#allocation8 + $0x138] sm:$0xf0]  ;;  %v14973_v14 = vld [vmem:[#allocation8 + $0x2c4] sm:$0xf] }
 0x9ea   : > { %9719 = vmatpush.bf16.msra.mxu3 %v13640_v22  ;;  %9681 = vmatpush.bf16.msrb.mxu0 %v13796_v49  ;;  %v14947_v22 = vld [vmem:[#allocation8 + $0x1f4] sm:$0xf]  ;;  %v13917_v49 = vld [vmem:[#allocation8 + $0x2f8] sm:$0xf0] }
 0x9eb   : > { %9709 = vmatpush.bf16.msra.mxu2 %v13544_v12  ;;  %v13856_v12 = vor.u32 %v14963_v53, %v13853_v9 }
 0x9ee   : > { %v20904_v4 = vpop.f32.mrf.mxu3  ;;  %9720 = vmatpush.bf16.msra.mxu3 %v13632_v55  ;;  %v13792_v55 = vor.u32 %v14947_v22, %v13789_v19  ;;  %v14959_v22 = vld [vmem:[#allocation8 + $0x254] sm:$0xf]  ;;  %v13837_v19 = vld [vmem:[#allocation8 + $0x258] sm:$0xf0] }
 0x9f2   : > { %9721 = vmatpush.bf16.msra.mxu3 %v13624_v32  ;;  %v14979_v32 = vld [vmem:[#allocation8 + $0x2f4] sm:$0xf] }
 0x9f6   : > { %v8923_v33 = vpop.f32.mrf.mxu3  ;;  %9722 = vmatpush.bf16.msra.mxu3 %v13616_v34  ;;  %v13709_v34 = vld [vmem:[#allocation8 + $0x158] sm:$0xf0] }
 0x9f7   : > { %v8938_v29 = vrot.slane %v8923_v33, 1 }
 0x9fa   : > { %9723 = vmatpush.bf16.msra.mxu3 %v13608_v11  ;;  %v14961_v11 = vld [vmem:[#allocation8 + $0x264] sm:$0xf] }
 0x9fe   : > { %v8926_v35 = vpop.f32.mrf.mxu3 }
 0x9ff   : > { %v8939_v28 = vrot.slane %v8926_v35, 1  ;;  %v14927_v35 = vld [vmem:[#allocation8 + $0x154] sm:$0xf] }
 0xa01   : > { %v8940_v15 = vsel %vm1263_vm2, %v8938_v29, %v8939_v28  ;;  %v8948_v42 = vmax.f32 %v8923_v33, %v8939_v28  ;;  %v13728_v33 = vor.u32 %v14931_v61, %v13725_v2  ;;  %v14925_v61 = vld [vmem:[#allocation8 + $0x144] sm:$0xf] }
 0xa02   : > { %v8946_v30 = vmax.f32 %v20904_v4, %v8940_v15  ;;  %v8980_v4 = vld [vmem:[#allocation4 + $0x10] sm:$0x3] }
 0xa03   : > { %v8962_v6 = vrot.slane %v8948_v42, 7  ;;  %v13773_v42 = vld [vmem:[#allocation8 + $0x1d8] sm:$0xf0] }
 0xa04   : > { %v8959_v57 = vrot.slane %v8946_v30, 7  ;;  %v13920_v30 = vor.u32 %v14979_v32, %v13917_v49  ;;  %v14937_v49 = vld [vmem:[#allocation8 + $0x1a4] sm:$0xf] }
 0xa06   : > { %v8963_v0 = vsel %vm5078_vm5, %v8959_v57, %v8962_v6  ;;  %8969 = vst [vmem:[#allocation4 + $0x8] sm:$0xfe] %v8959_v57  ;;  %v8928_v23 = vpop.f32.mrf.mxu3 }
 0xa07   : > { %8971 = vst [vmem:[#allocation4 + $0x18] sm:$0x3] %v8963_v0  ;;  %v13845_v0 = vld [vmem:[#allocation8 + $0x268] sm:$0xf0]  ;;  %v14977_v23 = vld [vmem:[#allocation8 + $0x2e4] sm:$0xf] }
 0xa0d   : > { %v8973_v59 = vld [vmem:[#allocation4 + $0x8] sm:$0xff] }
 0xa0e   : > { %v8979_v50 = vld [vmem:[#allocation4 + $0x8] sm:$0xfe]  ;;  %v8975_v5 = vld [vmem:[#allocation4 + $0x18] sm:$0x1]  ;;  %v8976_v16 = vpack.c.bf16 %v8973_v59, %v8972_v44  ;;  %v13909_v44 = vld [vmem:[#allocation8 + $0x2e8] sm:$0xf0]  ;;  %v13776_v59 = vor.u32 %v14943_v56, %v13773_v42 }
 0xa0f   : > { %v8981_v54 = vld [vmem:[#allocation4 + $0x18] sm:$0x3]  ;;  %v8982_v3 = vpack.c.bf16 %v8979_v50, %v8978_v45  ;;  %v8977_v52 = vpack.c.bf16 %v8975_v5, %v8974_v8  ;;  %v8985_v41 = vld [vmem:[#allocation4 + $0x8] sm:$0xfc]  ;;  %v13712_v8 = vor.u32 %v14927_v35, %v13709_v34  ;;  %v13701_v45 = vld [vmem:[#allocation8 + $0x148] sm:$0xf0]  ;;  %v13912_v2 = vor.u32 %v14977_v23, %v13909_v44 }
 0xa10   : > { %v8983_v40 = vpack.c.bf16 %v8981_v54, %v8980_v4  ;;  %v8992_v17 = vunpack.c.l.b16 %v8976_v16  ;;  %v8993_v13 = vunpack.c.h.b16 %v8976_v16  ;;  %v8987_v21 = vld [vmem:[#allocation4 + $0x18] sm:$0x7]  ;;  %v8988_v1 = vpack.c.bf16 %v8985_v41, %v8984_v31  ;;  %v14941_v50 = vld [vmem:[#allocation8 + $0x1c4] sm:$0xf]  ;;  %v13765_v5 = vld [vmem:[#allocation8 + $0x1c8] sm:$0xf0] }
 0xa11   : > { %v9002_v43 = vunpack.c.l.b16 %v8982_v3  ;;  %v9003_v20 = vunpack.c.h.b16 %v8982_v3  ;;  %v8994_v37 = vunpack.c.l.b16 %v8977_v52  ;;  %v8995_v47 = vunpack.c.h.b16 %v8977_v52  ;;  %v14921_v41 = vld [vmem:[#allocation8 + $0x124] sm:$0xf]  ;;  %v14955_v31 = vld [vmem:[#allocation8 + $0x234] sm:$0xf]  ;;  %v13885_v35 = vld [vmem:[#allocation8 + $0x2b8] sm:$0xf0] }
 0xa12   : > { %v9004_v26 = vunpack.c.l.b16 %v8983_v40  ;;  %v9005_v51 = vunpack.c.h.b16 %v8983_v40  ;;  %v8989_v29 = vpack.c.bf16 %v8987_v21, %v8986_v18  ;;  %v9026_v16 = vunpack.c.l.b16 %v8988_v1  ;;  %v14975_v40 = vld [vmem:[#allocation8 + $0x2d4] sm:$0xf]  ;;  %v13685_v21 = vld [vmem:[#allocation8 + $0x128] sm:$0xf0]  ;;  %v13821_v18 = vld [vmem:[#allocation8 + $0x238] sm:$0xf0] }
 0xa13   : > { %v20909_v25 = vpack.c.b16 %v8994_v37, %v8992_v17  ;;  %v20911_v60 = vpack.c.b16 %v8995_v47, %v8993_v13  ;;  %v9027_v54 = vunpack.c.h.b16 %v8988_v1  ;;  %v13848_v52 = vor.u32 %v14961_v11, %v13845_v0  ;;  %v13901_v17 = vld [vmem:[#allocation8 + $0x2d8] sm:$0xf0]  ;;  %v14919_v1 = vld [vmem:[#allocation8 + $0x114] sm:$0xf]  ;;  %v14953_v42 = vld [vmem:[#allocation8 + $0x224] sm:$0xf] }
 0xa14   : > { %v9006_v7 = vpack.c.b16 %v9004_v26, %v9002_v43  ;;  %v9007_v58 = vpack.c.b16 %v9005_v51, %v9003_v20  ;;  %v9028_v4 = vunpack.c.l.b16 %v8989_v29  ;;  %v9029_v3 = vunpack.c.h.b16 %v8989_v29  ;;  %v14923_v20 = vld [vmem:[#allocation8 + $0x134] sm:$0xf]  ;;  %v13757_v51 = vld [vmem:[#allocation8 + $0x1b8] sm:$0xf0]  ;;  %v13877_v11 = vld [vmem:[#allocation8 + $0x2a8] sm:$0xf0] }
 0xa15   : > { %9626 = vmatmul.bf16.vlgmr.msra.gmra.mxu0 %v20909_v25  ;;  %9640 = vmatmul.bf16.vlgmr.msra.gmra.mxu1 %v20911_v60  ;;  %v13704_v13 = vor.u32 %v14925_v61, %v13701_v45  ;;  %v13768_v43 = vor.u32 %v14941_v50, %v13765_v5  ;;  %v14939_v26 = vld [vmem:[#allocation8 + $0x1b4] sm:$0xf]  ;;  %v13688_v34 = vor.u32 %v14921_v41, %v13685_v21  ;;  %v13677_v29 = vld [vmem:[#allocation8 + $0x118] sm:$0xf0]  ;;  %v14917_v44 = vld [vmem:[#allocation8 + $0x104] sm:$0xf] }
 0xa16   : > { %v9011_v46 = vshll.u32 %v9006_v7, 16  ;;  %v9018_v39 = vshll.u32 %v9007_v58, 16  ;;  %9730 = vmatpush.bf16.msra.mxu0 %v13728_v33  ;;  %9744 = vmatpush.bf16.msra.mxu1 %v13792_v55  ;;  %v9009_v28 = vshrl.u32 %v9006_v7, 16  ;;  %v9016_v27 = vshrl.u32 %v9007_v58, 16  ;;  %v13893_v7 = vld [vmem:[#allocation8 + $0x2c8] sm:$0xf0] }
 0xa17   : > { %v20921_v37 = vpack.c.b16 %v9028_v4, %v9026_v16  ;;  %v20923_v47 = vpack.c.b16 %v9029_v3, %v9027_v54  ;;  %v13840_v33 = vor.u32 %v14959_v22, %v13837_v19  ;;  %v13904_v55 = vor.u32 %v14975_v40, %v13901_v17  ;;  %v13733_v61 = vld [vmem:[#allocation8 + $0x188] sm:$0xf0]  ;;  %v14951_v5 = vld [vmem:[#allocation8 + $0x214] sm:$0xf]  ;;  %v13805_v16 = vld [vmem:[#allocation8 + $0x218] sm:$0xf0] }
 0xa18   : > { %v9013_v48 = vrot.slane %v9011_v46, 1  ;;  %v9020_v15 = vrot.slane %v9018_v39, 1  ;;  %v13696_v58 = vor.u32 %v14923_v20, %v13693_v62  ;;  %v13760_v53 = vor.u32 %v14939_v26, %v13757_v51  ;;  %v14967_v4 = vld [vmem:[#allocation8 + $0x294] sm:$0xf]  ;;  %v13869_v54 = vld [vmem:[#allocation8 + $0x298] sm:$0xf0] }
 0xa19   : > { %v9032_v9 = vrot.slane %v20921_v37, 1  ;;  %v9033_v32 = vrot.slane %v20923_v47, 1  ;;  %v13832_v46 = vor.u32 %v14957_v38, %v13829_v24  ;;  %v13896_v39 = vor.u32 %v14973_v14, %v13893_v7  ;;  %v13797_v22 = vld [vmem:[#allocation8 + $0x208] sm:$0xf0]  ;;  %v14965_v19 = vld [vmem:[#allocation8 + $0x284] sm:$0xf] }
 0xa1a   : > { %v20915_v6 = vor.u32 %v9013_v48, %v9009_v28  ;;  %v20917_v57 = vor.u32 %v9020_v15, %v9016_v27  ;;  %9731 = vmatpush.bf16.msra.mxu0 %v13720_v36  ;;  %9745 = vmatpush.bf16.msra.mxu1 %v13784_v63  ;;  %v13749_v36 = vld [vmem:[#allocation8 + $0x1a8] sm:$0xf0]  ;;  %v14971_v63 = vld [vmem:[#allocation8 + $0x2b4] sm:$0xf]  ;;  %v13741_v48 = vld [vmem:[#allocation8 + $0x198] sm:$0xf0]  ;;  %v13824_v27 = vor.u32 %v14955_v31, %v13821_v18 }
 0xa1b   : > { %v13752_v56 = vor.u32 %v14937_v49, %v13749_v36  ;;  %v14935_v28 = vld [vmem:[#allocation8 + $0x194] sm:$0xf]  ;;  %v13888_v15 = vor.u32 %v14971_v63, %v13885_v35  ;;  %v13680_v0 = vor.u32 %v14919_v1, %v13677_v29  ;;  %v13861_v40 = vld [vmem:[#allocation8 + $0x288] sm:$0xf0]  ;;  %v13984_v31 = vld [vmem:[#allocation10 + $0x70] sm:$0xf] }
 0xa1c   : > { %9654 = vmatmul.bf16.vlgmr.msrb.gmra.mxu2 %v20915_v6  ;;  %9668 = vmatmul.bf16.vlgmr.msrb.gmra.mxu3 %v20917_v57  ;;  %v13744_v23 = vor.u32 %v14935_v28, %v13741_v48  ;;  %v9132_v14 = vld [vmem:[#allocation16] sm:$0x3]  ;;  %v14997_v35 = vld [vmem:[#allocation10 + $0x74] sm:$0xf0]  ;;  %v13976_v28 = vld [vmem:[#allocation10 + $0x60] sm:$0xf] }
 0xa1d   : > { %9758 = vmatpush.bf16.msrb.mxu2 %v13856_v12  ;;  %9772 = vmatpush.bf16.msrb.mxu3 %v13920_v30  ;;  %v13813_v12 = vld [vmem:[#allocation8 + $0x228] sm:$0xf0]  ;;  %v14969_v30 = vld [vmem:[#allocation8 + $0x2a4] sm:$0xf]  ;;  %v13985_v29 = vor.u32 %v14997_v35, %v13984_v31  ;;  %v14995_v48 = vld [vmem:[#allocation10 + $0x64] sm:$0xf0] }
 0xa1e   : > { %9732 = vmatpush.bf16.msra.mxu0 %v13712_v8  ;;  %9746 = vmatpush.bf16.msra.mxu1 %v13776_v59  ;;  %v13669_v8 = vld [vmem:[#allocation8 + $0x108] sm:$0xf0]  ;;  %v14933_v59 = vld [vmem:[#allocation8 + $0x184] sm:$0xf]  ;;  %v13816_v45 = vor.u32 %v14953_v42, %v13813_v12  ;;  %v13880_v50 = vor.u32 %v14969_v30, %v13877_v11  ;;  %v13977_v11 = vor.u32 %v14995_v48, %v13976_v28  ;;  %v14989_v28 = vld [vmem:[#allocation10 + $0x34] sm:$0xf0] }
 0xa1f   : > { %v13672_v3 = vor.u32 %v14917_v44, %v13669_v8  ;;  %v14008_v48 = vld [vmem:[#allocation10 + $0xa0] sm:$0xf] }
 0xa21   : > { %9759 = vmatpush.bf16.msrb.mxu2 %v13848_v52  ;;  %9773 = vmatpush.bf16.msrb.mxu3 %v13912_v2  ;;  %v13736_v52 = vor.u32 %v14933_v59, %v13733_v61  ;;  %v13872_v2 = vor.u32 %v14967_v4, %v13869_v54  ;;  %v13968_v59 = vld [vmem:[#allocation10 + $0x50] sm:$0xf]  ;;  %v14993_v61 = vld [vmem:[#allocation10 + $0x54] sm:$0xf0] }
 0xa22   : > { %9733 = vmatpush.bf16.msra.mxu0 %v13704_v13  ;;  %9747 = vmatpush.bf16.msra.mxu1 %v13768_v43  ;;  %v13864_v13 = vor.u32 %v14965_v19, %v13861_v40  ;;  %v14991_v19 = vld [vmem:[#allocation10 + $0x44] sm:$0xf0] }
 0xa25   : > { %9760 = vmatpush.bf16.msrb.mxu2 %v13840_v33  ;;  %9774 = vmatpush.bf16.msrb.mxu3 %v13904_v55 }
 0xa26   : > { %9682 = vmatmul.bf16.vlgmr.msrb.gmra.mxu0 %v9032_v9  ;;  %9696 = vmatmul.bf16.vlgmr.msrb.gmra.mxu1 %v9033_v32 }
 0xa27   : > { %9734 = vmatpush.bf16.msra.mxu0 %v13696_v58  ;;  %9748 = vmatpush.bf16.msra.mxu1 %v13760_v53  ;;  %v9135_v58 = vperm.slane %v9132_v14, 1  ;;  %v9134_v53 = vperm.slane %v9132_v14, 0 }
 0xa29   : > { %9761 = vmatpush.bf16.msrb.mxu2 %v13832_v46  ;;  %9775 = vmatpush.bf16.msrb.mxu3 %v13896_v39  ;;  %v14048_v46 = vld [vmem:[#allocation10 + $0xf0] sm:$0xf]  ;;  %v15013_v39 = vld [vmem:[#allocation10 + $0xf4] sm:$0xf0] }
 0xa2a   : > { %v14049_v63 = vor.u32 %v15013_v39, %v14048_v46 }
 0xa2b   : > { %9735 = vmatpush.bf16.msra.mxu0 %v13688_v34  ;;  %9749 = vmatpush.bf16.msra.mxu1 %v13752_v56  ;;  %v14040_v34 = vld [vmem:[#allocation10 + $0xe0] sm:$0xf]  ;;  %v15011_v56 = vld [vmem:[#allocation10 + $0xe4] sm:$0xf0] }
 0xa2c   : > { %9710 = vmatmul.bf16.vlgmr.msra.gmra.mxu2 %v20909_v25  ;;  %9724 = vmatmul.bf16.vlgmr.msra.gmra.mxu3 %v20911_v60  ;;  %v13808_v25 = vor.u32 %v14951_v5, %v13805_v16  ;;  %v14949_v60 = vld [vmem:[#allocation8 + $0x204] sm:$0xf]  ;;  %v14041_v42 = vor.u32 %v15011_v56, %v14040_v34  ;;  %v14112_v34 = vld [vmem:[#allocation10 + $0x170] sm:$0xf]  ;;  %v15029_v56 = vld [vmem:[#allocation10 + $0x174] sm:$0xf0] }
 0xa2d   : > { %9762 = vmatpush.bf16.msrb.mxu2 %v13824_v27  ;;  %9776 = vmatpush.bf16.msrb.mxu3 %v13888_v15  ;;  %v13800_v17 = vor.u32 %v14949_v60, %v13797_v22  ;;  %v13960_v22 = vld [vmem:[#allocation10 + $0x40] sm:$0xf] }
 0xa2f   : > { %9736 = vmatpush.bf16.msra.mxu0 %v13680_v0  ;;  %9750 = vmatpush.bf16.msra.mxu1 %v13744_v23  ;;  %v14032_v0 = vld [vmem:[#allocation10 + $0xd0] sm:$0xf]  ;;  %v15009_v23 = vld [vmem:[#allocation10 + $0xd4] sm:$0xf0] }
 0xa30   : > { %v14033_v5 = vor.u32 %v15009_v23, %v14032_v0  ;;  %v14000_v0 = vld [vmem:[#allocation10 + $0x90] sm:$0xf]  ;;  %v15001_v23 = vld [vmem:[#allocation10 + $0x94] sm:$0xf0] }
 0xa31   : > { %9763 = vmatpush.bf16.msrb.mxu2 %v13816_v45  ;;  %9777 = vmatpush.bf16.msrb.mxu3 %v13880_v50 }
 0xa33   : > { %9737 = vmatpush.bf16.msra.mxu0 %v13672_v3  ;;  %9751 = vmatpush.bf16.msra.mxu1 %v13736_v52  ;;  %v13969_v3 = vor.u32 %v14993_v61, %v13968_v59  ;;  %v14024_v52 = vld [vmem:[#allocation10 + $0xc0] sm:$0xf] }
 0xa34   : > { %v14104_v61 = vld [vmem:[#allocation10 + $0x160] sm:$0xf] }
 0xa35   : > { %9764 = vmatpush.bf16.msrb.mxu2 %v13808_v25  ;;  %9778 = vmatpush.bf16.msrb.mxu3 %v13872_v2  ;;  %v15007_v25 = vld [vmem:[#allocation10 + $0xc4] sm:$0xf0] }
 0xa36   : > { %9738 = vmatmul.bf16.vlgmr.msra.gmra.mxu0 %v20915_v6  ;;  %9752 = vmatmul.bf16.vlgmr.msra.gmra.mxu1 %v20917_v57 }
 0xa37   : > { %10135 = vmatpush.bf16.msrb.mxu1 %v13985_v29  ;;  %v13952_v29 = vld [vmem:[#allocation10 + $0x30] sm:$0xf] }
 0xa39   : > { %9765 = vmatpush.bf16.msrb.mxu2 %v13800_v17  ;;  %9779 = vmatpush.bf16.msrb.mxu3 %v13864_v13  ;;  %v14025_v13 = vor.u32 %v15007_v25, %v14024_v52  ;;  %v15025_v52 = vld [vmem:[#allocation10 + $0x154] sm:$0xf0] }
 0xa3b   : > { %10136 = vmatpush.bf16.msrb.mxu1 %v13977_v11 }
 0xa3c   : > { %9766 = vmatmul.bf16.vlgmr.msrb.gmra.mxu2 %v9032_v9  ;;  %9780 = vmatmul.bf16.vlgmr.msrb.gmra.mxu3 %v9033_v32 }
 0xa3d   : > { %10148 = vmatpush.bf16.msra.mxu2 %v14049_v63  ;;  %v14981_v63 = vld [vmem:[#allocation20] sm:$0x10] }
 0xa3f   : > { %10137 = vmatpush.bf16.msrb.mxu1 %v13969_v3  ;;  %v14096_v3 = vld [vmem:[#allocation10 + $0x150] sm:$0xf] }
 0xa40   : > { %v14097_v25 = vor.u32 %v15025_v52, %v14096_v3  ;;  %v14018_v3 = vld [vmem:[#allocation10 + $0xb8] sm:$0xf0] }
 0xa41   : > { %10149 = vmatpush.bf16.msra.mxu2 %v14041_v42  ;;  %v15003_v42 = vld [vmem:[#allocation10 + $0xa4] sm:$0xf0] }
 0xa42   : > { %v14009_v11 = vor.u32 %v15003_v42, %v14008_v48  ;;  %v15019_v48 = vld [vmem:[#allocation10 + $0x124] sm:$0xf0]  ;;  %v14986_v42 = vld [vmem:[#allocation10 + $0x24] sm:$0xf] }
 0xa45   : > { %10150 = vmatpush.bf16.msra.mxu2 %v14033_v5  ;;  %v14001_v5 = vor.u32 %v15001_v23, %v14000_v0  ;;  %v14090_v0 = vld [vmem:[#allocation10 + $0x148] sm:$0xf0] }
 0xa49   : > { %10151 = vmatpush.bf16.msra.mxu2 %v14025_v13  ;;  %v14088_v13 = vld [vmem:[#allocation10 + $0x140] sm:$0xf] }
 0xa92   : > { %v9627_v43 = vpop.f32.mrf.mxu0  ;;  %v9641_v20 = vpop.f32.mrf.mxu1 }
 0xa93   : > { %v9628_v9 = vadd.f32 %v9627_v43, %v9134_v53 }
 0xa95   : > { %v9642_v1 = vadd.f32 %v9641_v20, %v9628_v9  ;;  %v13961_v20 = vor.u32 %v14991_v19, %v13960_v22  ;;  %v13936_v19 = vld [vmem:[#allocation10 + $0x10] sm:$0xf] }
 0xa97   : > { %10138 = vmatpush.bf16.msrb.mxu1 %v13961_v20  ;;  %v14990_v20 = vld [vmem:[#allocation10 + $0x44] sm:$0xf] }
 0xa9a   : > { %v9629_v62 = vpop.f32.mrf.mxu0  ;;  %v9643_v26 = vpop.f32.mrf.mxu1 }
 0xa9b   : > { %v9630_v32 = vadd.f32 %v9629_v62, %v9134_v53  ;;  %v14016_v62 = vld [vmem:[#allocation10 + $0xb0] sm:$0xf] }
 0xa9d   : > { %v9644_v27 = vadd.f32 %v9643_v26, %v9630_v32  ;;  %v15005_v26 = vld [vmem:[#allocation10 + $0xb4] sm:$0xf0] }
 0xa9f   : > { %v9655_v51 = vpop.f32.mrf.mxu2  ;;  %v9669_v33 = vpop.f32.mrf.mxu3 }
 0xaa0   : > { %v9656_v12 = vadd.f32 %v9655_v51, %v9642_v1  ;;  %v14996_v1 = vld [vmem:[#allocation10 + $0x74] sm:$0xf] }
 0xaa2   : > { %v9670_v16 = vadd.f32 %v9669_v33, %v9656_v12  ;;  %v13944_v12 = vld [vmem:[#allocation10 + $0x20] sm:$0xf] }
 0xaa3   : > { %v9683_v55 = vpop.f32.mrf.mxu0  ;;  %v20939_v38 = vpop.f32.mrf.mxu1 }
 0xaa4   : > { %v9684_v43 = vadd.f32 %v9683_v55, %v9670_v16 }
 0xaa7   : > { %v9657_v6 = vpop.f32.mrf.mxu2  ;;  %v9671_v24 = vpop.f32.mrf.mxu3 }
 0xaa8   : > { %v9658_v44 = vadd.f32 %v9657_v6, %v9644_v27  ;;  %v14113_v27 = vor.u32 %v15029_v56, %v14112_v34  ;;  %v15021_v34 = vld [vmem:[#allocation10 + $0x134] sm:$0xf0]  ;;  %v14988_v56 = vld [vmem:[#allocation10 + $0x34] sm:$0xf] }
 0xaaa   : > { %v9672_v2 = vadd.f32 %v9671_v24, %v9658_v44  ;;  %v9698_v24 = vadd.f32 %v20939_v38, %v9684_v43  ;;  %10161 = vmatpush.bf16.msra.mxu3 %v14113_v27  ;;  %v13986_v44 = vld [vmem:[#allocation10 + $0x78] sm:$0xf0]  ;;  %v15023_v43 = vld [vmem:[#allocation10 + $0x144] sm:$0xf0] }
 0xaab   : > { %v20941_v57 = vpop.f32.mrf.mxu0  ;;  %v20943_v47 = vpop.f32.mrf.mxu1  ;;  %v13989_v59 = vor.u32 %v14996_v1, %v13986_v44  ;;  %v15006_v44 = vld [vmem:[#allocation10 + $0xc4] sm:$0xf] }
 0xaac   : > { %v9686_v51 = vadd.f32 %v20941_v57, %v9672_v2  ;;  %v9786_v9 = vmax.f32 %v9698_v24, 0.0  ;;  %v15641_v57 = vmov 65535   ;;  %v14992_v2 = vld [vmem:[#allocation10 + $0x54] sm:$0xf]  ;;  %v13928_v24 = vld [vmem:[#allocation10] sm:$0xf] }
 0xaaf   : > { %v9711_v7 = vpop.f32.mrf.mxu2  ;;  %v9725_v37 = vpop.f32.mrf.mxu3 }
 0xab0   : > { %v9712_v41 = vadd.f32 %v9711_v7, %v9135_v58  ;;  %v14017_v7 = vor.u32 %v15005_v26, %v14016_v62  ;;  %v14089_v62 = vor.u32 %v15023_v43, %v14088_v13  ;;  %v13962_v26 = vld [vmem:[#allocation10 + $0x48] sm:$0xf0] }
 0xab1   : > { %v14074_v43 = vld [vmem:[#allocation10 + $0x128] sm:$0xf0] }
 0xab2   : > { %v9726_v18 = vadd.f32 %v9725_v37, %v9712_v41  ;;  %10152 = vmatpush.bf16.msra.mxu2 %v14017_v7  ;;  %v14114_v7 = vld [vmem:[#allocation10 + $0x178] sm:$0xf0] }
 0xab3   : > { %v9739_v21 = vpop.f32.mrf.mxu0  ;;  %v9753_v30 = vpop.f32.mrf.mxu1 }
 0xab4   : > { %v9740_v8 = vadd.f32 %v9739_v21, %v9726_v18  ;;  %v13923_v18 = vld [vmem:[#allocation20] sm:$0xf] }
 0xab5   : > { %v13924_v35 = vor.u32 %v14981_v63, %v13923_v18  ;;  %v14098_v18 = vld [vmem:[#allocation10 + $0x158] sm:$0xf0]  ;;  %v15008_v63 = vld [vmem:[#allocation10 + $0xd4] sm:$0xf] }
 0xab6   : > { %v9754_v60 = vadd.f32 %v9753_v30, %v9740_v8  ;;  %v14987_v30 = vld [vmem:[#allocation10 + $0x24] sm:$0xf0]  ;;  %10153 = vmatpush.bf16.msra.mxu2 %v14009_v11  ;;  %v15022_v11 = vld [vmem:[#allocation10 + $0x144] sm:$0xf] }
 0xab7   : > { %v9713_v49 = vpop.f32.mrf.mxu2  ;;  %v9727_v36 = vpop.f32.mrf.mxu3  ;;  %v13945_v8 = vor.u32 %v14987_v30, %v13944_v12  ;;  %v13946_v12 = vld [vmem:[#allocation10 + $0x28] sm:$0xf0] }
 0xab8   : > { %v9714_v15 = vadd.f32 %v9713_v49, %v9135_v58  ;;  %v9700_v58 = vadd.f32 %v20943_v47, %v9686_v51  ;;  %v13992_v51 = vld [vmem:[#allocation10 + $0x80] sm:$0xf] }
 0xaba   : > { %v9728_v45 = vadd.f32 %v9727_v36, %v9714_v15  ;;  %v9788_v32 = vmax.f32 %v9700_v58, 0.0  ;;  %v9805_v36 = vsel %vm4938_vm3, 4294967295, %v15641_v57  ;;  %v13953_v15 = vor.u32 %v14989_v28, %v13952_v29  ;;  %10154 = vmatpush.bf16.msra.mxu2 %v14001_v5  ;;  %v13954_v29 = vld [vmem:[#allocation10 + $0x38] sm:$0xf0]  ;;  %v14072_v28 = vld [vmem:[#allocation10 + $0x120] sm:$0xf] }
 0xabb   : > { %v9741_v50 = vpop.f32.mrf.mxu0  ;;  %v9755_v33 = vpop.f32.mrf.mxu1  ;;  %v9806_v38 = vsel %vm9804_vm11, %v9805_v36, 0  ;;  %v13965_v58 = vor.u32 %v14990_v20, %v13962_v26  ;;  %v15010_v36 = vld [vmem:[#allocation10 + $0xe4] sm:$0xf]  ;;  %v14073_v23 = vor.u32 %v15019_v48, %v14072_v28  ;;  %v15020_v5 = vld [vmem:[#allocation10 + $0x134] sm:$0xf] }
 0xabc   : > { %v9742_v40 = vadd.f32 %v9741_v50, %v9728_v45  ;;  %10139 = vmatpush.bf16.msrb.mxu1 %v13953_v15  ;;  %v15027_v45 = vld [vmem:[#allocation10 + $0x164] sm:$0xf0]  ;;  %v14994_v50 = vld [vmem:[#allocation10 + $0x64] sm:$0xf]  ;;  %v13957_v15 = vor.u32 %v14988_v56, %v13954_v29  ;;  %v13930_v26 = vld [vmem:[#allocation10 + $0x8] sm:$0xf0] }
 0xabd   : > { %v14105_v16 = vor.u32 %v15027_v45, %v14104_v61  ;;  %v14093_v61 = vor.u32 %v15022_v11, %v14090_v0  ;;  %v14064_v45 = vld [vmem:[#allocation10 + $0x110] sm:$0xf]  ;;  %v9889_v11 = vld [vmem:[#allocation17] sm:$0x3] }
 0xabe   : > { %v9756_v6 = vadd.f32 %v9755_v33, %v9742_v40  ;;  %v14985_v40 = vld [vmem:[#allocation10 + $0x14] sm:$0xf0]  ;;  %v14999_v33 = vld [vmem:[#allocation10 + $0x84] sm:$0xf0] }
 0xabf   : > { %v9767_v4 = vpop.f32.mrf.mxu2  ;;  %v9781_v54 = vpop.f32.mrf.mxu3  ;;  %10162 = vmatpush.bf16.msra.mxu3 %v14105_v16  ;;  %v14082_v16 = vld [vmem:[#allocation10 + $0x138] sm:$0xf0] }
 0xac0   : > { %v9768_v17 = vadd.f32 %v9767_v4, %v9754_v60  ;;  %v13978_v4 = vld [vmem:[#allocation10 + $0x68] sm:$0xf0]  ;;  %10140 = vmatpush.bf16.msrb.mxu1 %v13945_v8  ;;  %v13970_v60 = vld [vmem:[#allocation10 + $0x58] sm:$0xf0] }
 0xac1   : > { %v13973_v22 = vor.u32 %v14992_v2, %v13970_v60  ;;  %v14026_v8 = vld [vmem:[#allocation10 + $0xc8] sm:$0xf0]  ;;  %v13938_v2 = vld [vmem:[#allocation10 + $0x18] sm:$0xf0]  ;;  %v14056_v60 = vld [vmem:[#allocation10 + $0x100] sm:$0xf] }
 0xac2   : > { %v9782_v14 = vadd.f32 %v9781_v54, %v9768_v17  ;;  %v13981_v54 = vor.u32 %v14994_v50, %v13978_v4  ;;  %v13937_v17 = vor.u32 %v14985_v40, %v13936_v19  ;;  %v14029_v50 = vor.u32 %v15006_v44, %v14026_v8  ;;  %v15017_v4 = vld [vmem:[#allocation10 + $0x114] sm:$0xf0]  ;;  %v15018_v40 = vld [vmem:[#allocation10 + $0x124] sm:$0xf] }
 0xac3   : > { %10163 = vmatpush.bf16.msra.mxu3 %v14097_v25  ;;  %v14065_v52 = vor.u32 %v15017_v4, %v14064_v45  ;;  %v14984_v25 = vld [vmem:[#allocation10 + $0x14] sm:$0xf]  ;;  %v14085_v19 = vor.u32 %v15020_v5, %v14082_v16  ;;  %v15035_v44 = vld [vmem:[%s21009_s16 + $0x28] sm:$0xff]  ;;  %v9891_v8 = vperm.slane %v9889_v11, 0 }
 0xac4   : > { %v9787_v55 = vmax.f32 %v9782_v14, 0.0  ;;  %10141 = vmatpush.bf16.msrb.mxu1 %v13937_v17  ;;  %v13993_v14 = vor.u32 %v14999_v33, %v13992_v51  ;;  %v13941_v17 = vor.u32 %v14984_v25, %v13938_v2  ;;  %v15002_v33 = vld [vmem:[#allocation10 + $0xa4] sm:$0xf] }
 0xac6   : > { %v9790_v46 = vmax.f32 %v9786_v9, %v9787_v55  ;;  %v15012_v55 = vld [vmem:[#allocation10 + $0xf4] sm:$0xf]  ;;  %v15026_v9 = vld [vmem:[#allocation10 + $0x164] sm:$0xf]  ;;  %10155 = vmatpush.bf16.msra.mxu2 %v13993_v14 }
 0xac7   : > { %v9769_v37 = vpop.f32.mrf.mxu2  ;;  %v9783_v41 = vpop.f32.mrf.mxu3  ;;  %10164 = vmatpush.bf16.msra.mxu3 %v14089_v62  ;;  %v14982_v62 = vld [vmem:[#allocation10 + $0x4] sm:$0xf] }
 0xac8   : > { %v9770_v53 = vadd.f32 %v9769_v37, %v9756_v6  ;;  %v15028_v6 = vld [vmem:[#allocation10 + $0x174] sm:$0xf]  ;;  %v14983_v37 = vld [vmem:[#allocation10 + $0x4] sm:$0xf0]  ;;  %v13933_v14 = vor.u32 %v14982_v62, %v13930_v26 }
 0xaca   : > { %v9784_v21 = vadd.f32 %v9783_v41, %v9770_v53  ;;  %v14117_v53 = vor.u32 %v15028_v6, %v14114_v7  ;;  %v13929_v41 = vor.u32 %v14983_v37, %v13928_v24  ;;  %v14010_v6 = vld [vmem:[#allocation10 + $0xa8] sm:$0xf0]  ;;  %v14077_v7 = vor.u32 %v15018_v40, %v14074_v43  ;;  %v15016_v37 = vld [vmem:[#allocation10 + $0x114] sm:$0xf] }
 0xacb   : > { %v14013_v24 = vor.u32 %v15002_v33, %v14010_v6  ;;  %v10217_v33 = vld [vmem:[#allocation22] sm:$0x7] }
 0xacc   : > { %v9789_v49 = vmax.f32 %v9784_v21, 0.0  ;;  %v14050_v21 = vld [vmem:[#allocation10 + $0xf8] sm:$0xf0]  ;;  %10200 = vmatpush.bf16.msrb.mxu2 %v14117_v53  ;;  %10142 = vmatpush.bf16.msrb.mxu1 %v13929_v41  ;;  %v15000_v53 = vld [vmem:[#allocation10 + $0x94] sm:$0xf] }
 0xacd   : > { %v14002_v41 = vld [vmem:[#allocation10 + $0x98] sm:$0xf0] }
 0xace   : > { %v9791_v39 = vmax.f32 %v9788_v32, %v9789_v49  ;;  %v14053_v32 = vor.u32 %v15012_v55, %v14050_v21  ;;  %v14106_v49 = vld [vmem:[#allocation10 + $0x168] sm:$0xf0]  ;;  %v14005_v21 = vor.u32 %v15000_v53, %v14002_v41  ;;  %v15031_v6 = vld [vmem:[%s21009_s16 + $0x8] sm:$0xff] }
 0xad0   : > { %v9792_v31 = vpack.c.bf16 %v9791_v39, %v9790_v46  ;;  %v14042_v46 = vld [vmem:[#allocation10 + $0xe8] sm:$0xf0]  ;;  %v14109_v39 = vor.u32 %v15026_v9, %v14106_v49  ;;  %10187 = vmatpush.bf16.msra.mxu1 %v14053_v32  ;;  %v15014_v9 = vld [vmem:[#allocation10 + $0x104] sm:$0xf] }
 0xad1   : > { %v14058_v32 = vld [vmem:[#allocation10 + $0x108] sm:$0xf0] }
 0xad2   : > { %v9808_v47 = vand.u32 %v9806_v38, %v9792_v31  ;;  %v15024_v38 = vld [vmem:[#allocation10 + $0x154] sm:$0xf]  ;;  %v14045_v31 = vor.u32 %v15010_v36, %v14042_v46  ;;  %10201 = vmatpush.bf16.msrb.mxu2 %v14109_v39  ;;  %v14998_v36 = vld [vmem:[#allocation10 + $0x84] sm:$0xf]  ;;  %v13994_v46 = vld [vmem:[#allocation10 + $0x88] sm:$0xf0] }
 0xad3   : > { %v14101_v27 = vor.u32 %v15024_v38, %v14098_v18 }
 0xad4   : > { %9817 = vmatpush.bf16.msrb.mxu0 %v9808_v47  ;;  %v14034_v47 = vld [vmem:[#allocation10 + $0xd8] sm:$0xf0]  ;;  %10188 = vmatpush.bf16.msra.mxu1 %v14045_v31  ;;  %v14061_v31 = vor.u32 %v15014_v9, %v14058_v32  ;;  %v10343_v9 = vld [vmem:[%s21240_s0 + $0x8] sm:$0x3] }
 0xad5   : > { %v14037_v30 = vor.u32 %v15008_v63, %v14034_v47  ;;  %v13997_v63 = vor.u32 %v14998_v36, %v13994_v46  ;;  %v10350_v32 = vunpack.c.l.b16 %v10343_v9  ;;  %v15038_v46 = vld [vmem:[%s21240_s0] sm:$0xff] }
 0xad6   : > { %10202 = vmatpush.bf16.msrb.mxu2 %v14101_v27 }
 0xad7   : > { %13925 = vmatmul.msk.bf16.vlgmr.msrb.gmra.mxu0 %vm9800_vm12, %v13924_v35  ;;  %v14080_v35 = vld [vmem:[#allocation10 + $0x130] sm:$0xf] }
 0xad8   : > { %10174 = vmatpush.bf16.msra.mxu0 %v13989_v59  ;;  %v14081_v1 = vor.u32 %v15021_v34, %v14080_v35  ;;  %v13949_v59 = vor.u32 %v14986_v42, %v13946_v12  ;;  %10189 = vmatpush.bf16.msra.mxu1 %v14037_v30  ;;  %v15036_v12 = vld [vmem:[%s21009_s16 + $0x30] sm:$0xff] }
 0xada   : > { %10165 = vmatpush.bf16.msra.mxu3 %v14081_v1  ;;  %10203 = vmatpush.bf16.msrb.mxu2 %v14093_v61  ;;  %v15034_v61 = vld [vmem:[%s21009_s16 + $0x20] sm:$0xff] }
 0xadc   : > { %10175 = vmatpush.bf16.msra.mxu0 %v13981_v54  ;;  %v15004_v54 = vld [vmem:[#allocation10 + $0xb4] sm:$0xf]  ;;  %10190 = vmatpush.bf16.msra.mxu1 %v14029_v50  ;;  %v9892_v50 = vperm.slane %v9889_v11, 1 }
 0xadd   : > { %v14021_v13 = vor.u32 %v15004_v54, %v14018_v3  ;;  %v15033_v54 = vld [vmem:[%s21009_s16 + $0x18] sm:$0xff] }
 0xade   : > { %10166 = vmatpush.bf16.msra.mxu3 %v14073_v23  ;;  %10204 = vmatpush.bf16.msrb.mxu2 %v14085_v19 }
 0xae0   : > { %10176 = vmatpush.bf16.msra.mxu0 %v13973_v22  ;;  %v15015_v22 = vld [vmem:[#allocation10 + $0x104] sm:$0xf0]  ;;  %10191 = vmatpush.bf16.msra.mxu1 %v14021_v13  ;;  %v10222_v13 = vsel %vm7037_vm7, 4294967295, %v15641_v57  ;;  %v15030_v57 = vld [vmem:[%s21009_s16] sm:$0xff] }
 0xae1   : > { %v14057_v20 = vor.u32 %v15015_v22, %v14056_v60  ;;  %v15032_v60 = vld [vmem:[%s21009_s16 + $0x10] sm:$0xff] }
 0xae2   : > { %10167 = vmatpush.bf16.msra.mxu3 %v14065_v52  ;;  %10205 = vmatpush.bf16.msrb.mxu2 %v14077_v7 }
 0xae4   : > { %10177 = vmatpush.bf16.msra.mxu0 %v13965_v58  ;;  %v14066_v58 = vld [vmem:[#allocation10 + $0x118] sm:$0xf0]  ;;  %10192 = vmatpush.bf16.msra.mxu1 %v14013_v24 }
 0xae5   : > { %v14069_v55 = vor.u32 %v15016_v37, %v14066_v58 }
 0xae6   : > { %10168 = vmatpush.bf16.msra.mxu3 %v14057_v20  ;;  %v10223_v20 = vsel %vm9826_vm13, %v10222_v13, 0 }
 0xae7   : > { %10206 = vmatpush.bf16.msrb.mxu2 %v14069_v55 }
 0xae8   : > { %10178 = vmatpush.bf16.msra.mxu0 %v13957_v15  ;;  %10193 = vmatpush.bf16.msra.mxu1 %v14005_v21  ;;  %v15037_v15 = vld [vmem:[%s21009_s16 + $0x38] sm:$0xff] }
 0xaeb   : > { %10207 = vmatpush.bf16.msrb.mxu2 %v14061_v31 }
 0xaec   : > { %10179 = vmatpush.bf16.msra.mxu0 %v13949_v59  ;;  %10194 = vmatpush.bf16.msra.mxu1 %v13997_v63 }
 0xaf0   : > { %10180 = vmatpush.bf16.msra.mxu0 %v13941_v17 }
 0xaf4   : > { %10181 = vmatpush.bf16.msra.mxu0 %v13933_v14 }
 0xaf8   : > { %10309 = vmatpush.bf16.msrb.mxu0 %v15037_v15 }
 0xafc   : > { %10310 = vmatpush.bf16.msrb.mxu0 %v15036_v12 }
 0xb00   : > { %10311 = vmatpush.bf16.msrb.mxu0 %v15035_v44 }
 0xb04   : > { %10312 = vmatpush.bf16.msrb.mxu0 %v15034_v61 }
 0xb08   : > { %10313 = vmatpush.bf16.msrb.mxu0 %v15033_v54 }
 0xb0c   : > { %10314 = vmatpush.bf16.msrb.mxu0 %v15032_v60 }
 0xb10   : > { %10315 = vmatpush.bf16.msrb.mxu0 %v15031_v6 }
 0xb14   : > { %10316 = vmatpush.bf16.msrb.mxu0 %v15030_v57 }
 0xb54   : > { %v9819_v51 = vpop.f32.mrf.mxu0 }
 0xb55   : > { %v9827_v39 = vrot.slane %v9819_v51, 5 }
 0xb5c   : > { %v9821_v49 = vpop.f32.mrf.mxu0 }
 0xb5d   : > { %v9828_v38 = vrot.slane %v9821_v49, 5  ;;  %v10352_v49 = vpack.c.b16 %v10350_v32, %v10350_v32 }
 0xb5f   : > { %v9829_v18 = vsel %vm9826_vm13, %v9827_v39, %v9828_v38  ;;  %v10359_v36 = vsel %vm7037_vm7, %v10352_v49, 0  ;;  %v10322_v39 = vld [vmem:[#allocation23] sm:$0x1] }
 0xb60   : > { %v9831_v47 = vmax.f32 %v9819_v51, %v9829_v18 }
 0xb62   : > { %9834 = vst [vmem:[#allocation5 + $0x1] sm:$0x1f] %v9831_v47 }
 0xb69   : > { %v9837_v35 = vld [vmem:[#allocation5 + $0x1] sm:$0x1f] }
 0xb6a   : > { %v9835_v34 = vld [vmem:[#allocation5] sm:$0x1f]  ;;  %v9838_v1 = vpack.c.bf16 %v9837_v35, %v9837_v35 }
 0xb6b   : > { %v9839_v56 = vld [vmem:[#allocation5 + $0x2] sm:$0x1f]  ;;  %v9836_v29 = vpack.c.bf16 %v9835_v34, %v9835_v34  ;;  %v10344_v34 = vld [vmem:[#allocation25] sm:$0x1] }
 0xb6c   : > { %v9840_v28 = vpack.c.bf16 %v9839_v56, %v9839_v56  ;;  %10156 = vmatmul.bf16.vlgmr.msra.gmra.mxu2 %v9838_v1 }
 0xb6d   : > { %10143 = vmatmul.bf16.vlgmr.msrb.gmra.mxu1 %v9836_v29  ;;  %10182 = vmatmul.bf16.vlgmr.msra.gmra.mxu0 %v9836_v29 }
 0xb6e   : > { %10169 = vmatmul.bf16.vlgmr.msra.gmra.mxu3 %v9840_v28 }
 0xb7c   : > { %10208 = vmatmul.bf16.vlgmr.msrb.gmra.mxu2 %v9840_v28 }
 0xb7d   : > { %10195 = vmatmul.bf16.vlgmr.msra.gmra.mxu1 %v9838_v1 }
 0xbea   : > { %v10144_v48 = vpop.f32.mrf.mxu1  ;;  %v10183_v27 = vpop.f32.mrf.mxu0 }
 0xbeb   : > { %v10145_v45 = vadd.f32 %v10144_v48, %v9891_v8  ;;  %v10184_v3 = vadd.f32 %v10183_v27, %v9892_v50 }
 0xbef   : > { %v10157_v42 = vpop.f32.mrf.mxu2 }
 0xbf0   : > { %v10158_v4 = vadd.f32 %v10157_v42, %v10145_v45 }
 0xbf1   : > { %v10170_v30 = vpop.f32.mrf.mxu3 }
 0xbf2   : > { %v10146_v0 = vpop.f32.mrf.mxu1  ;;  %v10185_v23 = vpop.f32.mrf.mxu0  ;;  %v10171_v25 = vadd.f32 %v10170_v30, %v10158_v4 }
 0xbf4   : > { %v10213_v40 = vmax.f32 %v10171_v25, 0.0 }
 0xbf7   : > { %v10159_v59 = vpop.f32.mrf.mxu2 }
 0xbf9   : > { %v10172_v5 = vpop.f32.mrf.mxu3 }
 0xbfa   : > { %v10196_v16 = vpop.f32.mrf.mxu1 }
 0xbfb   : > { %v10197_v52 = vadd.f32 %v10196_v16, %v10184_v3 }
 0xbff   : > { %v10209_v2 = vpop.f32.mrf.mxu2 }
 0xc00   : > { %v10210_v22 = vadd.f32 %v10209_v2, %v10197_v52 }
 0xc02   : > { %v10198_v19 = vpop.f32.mrf.mxu1  ;;  %v10214_v17 = vmax.f32 %v10210_v22, 0.0 }
 0xc04   : > { %v10215_v43 = vmax.f32 %v10213_v40, %v10214_v17 }
 0xc06   : > { %v10216_v62 = vpack.c.bf16 %v10215_v43, %v10215_v43 }
 0xc07   : > { %v10211_v26 = vpop.f32.mrf.mxu2 }
 0xc08   : > { %v10225_v51 = vand.u32 %v10223_v20, %v10216_v62 }
 0xc0a   : > { %10234 = vmatpush.bf16.msrb.mxu3 %v10225_v51 }
 0xc0d   : > { %14118 = vmatmul.msk.bf16.vlgmr.msrb.gmra.mxu3 %vm10218_vm14, %v10217_v33 }
 0xc0e   : > { %10367 = vmatpush.bf16.msra.mxu3 %v10359_v36 }
 0xc12   : > { %10368 = vmatpush.bf16.msra.mxu3 %v15038_v46 }
 0xc90   : > { %v10236_v14 = vpop.f32.mrf.mxu3 }
 0xc91   : > { %v10241_v7 = vrot.slane %v10236_v14, 3 }
 0xc93   : > { %v10243_v24 = vmax.f32 %v10236_v14, %v10241_v7 }
 0xc95   : > { %v10244_v37 = vpack.c.bf16 %v10243_v24, %v10243_v24 }
 0xc97   : > { %10317 = vmatmul.bf16.vlgmr.msrb.gmra.mxu0 %v10244_v37 }
 0xc98   : > { %v10238_v58 = vpop.f32.mrf.mxu3 }
 0xd14   : > { %v10318_v53 = vpop.f32.mrf.mxu0 }
 0xd15   : > { %10325 = vst [vmem:[#allocation1] sm:$0xff] %v10318_v53  ;;  %v10323_v10 = vadd.f32 %v10322_v39, %v10318_v53 }
 0xd1c   : > { %v10327_v41 = vld [vmem:[#allocation1 + $0x1] ss:$9 sm:$0xff]  ;;  %v10320_v55 = vpop.f32.mrf.mxu0 }
 0xd1d   : > { %10328 = vrot.lane.b32.xlu2 %v10327_v41, %s15642_s20  ;;  %10332 = vst [vmem:[#allocation1] sm:$0xff] %v10318_v53 }
 0xd24   : > { %v10334_v21 = vld [vmem:[#allocation1 + $0x2] ss:$9 sm:$0xff] }
 0xd25   : > { %10335 = vrot.lane.b32.xlu0 %v10334_v21, %s15643_s8 }
 0xd77   : > { %v10329_v38 = vpop.permute.xlu2 %10328 }
 0xd78   : > { %v10331_v31 = vadd.f32 %v10329_v38, %v10323_v10 }
 0xd97   : > { %v10336_v18 = vpop.permute.xlu0 %10335 }
 0xd98   : > { %v10338_v63 = vadd.f32 %v10336_v18, %v10331_v31 }
 0xd9a   : > { %v10339_v47 = vmax.f32 %v10338_v63, 0.0 }
 0xd9c   : > { %v10340_v35 = vpack.c.bf16 %v10339_v47, %v10339_v47 }
 0xd9e   : > { %14155 = vmatmul.msk.bf16.vlgmr.msra.gmra.mxu3 %vm10354_vm15, %v10340_v35 }
 0xe21   : > { %v10370_v56 = vpop.f32.mrf.mxu3 }
 0xe22   : > { %v10371_v1 = vadd.f32 %v10370_v56, %v10344_v34 }
 0xe24   : > { %10376 = vst.msk [vmem:[%s826_s22] sm:$0x1] %vm10375_vm0, %v10371_v1 }
 0xe29   : > { %v10372_v29 = vpop.f32.mrf.mxu3 }
 0xe2a PF: > { %s21241_s28 = sld [smem:[#allocation33_spill]] }
 0xe30   : > { %s37_s1 = sadd.s32 1, %s21241_s28  }
 0xe31   : > { %p34_p7 = scmp.ge.s32.totalorder %s37_s1, 4  }
 0xe33   :  { %36 = sbr.rel (!%p34_p7) target bundleno = 17 (0x11), region = 188 }
 0xe38   :  { %10396 = vsyncpa [#allocation7], 1 }
 0xe39   :  { %10398 = vsyncpa [#allocation7 + $0x1], 1 }
 0xe3a   :  { %10399 = vsyncpa [#allocation9], 1 }
 0xe3b   :  { %10400 = vsyncpa [#allocation12], 1 }
 0xe3c   :  { %10401 = vsyncpa [#allocation15], 1 }
 0xe3d   :  { %10402 = vsyncpa [#allocation18], 1 }
 0xe3e   :  { %10403 = vsyncpa [#allocation21], 1 }
 0xe3f   :  { %10404 = vsyncpa [#allocation24], 1 }

</bundles_post_ra>
